<compile_context>
chip_gen: v6e
topology: v6e:2x2x1
jax: 0.10.0
libtpu: 0.0.40
codegen_flags: <defaults>
</compile_context>

<pallas_src>
from functools import partial

import jax
import jax.numpy as jnp
from jax.experimental import pallas as pl
from jax.experimental.pallas import tpu as pltpu


def _round_up(x, m):
    return (x + m - 1) // m * m


# =============================================================================
# Kernel A: fused conv1 + conv2 + conv3 (one sample per grid step).
#
# Layout conventions inside the kernel (all "relaxed" rows use an 11-pitch:
# row = y*11 + x, columns x beyond the true output width are garbage and are
# never read by valid downstream entries):
#   xs_ref : (1, 4, 128, 16C) f32   phase-split 4x4 space-to-depth input,
#                                   phases flattened as rows a*11+b (pad->128)
#   x1_ref : (4, 112, 32)     f32   conv1 output, one relaxed (10x11) block per
#                                   output phase (ri,rj)
#   x2_ref : (104, 64)        f32   conv2 output, relaxed (9x11)
#   out    : (1, 49, 64)      f32   conv3 output, rows = (h*7+w), lanes = c
# =============================================================================
def _conv_stack_kernel(xs_ref, w1_ref, b1_ref, w2_ref, b2_ref, w3_ref, b3_ref,
                       out_ref, x1_ref, x2_ref):
    bf16 = jnp.bfloat16
    f32 = jnp.float32

    # Zero the few over-read pad rows (hygiene only: valid outputs never depend
    # on them, but this keeps every read deterministic / finite).
    for p in range(4):
        x1_ref[p, pl.ds(110, 2), :] = jnp.zeros((2, 32), f32)
    x2_ref[pl.ds(99, 5), :] = jnp.zeros((5, 64), f32)

    # -------- conv1: 8x8 stride 4  ==  2x2 stride 1 on 4x4 space-to-depth ----
    # Output phase (ri,rj) holds output pixels (2u+ri, 2v+rj); each of the four
    # 2x2 kernel positions (pi,pj) reads source phase (fi,fj) at a constant
    # row offset qi*11+qj, so the whole position is ONE contiguous slice.
    for ri in range(2):
        for rj in range(2):
            acc = None
            for pi in range(2):
                for pj in range(2):
                    qi, fi = (ri + pi) // 2, (ri + pi) % 2
                    qj, fj = (rj + pj) // 2, (rj + pj) % 2
                    src = xs_ref[0, fi * 2 + fj, pl.ds(qi * 11 + qj, 110), :]
                    d = jnp.dot(src.astype(bf16), w1_ref[pi * 2 + pj],
                                preferred_element_type=f32)
                    acc = d if acc is None else acc + d
            x1_ref[ri * 2 + rj, pl.ds(0, 110), :] = jnp.maximum(
                acc + b1_ref[...], 0.0)

    # -------- conv2: 4x4 stride 2 on the phase-ordered conv1 output ----------
    acc = None
    for ri in range(2):
        for rj in range(2):
            for qi in range(2):
                for qj in range(2):
                    src = x1_ref[ri * 2 + rj, pl.ds(qi * 11 + qj, 99), :]
                    d = jnp.dot(src.astype(bf16),
                                w2_ref[(2 * qi + ri) * 4 + (2 * qj + rj)],
                                preferred_element_type=f32)
                    acc = d if acc is None else acc + d
    x2_ref[pl.ds(0, 99), :] = jnp.maximum(acc + b2_ref[...], 0.0)

    # -------- conv3: 3x3 stride 1 ---------------------------------------------
    acc = None
    for i in range(3):
        for j in range(3):
            src = x2_ref[pl.ds(i * 11 + j, 77), :]
            d = jnp.dot(src.astype(bf16), w3_ref[i * 3 + j],
                        preferred_element_type=f32)
            acc = d if acc is None else acc + d
    y3 = jnp.maximum(acc + b3_ref[...], 0.0)            # (77, 64) relaxed

    # Compact the relaxed (7 x 11) rows to the true (7 x 7) output.
    for h in range(7):
        out_ref[0, pl.ds(h * 7, 7), :] = y3[h * 11:h * 11 + 7, :]


def conv_stack_pallas(xs, w1p, b1, w2p, b2, w3p, b3):
    n, _, rows, c16 = xs.shape                 # (N, 4, 128, 16*C)
    flops = 2 * n * (16 * 110 * c16 * 32 + 16 * 99 * 32 * 64 + 9 * 77 * 64 * 64)
    bytes_acc = (xs.size * 4
                 + (w1p.size + w2p.size + w3p.size) * 2
                 + (b1.size + b2.size + b3.size) * 4
                 + n * 49 * 64 * 4)
    return pl.pallas_call(
        _conv_stack_kernel,
        out_shape=jax.ShapeDtypeStruct((n, 49, 64), jnp.float32),
        grid_spec=pltpu.PrefetchScalarGridSpec(
            num_scalar_prefetch=0,
            grid=(n,),
            in_specs=[
                pl.BlockSpec((1, 4, rows, c16), lambda b: (b, 0, 0, 0)),
                pl.BlockSpec((4, c16, 32), lambda b: (0, 0, 0)),   # pinned
                pl.BlockSpec((1, 32), lambda b: (0, 0)),
                pl.BlockSpec((16, 32, 64), lambda b: (0, 0, 0)),   # pinned
                pl.BlockSpec((1, 64), lambda b: (0, 0)),
                pl.BlockSpec((9, 64, 64), lambda b: (0, 0, 0)),    # pinned
                pl.BlockSpec((1, 64), lambda b: (0, 0)),
            ],
            out_specs=pl.BlockSpec((1, 49, 64), lambda b: (b, 0, 0)),
            scratch_shapes=[
                pltpu.VMEM((4, 112, 32), jnp.float32),   # conv1 relaxed phases
                pltpu.VMEM((104, 64), jnp.float32),      # conv2 relaxed rows
            ],
        ),
        compiler_params=pltpu.CompilerParams(
            dimension_semantics=("parallel",),
            vmem_limit_bytes=32 * 1024 * 1024,
        ),
        cost_estimate=pl.CostEstimate(flops=flops, transcendentals=0,
                                      bytes_accessed=bytes_acc),
    )(xs, w1p, b1, w2p, b2, w3p, b3)


# =============================================================================
# Kernel B: fused fc1 (+ReLU) + fc2 over the whole batch (M-tiled grid).
# fc2 weight/bias are zero-padded to 128 output lanes (lane-dense stores).
# =============================================================================
def _fc_kernel(x_ref, w1_ref, b1_ref, w2_ref, b2_ref, o_ref):
    x = x_ref[...].astype(jnp.bfloat16)
    h = jnp.dot(x, w1_ref[...], preferred_element_type=jnp.float32)
    h = jnp.maximum(h + b1_ref[...], 0.0).astype(jnp.bfloat16)
    o_ref[...] = jnp.dot(h, w2_ref[...],
                         preferred_element_type=jnp.float32) + b2_ref[...]


def fc_pallas(x, w1, b1, w2, b2, *, tm):
    m, k1 = x.shape
    _, n1 = w1.shape
    _, dpad = w2.shape
    flops = 2 * m * (k1 * n1 + n1 * dpad)
    bytes_acc = x.size * 4 + (w1.size + w2.size) * 2 + (b1.size + b2.size) * 4 \
        + m * dpad * 4
    # NOTE: the pinned weight blocks could use pipeline_mode=pl.Buffered(1) to
    # skip their second pipeline buffer; VMEM has plenty of headroom here.
    return pl.pallas_call(
        _fc_kernel,
        out_shape=jax.ShapeDtypeStruct((m, dpad), jnp.float32),
        grid_spec=pltpu.PrefetchScalarGridSpec(
            num_scalar_prefetch=0,
            grid=(m // tm,),
            in_specs=[
                pl.BlockSpec((tm, k1), lambda i: (i, 0)),
                pl.BlockSpec((k1, n1), lambda i: (0, 0)),   # pinned fc1 weight
                pl.BlockSpec((1, n1), lambda i: (0, 0)),
                pl.BlockSpec((n1, dpad), lambda i: (0, 0)),  # pinned fc2 weight
                pl.BlockSpec((1, dpad), lambda i: (0, 0)),
            ],
            out_specs=pl.BlockSpec((tm, dpad), lambda i: (i, 0)),
        ),
        compiler_params=pltpu.CompilerParams(
            dimension_semantics=("parallel",),
            vmem_limit_bytes=32 * 1024 * 1024,
        ),
        cost_estimate=pl.CostEstimate(flops=flops, transcendentals=0,
                                      bytes_accessed=bytes_acc),
    )(x, w1, b1, w2, b2)


def _fc_tiling(n):
    """Pick (tm, padded_m): >=2 grid steps when the batch allows (megacore)."""
    m8 = _round_up(max(n, 1), 8)
    if m8 < 16:
        return m8, m8
    tm = min(256, _round_up((m8 + 1) // 2, 8))
    mp = _round_up(m8, tm)
    return tm, mp


# =============================================================================
# Parameter init (PyTorch-default-like uniform) and one-time folding.
# =============================================================================
def _init_conv(key, out_c, in_c, kh, kw):
    kw_, kb_ = jax.random.split(key)
    fan_in = in_c * kh * kw
    bound = 1.0 / jnp.sqrt(fan_in)
    w = jax.random.uniform(kw_, (out_c, in_c, kh, kw), jnp.float32, -bound, bound)
    b = jax.random.uniform(kb_, (out_c,), jnp.float32, -bound, bound)
    return w, b


def _init_linear(key, out_f, in_f):
    kw_, kb_ = jax.random.split(key)
    bound = 1.0 / jnp.sqrt(in_f)
    w = jax.random.uniform(kw_, (out_f, in_f), jnp.float32, -bound, bound)
    b = jax.random.uniform(kb_, (out_f,), jnp.float32, -bound, bound)
    return w, b


def init_arsenet_params(key, c, output_dim):
    k1, k2, k3, k4, k5 = jax.random.split(key, 5)
    p = {}
    p["c1_w"], p["c1_b"] = _init_conv(k1, 32, c, 8, 8)
    p["c2_w"], p["c2_b"] = _init_conv(k2, 64, 32, 4, 4)
    p["c3_w"], p["c3_b"] = _init_conv(k3, 64, 64, 3, 3)
    p["fc1_w"], p["fc1_b"] = _init_linear(k4, 512, 3136)
    p["fc2_w"], p["fc2_b"] = _init_linear(k5, output_dim, 512)
    return p


def _prepare_params(raw):
    """One-time weight folding: space-to-depth conv1, per-position conv slabs,
    flatten-permutation folded into fc1 rows, pre-transposed + lane-padded FC
    weights, bf16 weights."""
    bf16 = jnp.bfloat16
    f32 = jnp.float32
    w1, w2, w3 = raw["c1_w"], raw["c2_w"], raw["c3_w"]
    c = w1.shape[1]
    d = raw["fc2_w"].shape[0]
    dpad = _round_up(max(d, 1), 128)

    # conv1 (32, C, 8, 8) -> per 2x2 position p=(pi,pj): (16C, 32) with rows
    # ordered (di, dj, c) to match the space-to-depth channel layout.
    w1p = []
    for pi in range(2):
        for pj in range(2):
            blk = w1[:, :, 4 * pi:4 * pi + 4, 4 * pj:4 * pj + 4]   # (32,C,4,4)
            w1p.append(jnp.transpose(blk, (2, 3, 1, 0)).reshape(16 * c, 32))
    w1p = jnp.stack(w1p, axis=0).astype(bf16)                       # (4,16C,32)

    w2p = jnp.transpose(w2, (2, 3, 1, 0)).reshape(16, 32, 64).astype(bf16)
    w3p = jnp.transpose(w3, (2, 3, 1, 0)).reshape(9, 64, 64).astype(bf16)

    # fc1 (512, 3136) with PyTorch (c,h,w) flatten -> rows reordered to the
    # kernel's (h,w,c) flatten, pre-transposed to (3136, 512).
    fc1 = jnp.transpose(raw["fc1_w"].reshape(512, 64, 7, 7),
                        (2, 3, 1, 0)).reshape(3136, 512).astype(bf16)
    fc2 = jnp.pad(jnp.transpose(raw["fc2_w"]).astype(bf16),
                  ((0, 0), (0, dpad - d)))                          # (512,dpad)
    fc2_b = jnp.pad(raw["fc2_b"], (0, dpad - d)).reshape(1, dpad).astype(f32)

    return {
        "w1p": w1p, "b1": raw["c1_b"].reshape(1, 32).astype(f32),
        "w2p": w2p, "b2": raw["c2_b"].reshape(1, 64).astype(f32),
        "w3p": w3p, "b3": raw["c3_b"].reshape(1, 64).astype(f32),
        "fc1_w": fc1, "fc1_b": raw["fc1_b"].reshape(1, 512).astype(f32),
        "fc2_w": fc2, "fc2_b": fc2_b,
    }


def _prep_input(x_nchw):
    """(N,C,84,84) f32 -> phase-split 4x4 space-to-depth: (N, 4, 128, 16C).

    Phase (ri,rj) holds s2d pixels (2a+ri, 2b+rj) flattened as rows a*11+b
    (121 rows, zero-padded to 128 so in-kernel relaxed reads stay in bounds)."""
    n, c, _, _ = x_nchw.shape
    x = jnp.transpose(x_nchw, (0, 2, 3, 1))                           # NHWC
    x = x.reshape(n, 21, 4, 21, 4, c).transpose(0, 1, 3, 2, 4, 5)     # (n,21,21,4,4,c)
    x = x.reshape(n, 21, 21, 16 * c)
    x = jnp.pad(x, ((0, 0), (0, 1), (0, 1), (0, 0)))                  # (n,22,22,16c)
    phases = [x[:, ri::2, rj::2, :] for ri in (0, 1) for rj in (0, 1)]
    xs = jnp.stack(phases, axis=1).reshape(n, 4, 121, 16 * c)
    return jnp.pad(xs, ((0, 0), (0, 0), (0, 7), (0, 0)))              # rows->128


@partial(jax.jit, static_argnames=("out_dim",))
def arsenet_apply(params, x_nchw, *, out_dim):
    """Forward pass: (N, C, 84, 84) f32 -> (N, out_dim) f32."""
    n = x_nchw.shape[0]
    xs = _prep_input(x_nchw)
    conv_out = conv_stack_pallas(xs, params["w1p"], params["b1"],
                                 params["w2p"], params["b2"],
                                 params["w3p"], params["b3"])        # (N,49,64) f32
    feats = conv_out.reshape(n, 49 * 64)                             # (h,w,c) flatten
    tm, mp = _fc_tiling(n)
    if mp != n:
        feats = jnp.pad(feats, ((0, mp - n), (0, 0)))
    out = fc_pallas(feats, params["fc1_w"], params["fc1_b"],
                    params["fc2_w"], params["fc2_b"], tm=tm)
    return out[:n, :out_dim]


class ArseNet:
    """JAX/Pallas port of the PyTorch ArseNet (online + frozen target copy)."""

    def __init__(self, input_dim, output_dim, key):
        c, h, w = input_dim
        if h != 84:
            raise ArithmeticError(f"Expected input height: 84, got: {h}")
        if w != 84:
            raise ArithmeticError(f"Expected input width: 84, got: {w}")
        self.output_dim = output_dim
        self.online_raw = init_arsenet_params(key, c, output_dim)
        self.target_raw = jax.tree_util.tree_map(lambda a: a, self.online_raw)
        self.online = _prepare_params(self.online_raw)
        self.target = _prepare_params(self.target_raw)

    def forward(self, inputs, model):
        if model == "online":
            return arsenet_apply(self.online, inputs, out_dim=self.output_dim)
        elif model == "target":
            return arsenet_apply(self.target, inputs, out_dim=self.output_dim)


# -----------------------------------------------------------------------------
# Pure-JAX reference mirroring the kernel's precision (bf16 matmul operands,
# f32 accumulation) so the tolerance can stay tight.
# -----------------------------------------------------------------------------
def _ref_forward_bf16(raw, x_nchw):
    bf = jnp.bfloat16
    dn = ("NCHW", "OIHW", "NCHW")

    def conv(x, w, b, s):
        y = jax.lax.conv_general_dilated(
            x.astype(bf), w.astype(bf), (s, s), "VALID",
            dimension_numbers=dn, preferred_element_type=jnp.float32)
        return jnp.maximum(y + b[None, :, None, None], 0.0).astype(bf)

    x = conv(x_nchw, raw["c1_w"], raw["c1_b"], 4)
    x = conv(x, raw["c2_w"], raw["c2_b"], 2)
    x = conv(x, raw["c3_w"], raw["c3_b"], 1)
    x = x.reshape(x.shape[0], -1)                                   # (N,3136) (c,h,w)
    h1 = jnp.dot(x, raw["fc1_w"].T.astype(bf), preferred_element_type=jnp.float32)
    h1 = jnp.maximum(h1 + raw["fc1_b"], 0.0).astype(bf)
    out = jnp.dot(h1, raw["fc2_w"].T.astype(bf), preferred_element_type=jnp.float32)
    return out + raw["fc2_b"]


if __name__ == "__main__":
    key = jax.random.PRNGKey(0)
    k_param, k_data, k_param2, k_data2 = jax.random.split(key, 4)

    # ---- primary config -----------------------------------------------------
    batch, channels, output_dim = 2, 4, 8
    net = ArseNet((channels, 84, 84), output_dim, k_param)
    x = jax.random.normal(k_data, (batch, channels, 84, 84), jnp.float32)

    out_online = jax.block_until_ready(net.forward(x, "online"))
    out_target = jax.block_until_ready(net.forward(x, "target"))
    assert out_online.shape == (batch, output_dim)
    assert out_target.shape == (batch, output_dim)

    ref = jax.block_until_ready(_ref_forward_bf16(net.online_raw, x))
    assert jnp.allclose(out_online, ref, rtol=1e-2, atol=2e-3), "mismatch vs reference"
    assert jnp.allclose(out_online, out_target), "target copy should match online at init"

    # ---- secondary config: non-default C, batch not a multiple of the tile --
    batch2, channels2, output_dim2 = 3, 3, 5
    net2 = ArseNet((channels2, 84, 84), output_dim2, k_param2)
    x2 = jax.random.normal(k_data2, (batch2, channels2, 84, 84), jnp.float32)
    out2 = jax.block_until_ready(net2.forward(x2, "online"))
    ref2 = jax.block_until_ready(_ref_forward_bf16(net2.online_raw, x2))
    assert out2.shape == (batch2, output_dim2)
    assert jnp.allclose(out2, ref2, rtol=1e-2, atol=2e-3), "mismatch vs reference (cfg2)"

    print("KERNEL_OK")
</pallas_src>

<mosaic_0001>
module attributes {stable_mosaic.version = 11 : i64} {
  func.func @_conv_stack_kernel(%arg0: i32, %arg1: memref<1x4x128x64xf32, #tpu.memory_space<vmem>>, %arg2: memref<4x64x32xbf16, #tpu.memory_space<vmem>>, %arg3: memref<1x32xf32, #tpu.memory_space<vmem>>, %arg4: memref<16x32x64xbf16, #tpu.memory_space<vmem>>, %arg5: memref<1x64xf32, #tpu.memory_space<vmem>>, %arg6: memref<9x64x64xbf16, #tpu.memory_space<vmem>>, %arg7: memref<1x64xf32, #tpu.memory_space<vmem>>, %arg8: memref<1x49x64xf32, #tpu.memory_space<vmem>>, %arg9: memref<4x112x32xf32, #tpu.memory_space<vmem>>, %arg10: memref<104x64xf32, #tpu.memory_space<vmem>>) attributes {dimension_semantics = [#tpu.dimension_semantics<parallel>], iteration_bounds = array<i64: 2>, scalar_prefetch = 0 : i64, scratch_operands = 2 : i64, tpu.core_type = #tpu.core_type<tc>, window_params = [{transform_indices = @transform_0, window_bounds = array<i64: 1, 4, 128, 64>}, {pipeline_mode = #tpu.pipeline_mode<synchronous>, transform_indices = @transform_1, window_bounds = array<i64: 4, 64, 32>}, {pipeline_mode = #tpu.pipeline_mode<synchronous>, transform_indices = @transform_2, window_bounds = array<i64: 1, 32>}, {pipeline_mode = #tpu.pipeline_mode<synchronous>, transform_indices = @transform_3, window_bounds = array<i64: 16, 32, 64>}, {pipeline_mode = #tpu.pipeline_mode<synchronous>, transform_indices = @transform_4, window_bounds = array<i64: 1, 64>}, {pipeline_mode = #tpu.pipeline_mode<synchronous>, transform_indices = @transform_5, window_bounds = array<i64: 9, 64, 64>}, {pipeline_mode = #tpu.pipeline_mode<synchronous>, transform_indices = @transform_6, window_bounds = array<i64: 1, 64>}, {transform_indices = @transform_7, window_bounds = array<i64: 1, 49, 64>}]} {
    %cst = arith.constant 0.000000e+00 : f32
    %0 = vector.broadcast %cst : f32 to vector<2x32xf32>
    %c0 = arith.constant 0 : index
    %c110 = arith.constant 110 : index
    %c0_0 = arith.constant 0 : index
    %1 = vector.load %arg9[%c0, %c110, %c0_0] : memref<4x112x32xf32, #tpu.memory_space<vmem>>, vector<1x2x32xf32>
    %2 = vector.shape_cast %1 : vector<1x2x32xf32> to vector<2x32xf32>
    %3 = vector.shape_cast %0 : vector<2x32xf32> to vector<1x2x32xf32>
    tpu.vector_store %arg9[%c0, %c110, %c0_0], %3 {strides = array<i32>} : memref<4x112x32xf32, #tpu.memory_space<vmem>>, vector<1x2x32xf32>,
    %cst_1 = arith.constant 0.000000e+00 : f32
    %4 = vector.broadcast %cst_1 : f32 to vector<2x32xf32>
    %c1 = arith.constant 1 : index
    %c110_2 = arith.constant 110 : index
    %c0_3 = arith.constant 0 : index
    %5 = vector.load %arg9[%c1, %c110_2, %c0_3] : memref<4x112x32xf32, #tpu.memory_space<vmem>>, vector<1x2x32xf32>
    %6 = vector.shape_cast %5 : vector<1x2x32xf32> to vector<2x32xf32>
    %7 = vector.shape_cast %4 : vector<2x32xf32> to vector<1x2x32xf32>
    tpu.vector_store %arg9[%c1, %c110_2, %c0_3], %7 {strides = array<i32>} : memref<4x112x32xf32, #tpu.memory_space<vmem>>, vector<1x2x32xf32>,
    %cst_4 = arith.constant 0.000000e+00 : f32
    %8 = vector.broadcast %cst_4 : f32 to vector<2x32xf32>
    %c2 = arith.constant 2 : index
    %c110_5 = arith.constant 110 : index
    %c0_6 = arith.constant 0 : index
    %9 = vector.load %arg9[%c2, %c110_5, %c0_6] : memref<4x112x32xf32, #tpu.memory_space<vmem>>, vector<1x2x32xf32>
    %10 = vector.shape_cast %9 : vector<1x2x32xf32> to vector<2x32xf32>
    %11 = vector.shape_cast %8 : vector<2x32xf32> to vector<1x2x32xf32>
    tpu.vector_store %arg9[%c2, %c110_5, %c0_6], %11 {strides = array<i32>} : memref<4x112x32xf32, #tpu.memory_space<vmem>>, vector<1x2x32xf32>,
    %cst_7 = arith.constant 0.000000e+00 : f32
    %12 = vector.broadcast %cst_7 : f32 to vector<2x32xf32>
    %c3 = arith.constant 3 : index
    %c110_8 = arith.constant 110 : index
    %c0_9 = arith.constant 0 : index
    %13 = vector.load %arg9[%c3, %c110_8, %c0_9] : memref<4x112x32xf32, #tpu.memory_space<vmem>>, vector<1x2x32xf32>
    %14 = vector.shape_cast %13 : vector<1x2x32xf32> to vector<2x32xf32>
    %15 = vector.shape_cast %12 : vector<2x32xf32> to vector<1x2x32xf32>
    tpu.vector_store %arg9[%c3, %c110_8, %c0_9], %15 {strides = array<i32>} : memref<4x112x32xf32, #tpu.memory_space<vmem>>, vector<1x2x32xf32>,
    %cst_10 = arith.constant 0.000000e+00 : f32
    %16 = vector.broadcast %cst_10 : f32 to vector<5x64xf32>
    %c99 = arith.constant 99 : index
    %c0_11 = arith.constant 0 : index
    %17 = vector.load %arg10[%c99, %c0_11] : memref<104x64xf32, #tpu.memory_space<vmem>>, vector<5x64xf32>
    tpu.vector_store %arg10[%c99, %c0_11], %16 {strides = array<i32>} : memref<104x64xf32, #tpu.memory_space<vmem>>, vector<5x64xf32>,
    %c0_12 = arith.constant 0 : index
    %c0_13 = arith.constant 0 : index
    %c0_14 = arith.constant 0 : index
    %c0_15 = arith.constant 0 : index
    %18 = vector.load %arg1[%c0_12, %c0_13, %c0_14, %c0_15] : memref<1x4x128x64xf32, #tpu.memory_space<vmem>>, vector<1x1x110x64xf32>
    %19 = vector.shape_cast %18 : vector<1x1x110x64xf32> to vector<110x64xf32>
    %20 = arith.truncf %19 : vector<110x64xf32> to vector<110x64xbf16>
    %c0_16 = arith.constant 0 : index
    %c0_17 = arith.constant 0 : index
    %c0_18 = arith.constant 0 : index
    %21 = vector.load %arg2[%c0_16, %c0_17, %c0_18] : memref<4x64x32xbf16, #tpu.memory_space<vmem>>, vector<1x64x32xbf16>
    %22 = vector.shape_cast %21 : vector<1x64x32xbf16> to vector<64x32xbf16>
    %cst_19 = arith.constant dense<0.000000e+00> : vector<110x32xf32>
    %23 = tpu.matmul %20, %22, %cst_19 {dimension_numbers = #tpu.dot_dimension_numbers<[1], [0], [0], [1], [0, 0, 1, 1], [], []>} : vector<110x64xbf16>, vector<64x32xbf16>, vector<110x32xf32> -> vector<110x32xf32>
    %c0_20 = arith.constant 0 : index
    %c1_21 = arith.constant 1 : index
    %c0_22 = arith.constant 0 : index
    %c0_23 = arith.constant 0 : index
    %24 = vector.load %arg1[%c0_20, %c1_21, %c0_22, %c0_23] : memref<1x4x128x64xf32, #tpu.memory_space<vmem>>, vector<1x1x110x64xf32>
    %25 = vector.shape_cast %24 : vector<1x1x110x64xf32> to vector<110x64xf32>
    %26 = arith.truncf %25 : vector<110x64xf32> to vector<110x64xbf16>
    %c1_24 = arith.constant 1 : index
    %c0_25 = arith.constant 0 : index
    %c0_26 = arith.constant 0 : index
    %27 = vector.load %arg2[%c1_24, %c0_25, %c0_26] : memref<4x64x32xbf16, #tpu.memory_space<vmem>>, vector<1x64x32xbf16>
    %28 = vector.shape_cast %27 : vector<1x64x32xbf16> to vector<64x32xbf16>
    %cst_27 = arith.constant dense<0.000000e+00> : vector<110x32xf32>
    %29 = tpu.matmul %26, %28, %cst_27 {dimension_numbers = #tpu.dot_dimension_numbers<[1], [0], [0], [1], [0, 0, 1, 1], [], []>} : vector<110x64xbf16>, vector<64x32xbf16>, vector<110x32xf32> -> vector<110x32xf32>
    %30 = arith.addf %23, %29 : vector<110x32xf32>
    %c0_28 = arith.constant 0 : index
    %c2_29 = arith.constant 2 : index
    %c0_30 = arith.constant 0 : index
    %c0_31 = arith.constant 0 : index
    %31 = vector.load %arg1[%c0_28, %c2_29, %c0_30, %c0_31] : memref<1x4x128x64xf32, #tpu.memory_space<vmem>>, vector<1x1x110x64xf32>
    %32 = vector.shape_cast %31 : vector<1x1x110x64xf32> to vector<110x64xf32>
    %33 = arith.truncf %32 : vector<110x64xf32> to vector<110x64xbf16>
    %c2_32 = arith.constant 2 : index
    %c0_33 = arith.constant 0 : index
    %c0_34 = arith.constant 0 : index
    %34 = vector.load %arg2[%c2_32, %c0_33, %c0_34] : memref<4x64x32xbf16, #tpu.memory_space<vmem>>, vector<1x64x32xbf16>
    %35 = vector.shape_cast %34 : vector<1x64x32xbf16> to vector<64x32xbf16>
    %cst_35 = arith.constant dense<0.000000e+00> : vector<110x32xf32>
    %36 = tpu.matmul %33, %35, %cst_35 {dimension_numbers = #tpu.dot_dimension_numbers<[1], [0], [0], [1], [0, 0, 1, 1], [], []>} : vector<110x64xbf16>, vector<64x32xbf16>, vector<110x32xf32> -> vector<110x32xf32>
    %37 = arith.addf %30, %36 : vector<110x32xf32>
    %c0_36 = arith.constant 0 : index
    %c3_37 = arith.constant 3 : index
    %c0_38 = arith.constant 0 : index
    %c0_39 = arith.constant 0 : index
    %38 = vector.load %arg1[%c0_36, %c3_37, %c0_38, %c0_39] : memref<1x4x128x64xf32, #tpu.memory_space<vmem>>, vector<1x1x110x64xf32>
    %39 = vector.shape_cast %38 : vector<1x1x110x64xf32> to vector<110x64xf32>
    %40 = arith.truncf %39 : vector<110x64xf32> to vector<110x64xbf16>
    %c3_40 = arith.constant 3 : index
    %c0_41 = arith.constant 0 : index
    %c0_42 = arith.constant 0 : index
    %41 = vector.load %arg2[%c3_40, %c0_41, %c0_42] : memref<4x64x32xbf16, #tpu.memory_space<vmem>>, vector<1x64x32xbf16>
    %42 = vector.shape_cast %41 : vector<1x64x32xbf16> to vector<64x32xbf16>
    %cst_43 = arith.constant dense<0.000000e+00> : vector<110x32xf32>
    %43 = tpu.matmul %40, %42, %cst_43 {dimension_numbers = #tpu.dot_dimension_numbers<[1], [0], [0], [1], [0, 0, 1, 1], [], []>} : vector<110x64xbf16>, vector<64x32xbf16>, vector<110x32xf32> -> vector<110x32xf32>
    %44 = arith.addf %37, %43 : vector<110x32xf32>
    %c0_44 = arith.constant 0 : index
    %c0_45 = arith.constant 0 : index
    %45 = vector.load %arg3[%c0_44, %c0_45] : memref<1x32xf32, #tpu.memory_space<vmem>>, vector<1x32xf32>
    %46 = vector.broadcast %45 : vector<1x32xf32> to vector<110x32xf32>
    %47 = arith.addf %44, %46 : vector<110x32xf32>
    %cst_46 = arith.constant 0.000000e+00 : f32
    %48 = vector.broadcast %cst_46 : f32 to vector<110x32xf32>
    %49 = arith.maximumf %47, %48 : vector<110x32xf32>
    %c0_47 = arith.constant 0 : index
    %c0_48 = arith.constant 0 : index
    %c0_49 = arith.constant 0 : index
    %50 = vector.load %arg9[%c0_47, %c0_48, %c0_49] : memref<4x112x32xf32, #tpu.memory_space<vmem>>, vector<1x110x32xf32>
    %51 = vector.shape_cast %50 : vector<1x110x32xf32> to vector<110x32xf32>
    %52 = vector.shape_cast %49 : vector<110x32xf32> to vector<1x110x32xf32>
    tpu.vector_store %arg9[%c0_47, %c0_48, %c0_49], %52 {strides = array<i32>} : memref<4x112x32xf32, #tpu.memory_space<vmem>>, vector<1x110x32xf32>,
    %c0_50 = arith.constant 0 : index
    %c1_51 = arith.constant 1 : index
    %c0_52 = arith.constant 0 : index
    %c0_53 = arith.constant 0 : index
    %53 = vector.load %arg1[%c0_50, %c1_51, %c0_52, %c0_53] : memref<1x4x128x64xf32, #tpu.memory_space<vmem>>, vector<1x1x110x64xf32>
    %54 = vector.shape_cast %53 : vector<1x1x110x64xf32> to vector<110x64xf32>
    %55 = arith.truncf %54 : vector<110x64xf32> to vector<110x64xbf16>
    %c0_54 = arith.constant 0 : index
    %c0_55 = arith.constant 0 : index
    %c0_56 = arith.constant 0 : index
    %56 = vector.load %arg2[%c0_54, %c0_55, %c0_56] : memref<4x64x32xbf16, #tpu.memory_space<vmem>>, vector<1x64x32xbf16>
    %57 = vector.shape_cast %56 : vector<1x64x32xbf16> to vector<64x32xbf16>
    %cst_57 = arith.constant dense<0.000000e+00> : vector<110x32xf32>
    %58 = tpu.matmul %55, %57, %cst_57 {dimension_numbers = #tpu.dot_dimension_numbers<[1], [0], [0], [1], [0, 0, 1, 1], [], []>} : vector<110x64xbf16>, vector<64x32xbf16>, vector<110x32xf32> -> vector<110x32xf32>
    %c0_58 = arith.constant 0 : index
    %c0_59 = arith.constant 0 : index
    %c1_60 = arith.constant 1 : index
    %c0_61 = arith.constant 0 : index
    %59 = vector.load %arg1[%c0_58, %c0_59, %c1_60, %c0_61] : memref<1x4x128x64xf32, #tpu.memory_space<vmem>>, vector<1x1x110x64xf32>
    %60 = vector.shape_cast %59 : vector<1x1x110x64xf32> to vector<110x64xf32>
    %61 = arith.truncf %60 : vector<110x64xf32> to vector<110x64xbf16>
    %c1_62 = arith.constant 1 : index
    %c0_63 = arith.constant 0 : index
    %c0_64 = arith.constant 0 : index
    %62 = vector.load %arg2[%c1_62, %c0_63, %c0_64] : memref<4x64x32xbf16, #tpu.memory_space<vmem>>, vector<1x64x32xbf16>
    %63 = vector.shape_cast %62 : vector<1x64x32xbf16> to vector<64x32xbf16>
    %cst_65 = arith.constant dense<0.000000e+00> : vector<110x32xf32>
    %64 = tpu.matmul %61, %63, %cst_65 {dimension_numbers = #tpu.dot_dimension_numbers<[1], [0], [0], [1], [0, 0, 1, 1], [], []>} : vector<110x64xbf16>, vector<64x32xbf16>, vector<110x32xf32> -> vector<110x32xf32>
    %65 = arith.addf %58, %64 : vector<110x32xf32>
    %c0_66 = arith.constant 0 : index
    %c3_67 = arith.constant 3 : index
    %c0_68 = arith.constant 0 : index
    %c0_69 = arith.constant 0 : index
    %66 = vector.load %arg1[%c0_66, %c3_67, %c0_68, %c0_69] : memref<1x4x128x64xf32, #tpu.memory_space<vmem>>, vector<1x1x110x64xf32>
    %67 = vector.shape_cast %66 : vector<1x1x110x64xf32> to vector<110x64xf32>
    %68 = arith.truncf %67 : vector<110x64xf32> to vector<110x64xbf16>
    %c2_70 = arith.constant 2 : index
    %c0_71 = arith.constant 0 : index
    %c0_72 = arith.constant 0 : index
    %69 = vector.load %arg2[%c2_70, %c0_71, %c0_72] : memref<4x64x32xbf16, #tpu.memory_space<vmem>>, vector<1x64x32xbf16>
    %70 = vector.shape_cast %69 : vector<1x64x32xbf16> to vector<64x32xbf16>
    %cst_73 = arith.constant dense<0.000000e+00> : vector<110x32xf32>
    %71 = tpu.matmul %68, %70, %cst_73 {dimension_numbers = #tpu.dot_dimension_numbers<[1], [0], [0], [1], [0, 0, 1, 1], [], []>} : vector<110x64xbf16>, vector<64x32xbf16>, vector<110x32xf32> -> vector<110x32xf32>
    %72 = arith.addf %65, %71 : vector<110x32xf32>
    %c0_74 = arith.constant 0 : index
    %c2_75 = arith.constant 2 : index
    %c1_76 = arith.constant 1 : index
    %c0_77 = arith.constant 0 : index
    %73 = vector.load %arg1[%c0_74, %c2_75, %c1_76, %c0_77] : memref<1x4x128x64xf32, #tpu.memory_space<vmem>>, vector<1x1x110x64xf32>
    %74 = vector.shape_cast %73 : vector<1x1x110x64xf32> to vector<110x64xf32>
    %75 = arith.truncf %74 : vector<110x64xf32> to vector<110x64xbf16>
    %c3_78 = arith.constant 3 : index
    %c0_79 = arith.constant 0 : index
    %c0_80 = arith.constant 0 : index
    %76 = vector.load %arg2[%c3_78, %c0_79, %c0_80] : memref<4x64x32xbf16, #tpu.memory_space<vmem>>, vector<1x64x32xbf16>
    %77 = vector.shape_cast %76 : vector<1x64x32xbf16> to vector<64x32xbf16>
    %cst_81 = arith.constant dense<0.000000e+00> : vector<110x32xf32>
    %78 = tpu.matmul %75, %77, %cst_81 {dimension_numbers = #tpu.dot_dimension_numbers<[1], [0], [0], [1], [0, 0, 1, 1], [], []>} : vector<110x64xbf16>, vector<64x32xbf16>, vector<110x32xf32> -> vector<110x32xf32>
    %79 = arith.addf %72, %78 : vector<110x32xf32>
    %c0_82 = arith.constant 0 : index
    %c0_83 = arith.constant 0 : index
    %80 = vector.load %arg3[%c0_82, %c0_83] : memref<1x32xf32, #tpu.memory_space<vmem>>, vector<1x32xf32>
    %81 = vector.broadcast %80 : vector<1x32xf32> to vector<110x32xf32>
    %82 = arith.addf %79, %81 : vector<110x32xf32>
    %cst_84 = arith.constant 0.000000e+00 : f32
    %83 = vector.broadcast %cst_84 : f32 to vector<110x32xf32>
    %84 = arith.maximumf %82, %83 : vector<110x32xf32>
    %c1_85 = arith.constant 1 : index
    %c0_86 = arith.constant 0 : index
    %c0_87 = arith.constant 0 : index
    %85 = vector.load %arg9[%c1_85, %c0_86, %c0_87] : memref<4x112x32xf32, #tpu.memory_space<vmem>>, vector<1x110x32xf32>
    %86 = vector.shape_cast %85 : vector<1x110x32xf32> to vector<110x32xf32>
    %87 = vector.shape_cast %84 : vector<110x32xf32> to vector<1x110x32xf32>
    tpu.vector_store %arg9[%c1_85, %c0_86, %c0_87], %87 {strides = array<i32>} : memref<4x112x32xf32, #tpu.memory_space<vmem>>, vector<1x110x32xf32>,
    %c0_88 = arith.constant 0 : index
    %c2_89 = arith.constant 2 : index
    %c0_90 = arith.constant 0 : index
    %c0_91 = arith.constant 0 : index
    %88 = vector.load %arg1[%c0_88, %c2_89, %c0_90, %c0_91] : memref<1x4x128x64xf32, #tpu.memory_space<vmem>>, vector<1x1x110x64xf32>
    %89 = vector.shape_cast %88 : vector<1x1x110x64xf32> to vector<110x64xf32>
    %90 = arith.truncf %89 : vector<110x64xf32> to vector<110x64xbf16>
    %c0_92 = arith.constant 0 : index
    %c0_93 = arith.constant 0 : index
    %c0_94 = arith.constant 0 : index
    %91 = vector.load %arg2[%c0_92, %c0_93, %c0_94] : memref<4x64x32xbf16, #tpu.memory_space<vmem>>, vector<1x64x32xbf16>
    %92 = vector.shape_cast %91 : vector<1x64x32xbf16> to vector<64x32xbf16>
    %cst_95 = arith.constant dense<0.000000e+00> : vector<110x32xf32>
    %93 = tpu.matmul %90, %92, %cst_95 {dimension_numbers = #tpu.dot_dimension_numbers<[1], [0], [0], [1], [0, 0, 1, 1], [], []>} : vector<110x64xbf16>, vector<64x32xbf16>, vector<110x32xf32> -> vector<110x32xf32>
    %c0_96 = arith.constant 0 : index
    %c3_97 = arith.constant 3 : index
    %c0_98 = arith.constant 0 : index
    %c0_99 = arith.constant 0 : index
    %94 = vector.load %arg1[%c0_96, %c3_97, %c0_98, %c0_99] : memref<1x4x128x64xf32, #tpu.memory_space<vmem>>, vector<1x1x110x64xf32>
    %95 = vector.shape_cast %94 : vector<1x1x110x64xf32> to vector<110x64xf32>
    %96 = arith.truncf %95 : vector<110x64xf32> to vector<110x64xbf16>
    %c1_100 = arith.constant 1 : index
    %c0_101 = arith.constant 0 : index
    %c0_102 = arith.constant 0 : index
    %97 = vector.load %arg2[%c1_100, %c0_101, %c0_102] : memref<4x64x32xbf16, #tpu.memory_space<vmem>>, vector<1x64x32xbf16>
    %98 = vector.shape_cast %97 : vector<1x64x32xbf16> to vector<64x32xbf16>
    %cst_103 = arith.constant dense<0.000000e+00> : vector<110x32xf32>
    %99 = tpu.matmul %96, %98, %cst_103 {dimension_numbers = #tpu.dot_dimension_numbers<[1], [0], [0], [1], [0, 0, 1, 1], [], []>} : vector<110x64xbf16>, vector<64x32xbf16>, vector<110x32xf32> -> vector<110x32xf32>
    %100 = arith.addf %93, %99 : vector<110x32xf32>
    %c0_104 = arith.constant 0 : index
    %c0_105 = arith.constant 0 : index
    %c11 = arith.constant 11 : index
    %c0_106 = arith.constant 0 : index
    %101 = vector.load %arg1[%c0_104, %c0_105, %c11, %c0_106] : memref<1x4x128x64xf32, #tpu.memory_space<vmem>>, vector<1x1x110x64xf32>
    %102 = vector.shape_cast %101 : vector<1x1x110x64xf32> to vector<110x64xf32>
    %103 = arith.truncf %102 : vector<110x64xf32> to vector<110x64xbf16>
    %c2_107 = arith.constant 2 : index
    %c0_108 = arith.constant 0 : index
    %c0_109 = arith.constant 0 : index
    %104 = vector.load %arg2[%c2_107, %c0_108, %c0_109] : memref<4x64x32xbf16, #tpu.memory_space<vmem>>, vector<1x64x32xbf16>
    %105 = vector.shape_cast %104 : vector<1x64x32xbf16> to vector<64x32xbf16>
    %cst_110 = arith.constant dense<0.000000e+00> : vector<110x32xf32>
    %106 = tpu.matmul %103, %105, %cst_110 {dimension_numbers = #tpu.dot_dimension_numbers<[1], [0], [0], [1], [0, 0, 1, 1], [], []>} : vector<110x64xbf16>, vector<64x32xbf16>, vector<110x32xf32> -> vector<110x32xf32>
    %107 = arith.addf %100, %106 : vector<110x32xf32>
    %c0_111 = arith.constant 0 : index
    %c1_112 = arith.constant 1 : index
    %c11_113 = arith.constant 11 : index
    %c0_114 = arith.constant 0 : index
    %108 = vector.load %arg1[%c0_111, %c1_112, %c11_113, %c0_114] : memref<1x4x128x64xf32, #tpu.memory_space<vmem>>, vector<1x1x110x64xf32>
    %109 = vector.shape_cast %108 : vector<1x1x110x64xf32> to vector<110x64xf32>
    %110 = arith.truncf %109 : vector<110x64xf32> to vector<110x64xbf16>
    %c3_115 = arith.constant 3 : index
    %c0_116 = arith.constant 0 : index
    %c0_117 = arith.constant 0 : index
    %111 = vector.load %arg2[%c3_115, %c0_116, %c0_117] : memref<4x64x32xbf16, #tpu.memory_space<vmem>>, vector<1x64x32xbf16>
    %112 = vector.shape_cast %111 : vector<1x64x32xbf16> to vector<64x32xbf16>
    %cst_118 = arith.constant dense<0.000000e+00> : vector<110x32xf32>
    %113 = tpu.matmul %110, %112, %cst_118 {dimension_numbers = #tpu.dot_dimension_numbers<[1], [0], [0], [1], [0, 0, 1, 1], [], []>} : vector<110x64xbf16>, vector<64x32xbf16>, vector<110x32xf32> -> vector<110x32xf32>
    %114 = arith.addf %107, %113 : vector<110x32xf32>
    %c0_119 = arith.constant 0 : index
    %c0_120 = arith.constant 0 : index
    %115 = vector.load %arg3[%c0_119, %c0_120] : memref<1x32xf32, #tpu.memory_space<vmem>>, vector<1x32xf32>
    %116 = vector.broadcast %115 : vector<1x32xf32> to vector<110x32xf32>
    %117 = arith.addf %114, %116 : vector<110x32xf32>
    %cst_121 = arith.constant 0.000000e+00 : f32
    %118 = vector.broadcast %cst_121 : f32 to vector<110x32xf32>
    %119 = arith.maximumf %117, %118 : vector<110x32xf32>
    %c2_122 = arith.constant 2 : index
    %c0_123 = arith.constant 0 : index
    %c0_124 = arith.constant 0 : index
    %120 = vector.load %arg9[%c2_122, %c0_123, %c0_124] : memref<4x112x32xf32, #tpu.memory_space<vmem>>, vector<1x110x32xf32>
    %121 = vector.shape_cast %120 : vector<1x110x32xf32> to vector<110x32xf32>
    %122 = vector.shape_cast %119 : vector<110x32xf32> to vector<1x110x32xf32>
    tpu.vector_store %arg9[%c2_122, %c0_123, %c0_124], %122 {strides = array<i32>} : memref<4x112x32xf32, #tpu.memory_space<vmem>>, vector<1x110x32xf32>,
    %c0_125 = arith.constant 0 : index
    %c3_126 = arith.constant 3 : index
    %c0_127 = arith.constant 0 : index
    %c0_128 = arith.constant 0 : index
    %123 = vector.load %arg1[%c0_125, %c3_126, %c0_127, %c0_128] : memref<1x4x128x64xf32, #tpu.memory_space<vmem>>, vector<1x1x110x64xf32>
    %124 = vector.shape_cast %123 : vector<1x1x110x64xf32> to vector<110x64xf32>
    %125 = arith.truncf %124 : vector<110x64xf32> to vector<110x64xbf16>
    %c0_129 = arith.constant 0 : index
    %c0_130 = arith.constant 0 : index
    %c0_131 = arith.constant 0 : index
    %126 = vector.load %arg2[%c0_129, %c0_130, %c0_131] : memref<4x64x32xbf16, #tpu.memory_space<vmem>>, vector<1x64x32xbf16>
    %127 = vector.shape_cast %126 : vector<1x64x32xbf16> to vector<64x32xbf16>
    %cst_132 = arith.constant dense<0.000000e+00> : vector<110x32xf32>
    %128 = tpu.matmul %125, %127, %cst_132 {dimension_numbers = #tpu.dot_dimension_numbers<[1], [0], [0], [1], [0, 0, 1, 1], [], []>} : vector<110x64xbf16>, vector<64x32xbf16>, vector<110x32xf32> -> vector<110x32xf32>
    %c0_133 = arith.constant 0 : index
    %c2_134 = arith.constant 2 : index
    %c1_135 = arith.constant 1 : index
    %c0_136 = arith.constant 0 : index
    %129 = vector.load %arg1[%c0_133, %c2_134, %c1_135, %c0_136] : memref<1x4x128x64xf32, #tpu.memory_space<vmem>>, vector<1x1x110x64xf32>
    %130 = vector.shape_cast %129 : vector<1x1x110x64xf32> to vector<110x64xf32>
    %131 = arith.truncf %130 : vector<110x64xf32> to vector<110x64xbf16>
    %c1_137 = arith.constant 1 : index
    %c0_138 = arith.constant 0 : index
    %c0_139 = arith.constant 0 : index
    %132 = vector.load %arg2[%c1_137, %c0_138, %c0_139] : memref<4x64x32xbf16, #tpu.memory_space<vmem>>, vector<1x64x32xbf16>
    %133 = vector.shape_cast %132 : vector<1x64x32xbf16> to vector<64x32xbf16>
    %cst_140 = arith.constant dense<0.000000e+00> : vector<110x32xf32>
    %134 = tpu.matmul %131, %133, %cst_140 {dimension_numbers = #tpu.dot_dimension_numbers<[1], [0], [0], [1], [0, 0, 1, 1], [], []>} : vector<110x64xbf16>, vector<64x32xbf16>, vector<110x32xf32> -> vector<110x32xf32>
    %135 = arith.addf %128, %134 : vector<110x32xf32>
    %c0_141 = arith.constant 0 : index
    %c1_142 = arith.constant 1 : index
    %c11_143 = arith.constant 11 : index
    %c0_144 = arith.constant 0 : index
    %136 = vector.load %arg1[%c0_141, %c1_142, %c11_143, %c0_144] : memref<1x4x128x64xf32, #tpu.memory_space<vmem>>, vector<1x1x110x64xf32>
    %137 = vector.shape_cast %136 : vector<1x1x110x64xf32> to vector<110x64xf32>
    %138 = arith.truncf %137 : vector<110x64xf32> to vector<110x64xbf16>
    %c2_145 = arith.constant 2 : index
    %c0_146 = arith.constant 0 : index
    %c0_147 = arith.constant 0 : index
    %139 = vector.load %arg2[%c2_145, %c0_146, %c0_147] : memref<4x64x32xbf16, #tpu.memory_space<vmem>>, vector<1x64x32xbf16>
    %140 = vector.shape_cast %139 : vector<1x64x32xbf16> to vector<64x32xbf16>
    %cst_148 = arith.constant dense<0.000000e+00> : vector<110x32xf32>
    %141 = tpu.matmul %138, %140, %cst_148 {dimension_numbers = #tpu.dot_dimension_numbers<[1], [0], [0], [1], [0, 0, 1, 1], [], []>} : vector<110x64xbf16>, vector<64x32xbf16>, vector<110x32xf32> -> vector<110x32xf32>
    %142 = arith.addf %135, %141 : vector<110x32xf32>
    %c0_149 = arith.constant 0 : index
    %c0_150 = arith.constant 0 : index
    %c12 = arith.constant 12 : index
    %c0_151 = arith.constant 0 : index
    %143 = vector.load %arg1[%c0_149, %c0_150, %c12, %c0_151] : memref<1x4x128x64xf32, #tpu.memory_space<vmem>>, vector<1x1x110x64xf32>
    %144 = vector.shape_cast %143 : vector<1x1x110x64xf32> to vector<110x64xf32>
    %145 = arith.truncf %144 : vector<110x64xf32> to vector<110x64xbf16>
    %c3_152 = arith.constant 3 : index
    %c0_153 = arith.constant 0 : index
    %c0_154 = arith.constant 0 : index
    %146 = vector.load %arg2[%c3_152, %c0_153, %c0_154] : memref<4x64x32xbf16, #tpu.memory_space<vmem>>, vector<1x64x32xbf16>
    %147 = vector.shape_cast %146 : vector<1x64x32xbf16> to vector<64x32xbf16>
    %cst_155 = arith.constant dense<0.000000e+00> : vector<110x32xf32>
    %148 = tpu.matmul %145, %147, %cst_155 {dimension_numbers = #tpu.dot_dimension_numbers<[1], [0], [0], [1], [0, 0, 1, 1], [], []>} : vector<110x64xbf16>, vector<64x32xbf16>, vector<110x32xf32> -> vector<110x32xf32>
    %149 = arith.addf %142, %148 : vector<110x32xf32>
    %c0_156 = arith.constant 0 : index
    %c0_157 = arith.constant 0 : index
    %150 = vector.load %arg3[%c0_156, %c0_157] : memref<1x32xf32, #tpu.memory_space<vmem>>, vector<1x32xf32>
    %151 = vector.broadcast %150 : vector<1x32xf32> to vector<110x32xf32>
    %152 = arith.addf %149, %151 : vector<110x32xf32>
    %cst_158 = arith.constant 0.000000e+00 : f32
    %153 = vector.broadcast %cst_158 : f32 to vector<110x32xf32>
    %154 = arith.maximumf %152, %153 : vector<110x32xf32>
    %c3_159 = arith.constant 3 : index
    %c0_160 = arith.constant 0 : index
    %c0_161 = arith.constant 0 : index
    %155 = vector.load %arg9[%c3_159, %c0_160, %c0_161] : memref<4x112x32xf32, #tpu.memory_space<vmem>>, vector<1x110x32xf32>
    %156 = vector.shape_cast %155 : vector<1x110x32xf32> to vector<110x32xf32>
    %157 = vector.shape_cast %154 : vector<110x32xf32> to vector<1x110x32xf32>
    tpu.vector_store %arg9[%c3_159, %c0_160, %c0_161], %157 {strides = array<i32>} : memref<4x112x32xf32, #tpu.memory_space<vmem>>, vector<1x110x32xf32>,
    %c0_162 = arith.constant 0 : index
    %c0_163 = arith.constant 0 : index
    %c0_164 = arith.constant 0 : index
    %158 = vector.load %arg9[%c0_162, %c0_163, %c0_164] : memref<4x112x32xf32, #tpu.memory_space<vmem>>, vector<1x99x32xf32>
    %159 = vector.shape_cast %158 : vector<1x99x32xf32> to vector<99x32xf32>
    %160 = arith.truncf %159 : vector<99x32xf32> to vector<99x32xbf16>
    %c0_165 = arith.constant 0 : index
    %c0_166 = arith.constant 0 : index
    %c0_167 = arith.constant 0 : index
    %161 = vector.load %arg4[%c0_165, %c0_166, %c0_167] : memref<16x32x64xbf16, #tpu.memory_space<vmem>>, vector<1x32x64xbf16>
    %162 = vector.shape_cast %161 : vector<1x32x64xbf16> to vector<32x64xbf16>
    %cst_168 = arith.constant dense<0.000000e+00> : vector<99x64xf32>
    %163 = tpu.matmul %160, %162, %cst_168 {dimension_numbers = #tpu.dot_dimension_numbers<[1], [0], [0], [1], [0, 0, 1, 1], [], []>} : vector<99x32xbf16>, vector<32x64xbf16>, vector<99x64xf32> -> vector<99x64xf32>
    %c0_169 = arith.constant 0 : index
    %c1_170 = arith.constant 1 : index
    %c0_171 = arith.constant 0 : index
    %164 = vector.load %arg9[%c0_169, %c1_170, %c0_171] : memref<4x112x32xf32, #tpu.memory_space<vmem>>, vector<1x99x32xf32>
    %165 = vector.shape_cast %164 : vector<1x99x32xf32> to vector<99x32xf32>
    %166 = arith.truncf %165 : vector<99x32xf32> to vector<99x32xbf16>
    %c2_172 = arith.constant 2 : index
    %c0_173 = arith.constant 0 : index
    %c0_174 = arith.constant 0 : index
    %167 = vector.load %arg4[%c2_172, %c0_173, %c0_174] : memref<16x32x64xbf16, #tpu.memory_space<vmem>>, vector<1x32x64xbf16>
    %168 = vector.shape_cast %167 : vector<1x32x64xbf16> to vector<32x64xbf16>
    %cst_175 = arith.constant dense<0.000000e+00> : vector<99x64xf32>
    %169 = tpu.matmul %166, %168, %cst_175 {dimension_numbers = #tpu.dot_dimension_numbers<[1], [0], [0], [1], [0, 0, 1, 1], [], []>} : vector<99x32xbf16>, vector<32x64xbf16>, vector<99x64xf32> -> vector<99x64xf32>
    %170 = arith.addf %163, %169 : vector<99x64xf32>
    %c0_176 = arith.constant 0 : index
    %c11_177 = arith.constant 11 : index
    %c0_178 = arith.constant 0 : index
    %171 = vector.load %arg9[%c0_176, %c11_177, %c0_178] : memref<4x112x32xf32, #tpu.memory_space<vmem>>, vector<1x99x32xf32>
    %172 = vector.shape_cast %171 : vector<1x99x32xf32> to vector<99x32xf32>
    %173 = arith.truncf %172 : vector<99x32xf32> to vector<99x32xbf16>
    %c8 = arith.constant 8 : index
    %c0_179 = arith.constant 0 : index
    %c0_180 = arith.constant 0 : index
    %174 = vector.load %arg4[%c8, %c0_179, %c0_180] : memref<16x32x64xbf16, #tpu.memory_space<vmem>>, vector<1x32x64xbf16>
    %175 = vector.shape_cast %174 : vector<1x32x64xbf16> to vector<32x64xbf16>
    %cst_181 = arith.constant dense<0.000000e+00> : vector<99x64xf32>
    %176 = tpu.matmul %173, %175, %cst_181 {dimension_numbers = #tpu.dot_dimension_numbers<[1], [0], [0], [1], [0, 0, 1, 1], [], []>} : vector<99x32xbf16>, vector<32x64xbf16>, vector<99x64xf32> -> vector<99x64xf32>
    %177 = arith.addf %170, %176 : vector<99x64xf32>
    %c0_182 = arith.constant 0 : index
    %c12_183 = arith.constant 12 : index
    %c0_184 = arith.constant 0 : index
    %178 = vector.load %arg9[%c0_182, %c12_183, %c0_184] : memref<4x112x32xf32, #tpu.memory_space<vmem>>, vector<1x99x32xf32>
    %179 = vector.shape_cast %178 : vector<1x99x32xf32> to vector<99x32xf32>
    %180 = arith.truncf %179 : vector<99x32xf32> to vector<99x32xbf16>
    %c10 = arith.constant 10 : index
    %c0_185 = arith.constant 0 : index
    %c0_186 = arith.constant 0 : index
    %181 = vector.load %arg4[%c10, %c0_185, %c0_186] : memref<16x32x64xbf16, #tpu.memory_space<vmem>>, vector<1x32x64xbf16>
    %182 = vector.shape_cast %181 : vector<1x32x64xbf16> to vector<32x64xbf16>
    %cst_187 = arith.constant dense<0.000000e+00> : vector<99x64xf32>
    %183 = tpu.matmul %180, %182, %cst_187 {dimension_numbers = #tpu.dot_dimension_numbers<[1], [0], [0], [1], [0, 0, 1, 1], [], []>} : vector<99x32xbf16>, vector<32x64xbf16>, vector<99x64xf32> -> vector<99x64xf32>
    %184 = arith.addf %177, %183 : vector<99x64xf32>
    %c1_188 = arith.constant 1 : index
    %c0_189 = arith.constant 0 : index
    %c0_190 = arith.constant 0 : index
    %185 = vector.load %arg9[%c1_188, %c0_189, %c0_190] : memref<4x112x32xf32, #tpu.memory_space<vmem>>, vector<1x99x32xf32>
    %186 = vector.shape_cast %185 : vector<1x99x32xf32> to vector<99x32xf32>
    %187 = arith.truncf %186 : vector<99x32xf32> to vector<99x32xbf16>
    %c1_191 = arith.constant 1 : index
    %c0_192 = arith.constant 0 : index
    %c0_193 = arith.constant 0 : index
    %188 = vector.load %arg4[%c1_191, %c0_192, %c0_193] : memref<16x32x64xbf16, #tpu.memory_space<vmem>>, vector<1x32x64xbf16>
    %189 = vector.shape_cast %188 : vector<1x32x64xbf16> to vector<32x64xbf16>
    %cst_194 = arith.constant dense<0.000000e+00> : vector<99x64xf32>
    %190 = tpu.matmul %187, %189, %cst_194 {dimension_numbers = #tpu.dot_dimension_numbers<[1], [0], [0], [1], [0, 0, 1, 1], [], []>} : vector<99x32xbf16>, vector<32x64xbf16>, vector<99x64xf32> -> vector<99x64xf32>
    %191 = arith.addf %184, %190 : vector<99x64xf32>
    %c1_195 = arith.constant 1 : index
    %c1_196 = arith.constant 1 : index
    %c0_197 = arith.constant 0 : index
    %192 = vector.load %arg9[%c1_195, %c1_196, %c0_197] : memref<4x112x32xf32, #tpu.memory_space<vmem>>, vector<1x99x32xf32>
    %193 = vector.shape_cast %192 : vector<1x99x32xf32> to vector<99x32xf32>
    %194 = arith.truncf %193 : vector<99x32xf32> to vector<99x32xbf16>
    %c3_198 = arith.constant 3 : index
    %c0_199 = arith.constant 0 : index
    %c0_200 = arith.constant 0 : index
    %195 = vector.load %arg4[%c3_198, %c0_199, %c0_200] : memref<16x32x64xbf16, #tpu.memory_space<vmem>>, vector<1x32x64xbf16>
    %196 = vector.shape_cast %195 : vector<1x32x64xbf16> to vector<32x64xbf16>
    %cst_201 = arith.constant dense<0.000000e+00> : vector<99x64xf32>
    %197 = tpu.matmul %194, %196, %cst_201 {dimension_numbers = #tpu.dot_dimension_numbers<[1], [0], [0], [1], [0, 0, 1, 1], [], []>} : vector<99x32xbf16>, vector<32x64xbf16>, vector<99x64xf32> -> vector<99x64xf32>
    %198 = arith.addf %191, %197 : vector<99x64xf32>
    %c1_202 = arith.constant 1 : index
    %c11_203 = arith.constant 11 : index
    %c0_204 = arith.constant 0 : index
    %199 = vector.load %arg9[%c1_202, %c11_203, %c0_204] : memref<4x112x32xf32, #tpu.memory_space<vmem>>, vector<1x99x32xf32>
    %200 = vector.shape_cast %199 : vector<1x99x32xf32> to vector<99x32xf32>
    %201 = arith.truncf %200 : vector<99x32xf32> to vector<99x32xbf16>
    %c9 = arith.constant 9 : index
    %c0_205 = arith.constant 0 : index
    %c0_206 = arith.constant 0 : index
    %202 = vector.load %arg4[%c9, %c0_205, %c0_206] : memref<16x32x64xbf16, #tpu.memory_space<vmem>>, vector<1x32x64xbf16>
    %203 = vector.shape_cast %202 : vector<1x32x64xbf16> to vector<32x64xbf16>
    %cst_207 = arith.constant dense<0.000000e+00> : vector<99x64xf32>
    %204 = tpu.matmul %201, %203, %cst_207 {dimension_numbers = #tpu.dot_dimension_numbers<[1], [0], [0], [1], [0, 0, 1, 1], [], []>} : vector<99x32xbf16>, vector<32x64xbf16>, vector<99x64xf32> -> vector<99x64xf32>
    %205 = arith.addf %198, %204 : vector<99x64xf32>
    %c1_208 = arith.constant 1 : index
    %c12_209 = arith.constant 12 : index
    %c0_210 = arith.constant 0 : index
    %206 = vector.load %arg9[%c1_208, %c12_209, %c0_210] : memref<4x112x32xf32, #tpu.memory_space<vmem>>, vector<1x99x32xf32>
    %207 = vector.shape_cast %206 : vector<1x99x32xf32> to vector<99x32xf32>
    %208 = arith.truncf %207 : vector<99x32xf32> to vector<99x32xbf16>
    %c11_211 = arith.constant 11 : index
    %c0_212 = arith.constant 0 : index
    %c0_213 = arith.constant 0 : index
    %209 = vector.load %arg4[%c11_211, %c0_212, %c0_213] : memref<16x32x64xbf16, #tpu.memory_space<vmem>>, vector<1x32x64xbf16>
    %210 = vector.shape_cast %209 : vector<1x32x64xbf16> to vector<32x64xbf16>
    %cst_214 = arith.constant dense<0.000000e+00> : vector<99x64xf32>
    %211 = tpu.matmul %208, %210, %cst_214 {dimension_numbers = #tpu.dot_dimension_numbers<[1], [0], [0], [1], [0, 0, 1, 1], [], []>} : vector<99x32xbf16>, vector<32x64xbf16>, vector<99x64xf32> -> vector<99x64xf32>
    %212 = arith.addf %205, %211 : vector<99x64xf32>
    %c2_215 = arith.constant 2 : index
    %c0_216 = arith.constant 0 : index
    %c0_217 = arith.constant 0 : index
    %213 = vector.load %arg9[%c2_215, %c0_216, %c0_217] : memref<4x112x32xf32, #tpu.memory_space<vmem>>, vector<1x99x32xf32>
    %214 = vector.shape_cast %213 : vector<1x99x32xf32> to vector<99x32xf32>
    %215 = arith.truncf %214 : vector<99x32xf32> to vector<99x32xbf16>
    %c4 = arith.constant 4 : index
    %c0_218 = arith.constant 0 : index
    %c0_219 = arith.constant 0 : index
    %216 = vector.load %arg4[%c4, %c0_218, %c0_219] : memref<16x32x64xbf16, #tpu.memory_space<vmem>>, vector<1x32x64xbf16>
    %217 = vector.shape_cast %216 : vector<1x32x64xbf16> to vector<32x64xbf16>
    %cst_220 = arith.constant dense<0.000000e+00> : vector<99x64xf32>
    %218 = tpu.matmul %215, %217, %cst_220 {dimension_numbers = #tpu.dot_dimension_numbers<[1], [0], [0], [1], [0, 0, 1, 1], [], []>} : vector<99x32xbf16>, vector<32x64xbf16>, vector<99x64xf32> -> vector<99x64xf32>
    %219 = arith.addf %212, %218 : vector<99x64xf32>
    %c2_221 = arith.constant 2 : index
    %c1_222 = arith.constant 1 : index
    %c0_223 = arith.constant 0 : index
    %220 = vector.load %arg9[%c2_221, %c1_222, %c0_223] : memref<4x112x32xf32, #tpu.memory_space<vmem>>, vector<1x99x32xf32>
    %221 = vector.shape_cast %220 : vector<1x99x32xf32> to vector<99x32xf32>
    %222 = arith.truncf %221 : vector<99x32xf32> to vector<99x32xbf16>
    %c6 = arith.constant 6 : index
    %c0_224 = arith.constant 0 : index
    %c0_225 = arith.constant 0 : index
    %223 = vector.load %arg4[%c6, %c0_224, %c0_225] : memref<16x32x64xbf16, #tpu.memory_space<vmem>>, vector<1x32x64xbf16>
    %224 = vector.shape_cast %223 : vector<1x32x64xbf16> to vector<32x64xbf16>
    %cst_226 = arith.constant dense<0.000000e+00> : vector<99x64xf32>
    %225 = tpu.matmul %222, %224, %cst_226 {dimension_numbers = #tpu.dot_dimension_numbers<[1], [0], [0], [1], [0, 0, 1, 1], [], []>} : vector<99x32xbf16>, vector<32x64xbf16>, vector<99x64xf32> -> vector<99x64xf32>
    %226 = arith.addf %219, %225 : vector<99x64xf32>
    %c2_227 = arith.constant 2 : index
    %c11_228 = arith.constant 11 : index
    %c0_229 = arith.constant 0 : index
    %227 = vector.load %arg9[%c2_227, %c11_228, %c0_229] : memref<4x112x32xf32, #tpu.memory_space<vmem>>, vector<1x99x32xf32>
    %228 = vector.shape_cast %227 : vector<1x99x32xf32> to vector<99x32xf32>
    %229 = arith.truncf %228 : vector<99x32xf32> to vector<99x32xbf16>
    %c12_230 = arith.constant 12 : index
    %c0_231 = arith.constant 0 : index
    %c0_232 = arith.constant 0 : index
    %230 = vector.load %arg4[%c12_230, %c0_231, %c0_232] : memref<16x32x64xbf16, #tpu.memory_space<vmem>>, vector<1x32x64xbf16>
    %231 = vector.shape_cast %230 : vector<1x32x64xbf16> to vector<32x64xbf16>
    %cst_233 = arith.constant dense<0.000000e+00> : vector<99x64xf32>
    %232 = tpu.matmul %229, %231, %cst_233 {dimension_numbers = #tpu.dot_dimension_numbers<[1], [0], [0], [1], [0, 0, 1, 1], [], []>} : vector<99x32xbf16>, vector<32x64xbf16>, vector<99x64xf32> -> vector<99x64xf32>
    %233 = arith.addf %226, %232 : vector<99x64xf32>
    %c2_234 = arith.constant 2 : index
    %c12_235 = arith.constant 12 : index
    %c0_236 = arith.constant 0 : index
    %234 = vector.load %arg9[%c2_234, %c12_235, %c0_236] : memref<4x112x32xf32, #tpu.memory_space<vmem>>, vector<1x99x32xf32>
    %235 = vector.shape_cast %234 : vector<1x99x32xf32> to vector<99x32xf32>
    %236 = arith.truncf %235 : vector<99x32xf32> to vector<99x32xbf16>
    %c14 = arith.constant 14 : index
    %c0_237 = arith.constant 0 : index
    %c0_238 = arith.constant 0 : index
    %237 = vector.load %arg4[%c14, %c0_237, %c0_238] : memref<16x32x64xbf16, #tpu.memory_space<vmem>>, vector<1x32x64xbf16>
    %238 = vector.shape_cast %237 : vector<1x32x64xbf16> to vector<32x64xbf16>
    %cst_239 = arith.constant dense<0.000000e+00> : vector<99x64xf32>
    %239 = tpu.matmul %236, %238, %cst_239 {dimension_numbers = #tpu.dot_dimension_numbers<[1], [0], [0], [1], [0, 0, 1, 1], [], []>} : vector<99x32xbf16>, vector<32x64xbf16>, vector<99x64xf32> -> vector<99x64xf32>
    %240 = arith.addf %233, %239 : vector<99x64xf32>
    %c3_240 = arith.constant 3 : index
    %c0_241 = arith.constant 0 : index
    %c0_242 = arith.constant 0 : index
    %241 = vector.load %arg9[%c3_240, %c0_241, %c0_242] : memref<4x112x32xf32, #tpu.memory_space<vmem>>, vector<1x99x32xf32>
    %242 = vector.shape_cast %241 : vector<1x99x32xf32> to vector<99x32xf32>
    %243 = arith.truncf %242 : vector<99x32xf32> to vector<99x32xbf16>
    %c5 = arith.constant 5 : index
    %c0_243 = arith.constant 0 : index
    %c0_244 = arith.constant 0 : index
    %244 = vector.load %arg4[%c5, %c0_243, %c0_244] : memref<16x32x64xbf16, #tpu.memory_space<vmem>>, vector<1x32x64xbf16>
    %245 = vector.shape_cast %244 : vector<1x32x64xbf16> to vector<32x64xbf16>
    %cst_245 = arith.constant dense<0.000000e+00> : vector<99x64xf32>
    %246 = tpu.matmul %243, %245, %cst_245 {dimension_numbers = #tpu.dot_dimension_numbers<[1], [0], [0], [1], [0, 0, 1, 1], [], []>} : vector<99x32xbf16>, vector<32x64xbf16>, vector<99x64xf32> -> vector<99x64xf32>
    %247 = arith.addf %240, %246 : vector<99x64xf32>
    %c3_246 = arith.constant 3 : index
    %c1_247 = arith.constant 1 : index
    %c0_248 = arith.constant 0 : index
    %248 = vector.load %arg9[%c3_246, %c1_247, %c0_248] : memref<4x112x32xf32, #tpu.memory_space<vmem>>, vector<1x99x32xf32>
    %249 = vector.shape_cast %248 : vector<1x99x32xf32> to vector<99x32xf32>
    %250 = arith.truncf %249 : vector<99x32xf32> to vector<99x32xbf16>
    %c7 = arith.constant 7 : index
    %c0_249 = arith.constant 0 : index
    %c0_250 = arith.constant 0 : index
    %251 = vector.load %arg4[%c7, %c0_249, %c0_250] : memref<16x32x64xbf16, #tpu.memory_space<vmem>>, vector<1x32x64xbf16>
    %252 = vector.shape_cast %251 : vector<1x32x64xbf16> to vector<32x64xbf16>
    %cst_251 = arith.constant dense<0.000000e+00> : vector<99x64xf32>
    %253 = tpu.matmul %250, %252, %cst_251 {dimension_numbers = #tpu.dot_dimension_numbers<[1], [0], [0], [1], [0, 0, 1, 1], [], []>} : vector<99x32xbf16>, vector<32x64xbf16>, vector<99x64xf32> -> vector<99x64xf32>
    %254 = arith.addf %247, %253 : vector<99x64xf32>
    %c3_252 = arith.constant 3 : index
    %c11_253 = arith.constant 11 : index
    %c0_254 = arith.constant 0 : index
    %255 = vector.load %arg9[%c3_252, %c11_253, %c0_254] : memref<4x112x32xf32, #tpu.memory_space<vmem>>, vector<1x99x32xf32>
    %256 = vector.shape_cast %255 : vector<1x99x32xf32> to vector<99x32xf32>
    %257 = arith.truncf %256 : vector<99x32xf32> to vector<99x32xbf16>
    %c13 = arith.constant 13 : index
    %c0_255 = arith.constant 0 : index
    %c0_256 = arith.constant 0 : index
    %258 = vector.load %arg4[%c13, %c0_255, %c0_256] : memref<16x32x64xbf16, #tpu.memory_space<vmem>>, vector<1x32x64xbf16>
    %259 = vector.shape_cast %258 : vector<1x32x64xbf16> to vector<32x64xbf16>
    %cst_257 = arith.constant dense<0.000000e+00> : vector<99x64xf32>
    %260 = tpu.matmul %257, %259, %cst_257 {dimension_numbers = #tpu.dot_dimension_numbers<[1], [0], [0], [1], [0, 0, 1, 1], [], []>} : vector<99x32xbf16>, vector<32x64xbf16>, vector<99x64xf32> -> vector<99x64xf32>
    %261 = arith.addf %254, %260 : vector<99x64xf32>
    %c3_258 = arith.constant 3 : index
    %c12_259 = arith.constant 12 : index
    %c0_260 = arith.constant 0 : index
    %262 = vector.load %arg9[%c3_258, %c12_259, %c0_260] : memref<4x112x32xf32, #tpu.memory_space<vmem>>, vector<1x99x32xf32>
    %263 = vector.shape_cast %262 : vector<1x99x32xf32> to vector<99x32xf32>
    %264 = arith.truncf %263 : vector<99x32xf32> to vector<99x32xbf16>
    %c15 = arith.constant 15 : index
    %c0_261 = arith.constant 0 : index
    %c0_262 = arith.constant 0 : index
    %265 = vector.load %arg4[%c15, %c0_261, %c0_262] : memref<16x32x64xbf16, #tpu.memory_space<vmem>>, vector<1x32x64xbf16>
    %266 = vector.shape_cast %265 : vector<1x32x64xbf16> to vector<32x64xbf16>
    %cst_263 = arith.constant dense<0.000000e+00> : vector<99x64xf32>
    %267 = tpu.matmul %264, %266, %cst_263 {dimension_numbers = #tpu.dot_dimension_numbers<[1], [0], [0], [1], [0, 0, 1, 1], [], []>} : vector<99x32xbf16>, vector<32x64xbf16>, vector<99x64xf32> -> vector<99x64xf32>
    %268 = arith.addf %261, %267 : vector<99x64xf32>
    %c0_264 = arith.constant 0 : index
    %c0_265 = arith.constant 0 : index
    %269 = vector.load %arg5[%c0_264, %c0_265] : memref<1x64xf32, #tpu.memory_space<vmem>>, vector<1x64xf32>
    %270 = vector.broadcast %269 : vector<1x64xf32> to vector<99x64xf32>
    %271 = arith.addf %268, %270 : vector<99x64xf32>
    %cst_266 = arith.constant 0.000000e+00 : f32
    %272 = vector.broadcast %cst_266 : f32 to vector<99x64xf32>
    %273 = arith.maximumf %271, %272 : vector<99x64xf32>
    %c0_267 = arith.constant 0 : index
    %c0_268 = arith.constant 0 : index
    %274 = vector.load %arg10[%c0_267, %c0_268] : memref<104x64xf32, #tpu.memory_space<vmem>>, vector<99x64xf32>
    tpu.vector_store %arg10[%c0_267, %c0_268], %273 {strides = array<i32>} : memref<104x64xf32, #tpu.memory_space<vmem>>, vector<99x64xf32>,
    %c0_269 = arith.constant 0 : index
    %c0_270 = arith.constant 0 : index
    %275 = vector.load %arg10[%c0_269, %c0_270] : memref<104x64xf32, #tpu.memory_space<vmem>>, vector<77x64xf32>
    %276 = arith.truncf %275 : vector<77x64xf32> to vector<77x64xbf16>
    %c0_271 = arith.constant 0 : index
    %c0_272 = arith.constant 0 : index
    %c0_273 = arith.constant 0 : index
    %277 = vector.load %arg6[%c0_271, %c0_272, %c0_273] : memref<9x64x64xbf16, #tpu.memory_space<vmem>>, vector<1x64x64xbf16>
    %278 = vector.shape_cast %277 : vector<1x64x64xbf16> to vector<64x64xbf16>
    %cst_274 = arith.constant dense<0.000000e+00> : vector<77x64xf32>
    %279 = tpu.matmul %276, %278, %cst_274 {dimension_numbers = #tpu.dot_dimension_numbers<[1], [0], [0], [1], [0, 0, 1, 1], [], []>} : vector<77x64xbf16>, vector<64x64xbf16>, vector<77x64xf32> -> vector<77x64xf32>
    %c1_275 = arith.constant 1 : index
    %c0_276 = arith.constant 0 : index
    %280 = vector.load %arg10[%c1_275, %c0_276] : memref<104x64xf32, #tpu.memory_space<vmem>>, vector<77x64xf32>
    %281 = arith.truncf %280 : vector<77x64xf32> to vector<77x64xbf16>
    %c1_277 = arith.constant 1 : index
    %c0_278 = arith.constant 0 : index
    %c0_279 = arith.constant 0 : index
    %282 = vector.load %arg6[%c1_277, %c0_278, %c0_279] : memref<9x64x64xbf16, #tpu.memory_space<vmem>>, vector<1x64x64xbf16>
    %283 = vector.shape_cast %282 : vector<1x64x64xbf16> to vector<64x64xbf16>
    %cst_280 = arith.constant dense<0.000000e+00> : vector<77x64xf32>
    %284 = tpu.matmul %281, %283, %cst_280 {dimension_numbers = #tpu.dot_dimension_numbers<[1], [0], [0], [1], [0, 0, 1, 1], [], []>} : vector<77x64xbf16>, vector<64x64xbf16>, vector<77x64xf32> -> vector<77x64xf32>
    %285 = arith.addf %279, %284 : vector<77x64xf32>
    %c2_281 = arith.constant 2 : index
    %c0_282 = arith.constant 0 : index
    %286 = vector.load %arg10[%c2_281, %c0_282] : memref<104x64xf32, #tpu.memory_space<vmem>>, vector<77x64xf32>
    %287 = arith.truncf %286 : vector<77x64xf32> to vector<77x64xbf16>
    %c2_283 = arith.constant 2 : index
    %c0_284 = arith.constant 0 : index
    %c0_285 = arith.constant 0 : index
    %288 = vector.load %arg6[%c2_283, %c0_284, %c0_285] : memref<9x64x64xbf16, #tpu.memory_space<vmem>>, vector<1x64x64xbf16>
    %289 = vector.shape_cast %288 : vector<1x64x64xbf16> to vector<64x64xbf16>
    %cst_286 = arith.constant dense<0.000000e+00> : vector<77x64xf32>
    %290 = tpu.matmul %287, %289, %cst_286 {dimension_numbers = #tpu.dot_dimension_numbers<[1], [0], [0], [1], [0, 0, 1, 1], [], []>} : vector<77x64xbf16>, vector<64x64xbf16>, vector<77x64xf32> -> vector<77x64xf32>
    %291 = arith.addf %285, %290 : vector<77x64xf32>
    %c11_287 = arith.constant 11 : index
    %c0_288 = arith.constant 0 : index
    %292 = vector.load %arg10[%c11_287, %c0_288] : memref<104x64xf32, #tpu.memory_space<vmem>>, vector<77x64xf32>
    %293 = arith.truncf %292 : vector<77x64xf32> to vector<77x64xbf16>
    %c3_289 = arith.constant 3 : index
    %c0_290 = arith.constant 0 : index
    %c0_291 = arith.constant 0 : index
    %294 = vector.load %arg6[%c3_289, %c0_290, %c0_291] : memref<9x64x64xbf16, #tpu.memory_space<vmem>>, vector<1x64x64xbf16>
    %295 = vector.shape_cast %294 : vector<1x64x64xbf16> to vector<64x64xbf16>
    %cst_292 = arith.constant dense<0.000000e+00> : vector<77x64xf32>
    %296 = tpu.matmul %293, %295, %cst_292 {dimension_numbers = #tpu.dot_dimension_numbers<[1], [0], [0], [1], [0, 0, 1, 1], [], []>} : vector<77x64xbf16>, vector<64x64xbf16>, vector<77x64xf32> -> vector<77x64xf32>
    %297 = arith.addf %291, %296 : vector<77x64xf32>
    %c12_293 = arith.constant 12 : index
    %c0_294 = arith.constant 0 : index
    %298 = vector.load %arg10[%c12_293, %c0_294] : memref<104x64xf32, #tpu.memory_space<vmem>>, vector<77x64xf32>
    %299 = arith.truncf %298 : vector<77x64xf32> to vector<77x64xbf16>
    %c4_295 = arith.constant 4 : index
    %c0_296 = arith.constant 0 : index
    %c0_297 = arith.constant 0 : index
    %300 = vector.load %arg6[%c4_295, %c0_296, %c0_297] : memref<9x64x64xbf16, #tpu.memory_space<vmem>>, vector<1x64x64xbf16>
    %301 = vector.shape_cast %300 : vector<1x64x64xbf16> to vector<64x64xbf16>
    %cst_298 = arith.constant dense<0.000000e+00> : vector<77x64xf32>
    %302 = tpu.matmul %299, %301, %cst_298 {dimension_numbers = #tpu.dot_dimension_numbers<[1], [0], [0], [1], [0, 0, 1, 1], [], []>} : vector<77x64xbf16>, vector<64x64xbf16>, vector<77x64xf32> -> vector<77x64xf32>
    %303 = arith.addf %297, %302 : vector<77x64xf32>
    %c13_299 = arith.constant 13 : index
    %c0_300 = arith.constant 0 : index
    %304 = vector.load %arg10[%c13_299, %c0_300] : memref<104x64xf32, #tpu.memory_space<vmem>>, vector<77x64xf32>
    %305 = arith.truncf %304 : vector<77x64xf32> to vector<77x64xbf16>
    %c5_301 = arith.constant 5 : index
    %c0_302 = arith.constant 0 : index
    %c0_303 = arith.constant 0 : index
    %306 = vector.load %arg6[%c5_301, %c0_302, %c0_303] : memref<9x64x64xbf16, #tpu.memory_space<vmem>>, vector<1x64x64xbf16>
    %307 = vector.shape_cast %306 : vector<1x64x64xbf16> to vector<64x64xbf16>
    %cst_304 = arith.constant dense<0.000000e+00> : vector<77x64xf32>
    %308 = tpu.matmul %305, %307, %cst_304 {dimension_numbers = #tpu.dot_dimension_numbers<[1], [0], [0], [1], [0, 0, 1, 1], [], []>} : vector<77x64xbf16>, vector<64x64xbf16>, vector<77x64xf32> -> vector<77x64xf32>
    %309 = arith.addf %303, %308 : vector<77x64xf32>
    %c22 = arith.constant 22 : index
    %c0_305 = arith.constant 0 : index
    %310 = vector.load %arg10[%c22, %c0_305] : memref<104x64xf32, #tpu.memory_space<vmem>>, vector<77x64xf32>
    %311 = arith.truncf %310 : vector<77x64xf32> to vector<77x64xbf16>
    %c6_306 = arith.constant 6 : index
    %c0_307 = arith.constant 0 : index
    %c0_308 = arith.constant 0 : index
    %312 = vector.load %arg6[%c6_306, %c0_307, %c0_308] : memref<9x64x64xbf16, #tpu.memory_space<vmem>>, vector<1x64x64xbf16>
    %313 = vector.shape_cast %312 : vector<1x64x64xbf16> to vector<64x64xbf16>
    %cst_309 = arith.constant dense<0.000000e+00> : vector<77x64xf32>
    %314 = tpu.matmul %311, %313, %cst_309 {dimension_numbers = #tpu.dot_dimension_numbers<[1], [0], [0], [1], [0, 0, 1, 1], [], []>} : vector<77x64xbf16>, vector<64x64xbf16>, vector<77x64xf32> -> vector<77x64xf32>
    %315 = arith.addf %309, %314 : vector<77x64xf32>
    %c23 = arith.constant 23 : index
    %c0_310 = arith.constant 0 : index
    %316 = vector.load %arg10[%c23, %c0_310] : memref<104x64xf32, #tpu.memory_space<vmem>>, vector<77x64xf32>
    %317 = arith.truncf %316 : vector<77x64xf32> to vector<77x64xbf16>
    %c7_311 = arith.constant 7 : index
    %c0_312 = arith.constant 0 : index
    %c0_313 = arith.constant 0 : index
    %318 = vector.load %arg6[%c7_311, %c0_312, %c0_313] : memref<9x64x64xbf16, #tpu.memory_space<vmem>>, vector<1x64x64xbf16>
    %319 = vector.shape_cast %318 : vector<1x64x64xbf16> to vector<64x64xbf16>
    %cst_314 = arith.constant dense<0.000000e+00> : vector<77x64xf32>
    %320 = tpu.matmul %317, %319, %cst_314 {dimension_numbers = #tpu.dot_dimension_numbers<[1], [0], [0], [1], [0, 0, 1, 1], [], []>} : vector<77x64xbf16>, vector<64x64xbf16>, vector<77x64xf32> -> vector<77x64xf32>
    %321 = arith.addf %315, %320 : vector<77x64xf32>
    %c24 = arith.constant 24 : index
    %c0_315 = arith.constant 0 : index
    %322 = vector.load %arg10[%c24, %c0_315] : memref<104x64xf32, #tpu.memory_space<vmem>>, vector<77x64xf32>
    %323 = arith.truncf %322 : vector<77x64xf32> to vector<77x64xbf16>
    %c8_316 = arith.constant 8 : index
    %c0_317 = arith.constant 0 : index
    %c0_318 = arith.constant 0 : index
    %324 = vector.load %arg6[%c8_316, %c0_317, %c0_318] : memref<9x64x64xbf16, #tpu.memory_space<vmem>>, vector<1x64x64xbf16>
    %325 = vector.shape_cast %324 : vector<1x64x64xbf16> to vector<64x64xbf16>
    %cst_319 = arith.constant dense<0.000000e+00> : vector<77x64xf32>
    %326 = tpu.matmul %323, %325, %cst_319 {dimension_numbers = #tpu.dot_dimension_numbers<[1], [0], [0], [1], [0, 0, 1, 1], [], []>} : vector<77x64xbf16>, vector<64x64xbf16>, vector<77x64xf32> -> vector<77x64xf32>
    %327 = arith.addf %321, %326 : vector<77x64xf32>
    %c0_320 = arith.constant 0 : index
    %c0_321 = arith.constant 0 : index
    %328 = vector.load %arg7[%c0_320, %c0_321] : memref<1x64xf32, #tpu.memory_space<vmem>>, vector<1x64xf32>
    %329 = vector.broadcast %328 : vector<1x64xf32> to vector<77x64xf32>
    %330 = arith.addf %327, %329 : vector<77x64xf32>
    %cst_322 = arith.constant 0.000000e+00 : f32
    %331 = vector.broadcast %cst_322 : f32 to vector<77x64xf32>
    %332 = arith.maximumf %330, %331 : vector<77x64xf32>
    %333 = vector.extract_strided_slice %332 {offsets = [0, 0], sizes = [7, 64], strides = [1, 1]} : vector<77x64xf32> to vector<7x64xf32>
    %c0_323 = arith.constant 0 : index
    %c0_324 = arith.constant 0 : index
    %c0_325 = arith.constant 0 : index
    %334 = vector.load %arg8[%c0_323, %c0_324, %c0_325] : memref<1x49x64xf32, #tpu.memory_space<vmem>>, vector<1x7x64xf32>
    %335 = vector.shape_cast %334 : vector<1x7x64xf32> to vector<7x64xf32>
    %336 = vector.shape_cast %333 : vector<7x64xf32> to vector<1x7x64xf32>
    tpu.vector_store %arg8[%c0_323, %c0_324, %c0_325], %336 {strides = array<i32>} : memref<1x49x64xf32, #tpu.memory_space<vmem>>, vector<1x7x64xf32>,
    %337 = vector.extract_strided_slice %332 {offsets = [11, 0], sizes = [7, 64], strides = [1, 1]} : vector<77x64xf32> to vector<7x64xf32>
    %c0_326 = arith.constant 0 : index
    %c7_327 = arith.constant 7 : index
    %c0_328 = arith.constant 0 : index
    %338 = vector.load %arg8[%c0_326, %c7_327, %c0_328] : memref<1x49x64xf32, #tpu.memory_space<vmem>>, vector<1x7x64xf32>
    %339 = vector.shape_cast %338 : vector<1x7x64xf32> to vector<7x64xf32>
    %340 = vector.shape_cast %337 : vector<7x64xf32> to vector<1x7x64xf32>
    tpu.vector_store %arg8[%c0_326, %c7_327, %c0_328], %340 {strides = array<i32>} : memref<1x49x64xf32, #tpu.memory_space<vmem>>, vector<1x7x64xf32>,
    %341 = vector.extract_strided_slice %332 {offsets = [22, 0], sizes = [7, 64], strides = [1, 1]} : vector<77x64xf32> to vector<7x64xf32>
    %c0_329 = arith.constant 0 : index
    %c14_330 = arith.constant 14 : index
    %c0_331 = arith.constant 0 : index
    %342 = vector.load %arg8[%c0_329, %c14_330, %c0_331] : memref<1x49x64xf32, #tpu.memory_space<vmem>>, vector<1x7x64xf32>
    %343 = vector.shape_cast %342 : vector<1x7x64xf32> to vector<7x64xf32>
    %344 = vector.shape_cast %341 : vector<7x64xf32> to vector<1x7x64xf32>
    tpu.vector_store %arg8[%c0_329, %c14_330, %c0_331], %344 {strides = array<i32>} : memref<1x49x64xf32, #tpu.memory_space<vmem>>, vector<1x7x64xf32>,
    %345 = vector.extract_strided_slice %332 {offsets = [33, 0], sizes = [7, 64], strides = [1, 1]} : vector<77x64xf32> to vector<7x64xf32>
    %c0_332 = arith.constant 0 : index
    %c21 = arith.constant 21 : index
    %c0_333 = arith.constant 0 : index
    %346 = vector.load %arg8[%c0_332, %c21, %c0_333] : memref<1x49x64xf32, #tpu.memory_space<vmem>>, vector<1x7x64xf32>
    %347 = vector.shape_cast %346 : vector<1x7x64xf32> to vector<7x64xf32>
    %348 = vector.shape_cast %345 : vector<7x64xf32> to vector<1x7x64xf32>
    tpu.vector_store %arg8[%c0_332, %c21, %c0_333], %348 {strides = array<i32>} : memref<1x49x64xf32, #tpu.memory_space<vmem>>, vector<1x7x64xf32>,
    %349 = vector.extract_strided_slice %332 {offsets = [44, 0], sizes = [7, 64], strides = [1, 1]} : vector<77x64xf32> to vector<7x64xf32>
    %c0_334 = arith.constant 0 : index
    %c28 = arith.constant 28 : index
    %c0_335 = arith.constant 0 : index
    %350 = vector.load %arg8[%c0_334, %c28, %c0_335] : memref<1x49x64xf32, #tpu.memory_space<vmem>>, vector<1x7x64xf32>
    %351 = vector.shape_cast %350 : vector<1x7x64xf32> to vector<7x64xf32>
    %352 = vector.shape_cast %349 : vector<7x64xf32> to vector<1x7x64xf32>
    tpu.vector_store %arg8[%c0_334, %c28, %c0_335], %352 {strides = array<i32>} : memref<1x49x64xf32, #tpu.memory_space<vmem>>, vector<1x7x64xf32>,
    %353 = vector.extract_strided_slice %332 {offsets = [55, 0], sizes = [7, 64], strides = [1, 1]} : vector<77x64xf32> to vector<7x64xf32>
    %c0_336 = arith.constant 0 : index
    %c35 = arith.constant 35 : index
    %c0_337 = arith.constant 0 : index
    %354 = vector.load %arg8[%c0_336, %c35, %c0_337] : memref<1x49x64xf32, #tpu.memory_space<vmem>>, vector<1x7x64xf32>
    %355 = vector.shape_cast %354 : vector<1x7x64xf32> to vector<7x64xf32>
    %356 = vector.shape_cast %353 : vector<7x64xf32> to vector<1x7x64xf32>
    tpu.vector_store %arg8[%c0_336, %c35, %c0_337], %356 {strides = array<i32>} : memref<1x49x64xf32, #tpu.memory_space<vmem>>, vector<1x7x64xf32>,
    %357 = vector.extract_strided_slice %332 {offsets = [66, 0], sizes = [7, 64], strides = [1, 1]} : vector<77x64xf32> to vector<7x64xf32>
    %c0_338 = arith.constant 0 : index
    %c42 = arith.constant 42 : index
    %c0_339 = arith.constant 0 : index
    %358 = vector.load %arg8[%c0_338, %c42, %c0_339] : memref<1x49x64xf32, #tpu.memory_space<vmem>>, vector<1x7x64xf32>
    %359 = vector.shape_cast %358 : vector<1x7x64xf32> to vector<7x64xf32>
    %360 = vector.shape_cast %357 : vector<7x64xf32> to vector<1x7x64xf32>
    tpu.vector_store %arg8[%c0_338, %c42, %c0_339], %360 {strides = array<i32>} : memref<1x49x64xf32, #tpu.memory_space<vmem>>, vector<1x7x64xf32>,
    return
  }
  func.func @transform_0(%arg0: i32) -> (i32, i32, i32, i32) {
    %c0_i32 = arith.constant 0 : i32
    %c0_i32_0 = arith.constant 0 : i32
    %c0_i32_1 = arith.constant 0 : i32
    %c0_i32_2 = arith.constant 0 : i32
    return %arg0, %c0_i32, %c0_i32_0, %c0_i32_1 : i32, i32, i32, i32
  }
  func.func @transform_1(%arg0: i32) -> (i32, i32, i32) {
    %c0_i32 = arith.constant 0 : i32
    %c0_i32_0 = arith.constant 0 : i32
    %c0_i32_1 = arith.constant 0 : i32
    %c0_i32_2 = arith.constant 0 : i32
    return %c0_i32, %c0_i32_0, %c0_i32_1 : i32, i32, i32
  }
  func.func @transform_2(%arg0: i32) -> (i32, i32) {
    %c0_i32 = arith.constant 0 : i32
    %c0_i32_0 = arith.constant 0 : i32
    %c0_i32_1 = arith.constant 0 : i32
    return %c0_i32, %c0_i32_0 : i32, i32
  }
  func.func @transform_3(%arg0: i32) -> (i32, i32, i32) {
    %c0_i32 = arith.constant 0 : i32
    %c0_i32_0 = arith.constant 0 : i32
    %c0_i32_1 = arith.constant 0 : i32
    %c0_i32_2 = arith.constant 0 : i32
    return %c0_i32, %c0_i32_0, %c0_i32_1 : i32, i32, i32
  }
  func.func @transform_4(%arg0: i32) -> (i32, i32) {
    %c0_i32 = arith.constant 0 : i32
    %c0_i32_0 = arith.constant 0 : i32
    %c0_i32_1 = arith.constant 0 : i32
    return %c0_i32, %c0_i32_0 : i32, i32
  }
  func.func @transform_5(%arg0: i32) -> (i32, i32, i32) {
    %c0_i32 = arith.constant 0 : i32
    %c0_i32_0 = arith.constant 0 : i32
    %c0_i32_1 = arith.constant 0 : i32
    %c0_i32_2 = arith.constant 0 : i32
    return %c0_i32, %c0_i32_0, %c0_i32_1 : i32, i32, i32
  }
  func.func @transform_6(%arg0: i32) -> (i32, i32) {
    %c0_i32 = arith.constant 0 : i32
    %c0_i32_0 = arith.constant 0 : i32
    %c0_i32_1 = arith.constant 0 : i32
    return %c0_i32, %c0_i32_0 : i32, i32
  }
  func.func @transform_7(%arg0: i32) -> (i32, i32, i32) {
    %c0_i32 = arith.constant 0 : i32
    %c0_i32_0 = arith.constant 0 : i32
    %c0_i32_1 = arith.constant 0 : i32
    return %arg0, %c0_i32, %c0_i32_0 : i32, i32, i32
  }
}

module attributes {stable_mosaic.version = 11 : i64} {
  func.func @_fc_kernel(%arg0: i32, %arg1: memref<8x3136xf32, #tpu.memory_space<vmem>>, %arg2: memref<3136x512xbf16, #tpu.memory_space<vmem>>, %arg3: memref<1x512xf32, #tpu.memory_space<vmem>>, %arg4: memref<512x128xbf16, #tpu.memory_space<vmem>>, %arg5: memref<1x128xf32, #tpu.memory_space<vmem>>, %arg6: memref<8x128xf32, #tpu.memory_space<vmem>>) attributes {dimension_semantics = [#tpu.dimension_semantics<parallel>], iteration_bounds = array<i64: 1>, scalar_prefetch = 0 : i64, scratch_operands = 0 : i64, tpu.core_type = #tpu.core_type<tc>, window_params = [{transform_indices = @transform_0, window_bounds = array<i64: 8, 3136>}, {pipeline_mode = #tpu.pipeline_mode<synchronous>, transform_indices = @transform_1, window_bounds = array<i64: 3136, 512>}, {pipeline_mode = #tpu.pipeline_mode<synchronous>, transform_indices = @transform_2, window_bounds = array<i64: 1, 512>}, {pipeline_mode = #tpu.pipeline_mode<synchronous>, transform_indices = @transform_3, window_bounds = array<i64: 512, 128>}, {pipeline_mode = #tpu.pipeline_mode<synchronous>, transform_indices = @transform_4, window_bounds = array<i64: 1, 128>}, {transform_indices = @transform_5, window_bounds = array<i64: 8, 128>}]} {
    %c0 = arith.constant 0 : index
    %c0_0 = arith.constant 0 : index
    %0 = vector.load %arg1[%c0, %c0_0] : memref<8x3136xf32, #tpu.memory_space<vmem>>, vector<8x3136xf32>
    %1 = arith.truncf %0 : vector<8x3136xf32> to vector<8x3136xbf16>
    %c0_1 = arith.constant 0 : index
    %c0_2 = arith.constant 0 : index
    %2 = vector.load %arg2[%c0_1, %c0_2] : memref<3136x512xbf16, #tpu.memory_space<vmem>>, vector<3136x512xbf16>
    %cst = arith.constant dense<0.000000e+00> : vector<8x512xf32>
    %3 = tpu.matmul %1, %2, %cst {dimension_numbers = #tpu.dot_dimension_numbers<[1], [0], [0], [1], [0, 0, 1, 1], [], []>} : vector<8x3136xbf16>, vector<3136x512xbf16>, vector<8x512xf32> -> vector<8x512xf32>
    %c0_3 = arith.constant 0 : index
    %c0_4 = arith.constant 0 : index
    %4 = vector.load %arg3[%c0_3, %c0_4] : memref<1x512xf32, #tpu.memory_space<vmem>>, vector<1x512xf32>
    %5 = vector.broadcast %4 : vector<1x512xf32> to vector<8x512xf32>
    %6 = arith.addf %3, %5 : vector<8x512xf32>
    %cst_5 = arith.constant 0.000000e+00 : f32
    %7 = vector.broadcast %cst_5 : f32 to vector<8x512xf32>
    %8 = arith.maximumf %6, %7 : vector<8x512xf32>
    %9 = arith.truncf %8 : vector<8x512xf32> to vector<8x512xbf16>
    %c0_6 = arith.constant 0 : index
    %c0_7 = arith.constant 0 : index
    %10 = vector.load %arg4[%c0_6, %c0_7] : memref<512x128xbf16, #tpu.memory_space<vmem>>, vector<512x128xbf16>
    %cst_8 = arith.constant dense<0.000000e+00> : vector<8x128xf32>
    %11 = tpu.matmul %9, %10, %cst_8 {dimension_numbers = #tpu.dot_dimension_numbers<[1], [0], [0], [1], [0, 0, 1, 1], [], []>} : vector<8x512xbf16>, vector<512x128xbf16>, vector<8x128xf32> -> vector<8x128xf32>
    %c0_9 = arith.constant 0 : index
    %c0_10 = arith.constant 0 : index
    %12 = vector.load %arg5[%c0_9, %c0_10] : memref<1x128xf32, #tpu.memory_space<vmem>>, vector<1x128xf32>
    %13 = vector.broadcast %12 : vector<1x128xf32> to vector<8x128xf32>
    %14 = arith.addf %11, %13 : vector<8x128xf32>
    %c0_11 = arith.constant 0 : index
    %c0_12 = arith.constant 0 : index
    %15 = vector.load %arg6[%c0_11, %c0_12] : memref<8x128xf32, #tpu.memory_space<vmem>>, vector<8x128xf32>
    tpu.vector_store %arg6[%c0_11, %c0_12], %14 {strides = array<i32>} : memref<8x128xf32, #tpu.memory_space<vmem>>, vector<8x128xf32>,
    return
  }
  func.func @transform_0(%arg0: i32) -> (i32, i32) {
    %c0_i32 = arith.constant 0 : i32
    %c0_i32_0 = arith.constant 0 : i32
    return %arg0, %c0_i32 : i32, i32
  }
  func.func @transform_1(%arg0: i32) -> (i32, i32) {
    %c0_i32 = arith.constant 0 : i32
    %c0_i32_0 = arith.constant 0 : i32
    %c0_i32_1 = arith.constant 0 : i32
    return %c0_i32, %c0_i32_0 : i32, i32
  }
  func.func @transform_2(%arg0: i32) -> (i32, i32) {
    %c0_i32 = arith.constant 0 : i32
    %c0_i32_0 = arith.constant 0 : i32
    %c0_i32_1 = arith.constant 0 : i32
    return %c0_i32, %c0_i32_0 : i32, i32
  }
  func.func @transform_3(%arg0: i32) -> (i32, i32) {
    %c0_i32 = arith.constant 0 : i32
    %c0_i32_0 = arith.constant 0 : i32
    %c0_i32_1 = arith.constant 0 : i32
    return %c0_i32, %c0_i32_0 : i32, i32
  }
  func.func @transform_4(%arg0: i32) -> (i32, i32) {
    %c0_i32 = arith.constant 0 : i32
    %c0_i32_0 = arith.constant 0 : i32
    %c0_i32_1 = arith.constant 0 : i32
    return %c0_i32, %c0_i32_0 : i32, i32
  }
  func.func @transform_5(%arg0: i32) -> (i32, i32) {
    %c0_i32 = arith.constant 0 : i32
    %c0_i32_0 = arith.constant 0 : i32
    return %arg0, %c0_i32 : i32, i32
  }
}

</mosaic_0001>

<bundles_post_ra>
// kernel: arsenet_apply.2
= control target key start
LH: loop header
LB: loop body
LE: loop exit
PB: predicated region body
PF: predicated region fallthrough
CT: control target
= control target key end

     0   :  { %s9927_s24 = smov 0   ;;  %s12791_s0 = inlined_call_operand.vmem [shape: f32[2,4,128,64], index: 0, kind: input, shape index: {}]   ;;  %s12792_s1 = inlined_call_operand.vmem [shape: bf16[4,64,32], index: 1, kind: input, shape index: {}]   ;;  %s12793_s2 = inlined_call_operand.vmem [shape: f32[1,32], index: 2, kind: input, shape index: {}]   ;;  %s12794_s3 = inlined_call_operand.vmem [shape: bf16[16,32,64], index: 3, kind: input, shape index: {}]   ;;  %s12795_s4 = inlined_call_operand.vmem [shape: f32[1,64], index: 4, kind: input, shape index: {}]   ;;  %s12796_s5 = inlined_call_operand.vmem [shape: bf16[9,64,64], index: 5, kind: input, shape index: {}]   ;;  %s12797_s6 = inlined_call_operand.vmem [shape: f32[1,64], index: 6, kind: input, shape index: {}]   ;;  %s12798_s7 = inlined_call_operand.vmem [shape: f32[2,49,64], index: 7, kind: output, shape index: {}]  }
   0x1 LB: > { %s7176_s25 = sadd.s32 4294967295, %s9883_s24   ;;  %p7180_p0 = scmp.ge.s32.totalorder %s9883_s24, 1  ;;  %s9883_s24 = sphi %s9927_s24, %s17_s24  }
   0x2   : > { %p237_p1 = scmp.lt.s32.totalorder %s9883_s24, 3 }
   0x4   : > { %p238_p2 = pnand %p7180_p0, %p237_p1 }
   0x5   : > { %p269_p3 = scmp.lt.s32.totalorder (!%p238_p2), %s7176_s25, 1 }
   0x6   : > { %241 = sbr.rel (%p238_p2) target bundleno = 1497 (0x5d9), region = 48 }
   0xb   : > { %v9742_v0 = vld [vmem:[%s12792_s1 + $0x38] sm:$0xff]   ;;  %v9885_v1 = vmov 0.0   ;;  %v9743_v2 = vld [vmem:[%s12792_s1 + $0x30] sm:$0xff]   ;;  %vm9886_vm0 = vmmov 0   ;;  %s12800_s25 = smov (!%p269_p3, %s7176_s25), 1  ;;  %v9744_v3 = vld [vmem:[%s12792_s1 + $0x28] sm:$0xff]  }
   0xc   : > { %8383 = vmatprep.subr.bf16.mxu0 %v9885_v1  ;;  %9723 = vmatprep.subr.bf16.mxu1 %v9885_v1  ;;  %s7981_s9 = sshll.u32 %s12800_s25, 9  ;;  %v9745_v4 = vld [vmem:[%s12792_s1 + $0x20] sm:$0xff]   ;;  %vm374_vm1 = vcmask 523264   ;;  %v9746_v11 = vld [vmem:[%s12792_s1 + $0x18] sm:$0xff]   ;;  %v9747_v13 = vld [vmem:[%s12792_s1 + $0x10] sm:$0xff]   ;;  %vm280_vm2 = vcmask 254976  }
   0xd   : > { %8384 = vmatpush3.bf16.msra.mxu0 %v9742_v0  ;;  %9727 = vmatpush3.bf16.msra.mxu1 %v9742_v0  ;;  %s9960_s12 = scalar_lea.vmem %s12791_s0, %s7981_s9  ;;  %v9751_v12 = vld [vmem:[%s12792_s1 + $0x58] sm:$0xff]   ;;  %v9752_v18 = vld [vmem:[%s12792_s1 + $0x50] sm:$0xff]   ;;  %v9748_v21 = vld [vmem:[%s12792_s1 + $0x8] sm:$0xff]   ;;  %281 = vst.msk [vmem:[#allocation2 + $0x6e] sm:$0x3] %vm280_vm2, %v9885_v1  ;;  %vm1012_vm3 = vcmask 261120  }
   0xe   : > { %8385 = vmatprep.subr.bf16.mxu0 %v9885_v1  ;;  %9724 = vmatprep.subr.bf16.mxu1 %v9885_v1  ;;  %v7184_v5 = vld [vmem:[%s9960_s12 + $0x80] sm:$0xff]  ;;  %v7185_v6 = vld [vmem:[%s9960_s12 + $0x88] sm:$0xff]  ;;  %v7194_v7 = vld [vmem:[%s9960_s12 + $0xd0] sm:$0xff]  ;;  %283 = vst.msk [vmem:[#allocation2 + $0xde] sm:$0x3] %vm280_vm2, %v9885_v1  ;;  %vm1026_vm4 = vcmask 259072  }
   0xf   : > { %8391 = vmatprep.mubr.msk.bf16.mxu0 %vm9886_vm0, %v9885_v1  ;;  %8411 = vmatprep.mubr.msk.bf16.mxu1 %vm9886_vm0, %v9885_v1  ;;  %v7195_v8 = vld [vmem:[%s9960_s12 + $0xd8] sm:$0xff]  ;;  %v9971_v9 = vpack.c.bf16 %v7185_v6, %v7184_v5  ;;  %v7186_v14 = vld [vmem:[%s9960_s12 + $0x90] sm:$0xff]  ;;  %v7196_v16 = vld [vmem:[%s9960_s12 + $0xe0] sm:$0xff]  ;;  %285 = vst.msk [vmem:[#allocation2 + $0x14e] sm:$0x3] %vm280_vm2, %v9885_v1  ;;  %vm288_vm5 = vcmask 520192  }
  0x10   : > { %v9973_v10 = vpack.c.bf16 %v7195_v8, %v7194_v7  ;;  %v7187_v15 = vld [vmem:[%s9960_s12 + $0x98] sm:$0xff]  ;;  %v7197_v17 = vld [vmem:[%s9960_s12 + $0xe8] sm:$0x3f]  ;;  %v9749_v22 = vld [vmem:[%s12792_s1] sm:$0xff]   ;;  %287 = vst.msk [vmem:[#allocation2 + $0x1be] sm:$0x3] %vm280_vm2, %v9885_v1 }
  0x11   : > { %8386 = vmatpush3.bf16.msra.mxu0 %v9743_v2  ;;  %9728 = vmatpush3.bf16.msra.mxu1 %v9743_v2  ;;  %v10002_v19 = vpack.c.bf16 %v7187_v15, %v7186_v14  ;;  %v340_v20 = vpack.c.bf16 %v7197_v17, %v7196_v16  ;;  %v7188_v23 = vld [vmem:[%s9960_s12 + $0xa0] sm:$0xff]  ;;  %v7189_v24 = vld [vmem:[%s9960_s12 + $0xa8] sm:$0xff]  ;;  %v9750_v30 = vld [vmem:[%s12792_s1 + $0x78] sm:$0xff]   ;;  %289 = vst.msk [vmem:[#allocation3 + $0x63] sm:$0x1f] %vm288_vm5, %v9885_v1  ;;  %vm5777_vm6 = vcmask 518144  }
  0x12   : > { %8387 = vmatprep.subr.bf16.mxu0 %v9885_v1  ;;  %9725 = vmatprep.subr.bf16.mxu1 %v9885_v1  ;;  %v9754_v25 = vld [vmem:[%s12792_s1 + $0x48] sm:$0xff]   ;;  %v290_v26 = vld [vmem:[%s9960_s12] sm:$0xff]  ;;  %v10028_v28 = vpack.c.bf16 %v7189_v24, %v7188_v23  ;;  %v7190_v31 = vld [vmem:[%s9960_s12 + $0xb0] sm:$0xff]  ;;  %s9731_s14 = smul.u32 56, %s12800_s25  ;;  %vm7099_vm7 = vcmask 522240   ;;  %vm7101_vm8 = vcmask 523267  }
  0x13   : > { %v291_v27 = vld [vmem:[%s9960_s12 + $0x8] sm:$0xff]  ;;  %v7191_v32 = vld [vmem:[%s9960_s12 + $0xb8] sm:$0xff]  ;;  %v9755_v33 = vld [vmem:[%s12792_s1 + $0x40] sm:$0xff]   ;;  %vm7103_vm9 = vcmask 517120   ;;  %vm7105_vm10 = vcmask 523270   ;;  %vm7108_vm11 = vcmask 523265  }
  0x14   : > { %v304_v29 = vpack.c.bf16 %v291_v27, %v290_v26  ;;  %v292_v34 = vld [vmem:[%s9960_s12 + $0x10] sm:$0xff]  ;;  %v293_v35 = vld [vmem:[%s9960_s12 + $0x18] sm:$0xff]  ;;  %v10053_v37 = vpack.c.bf16 %v7191_v32, %v7190_v31  ;;  %v9756_v39 = vld [vmem:[%s12792_s1 + $0x68] sm:$0xff]   ;;  %s12747_s19 = scalar_lea.vmem %s12798_s7, %s9731_s14  ;;  %vm7110_vm12 = vcmask 523268   ;;  %vm7113_vm13 = vcmask 523271  }
  0x15   : > { %8388 = vmatpush3.bf16.msra.mxu0 %v9744_v3  ;;  %9729 = vmatpush3.bf16.msra.mxu1 %v9744_v3  ;;  %v9753_v36 = vld [vmem:[%s12792_s1 + $0x70] sm:$0xff]   ;;  %v305_v38 = vpack.c.bf16 %v293_v35, %v292_v34  ;;  %v7192_v40 = vld [vmem:[%s9960_s12 + $0xc0] sm:$0xff]  ;;  %v7193_v41 = vld [vmem:[%s9960_s12 + $0xc8] sm:$0xff]  ;;  %vm7115_vm14 = vcmask 521216   ;;  %vm7117_vm15 = vcmask 523266  }
  0x16   : > { %8389 = vmatprep.subr.bf16.mxu0 %v9885_v1  ;;  %9726 = vmatprep.subr.bf16.mxu1 %v9885_v1  ;;  %v294_v42 = vld [vmem:[%s9960_s12 + $0x20] sm:$0xff]  ;;  %v295_v43 = vld [vmem:[%s9960_s12 + $0x28] sm:$0xff]  ;;  %v10075_v45 = vpack.c.bf16 %v7193_v41, %v7192_v40  ;;  %v296_v47 = vld [vmem:[%s9960_s12 + $0x30] sm:$0xff] }
  0x17   : > { %v9757_v44 = vld [vmem:[%s12792_s1 + $0x60] sm:$0xff]   ;;  %v306_v46 = vpack.c.bf16 %v295_v43, %v294_v42  ;;  %v297_v48 = vld [vmem:[%s9960_s12 + $0x38] sm:$0xff]  ;;  %v7229_v50 = vld [vmem:[%s9960_s12 + $0x108] sm:$0xff] }
  0x18   : > { %v7228_v49 = vld [vmem:[%s9960_s12 + $0x100] sm:$0xff]  ;;  %v307_v51 = vpack.c.bf16 %v297_v48, %v296_v47  ;;  %v9758_v53 = vld [vmem:[%s12792_s1 + $0x38] sm:$0xff]   ;;  %v299_v55 = vld [vmem:[%s9960_s12 + $0x48] sm:$0xff] }
  0x19   : > { %8390 = vmatpush3.bf16.msra.mxu0 %v9745_v4  ;;  %9730 = vmatpush3.bf16.msra.mxu1 %v9745_v4  ;;  %v10089_v52 = vpack.c.bf16 %v7229_v50, %v7228_v49  ;;  %v298_v54 = vld [vmem:[%s9960_s12 + $0x40] sm:$0xff]  ;;  %v7230_v56 = vld [vmem:[%s9960_s12 + $0x110] sm:$0xff]  ;;  %v7231_v57 = vld [vmem:[%s9960_s12 + $0x118] sm:$0xff] }
  0x1a   : > { %8419 = vmatprep.subr.bf16.mxu1 %v9885_v1  ;;  %8455 = vmatprep.subr.bf16.mxu0 %v9885_v1  ;;  %v9760_v58 = vld [vmem:[%s12792_s1 + $0x30] sm:$0xff]   ;;  %v308_v59 = vpack.c.bf16 %v299_v55, %v298_v54  ;;  %v10109_v60 = vpack.c.bf16 %v7231_v57, %v7230_v56  ;;  %v9762_v61 = vld [vmem:[%s12792_s1 + $0x28] sm:$0xff]   ;;  %v301_v63 = vld [vmem:[%s9960_s12 + $0x58] sm:$0xff] }
  0x1b   : > { %v300_v62 = vld [vmem:[%s9960_s12 + $0x50] sm:$0xff]  ;;  %v7232_v0 = vld [vmem:[%s9960_s12 + $0x120] sm:$0xff]  ;;  %v7233_v2 = vld [vmem:[%s9960_s12 + $0x128] sm:$0xff] }
  0x1c   : > { %8392 = vmatmul.mubr.msk.bf16.vlgmr.msra.gmra.mxu0 %vm374_vm1, %v9971_v9  ;;  %8412 = vmatmul.mubr.msk.bf16.vlgmr.msra.gmra.mxu1 %vm374_vm1, %v9973_v10  ;;  %v9763_v3 = vld [vmem:[%s12792_s1 + $0x20] sm:$0xff]   ;;  %v309_v4 = vpack.c.bf16 %v301_v63, %v300_v62  ;;  %v10130_v5 = vpack.c.bf16 %v7233_v2, %v7232_v0  ;;  %v303_v7 = vld [vmem:[%s9960_s12 + $0x68] sm:$0x3f]  ;;  %v7234_v8 = vld [vmem:[%s9960_s12 + $0x130] sm:$0xff] }
  0x1d   : > { %8420 = vmatpush3.bf16.msra.mxu1 %v9746_v11  ;;  %8395 = vmatprep.mubr.msk.bf16.mxu0 %vm9886_vm0, %v9885_v1  ;;  %v302_v6 = vld [vmem:[%s9960_s12 + $0x60] sm:$0xff]  ;;  %v7235_v11 = vld [vmem:[%s9960_s12 + $0x138] sm:$0xff]  ;;  %v7237_v15 = vld [vmem:[%s9960_s12 + $0x148] sm:$0xff] }
  0x1e   : > { %8421 = vmatprep.subr.bf16.mxu1 %v9885_v1  ;;  %8415 = vmatprep.mubr.msk.bf16.mxu1 %vm9886_vm0, %v9885_v1  ;;  %v7236_v14 = vld [vmem:[%s9960_s12 + $0x140] sm:$0xff]  ;;  %v7262_v17 = vld [vmem:[%s9960_s12 + $0x188] sm:$0xff]  ;;  %v7239_v23 = vld [vmem:[%s9960_s12 + $0x158] sm:$0xff] }
  0x1f   : > { %8456 = vmatpush3.bf16.msra.mxu0 %v9751_v12  ;;  %v310_v12 = vpack.c.bf16 %v303_v7, %v302_v6  ;;  %v7261_v16 = vld [vmem:[%s9960_s12 + $0x180] sm:$0xff]  ;;  %v7263_v24 = vld [vmem:[%s9960_s12 + $0x190] sm:$0xff]  ;;  %v7241_v32 = vld [vmem:[%s9960_s12 + $0x168] sm:$0x3f] }
  0x20   : > { %8457 = vmatprep.subr.bf16.mxu0 %v9885_v1  ;;  %v9761_v26 = vld [vmem:[%s12792_s1 + $0x10] sm:$0xff]   ;;  %v7240_v31 = vld [vmem:[%s9960_s12 + $0x160] sm:$0xff]  ;;  %v7266_v34 = vld [vmem:[%s9960_s12 + $0x1a8] sm:$0xff] }
  0x21   : > { %8422 = vmatpush3.bf16.msra.mxu1 %v9747_v13  ;;  %v10144_v13 = vpack.c.bf16 %v7235_v11, %v7234_v8  ;;  %v9765_v35 = vld [vmem:[%s12792_s1] sm:$0xff]   ;;  %v7268_v40 = vld [vmem:[%s9960_s12 + $0x1b8] sm:$0xff]  ;;  %v1058_v42 = vld [vmem:[%s9960_s12 + $0x9] sm:$0xff] }
  0x22   : > { %8423 = vmatprep.subr.bf16.mxu1 %v9885_v1  ;;  %v1057_v41 = vld [vmem:[%s9960_s12 + $0x1] sm:$0xff]  ;;  %v1059_v49 = vld [vmem:[%s9960_s12 + $0x11] sm:$0xff]  ;;  %v1060_v50 = vld [vmem:[%s9960_s12 + $0x19] sm:$0xff] }
  0x23   : > { %8458 = vmatpush3.bf16.msra.mxu0 %v9752_v18  ;;  %v638_v18 = vpack.c.bf16 %v7237_v15, %v7236_v14  ;;  %v7269_v47 = vld [vmem:[%s9960_s12 + $0x1c0] sm:$0xff]  ;;  %v7270_v48 = vld [vmem:[%s9960_s12 + $0x1c8] sm:$0xff]  ;;  %v1072_v54 = vpack.c.bf16 %v1060_v50, %v1059_v49  ;;  %v7271_v56 = vld [vmem:[%s9960_s12 + $0x1d0] sm:$0xff] }
  0x24   : > { %8396 = vmatmul.mubr.msk.bf16.gmra.mxu0 %vm374_vm1, %v10002_v19  ;;  %8416 = vmatmul.mubr.msk.bf16.gmra.mxu1 %vm374_vm1, %v340_v20  ;;  %v10157_v20 = vpack.c.bf16 %v7262_v17, %v7261_v16  ;;  %v9770_v55 = vld [vmem:[%s12792_s1 + $0x48] sm:$0xff]   ;;  %v7272_v57 = vld [vmem:[%s9960_s12 + $0x1d8] sm:$0xff]  ;;  %v10256_v0 = vld [vmem:[%s9960_s12 + $0x1e0] sm:$0xff] }
  0x25   : > { %8424 = vmatpush3.bf16.msra.mxu1 %v9748_v21  ;;  %8399 = vmatprep.mubr.msk.bf16.mxu0 %vm9886_vm0, %v9885_v1  ;;  %v9759_v21 = vld [vmem:[%s12792_s1 + $0x18] sm:$0xff]   ;;  %v10253_v62 = vpack.c.bf16 %v7272_v57, %v7271_v56  ;;  %v7274_v2 = vld [vmem:[%s9960_s12 + $0x1e8] sm:$0x3f]  ;;  %v9769_v17 = vld [vmem:[%s12792_s1 + $0x70] sm:$0xff]  }
  0x26   : > { %8425 = vmatprep.subr.bf16.mxu1 %v9885_v1  ;;  %8427 = vmatprep.mubr.msk.bf16.mxu1 %vm9886_vm0, %v9885_v1  ;;  %v819_v6 = vpack.c.bf16 %v7274_v2, %v10256_v0  ;;  %v1065_v8 = vld [vmem:[%s9960_s12 + $0x41] sm:$0xff]  ;;  %v1066_v11 = vld [vmem:[%s9960_s12 + $0x49] sm:$0xff]  ;;  %v9767_v14 = vld [vmem:[%s12792_s1 + $0x78] sm:$0xff]  }
  0x27   : > { %8459 = vmatprep.subr.bf16.mxu0 %v9885_v1  ;;  %v1067_v15 = vld [vmem:[%s9960_s12 + $0x51] sm:$0xff]  ;;  %v1068_v16 = vld [vmem:[%s9960_s12 + $0x59] sm:$0xff] }
  0x28   : > { %8460 = vmatpush3.bf16.msra.mxu0 %v9754_v25  ;;  %v7264_v25 = vld [vmem:[%s9960_s12 + $0x198] sm:$0xff]  ;;  %v9781_v49 = vld [vmem:[%s12792_s1] sm:$0xff]  }
  0x29   : > { %8426 = vmatpush3.bf16.msra.mxu1 %v9749_v22  ;;  %8461 = vmatprep.subr.bf16.mxu0 %v9885_v1  ;;  %v7238_v22 = vld [vmem:[%s9960_s12 + $0x150] sm:$0xff] }
  0x2a   : > { %8491 = vmatprep.subr.bf16.mxu1 %v9885_v1  ;;  %v639_v27 = vpack.c.bf16 %v7239_v23, %v7238_v22  ;;  %v1070_v22 = vld [vmem:[%s9960_s12 + $0x69] sm:$0x3f]  ;;  %v9773_v23 = vld [vmem:[%s12792_s1 + $0x60] sm:$0xff]  }
  0x2c   : > { %8400 = vmatmul.mubr.msk.bf16.gmra.mxu0 %vm374_vm1, %v10028_v28  ;;  %8428 = vmatmul.mubr.msk.bf16.vlgmr.msra.gmra.mxu1 %vm374_vm1, %v304_v29  ;;  %v10177_v29 = vpack.c.bf16 %v7264_v25, %v7263_v24  ;;  %v9779_v25 = vld [vmem:[%s12792_s1 + $0x20] sm:$0xff]  }
  0x2d   : > { %8492 = vmatpush3.bf16.msra.mxu1 %v9750_v30  ;;  %8403 = vmatprep.mubr.msk.bf16.mxu0 %vm9886_vm0, %v9885_v1  ;;  %v9764_v30 = vld [vmem:[%s12792_s1 + $0x8] sm:$0xff]  }
  0x2e   : > { %8431 = vmatprep.mubr.msk.bf16.mxu1 %vm9886_vm0, %v9885_v1  ;;  %8493 = vmatprep.subr.bf16.mxu1 %v9885_v1 }
  0x2f   : > { %8462 = vmatpush3.bf16.msra.mxu0 %v9755_v33  ;;  %v7265_v33 = vld [vmem:[%s9960_s12 + $0x1a0] sm:$0xff] }
  0x30   : > { %8527 = vmatprep.subr.bf16.mxu0 %v9885_v1 }
  0x31   : > { %8494 = vmatpush3.bf16.msra.mxu1 %v9753_v36  ;;  %v640_v36 = vpack.c.bf16 %v7241_v32, %v7240_v31  ;;  %v9775_v32 = vld [vmem:[%s12792_s1 + $0x18] sm:$0xff]  }
  0x32   : > { %8495 = vmatprep.subr.bf16.mxu1 %v9885_v1 }
  0x34   : > { %8404 = vmatmul.mubr.msk.bf16.gmra.mxu0 %vm374_vm1, %v10053_v37  ;;  %8432 = vmatmul.mubr.msk.bf16.gmra.mxu1 %vm374_vm1, %v305_v38  ;;  %v10198_v38 = vpack.c.bf16 %v7266_v34, %v7265_v33  ;;  %v7374_v33 = vld [vmem:[%s9960_s12 + $0x111] sm:$0xff]  ;;  %v7375_v34 = vld [vmem:[%s9960_s12 + $0x119] sm:$0xff] }
  0x35   : > { %8407 = vmatprep.mubr.msk.bf16.mxu0 %vm9886_vm0, %v9885_v1  ;;  %8435 = vmatprep.mubr.msk.bf16.mxu1 %vm9886_vm0, %v9885_v1 }
  0x36   : > { %8496 = vmatpush3.bf16.msra.mxu1 %v9756_v39  ;;  %v7267_v39 = vld [vmem:[%s9960_s12 + $0x1b0] sm:$0xff] }
  0x37   : > { %8497 = vmatprep.subr.bf16.mxu1 %v9885_v1  ;;  %v10212_v43 = vpack.c.bf16 %v7268_v40, %v7267_v39  ;;  %v9780_v39 = vld [vmem:[%s12792_s1 + $0x8] sm:$0xff]  }
  0x3a   : > { %8498 = vmatpush3.bf16.msra.mxu1 %v9757_v44  ;;  %v1071_v44 = vpack.c.bf16 %v1058_v42, %v1057_v41  ;;  %v7352_v42 = vld [vmem:[%s9960_s12 + $0x1e8] sm:$0x3f] }
  0x3b   : > { %8563 = vmatprep.subr.bf16.mxu1 %v9885_v1 }
  0x3c   : > { %8408 = vmatmul.mubr.msk.bf16.gmra.mxu0 %vm374_vm1, %v10075_v45  ;;  %8436 = vmatmul.mubr.msk.bf16.gmra.mxu1 %vm374_vm1, %v306_v46  ;;  %v9766_v46 = vld [vmem:[%s12792_s1 + $0x58] sm:$0xff]  }
  0x3d   : > { %8439 = vmatprep.mubr.msk.bf16.mxu1 %vm9886_vm0, %v9885_v1  ;;  %8463 = vmatprep.mubr.msk.bf16.mxu0 %vm9886_vm0, %v9885_v1 }
  0x44   : > { %8440 = vmatmul.mubr.msk.bf16.gmra.mxu1 %vm374_vm1, %v307_v51  ;;  %8464 = vmatmul.mubr.msk.bf16.vlgmr.msra.gmra.mxu0 %vm374_vm1, %v10089_v52  ;;  %v9768_v51 = vld [vmem:[%s12792_s1 + $0x50] sm:$0xff]  }
  0x45   : > { %8443 = vmatprep.mubr.msk.bf16.mxu1 %vm9886_vm0, %v9885_v1  ;;  %8467 = vmatprep.mubr.msk.bf16.mxu0 %vm9886_vm0, %v9885_v1 }
  0x46   : > { %8528 = vmatpush3.bf16.msra.mxu0 %v9758_v53  ;;  %v10232_v53 = vpack.c.bf16 %v7270_v48, %v7269_v47 }
  0x47   : > { %8529 = vmatprep.subr.bf16.mxu0 %v9885_v1 }
  0x4a   : > { %8530 = vmatpush3.bf16.msra.mxu0 %v9760_v58  ;;  %v1061_v58 = vld [vmem:[%s9960_s12 + $0x21] sm:$0xff] }
  0x4b   : > { %8531 = vmatprep.subr.bf16.mxu0 %v9885_v1 }
  0x4c   : > { %8444 = vmatmul.mubr.msk.bf16.gmra.mxu1 %vm374_vm1, %v308_v59  ;;  %8468 = vmatmul.mubr.msk.bf16.gmra.mxu0 %vm374_vm1, %v10109_v60  ;;  %v1062_v59 = vld [vmem:[%s9960_s12 + $0x29] sm:$0xff] }
  0x4d   : > { %8447 = vmatprep.mubr.msk.bf16.mxu1 %vm9886_vm0, %v9885_v1  ;;  %8471 = vmatprep.mubr.msk.bf16.mxu0 %vm9886_vm0, %v9885_v1  ;;  %v1073_v63 = vpack.c.bf16 %v1062_v59, %v1061_v58 }
  0x4e   : > { %8532 = vmatpush3.bf16.msra.mxu0 %v9762_v61  ;;  %v9771_v61 = vld [vmem:[%s12792_s1 + $0x40] sm:$0xff]  }
  0x4f   : > { %8533 = vmatprep.subr.bf16.mxu0 %v9885_v1 }
  0x52   : > { %8534 = vmatpush3.bf16.msra.mxu0 %v9763_v3  ;;  %v1063_v3 = vld [vmem:[%s9960_s12 + $0x31] sm:$0xff] }
  0x53   : > { %8599 = vmatprep.subr.bf16.mxu0 %v9885_v1 }
  0x54   : > { %8448 = vmatmul.mubr.msk.bf16.gmra.mxu1 %vm374_vm1, %v309_v4  ;;  %8472 = vmatmul.mubr.msk.bf16.gmra.mxu0 %vm374_vm1, %v10130_v5  ;;  %v1064_v4 = vld [vmem:[%s9960_s12 + $0x39] sm:$0xff] }
  0x55   : > { %8451 = vmatprep.mubr.msk.bf16.mxu1 %vm9886_vm0, %v9885_v1  ;;  %8475 = vmatprep.mubr.msk.bf16.mxu0 %vm9886_vm0, %v9885_v1  ;;  %v1074_v7 = vpack.c.bf16 %v1064_v4, %v1063_v3 }
  0x5c   : > { %8452 = vmatmul.mubr.msk.bf16.gmra.mxu1 %vm374_vm1, %v310_v12  ;;  %8476 = vmatmul.mubr.msk.bf16.gmra.mxu0 %vm374_vm1, %v10144_v13  ;;  %v1075_v12 = vpack.c.bf16 %v1066_v11, %v1065_v8 }
  0x5d   : > { %8479 = vmatprep.mubr.msk.bf16.mxu0 %vm9886_vm0, %v9885_v1  ;;  %8499 = vmatprep.mubr.msk.bf16.mxu1 %vm9886_vm0, %v9885_v1 }
  0x64   : > { %8480 = vmatmul.mubr.msk.bf16.gmra.mxu0 %vm374_vm1, %v638_v18  ;;  %8500 = vmatmul.mubr.msk.bf16.vlgmr.msra.gmra.mxu1 %vm374_vm1, %v10157_v20  ;;  %v1076_v18 = vpack.c.bf16 %v1068_v16, %v1067_v15  ;;  %v7380_v16 = vld [vmem:[%s9960_s12 + $0x141] sm:$0xff] }
  0x65   : > { %8564 = vmatpush3.bf16.msra.mxu1 %v9759_v21  ;;  %8483 = vmatprep.mubr.msk.bf16.mxu0 %vm9886_vm0, %v9885_v1  ;;  %v1069_v21 = vld [vmem:[%s9960_s12 + $0x61] sm:$0xff] }
  0x66   : > { %8503 = vmatprep.mubr.msk.bf16.mxu1 %vm9886_vm0, %v9885_v1  ;;  %8565 = vmatprep.subr.bf16.mxu1 %v9885_v1  ;;  %v1077_v24 = vpack.c.bf16 %v1070_v22, %v1069_v21  ;;  %v9784_v21 = vld [vmem:[%s12792_s1 + $0x50] sm:$0xff]  }
  0x69   : > { %8566 = vmatpush3.bf16.msra.mxu1 %v9761_v26  ;;  %v9874_v26 = vld [vmem:[%s9960_s12 + $0xe0] sm:$0xff] }
  0x6a   : > { %8567 = vmatprep.subr.bf16.mxu1 %v9885_v1 }
  0x6c   : > { %8484 = vmatmul.mubr.msk.bf16.gmra.mxu0 %vm374_vm1, %v639_v27  ;;  %8504 = vmatmul.mubr.msk.bf16.gmra.mxu1 %vm374_vm1, %v10177_v29 }
  0x6d   : > { %8487 = vmatprep.mubr.msk.bf16.mxu0 %vm9886_vm0, %v9885_v1  ;;  %8507 = vmatprep.mubr.msk.bf16.mxu1 %vm9886_vm0, %v9885_v1 }
  0x6e   : > { %8568 = vmatpush3.bf16.msra.mxu1 %v9764_v30  ;;  %v7373_v30 = vld [vmem:[%s9960_s12 + $0x109] sm:$0xff] }
  0x6f   : > { %8569 = vmatprep.subr.bf16.mxu1 %v9885_v1 }
  0x72   : > { %8570 = vmatpush3.bf16.msra.mxu1 %v9765_v35  ;;  %v9777_v35 = vld [vmem:[%s12792_s1 + $0x10] sm:$0xff]  }
  0x73   : > { %8635 = vmatprep.subr.bf16.mxu1 %v9885_v1 }
  0x74   : > { %8488 = vmatmul.mubr.msk.bf16.gmra.mxu0 %vm374_vm1, %v640_v36  ;;  %8508 = vmatmul.mubr.msk.bf16.gmra.mxu1 %vm374_vm1, %v10198_v38  ;;  %v10389_v36 = vpack.c.bf16 %v7375_v34, %v7374_v33 }
  0x75   : > { %8511 = vmatprep.mubr.msk.bf16.mxu1 %vm9886_vm0, %v9885_v1  ;;  %8535 = vmatprep.mubr.msk.bf16.mxu0 %vm9886_vm0, %v9885_v1 }
  0x7c   : > { %8512 = vmatmul.mubr.msk.bf16.gmra.mxu1 %vm374_vm1, %v10212_v43  ;;  %8536 = vmatmul.mubr.msk.bf16.vlgmr.msra.gmra.mxu0 %vm374_vm1, %v1071_v44  ;;  %v7376_v44 = vld [vmem:[%s9960_s12 + $0x121] sm:$0xff] }
  0x7d   : > { %8515 = vmatprep.mubr.msk.bf16.mxu1 %vm9886_vm0, %v9885_v1  ;;  %8539 = vmatprep.mubr.msk.bf16.mxu0 %vm9886_vm0, %v9885_v1 }
  0x7e   : > { %8600 = vmatpush3.bf16.msra.mxu0 %v9766_v46  ;;  %v7377_v46 = vld [vmem:[%s9960_s12 + $0x129] sm:$0xff] }
  0x7f   : > { %8601 = vmatprep.subr.bf16.mxu0 %v9885_v1 }
  0x82   : > { %8602 = vmatpush3.bf16.msra.mxu0 %v9768_v51 }
  0x83   : > { %8603 = vmatprep.subr.bf16.mxu0 %v9885_v1 }
  0x84   : > { %8516 = vmatmul.mubr.msk.bf16.gmra.mxu1 %vm374_vm1, %v10232_v53  ;;  %8540 = vmatmul.mubr.msk.bf16.gmra.mxu0 %vm374_vm1, %v1072_v54  ;;  %v1374_v54 = vpack.c.bf16 %v7352_v42, %v10256_v0 }
  0x85   : > { %8519 = vmatprep.mubr.msk.bf16.mxu1 %vm9886_vm0, %v9885_v1  ;;  %8543 = vmatprep.mubr.msk.bf16.mxu0 %vm9886_vm0, %v9885_v1 }
  0x86   : > { %8604 = vmatpush3.bf16.msra.mxu0 %v9770_v55  ;;  %v10419_v55 = vpack.c.bf16 %v7377_v46, %v7376_v44  ;;  %v10514_v44 = vld [vmem:[%s9960_s12 + $0x161] sm:$0xff]  ;;  %v7385_v46 = vld [vmem:[%s9960_s12 + $0x169] sm:$0x3f] }
  0x87   : > { %8605 = vmatprep.subr.bf16.mxu0 %v9885_v1 }
  0x8a   : > { %8606 = vmatpush3.bf16.msra.mxu0 %v9771_v61  ;;  %v7378_v61 = vld [vmem:[%s9960_s12 + $0x131] sm:$0xff] }
  0x8b   : > { %8671 = vmatprep.subr.bf16.mxu0 %v9885_v1 }
  0x8c   : > { %8520 = vmatmul.mubr.msk.bf16.gmra.mxu1 %vm374_vm1, %v10253_v62  ;;  %8544 = vmatmul.mubr.msk.bf16.gmra.mxu0 %vm374_vm1, %v1073_v63  ;;  %v7379_v63 = vld [vmem:[%s9960_s12 + $0x139] sm:$0xff] }
  0x8d   : > { %8523 = vmatprep.mubr.msk.bf16.mxu1 %vm9886_vm0, %v9885_v1  ;;  %8547 = vmatprep.mubr.msk.bf16.mxu0 %vm9886_vm0, %v9885_v1 }
  0x94   : > { %8524 = vmatmul.mubr.msk.bf16.gmra.mxu1 %vm374_vm1, %v819_v6  ;;  %8548 = vmatmul.mubr.msk.bf16.gmra.mxu0 %vm374_vm1, %v1074_v7  ;;  %v10443_v7 = vpack.c.bf16 %v7379_v63, %v7378_v61 }
  0x95   : > { %8551 = vmatprep.mubr.msk.bf16.mxu0 %vm9886_vm0, %v9885_v1  ;;  %8571 = vmatprep.mubr.msk.bf16.mxu1 %vm9886_vm0, %v9885_v1 }
  0x9c   : > { %8552 = vmatmul.mubr.msk.bf16.gmra.mxu0 %vm374_vm1, %v1075_v12  ;;  %8572 = vmatmul.mubr.msk.bf16.vlgmr.msra.gmra.mxu1 %vm374_vm1, %v9971_v9  ;;  %v9772_v9 = vld [vmem:[%s12792_s1 + $0x68] sm:$0xff]   ;;  %v9782_v12 = vld [vmem:[%s12792_s1 + $0x58] sm:$0xff]  }
  0x9d   : > { %8636 = vmatpush3.bf16.msra.mxu1 %v9767_v14  ;;  %8555 = vmatprep.mubr.msk.bf16.mxu0 %vm9886_vm0, %v9885_v1 }
  0x9e   : > { %8575 = vmatprep.mubr.msk.bf16.mxu1 %vm9886_vm0, %v9885_v1  ;;  %8637 = vmatprep.subr.bf16.mxu1 %v9885_v1 }
  0xa1   : > { %8638 = vmatpush3.bf16.msra.mxu1 %v9769_v17  ;;  %v7381_v17 = vld [vmem:[%s9960_s12 + $0x149] sm:$0xff] }
  0xa2   : > { %8639 = vmatprep.subr.bf16.mxu1 %v9885_v1 }
  0xa4   : > { %8556 = vmatmul.mubr.msk.bf16.gmra.mxu0 %vm374_vm1, %v1076_v18  ;;  %8576 = vmatmul.mubr.msk.bf16.gmra.mxu1 %vm374_vm1, %v10002_v19  ;;  %v9774_v19 = vld [vmem:[%s12792_s1 + $0x38] sm:$0xff]  }
  0xa5   : > { %8559 = vmatprep.mubr.msk.bf16.mxu0 %vm9886_vm0, %v9885_v1  ;;  %8579 = vmatprep.mubr.msk.bf16.mxu1 %vm9886_vm0, %v9885_v1 }
  0xa6   : > { %8640 = vmatpush3.bf16.msra.mxu1 %v9772_v9 }
  0xa7   : > { %8641 = vmatprep.subr.bf16.mxu1 %v9885_v1 }
  0xaa   : > { %8642 = vmatpush3.bf16.msra.mxu1 %v9773_v23  ;;  %v10470_v23 = vpack.c.bf16 %v7381_v17, %v7380_v16 }
  0xab   : > { %8707 = vmatprep.subr.bf16.mxu1 %v9885_v1 }
  0xac   : > { %8560 = vmatmul.mubr.msk.bf16.gmra.mxu0 %vm374_vm1, %v1077_v24  ;;  %8580 = vmatmul.mubr.msk.bf16.gmra.mxu1 %vm374_vm1, %v10028_v28  ;;  %v9776_v28 = vld [vmem:[%s12792_s1 + $0x30] sm:$0xff]  }
  0xad   : > { %8583 = vmatprep.mubr.msk.bf16.mxu1 %vm9886_vm0, %v9885_v1  ;;  %8607 = vmatprep.mubr.msk.bf16.mxu0 %vm9886_vm0, %v9885_v1 }
  0xb4   : > { %8584 = vmatmul.mubr.msk.bf16.gmra.mxu1 %vm374_vm1, %v10053_v37  ;;  %8608 = vmatmul.mubr.msk.bf16.vlgmr.msra.gmra.mxu0 %vm374_vm1, %v10157_v20  ;;  %v9778_v37 = vld [vmem:[%s12792_s1 + $0x28] sm:$0xff]  }
  0xb5   : > { %8587 = vmatprep.mubr.msk.bf16.mxu1 %vm9886_vm0, %v9885_v1  ;;  %8611 = vmatprep.mubr.msk.bf16.mxu0 %vm9886_vm0, %v9885_v1 }
  0xb6   : > { %8672 = vmatpush3.bf16.msra.mxu0 %v9774_v19 }
  0xb7   : > { %8673 = vmatprep.subr.bf16.mxu0 %v9885_v1 }
  0xba   : > { %8674 = vmatpush3.bf16.msra.mxu0 %v9776_v28  ;;  %v9786_v28 = vld [vmem:[%s12792_s1 + $0x48] sm:$0xff]  }
  0xbb   : > { %8675 = vmatprep.subr.bf16.mxu0 %v9885_v1 }
  0xbc   : > { %8588 = vmatmul.mubr.msk.bf16.gmra.mxu1 %vm374_vm1, %v10075_v45  ;;  %8612 = vmatmul.mubr.msk.bf16.gmra.mxu0 %vm374_vm1, %v10177_v29  ;;  %v7308_v45 = vld [vmem:[%s9960_s12 + $0xe8] sm:$0x3f] }
  0xbd   : > { %8591 = vmatprep.mubr.msk.bf16.mxu1 %vm9886_vm0, %v9885_v1  ;;  %8615 = vmatprep.mubr.msk.bf16.mxu0 %vm9886_vm0, %v9885_v1  ;;  %v1048_v27 = vpack.c.bf16 %v7308_v45, %v9874_v26  ;;  %v7382_v45 = vld [vmem:[%s9960_s12 + $0x151] sm:$0xff]  ;;  %v7383_v26 = vld [vmem:[%s9960_s12 + $0x159] sm:$0xff] }
  0xbe   : > { %8676 = vmatpush3.bf16.msra.mxu0 %v9778_v37  ;;  %v10498_v33 = vpack.c.bf16 %v7383_v26, %v7382_v45  ;;  %v9788_v45 = vld [vmem:[%s12792_s1 + $0x68] sm:$0xff]  }
  0xbf   : > { %8677 = vmatprep.subr.bf16.mxu0 %v9885_v1 }
  0xc2   : > { %8678 = vmatpush3.bf16.msra.mxu0 %v9779_v25 }
  0xc3   : > { %8743 = vmatprep.subr.bf16.mxu0 %v9885_v1 }
  0xc4   : > { %8592 = vmatmul.mubr.msk.bf16.gmra.mxu1 %vm374_vm1, %v9973_v10  ;;  %8616 = vmatmul.mubr.msk.bf16.gmra.mxu0 %vm374_vm1, %v10198_v38  ;;  %v7372_v10 = vld [vmem:[%s9960_s12 + $0x101] sm:$0xff] }
  0xc5   : > { %8595 = vmatprep.mubr.msk.bf16.mxu1 %vm9886_vm0, %v9885_v1  ;;  %8619 = vmatprep.mubr.msk.bf16.mxu0 %vm9886_vm0, %v9885_v1  ;;  %v10370_v31 = vpack.c.bf16 %v7373_v30, %v7372_v10  ;;  %v9787_v30 = vld [vmem:[%s12792_s1 + $0x40] sm:$0xff]  }
  0xcc   : > { %8596 = vmatmul.mubr.msk.bf16.gmra.mxu1 %vm374_vm1, %v1048_v27  ;;  %8620 = vmatmul.mubr.msk.bf16.gmra.mxu0 %vm374_vm1, %v10212_v43 }
  0xcd   : > { %8623 = vmatprep.mubr.msk.bf16.mxu0 %vm9886_vm0, %v9885_v1  ;;  %8643 = vmatprep.mubr.msk.bf16.mxu1 %vm9886_vm0, %v9885_v1 }
  0xd4   : > { %8624 = vmatmul.mubr.msk.bf16.gmra.mxu0 %vm374_vm1, %v10232_v53  ;;  %8644 = vmatmul.mubr.msk.bf16.vlgmr.msra.gmra.mxu1 %vm374_vm1, %v10370_v31 }
  0xd5   : > { %8708 = vmatpush3.bf16.msra.mxu1 %v9775_v32  ;;  %8627 = vmatprep.mubr.msk.bf16.mxu0 %vm9886_vm0, %v9885_v1 }
  0xd6   : > { %8647 = vmatprep.mubr.msk.bf16.mxu1 %vm9886_vm0, %v9885_v1  ;;  %8709 = vmatprep.subr.bf16.mxu1 %v9885_v1 }
  0xd9   : > { %8710 = vmatpush3.bf16.msra.mxu1 %v9777_v35 }
  0xda   : > { %8711 = vmatprep.subr.bf16.mxu1 %v9885_v1 }
  0xdc   : > { %v10395_v40 = vpop.f32.mrf.mxu0  ;;  %v10397_v41 = vpop.f32.mrf.mxu1  ;;  %8628 = vmatmul.mubr.msk.bf16.gmra.mxu0 %vm374_vm1, %v10253_v62  ;;  %8648 = vmatmul.mubr.msk.bf16.gmra.mxu1 %vm374_vm1, %v10389_v36 }
  0xdd   : > { %8631 = vmatprep.mubr.msk.bf16.mxu0 %vm9886_vm0, %v9885_v1  ;;  %8651 = vmatprep.mubr.msk.bf16.mxu1 %vm9886_vm0, %v9885_v1 }
  0xde   : > { %v8393_v47 = vpop.f32.mrf.mxu0  ;;  %v8413_v48 = vpop.f32.mrf.mxu1  ;;  %8712 = vmatpush3.bf16.msra.mxu1 %v9780_v39 }
  0xdf   : > { %8713 = vmatprep.subr.bf16.mxu1 %v9885_v1 }
  0xe0   : > { %v10414_v50 = vpop.f32.mrf.mxu0  ;;  %v10416_v51 = vpop.f32.mrf.mxu1 }
  0xe2   : > { %v8394_v56 = vpop.f32.mrf.mxu0  ;;  %v8414_v57 = vpop.f32.mrf.mxu1  ;;  %8714 = vmatpush3.bf16.msra.mxu1 %v9781_v49 }
  0xe3   : > { %8779 = vmatprep.subr.bf16.mxu1 %v9885_v1  ;;  %v1551_v56 = vpack.c.bf16 %v7385_v46, %v10514_v44 }
  0xe4   : > { %v10426_v58 = vpop.f32.mrf.mxu0  ;;  %v10428_v59 = vpop.f32.mrf.mxu1  ;;  %8632 = vmatmul.mubr.msk.bf16.gmra.mxu0 %vm374_vm1, %v1374_v54  ;;  %8652 = vmatmul.mubr.msk.bf16.gmra.mxu1 %vm374_vm1, %v10419_v55 }
  0xe5   : > { %8655 = vmatprep.mubr.msk.bf16.mxu1 %vm9886_vm0, %v9885_v1  ;;  %8679 = vmatprep.mubr.msk.bf16.mxu0 %vm9886_vm0, %v9885_v1 }
  0xe6   : > { %v8397_v2 = vpop.f32.mrf.mxu0  ;;  %v8417_v3 = vpop.f32.mrf.mxu1 }
  0xe8   : > { %v10439_v4 = vpop.f32.mrf.mxu0  ;;  %v10441_v6 = vpop.f32.mrf.mxu1 }
  0xea   : > { %v8398_v8 = vpop.f32.mrf.mxu0  ;;  %v8418_v11 = vpop.f32.mrf.mxu1 }
  0xec   : > { %v10448_v14 = vpop.f32.mrf.mxu0  ;;  %v10450_v15 = vpop.f32.mrf.mxu1  ;;  %8656 = vmatmul.mubr.msk.bf16.gmra.mxu1 %vm374_vm1, %v10443_v7  ;;  %8680 = vmatmul.mubr.msk.bf16.vlgmr.msra.gmra.mxu0 %vm374_vm1, %v10157_v20 }
  0xed   : > { %8659 = vmatprep.mubr.msk.bf16.mxu1 %vm9886_vm0, %v9885_v1  ;;  %8683 = vmatprep.mubr.msk.bf16.mxu0 %vm9886_vm0, %v9885_v1 }
  0xee   : > { %v8401_v18 = vpop.f32.mrf.mxu0  ;;  %v8429_v9 = vpop.f32.mrf.mxu1  ;;  %8744 = vmatpush3.bf16.msra.mxu0 %v9782_v12  ;;  %v9783_v12 = vld [vmem:[%s12792_s1 + $0x78] sm:$0xff]  }
  0xef   : > { %8745 = vmatprep.subr.bf16.mxu0 %v9885_v1  ;;  %v9785_v9 = vld [vmem:[%s12792_s1 + $0x70] sm:$0xff]  }
  0xf0   : > { %v10466_v20 = vpop.f32.mrf.mxu0  ;;  %v10468_v22 = vpop.f32.mrf.mxu1 }
  0xf2   : > { %v8402_v24 = vpop.f32.mrf.mxu0  ;;  %v8430_v19 = vpop.f32.mrf.mxu1  ;;  %8746 = vmatpush3.bf16.msra.mxu0 %v9784_v21 }
  0xf3   : > { %8747 = vmatprep.subr.bf16.mxu0 %v9885_v1 }
  0xf4   : > { %v10476_v37 = vpop.f32.mrf.mxu0  ;;  %v10478_v25 = vpop.f32.mrf.mxu1  ;;  %8660 = vmatmul.mubr.msk.bf16.gmra.mxu1 %vm374_vm1, %v10470_v23  ;;  %8684 = vmatmul.mubr.msk.bf16.gmra.mxu0 %vm374_vm1, %v10177_v29 }
  0xf5   : > { %8663 = vmatprep.mubr.msk.bf16.mxu1 %vm9886_vm0, %v9885_v1  ;;  %8687 = vmatprep.mubr.msk.bf16.mxu0 %vm9886_vm0, %v9885_v1 }
  0xf6   : > { %v8405_v27 = vpop.f32.mrf.mxu0  ;;  %v8433_v10 = vpop.f32.mrf.mxu1  ;;  %8748 = vmatpush3.bf16.msra.mxu0 %v9786_v28 }
  0xf7   : > { %8749 = vmatprep.subr.bf16.mxu0 %v9885_v1  ;;  %v7433_v10 = vld [vmem:[%s9960_s12 + $0x1e8] sm:$0x3f] }
  0xf8   : > { %v10494_v29 = vpop.f32.mrf.mxu0  ;;  %v10496_v32 = vpop.f32.mrf.mxu1  ;;  %v1806_v46 = vpack.c.bf16 %v7433_v10, %v10256_v0  ;;  %v2083_v0 = vld [vmem:[%s9960_s12 + $0xb] sm:$0xff]  ;;  %v10615_v10 = vld [vmem:[%s12793_s2] ss:$0 sm:$0xff] }
  0xfa   : > { %v8406_v34 = vpop.f32.mrf.mxu0  ;;  %v8434_v35 = vpop.f32.mrf.mxu1  ;;  %8750 = vmatpush3.bf16.msra.mxu0 %v9787_v30 }
  0xfb   : > { %8815 = vmatprep.subr.bf16.mxu0 %v9885_v1  ;;  %v9789_v35 = vld [vmem:[%s12792_s1 + $0x60] sm:$0xff]  }
  0xfc   : > { %v10501_v39 = vpop.f32.mrf.mxu0  ;;  %v10503_v42 = vpop.f32.mrf.mxu1  ;;  %8664 = vmatmul.mubr.msk.bf16.gmra.mxu1 %vm374_vm1, %v10498_v33  ;;  %8688 = vmatmul.mubr.msk.bf16.gmra.mxu0 %vm374_vm1, %v10198_v38 }
  0xfd   : > { %8667 = vmatprep.mubr.msk.bf16.mxu1 %vm9886_vm0, %v9885_v1  ;;  %8691 = vmatprep.mubr.msk.bf16.mxu0 %vm9886_vm0, %v9885_v1 }
  0xfe   : > { %v8409_v47 = vpop.f32.mrf.mxu0  ;;  %v8437_v48 = vpop.f32.mrf.mxu1 }
 0x100   : > { %v10517_v49 = vpop.f32.mrf.mxu0  ;;  %v10519_v54 = vpop.f32.mrf.mxu1 }
 0x102   : > { %v8410_v57 = vpop.f32.mrf.mxu0  ;;  %v8438_v61 = vpop.f32.mrf.mxu1 }
 0x103   : > { %v2084_v61 = vld [vmem:[%s9960_s12 + $0x13] sm:$0xff] }
 0x104   : > { %v10522_v38 = vpop.f32.mrf.mxu1  ;;  %v10524_v63 = vpop.f32.mrf.mxu0  ;;  %8668 = vmatmul.mubr.msk.bf16.gmra.mxu1 %vm374_vm1, %v1551_v56  ;;  %8692 = vmatmul.mubr.msk.bf16.gmra.mxu0 %vm374_vm1, %v10212_v43 }
 0x105   : > { %8695 = vmatprep.mubr.msk.bf16.mxu0 %vm9886_vm0, %v9885_v1  ;;  %8715 = vmatprep.mubr.msk.bf16.mxu1 %vm9886_vm0, %v9885_v1 }
 0x106   : > { %v8441_v2 = vpop.f32.mrf.mxu1  ;;  %v8465_v3 = vpop.f32.mrf.mxu0 }
 0x108   : > { %v10533_v8 = vpop.f32.mrf.mxu1  ;;  %v10535_v11 = vpop.f32.mrf.mxu0 }
 0x10a   : > { %v8442_v16 = vpop.f32.mrf.mxu1  ;;  %v8466_v17 = vpop.f32.mrf.mxu0 }
 0x10b   : > { %v2097_v17 = vpack.c.bf16 %v2084_v61, %v2083_v0 }
 0x10c   : > { %v10540_v18 = vpop.f32.mrf.mxu1  ;;  %v10542_v43 = vpop.f32.mrf.mxu0  ;;  %8696 = vmatmul.mubr.msk.bf16.gmra.mxu0 %vm374_vm1, %v10232_v53  ;;  %8716 = vmatmul.mubr.msk.bf16.vlgmr.msra.gmra.mxu1 %vm374_vm1, %v10089_v52 }
 0x10d   : > { %8780 = vmatpush3.bf16.msra.mxu1 %v9783_v12  ;;  %8699 = vmatprep.mubr.msk.bf16.mxu0 %vm9886_vm0, %v9885_v1 }
 0x10e   : > { %v8445_v21 = vpop.f32.mrf.mxu1  ;;  %v8469_v24 = vpop.f32.mrf.mxu0  ;;  %8719 = vmatprep.mubr.msk.bf16.mxu1 %vm9886_vm0, %v9885_v1  ;;  %8781 = vmatprep.subr.bf16.mxu1 %v9885_v1 }
 0x10f   : > { %v9790_v24 = vld [vmem:[%s12792_s1 + $0x38] sm:$0xff]  }
 0x110   : > { %v10556_v53 = vpop.f32.mrf.mxu1  ;;  %v10558_v19 = vpop.f32.mrf.mxu0 }
 0x111   : > { %8782 = vmatpush3.bf16.msra.mxu1 %v9785_v9 }
 0x112   : > { %v8446_v52 = vpop.f32.mrf.mxu1  ;;  %v8470_v28 = vpop.f32.mrf.mxu0  ;;  %8783 = vmatprep.subr.bf16.mxu1 %v9885_v1 }
 0x114   : > { %v10564_v26 = vpop.f32.mrf.mxu1  ;;  %v10566_v27 = vpop.f32.mrf.mxu0  ;;  %8700 = vmatmul.mubr.msk.bf16.gmra.mxu0 %vm374_vm1, %v10253_v62  ;;  %8720 = vmatmul.mubr.msk.bf16.gmra.mxu1 %vm374_vm1, %v10109_v60 }
 0x115   : > { %8703 = vmatprep.mubr.msk.bf16.mxu0 %vm9886_vm0, %v9885_v1  ;;  %8723 = vmatprep.mubr.msk.bf16.mxu1 %vm9886_vm0, %v9885_v1 }
 0x116   : > { %v8449_v30 = vpop.f32.mrf.mxu1  ;;  %v8473_v34 = vpop.f32.mrf.mxu0  ;;  %8784 = vmatpush3.bf16.msra.mxu1 %v9788_v45 }
 0x117   : > { %8785 = vmatprep.subr.bf16.mxu1 %v9885_v1  ;;  %v2085_v34 = vld [vmem:[%s9960_s12 + $0x1b] sm:$0xff] }
 0x118   : > { %v10581_v62 = vpop.f32.mrf.mxu1  ;;  %v10583_v60 = vpop.f32.mrf.mxu0 }
 0x11a   : > { %v8450_v47 = vpop.f32.mrf.mxu1  ;;  %v8474_v48 = vpop.f32.mrf.mxu0  ;;  %8786 = vmatpush3.bf16.msra.mxu1 %v9789_v35  ;;  %v2086_v35 = vld [vmem:[%s9960_s12 + $0x23] sm:$0xff] }
 0x11b   : > { %8851 = vmatprep.subr.bf16.mxu1 %v9885_v1 }
 0x11c   : > { %v10587_v56 = vpop.f32.mrf.mxu1  ;;  %v10589_v57 = vpop.f32.mrf.mxu0  ;;  %8704 = vmatmul.mubr.msk.bf16.gmra.mxu0 %vm374_vm1, %v1806_v46  ;;  %8724 = vmatmul.mubr.msk.bf16.gmra.mxu1 %vm374_vm1, %v10130_v5  ;;  %v565_v5 = vadd.f32 %v10450_v15, %v10395_v40  ;;  %v7414_v40 = vld [vmem:[%s9960_s12 + $0x140] sm:$0xff]  ;;  %v568_v15 = vadd.f32 %v10468_v22, %v10414_v50 }
 0x11d   : > { %8727 = vmatprep.mubr.msk.bf16.mxu1 %vm9886_vm0, %v9885_v1  ;;  %8751 = vmatprep.mubr.msk.bf16.mxu0 %vm9886_vm0, %v9885_v1 }
 0x11e   : > { %v8453_v2 = vpop.f32.mrf.mxu1  ;;  %v8477_v3 = vpop.f32.mrf.mxu0  ;;  %v784_v52 = vadd.f32 %v10524_v63, %v565_v5  ;;  %v7415_v63 = vld [vmem:[%s9960_s12 + $0x148] sm:$0xff]  ;;  %v785_v48 = vadd.f32 %v10535_v11, %v568_v15 }
 0x11f   : > { %v1775_v61 = vpack.c.bf16 %v7415_v63, %v7414_v40  ;;  %v2098_v2 = vpack.c.bf16 %v2086_v35, %v2085_v34  ;;  %v573_v3 = vadd.f32 %v10478_v25, %v10426_v58  ;;  %v9794_v11 = vld [vmem:[%s12792_s1 + $0x28] sm:$0xff]   ;;  %v576_v40 = vadd.f32 %v10496_v32, %v10439_v4  ;;  %v2088_v34 = vld [vmem:[%s9960_s12 + $0x33] sm:$0xff] }
 0x120   : > { %v10600_v12 = vpop.f32.mrf.mxu1  ;;  %v10602_v16 = vpop.f32.mrf.mxu0  ;;  %v2087_v63 = vld [vmem:[%s9960_s12 + $0x2b] sm:$0xff] }
 0x121   : > { %v787_v4 = vadd.f32 %v10558_v19, %v576_v40 }
 0x122   : > { %v8454_v9 = vpop.f32.mrf.mxu1  ;;  %v8478_v21 = vpop.f32.mrf.mxu0 }
 0x124   : > { %v10610_v28 = vpop.f32.mrf.mxu0  ;;  %v908_v45 = vpop.f32.mrf.mxu1  ;;  %8728 = vmatmul.mubr.msk.bf16.gmra.mxu1 %vm374_vm1, %v10144_v13  ;;  %8752 = vmatmul.mubr.msk.bf16.vlgmr.msra.gmra.mxu0 %vm374_vm1, %v2097_v17  ;;  %v9792_v13 = vld [vmem:[%s12792_s1 + $0x30] sm:$0xff]  }
 0x125   : > { %v963_v30 = vadd.f32 %v908_v45, %v784_v52  ;;  %8731 = vmatprep.mubr.msk.bf16.mxu1 %vm9886_vm0, %v9885_v1  ;;  %8755 = vmatprep.mubr.msk.bf16.mxu0 %vm9886_vm0, %v9885_v1  ;;  %v7416_v45 = vld [vmem:[%s9960_s12 + $0x150] sm:$0xff] }
 0x126   : > { %v8481_v46 = vpop.f32.mrf.mxu0  ;;  %v8501_v47 = vpop.f32.mrf.mxu1  ;;  %8816 = vmatpush3.bf16.msra.mxu0 %v9790_v24  ;;  %v786_v24 = vadd.f32 %v10542_v43, %v573_v3 }
 0x127   : > { %v984_v50 = vadd.f32 %v10615_v10, %v963_v30  ;;  %8817 = vmatprep.subr.bf16.mxu0 %v9885_v1  ;;  %v7417_v30 = vld [vmem:[%s9960_s12 + $0x158] sm:$0xff]  ;;  %v9795_v47 = vld [vmem:[%s12792_s1 + $0x20] sm:$0xff]  }
 0x128   : > { %v10636_v22 = vpop.f32.mrf.mxu0  ;;  %v911_v0 = vpop.f32.mrf.mxu1 }
 0x129   : > { %v998_v17 = vmax.f32 %v984_v50, 0.0  ;;  %v964_v5 = vadd.f32 %v911_v0, %v785_v48  ;;  %v1776_v50 = vpack.c.bf16 %v7417_v30, %v7416_v45  ;;  %v2099_v0 = vpack.c.bf16 %v2088_v34, %v2087_v63  ;;  %v2090_v45 = vld [vmem:[%s9960_s12 + $0x43] sm:$0xff] }
 0x12a   : > { %v8482_v9 = vpop.f32.mrf.mxu0  ;;  %v8502_v21 = vpop.f32.mrf.mxu1  ;;  %8818 = vmatpush3.bf16.msra.mxu0 %v9792_v13 }
 0x12b   : > { %1013 = vst.msk [vmem:[#allocation2] sm:$0xff] %vm1012_vm3, %v998_v17  ;;  %v985_v52 = vadd.f32 %v10615_v10, %v964_v5  ;;  %8819 = vmatprep.subr.bf16.mxu0 %v9885_v1 }
 0x12c   : > { %v10647_v58 = vpop.f32.mrf.mxu0  ;;  %v916_v25 = vpop.f32.mrf.mxu1  ;;  %8732 = vmatmul.mubr.msk.bf16.gmra.mxu1 %vm374_vm1, %v1775_v61  ;;  %8756 = vmatmul.mubr.msk.bf16.gmra.mxu0 %vm374_vm1, %v2098_v2  ;;  %v581_v61 = vadd.f32 %v10503_v42, %v10448_v14  ;;  %v7418_v14 = vld [vmem:[%s9960_s12 + $0x160] sm:$0xff]  ;;  %v584_v42 = vadd.f32 %v10519_v54, %v10466_v20 }
 0x12d   : > { %v999_v15 = vmax.f32 %v985_v52, 0.0  ;;  %v965_v43 = vadd.f32 %v916_v25, %v786_v24  ;;  %8735 = vmatprep.mubr.msk.bf16.mxu1 %vm9886_vm0, %v9885_v1  ;;  %8759 = vmatprep.mubr.msk.bf16.mxu0 %vm9886_vm0, %v9885_v1  ;;  %v7419_v52 = vld [vmem:[%s9960_s12 + $0x168] sm:$0x3f]  ;;  %v2089_v25 = vld [vmem:[%s9960_s12 + $0x3b] sm:$0xff] }
 0x12e   : > { %v8485_v35 = vpop.f32.mrf.mxu0  ;;  %v8505_v46 = vpop.f32.mrf.mxu1  ;;  %8820 = vmatpush3.bf16.msra.mxu0 %v9794_v11  ;;  %v788_v19 = vadd.f32 %v10566_v27, %v581_v61  ;;  %v1777_v63 = vpack.c.bf16 %v7419_v52, %v7418_v14  ;;  %v2100_v34 = vpack.c.bf16 %v2090_v45, %v2089_v25 }
 0x12f   : > { %1014 = vst.msk [vmem:[#allocation2 + $0x8] sm:$0xff] %vm1012_vm3, %v999_v15  ;;  %v986_v32 = vadd.f32 %v10615_v10, %v965_v43  ;;  %8821 = vmatprep.subr.bf16.mxu0 %v9885_v1  ;;  %v789_v43 = vadd.f32 %v10583_v60, %v584_v42  ;;  %v589_v35 = vadd.f32 %v10522_v38, %v10476_v37  ;;  %v2091_v37 = vld [vmem:[%s9960_s12 + $0x4b] sm:$0xff] }
 0x130   : > { %v10668_v13 = vpop.f32.mrf.mxu0  ;;  %v919_v48 = vpop.f32.mrf.mxu1  ;;  %v592_v38 = vadd.f32 %v10533_v8, %v10494_v29 }
 0x131   : > { %v1000_v2 = vmax.f32 %v986_v32, 0.0  ;;  %v966_v3 = vadd.f32 %v919_v48, %v787_v4  ;;  %v790_v60 = vadd.f32 %v10589_v57, %v589_v35  ;;  %v2092_v57 = vld [vmem:[%s9960_s12 + $0x53] sm:$0xff]  ;;  %v7486_v35 = vld [vmem:[%s9960_s12 + $0xa3] sm:$0xff] }
 0x132   : > { %v8486_v17 = vpop.f32.mrf.mxu0  ;;  %v8506_v5 = vpop.f32.mrf.mxu1  ;;  %8822 = vmatpush3.bf16.msra.mxu0 %v9795_v47  ;;  %v2101_v14 = vpack.c.bf16 %v2092_v57, %v2091_v37  ;;  %v605_v37 = vadd.f32 %v10564_v26, %v10397_v41 }
 0x133   : > { %1015 = vst.msk [vmem:[#allocation2 + $0x10] sm:$0xff] %vm1012_vm3, %v1000_v2  ;;  %v987_v9 = vadd.f32 %v10615_v10, %v966_v3  ;;  %8887 = vmatprep.subr.bf16.mxu0 %v9885_v1  ;;  %v7483_v3 = vld [vmem:[%s9960_s12 + $0x8b] sm:$0xff]  ;;  %v7484_v17 = vld [vmem:[%s9960_s12 + $0x93] sm:$0xff] }
 0x134   : > { %v10676_v21 = vpop.f32.mrf.mxu0  ;;  %v924_v11 = vpop.f32.mrf.mxu1  ;;  %8736 = vmatmul.mubr.msk.bf16.gmra.mxu1 %vm374_vm1, %v1776_v50  ;;  %8760 = vmatmul.mubr.msk.bf16.gmra.mxu0 %vm374_vm1, %v2099_v0  ;;  %v10719_v42 = vpack.c.bf16 %v7484_v17, %v7483_v3  ;;  %v794_v3 = vadd.f32 %v10647_v58, %v605_v37  ;;  %v2096_v58 = vld [vmem:[%s9960_s12 + $0x73] sm:$0x3f] }
 0x135   : > { %v1001_v24 = vmax.f32 %v987_v9, 0.0  ;;  %v967_v27 = vadd.f32 %v924_v11, %v788_v19  ;;  %8739 = vmatprep.mubr.msk.bf16.mxu1 %vm9886_vm0, %v9885_v1  ;;  %8763 = vmatprep.mubr.msk.bf16.mxu0 %vm9886_vm0, %v9885_v1  ;;  %v791_v9 = vadd.f32 %v10602_v16, %v592_v38  ;;  %v9791_v16 = vld [vmem:[%s12792_s1 + $0x18] sm:$0xff]  }
 0x136   : > { %v8489_v40 = vpop.f32.mrf.mxu0  ;;  %v8509_v15 = vpop.f32.mrf.mxu1 }
 0x137   : > { %1016 = vst.msk [vmem:[#allocation2 + $0x18] sm:$0xff] %vm1012_vm3, %v1001_v24  ;;  %v988_v30 = vadd.f32 %v10615_v10, %v967_v27  ;;  %v597_v24 = vadd.f32 %v10540_v18, %v10501_v39  ;;  %v2093_v39 = vld [vmem:[%s9960_s12 + $0x5b] sm:$0xff]  ;;  %v2094_v18 = vld [vmem:[%s9960_s12 + $0x63] sm:$0xff] }
 0x138   : > { %v10693_v20 = vpop.f32.mrf.mxu0  ;;  %v927_v54 = vpop.f32.mrf.mxu1 }
 0x139   : > { %v1002_v46 = vmax.f32 %v988_v30, 0.0  ;;  %v968_v47 = vadd.f32 %v927_v54, %v789_v43  ;;  %v792_v40 = vadd.f32 %v10610_v28, %v597_v24  ;;  %v600_v54 = vadd.f32 %v10556_v53, %v10517_v49  ;;  %v7485_v28 = vld [vmem:[%s9960_s12 + $0x9b] sm:$0xff] }
 0x13a   : > { %v8490_v4 = vpop.f32.mrf.mxu0  ;;  %v8510_v32 = vpop.f32.mrf.mxu1 }
 0x13b   : > { %1017 = vst.msk [vmem:[#allocation2 + $0x20] sm:$0xff] %vm1012_vm3, %v1002_v46  ;;  %v989_v48 = vadd.f32 %v10615_v10, %v968_v47  ;;  %v9793_v46 = vld [vmem:[%s12792_s1 + $0x10] sm:$0xff]   ;;  %v793_v49 = vadd.f32 %v10636_v22, %v600_v54  ;;  %v9796_v22 = vld [vmem:[%s12792_s1 + $0x8] sm:$0xff]  }
 0x13c   : > { %v932_v50 = vpop.f32.mrf.mxu1  ;;  %v10700_v0 = vpop.f32.mrf.mxu0  ;;  %8740 = vmatmul.mubr.msk.bf16.gmra.mxu1 %vm374_vm1, %v1777_v63  ;;  %8764 = vmatmul.mubr.msk.bf16.gmra.mxu0 %vm374_vm1, %v2100_v34 }
 0x13d   : > { %v1003_v61 = vmax.f32 %v989_v48, 0.0  ;;  %v969_v2 = vadd.f32 %v932_v50, %v790_v60  ;;  %8767 = vmatprep.mubr.msk.bf16.mxu0 %vm9886_vm0, %v9885_v1  ;;  %8787 = vmatprep.mubr.msk.bf16.mxu1 %vm9886_vm0, %v9885_v1  ;;  %v2102_v48 = vpack.c.bf16 %v2094_v18, %v2093_v39  ;;  %v10753_v50 = vpack.c.bf16 %v7486_v35, %v7485_v28 }
 0x13e   : > { %v8513_v5 = vpop.f32.mrf.mxu1  ;;  %v8537_v19 = vpop.f32.mrf.mxu0 }
 0x13f   : > { %1018 = vst.msk [vmem:[#allocation2 + $0x28] sm:$0xff] %vm1012_vm3, %v1003_v61  ;;  %v990_v11 = vadd.f32 %v10615_v10, %v969_v2  ;;  %v2095_v5 = vld [vmem:[%s9960_s12 + $0x6b] sm:$0xff]  ;;  %v608_v19 = vadd.f32 %v10581_v62, %v10416_v51 }
 0x140   : > { %v935_v29 = vpop.f32.mrf.mxu1  ;;  %v10717_v8 = vpop.f32.mrf.mxu0 }
 0x141   : > { %v1004_v27 = vmax.f32 %v990_v11, 0.0  ;;  %v970_v52 = vadd.f32 %v935_v29, %v791_v9  ;;  %v7487_v29 = vld [vmem:[%s9960_s12 + $0xab] sm:$0xff]  ;;  %v795_v51 = vadd.f32 %v10668_v13, %v608_v19 }
 0x142   : > { %v8514_v25 = vpop.f32.mrf.mxu1  ;;  %v8538_v45 = vpop.f32.mrf.mxu0 }
 0x143   : > { %1019 = vst.msk [vmem:[#allocation2 + $0x30] sm:$0xff] %vm1012_vm3, %v1004_v27  ;;  %v991_v15 = vadd.f32 %v10615_v10, %v970_v52  ;;  %v9797_v52 = vld [vmem:[%s12792_s1] sm:$0xff]   ;;  %v2103_v45 = vpack.c.bf16 %v2096_v58, %v2095_v5 }
 0x144   : > { %v940_v43 = vpop.f32.mrf.mxu1  ;;  %v10729_v30 = vpop.f32.mrf.mxu0  ;;  %8768 = vmatmul.mubr.msk.bf16.gmra.mxu0 %vm374_vm1, %v2101_v14  ;;  %8788 = vmatmul.mubr.msk.bf16.vlgmr.msra.gmra.mxu1 %vm374_vm1, %v10719_v42  ;;  %v7488_v14 = vld [vmem:[%s9960_s12 + $0xb3] sm:$0xff] }
 0x145   : > { %v1005_v63 = vmax.f32 %v991_v15, 0.0  ;;  %v971_v34 = vadd.f32 %v940_v43, %v792_v40  ;;  %8852 = vmatpush3.bf16.msra.mxu1 %v9791_v16  ;;  %8771 = vmatprep.mubr.msk.bf16.mxu0 %vm9886_vm0, %v9885_v1  ;;  %v10788_v40 = vpack.c.bf16 %v7488_v14, %v7487_v29  ;;  %v613_v15 = vadd.f32 %v10587_v56, %v10428_v59 }
 0x146   : > { %v8517_v47 = vpop.f32.mrf.mxu1  ;;  %v8541_v4 = vpop.f32.mrf.mxu0  ;;  %8791 = vmatprep.mubr.msk.bf16.mxu1 %vm9886_vm0, %v9885_v1  ;;  %8853 = vmatprep.subr.bf16.mxu1 %v9885_v1  ;;  %v616_v59 = vadd.f32 %v10600_v12, %v10441_v6 }
 0x147   : > { %1020 = vst.msk [vmem:[#allocation2 + $0x38] sm:$0xff] %vm1012_vm3, %v1005_v63  ;;  %v992_v53 = vadd.f32 %v10615_v10, %v971_v34  ;;  %v796_v54 = vadd.f32 %v10676_v21, %v613_v15  ;;  %v7489_v21 = vld [vmem:[%s9960_s12 + $0xbb] sm:$0xff] }
 0x148   : > { %v943_v32 = vpop.f32.mrf.mxu1  ;;  %v10751_v60 = vpop.f32.mrf.mxu0  ;;  %v9803_v15 = vld [vmem:[%s12792_s1 + $0x40] sm:$0xff]  }
 0x149   : > { %v1006_v38 = vmax.f32 %v992_v53, 0.0  ;;  %v972_v61 = vadd.f32 %v943_v32, %v793_v49  ;;  %8854 = vmatpush3.bf16.msra.mxu1 %v9793_v46  ;;  %v7490_v46 = vld [vmem:[%s9960_s12 + $0xc3] sm:$0xff]  ;;  %v797_v49 = vadd.f32 %v10693_v20, %v616_v59  ;;  %v7496_v59 = vld [vmem:[%s9960_s12 + $0xf3] sm:$0x3f] }
 0x14a   : > { %v8518_v2 = vpop.f32.mrf.mxu1  ;;  %v8542_v57 = vpop.f32.mrf.mxu0  ;;  %8855 = vmatprep.subr.bf16.mxu1 %v9885_v1  ;;  %v10814_v12 = vpack.c.bf16 %v7490_v46, %v7489_v21 }
 0x14b   : > { %1021 = vst.msk [vmem:[#allocation2 + $0x40] sm:$0xff] %vm1012_vm3, %v1006_v38  ;;  %v993_v41 = vadd.f32 %v10615_v10, %v972_v61  ;;  %v9798_v2 = vld [vmem:[%s12792_s1 + $0x58] sm:$0xff]  }
 0x14c   : > { %v948_v26 = vpop.f32.mrf.mxu1  ;;  %v10764_v17 = vpop.f32.mrf.mxu0  ;;  %8772 = vmatmul.mubr.msk.bf16.gmra.mxu0 %vm374_vm1, %v2102_v48  ;;  %8792 = vmatmul.mubr.msk.bf16.gmra.mxu1 %vm374_vm1, %v10753_v50 }
 0x14d   : > { %v1007_v9 = vmax.f32 %v993_v41, 0.0  ;;  %v973_v11 = vadd.f32 %v948_v26, %v794_v3  ;;  %8775 = vmatprep.mubr.msk.bf16.mxu0 %vm9886_vm0, %v9885_v1  ;;  %8795 = vmatprep.mubr.msk.bf16.mxu1 %vm9886_vm0, %v9885_v1  ;;  %v7491_v41 = vld [vmem:[%s9960_s12 + $0xcb] sm:$0xff]  ;;  %v7492_v26 = vld [vmem:[%s9960_s12 + $0xd3] sm:$0xff] }
 0x14e   : > { %v8521_v24 = vpop.f32.mrf.mxu1  ;;  %v8545_v27 = vpop.f32.mrf.mxu0  ;;  %8856 = vmatpush3.bf16.msra.mxu1 %v9796_v22  ;;  %v10844_v58 = vpack.c.bf16 %v7492_v26, %v7491_v41 }
 0x14f   : > { %1022 = vst.msk [vmem:[#allocation2 + $0x48] sm:$0xff] %vm1012_vm3, %v1007_v9  ;;  %v994_v62 = vadd.f32 %v10615_v10, %v973_v11  ;;  %8857 = vmatprep.subr.bf16.mxu1 %v9885_v1  ;;  %v9800_v9 = vld [vmem:[%s12792_s1 + $0x50] sm:$0xff]   ;;  %v9802_v24 = vld [vmem:[%s12792_s1 + $0x48] sm:$0xff]  }
 0x150   : > { %v951_v16 = vpop.f32.mrf.mxu1  ;;  %v10786_v25 = vpop.f32.mrf.mxu0 }
 0x151   : > { %v1008_v43 = vmax.f32 %v994_v62, 0.0  ;;  %v974_v39 = vadd.f32 %v951_v16, %v795_v51  ;;  %v7493_v51 = vld [vmem:[%s9960_s12 + $0xdb] sm:$0xff]  ;;  %v7494_v62 = vld [vmem:[%s9960_s12 + $0xe3] sm:$0xff] }
 0x152   : > { %v8522_v18 = vpop.f32.mrf.mxu1  ;;  %v8546_v13 = vpop.f32.mrf.mxu0  ;;  %8858 = vmatpush3.bf16.msra.mxu1 %v9797_v52 }
 0x153   : > { %1023 = vst.msk [vmem:[#allocation2 + $0x50] sm:$0xff] %vm1012_vm3, %v1008_v43  ;;  %v995_v63 = vadd.f32 %v10615_v10, %v974_v39  ;;  %8923 = vmatprep.subr.bf16.mxu1 %v9885_v1  ;;  %v10872_v39 = vpack.c.bf16 %v7494_v62, %v7493_v51 }
 0x154   : > { %v956_v34 = vpop.f32.mrf.mxu1  ;;  %v10796_v28 = vpop.f32.mrf.mxu0  ;;  %8776 = vmatmul.mubr.msk.bf16.gmra.mxu0 %vm374_vm1, %v2103_v45  ;;  %8796 = vmatmul.mubr.msk.bf16.gmra.mxu1 %vm374_vm1, %v10788_v40 }
 0x155   : > { %v1009_v56 = vmax.f32 %v995_v63, 0.0  ;;  %v975_v35 = vadd.f32 %v956_v34, %v796_v54  ;;  %8799 = vmatprep.mubr.msk.bf16.mxu1 %vm9886_vm0, %v9885_v1  ;;  %8823 = vmatprep.mubr.msk.bf16.mxu0 %vm9886_vm0, %v9885_v1  ;;  %v10888_v34 = vld [vmem:[%s9960_s12 + $0xeb] sm:$0xff] }
 0x156   : > { %v8525_v47 = vpop.f32.mrf.mxu1  ;;  %v8549_v4 = vpop.f32.mrf.mxu0 }
 0x157   : > { %1024 = vst.msk [vmem:[#allocation2 + $0x58] sm:$0xff] %vm1012_vm3, %v1009_v56  ;;  %v996_v53 = vadd.f32 %v10615_v10, %v975_v35  ;;  %v2280_v47 = vpack.c.bf16 %v7496_v59, %v10888_v34  ;;  %v7544_v59 = vld [vmem:[%s9960_s12 + $0x169] sm:$0x3f] }
 0x158   : > { %v959_v32 = vpop.f32.mrf.mxu1  ;;  %v10812_v6 = vpop.f32.mrf.mxu0 }
 0x159   : > { %v1010_v48 = vmax.f32 %v996_v53, 0.0  ;;  %v976_v37 = vadd.f32 %v959_v32, %v797_v49  ;;  %v7517_v32 = vld [vmem:[%s9960_s12 + $0x180] sm:$0xff] }
 0x15a   : > { %v8526_v38 = vpop.f32.mrf.mxu1  ;;  %v8550_v61 = vpop.f32.mrf.mxu0 }
 0x15b   : > { %1025 = vst.msk [vmem:[#allocation2 + $0x60] sm:$0xff] %vm1012_vm3, %v1010_v48  ;;  %v997_v20 = vadd.f32 %v10615_v10, %v976_v37  ;;  %v7518_v48 = vld [vmem:[%s9960_s12 + $0x188] sm:$0xff] }
 0x15c   : > { %v10821_v57 = vpop.f32.mrf.mxu0  ;;  %v10823_v22 = vpop.f32.mrf.mxu1  ;;  %8800 = vmatmul.mubr.msk.bf16.gmra.mxu1 %vm374_vm1, %v10814_v12  ;;  %8824 = vmatmul.mubr.msk.bf16.vlgmr.msra.gmra.mxu0 %vm374_vm1, %v10370_v31 }
 0x15d   : > { %v1011_v3 = vmax.f32 %v997_v20, 0.0  ;;  %8803 = vmatprep.mubr.msk.bf16.mxu1 %vm9886_vm0, %v9885_v1  ;;  %8827 = vmatprep.mubr.msk.bf16.mxu0 %vm9886_vm0, %v9885_v1  ;;  %v2500_v20 = vpack.c.bf16 %v7518_v48, %v7517_v32  ;;  %v2535_v48 = vpack.c.bf16 %v7544_v59, %v10514_v44  ;;  %v7523_v44 = vld [vmem:[%s9960_s12 + $0x1b0] sm:$0xff] }
 0x15e   : > { %v8553_v5 = vpop.f32.mrf.mxu0  ;;  %v8573_v19 = vpop.f32.mrf.mxu1  ;;  %8888 = vmatpush3.bf16.msra.mxu0 %v9798_v2 }
 0x15f   : > { %1027 = vst.msk [vmem:[#allocation2 + $0x68] sm:$0x3f] %vm1026_vm4, %v1011_v3  ;;  %8889 = vmatprep.subr.bf16.mxu0 %v9885_v1  ;;  %v7519_v19 = vld [vmem:[%s9960_s12 + $0x190] sm:$0xff] }
 0x160   : > { %v10840_v31 = vpop.f32.mrf.mxu0  ;;  %v10842_v11 = vpop.f32.mrf.mxu1 }
 0x162   : > { %v8554_v29 = vpop.f32.mrf.mxu0  ;;  %v8574_v14 = vpop.f32.mrf.mxu1  ;;  %8890 = vmatpush3.bf16.msra.mxu0 %v9800_v9  ;;  %v7520_v9 = vld [vmem:[%s9960_s12 + $0x198] sm:$0xff] }
 0x163   : > { %8891 = vmatprep.subr.bf16.mxu0 %v9885_v1  ;;  %v9801_v29 = vld [vmem:[%s12792_s1 + $0x70] sm:$0xff]   ;;  %v2501_v62 = vpack.c.bf16 %v7520_v9, %v7519_v19 }
 0x164   : > { %v10850_v27 = vpop.f32.mrf.mxu0  ;;  %v10852_v52 = vpop.f32.mrf.mxu1  ;;  %8804 = vmatmul.mubr.msk.bf16.gmra.mxu1 %vm374_vm1, %v10844_v58  ;;  %8828 = vmatmul.mubr.msk.bf16.gmra.mxu0 %vm374_vm1, %v10389_v36 }
 0x165   : > { %8807 = vmatprep.mubr.msk.bf16.mxu1 %vm9886_vm0, %v9885_v1  ;;  %8831 = vmatprep.mubr.msk.bf16.mxu0 %vm9886_vm0, %v9885_v1 }
 0x166   : > { %v8557_v16 = vpop.f32.mrf.mxu0  ;;  %v8577_v45 = vpop.f32.mrf.mxu1  ;;  %8892 = vmatpush3.bf16.msra.mxu0 %v9802_v24 }
 0x167   : > { %8893 = vmatprep.subr.bf16.mxu0 %v9885_v1 }
 0x168   : > { %v10868_v36 = vpop.f32.mrf.mxu0  ;;  %v10870_v43 = vpop.f32.mrf.mxu1 }
 0x16a   : > { %v8558_v18 = vpop.f32.mrf.mxu0  ;;  %v8578_v13 = vpop.f32.mrf.mxu1  ;;  %8894 = vmatpush3.bf16.msra.mxu0 %v9803_v15  ;;  %v9804_v15 = vld [vmem:[%s12792_s1 + $0x68] sm:$0xff]  }
 0x16b   : > { %8959 = vmatprep.subr.bf16.mxu0 %v9885_v1 }
 0x16c   : > { %v10875_v54 = vpop.f32.mrf.mxu0  ;;  %v10877_v63 = vpop.f32.mrf.mxu1  ;;  %8808 = vmatmul.mubr.msk.bf16.gmra.mxu1 %vm374_vm1, %v10872_v39  ;;  %8832 = vmatmul.mubr.msk.bf16.gmra.mxu0 %vm374_vm1, %v10419_v55 }
 0x16d   : > { %8811 = vmatprep.mubr.msk.bf16.mxu1 %vm9886_vm0, %v9885_v1  ;;  %8835 = vmatprep.mubr.msk.bf16.mxu0 %vm9886_vm0, %v9885_v1 }
 0x16e   : > { %v8561_v56 = vpop.f32.mrf.mxu0  ;;  %v8581_v35 = vpop.f32.mrf.mxu1 }
 0x16f   : > { %v7521_v56 = vld [vmem:[%s9960_s12 + $0x1a0] sm:$0xff]  ;;  %v7522_v35 = vld [vmem:[%s9960_s12 + $0x1a8] sm:$0xff] }
 0x170   : > { %v10891_v21 = vpop.f32.mrf.mxu0  ;;  %v10893_v46 = vpop.f32.mrf.mxu1 }
 0x172   : > { %v8562_v55 = vpop.f32.mrf.mxu0  ;;  %v8582_v4 = vpop.f32.mrf.mxu1 }
 0x173   : > { %v9805_v4 = vld [vmem:[%s12792_s1 + $0x60] sm:$0xff]  }
 0x174   : > { %v10896_v49 = vpop.f32.mrf.mxu1  ;;  %v10898_v53 = vpop.f32.mrf.mxu0  ;;  %8812 = vmatmul.mubr.msk.bf16.gmra.mxu1 %vm374_vm1, %v2280_v47  ;;  %8836 = vmatmul.mubr.msk.bf16.gmra.mxu0 %vm374_vm1, %v10443_v7  ;;  %v9799_v7 = vld [vmem:[%s12792_s1 + $0x78] sm:$0xff]  }
 0x175   : > { %8839 = vmatprep.mubr.msk.bf16.mxu0 %vm9886_vm0, %v9885_v1  ;;  %8859 = vmatprep.mubr.msk.bf16.mxu1 %vm9886_vm0, %v9885_v1 }
 0x176   : > { %v8585_v37 = vpop.f32.mrf.mxu1  ;;  %v8609_v38 = vpop.f32.mrf.mxu0 }
 0x177   : > { %v2502_v37 = vpack.c.bf16 %v7522_v35, %v7521_v56 }
 0x178   : > { %v10909_v61 = vpop.f32.mrf.mxu1  ;;  %v10911_v2 = vpop.f32.mrf.mxu0 }
 0x17a   : > { %v8586_v3 = vpop.f32.mrf.mxu1  ;;  %v8610_v41 = vpop.f32.mrf.mxu0 }
 0x17b   : > { %v7524_v41 = vld [vmem:[%s9960_s12 + $0x1b8] sm:$0xff] }
 0x17c   : > { %v10916_v26 = vpop.f32.mrf.mxu1  ;;  %v10918_v5 = vpop.f32.mrf.mxu0  ;;  %8840 = vmatmul.mubr.msk.bf16.gmra.mxu0 %vm374_vm1, %v10470_v23  ;;  %8860 = vmatmul.mubr.msk.bf16.vlgmr.msra.gmra.mxu1 %vm374_vm1, %v2500_v20 }
 0x17d   : > { %8924 = vmatpush3.bf16.msra.mxu1 %v9799_v7  ;;  %8843 = vmatprep.mubr.msk.bf16.mxu0 %vm9886_vm0, %v9885_v1 }
 0x17e   : > { %v8589_v14 = vpop.f32.mrf.mxu1  ;;  %v8613_v24 = vpop.f32.mrf.mxu0  ;;  %8863 = vmatprep.mubr.msk.bf16.mxu1 %vm9886_vm0, %v9885_v1  ;;  %8925 = vmatprep.subr.bf16.mxu1 %v9885_v1 }
 0x17f   : > { %v2503_v24 = vpack.c.bf16 %v7524_v41, %v7523_v44 }
 0x180   : > { %v10933_v23 = vpop.f32.mrf.mxu1  ;;  %v10935_v51 = vpop.f32.mrf.mxu0 }
 0x181   : > { %8926 = vmatpush3.bf16.msra.mxu1 %v9801_v29 }
 0x182   : > { %v8590_v16 = vpop.f32.mrf.mxu1  ;;  %v8614_v45 = vpop.f32.mrf.mxu0  ;;  %8927 = vmatprep.subr.bf16.mxu1 %v9885_v1 }
 0x184   : > { %v10941_v18 = vpop.f32.mrf.mxu1  ;;  %v10943_v13 = vpop.f32.mrf.mxu0  ;;  %8844 = vmatmul.mubr.msk.bf16.gmra.mxu0 %vm374_vm1, %v10498_v33  ;;  %8864 = vmatmul.mubr.msk.bf16.gmra.mxu1 %vm374_vm1, %v2501_v62  ;;  %v1300_v62 = vadd.f32 %v10823_v22, %v10700_v0  ;;  %v7525_v22 = vld [vmem:[%s9960_s12 + $0x1c0] sm:$0xff] }
 0x185   : > { %8847 = vmatprep.mubr.msk.bf16.mxu0 %vm9886_vm0, %v9885_v1  ;;  %8867 = vmatprep.mubr.msk.bf16.mxu1 %vm9886_vm0, %v9885_v1 }
 0x186   : > { %v8593_v47 = vpop.f32.mrf.mxu1  ;;  %v8617_v55 = vpop.f32.mrf.mxu0  ;;  %8928 = vmatpush3.bf16.msra.mxu1 %v9804_v15  ;;  %v9806_v15 = vld [vmem:[%s12794_s3 + $0x28] sm:$0xff]   ;;  %v1517_v59 = vadd.f32 %v10898_v53, %v1300_v62 }
 0x187   : > { %8929 = vmatprep.subr.bf16.mxu1 %v9885_v1  ;;  %v1303_v47 = vadd.f32 %v10842_v11, %v10717_v8  ;;  %v7526_v53 = vld [vmem:[%s9960_s12 + $0x1c8] sm:$0xff] }
 0x188   : > { %v10959_v33 = vpop.f32.mrf.mxu1  ;;  %v10961_v32 = vpop.f32.mrf.mxu0 }
 0x18a   : > { %v8594_v38 = vpop.f32.mrf.mxu1  ;;  %v8618_v20 = vpop.f32.mrf.mxu0  ;;  %8930 = vmatpush3.bf16.msra.mxu1 %v9805_v4 }
 0x18b   : > { %8991 = vmatprep.subr.bf16.mxu1 %v9885_v1  ;;  %v2504_v38 = vpack.c.bf16 %v7526_v53, %v7525_v22  ;;  %v1308_v20 = vadd.f32 %v10852_v52, %v10729_v30  ;;  %v1311_v30 = vadd.f32 %v10870_v43, %v10751_v60  ;;  %v1316_v22 = vadd.f32 %v10877_v63, %v10764_v17 }
 0x18c   : > { %v10965_v7 = vpop.f32.mrf.mxu1  ;;  %v10967_v3 = vpop.f32.mrf.mxu0  ;;  %8848 = vmatmul.mubr.msk.bf16.gmra.mxu0 %vm374_vm1, %v2535_v48  ;;  %8868 = vmatmul.mubr.msk.bf16.gmra.mxu1 %vm374_vm1, %v2502_v37  ;;  %v9808_v48 = vld [vmem:[%s12794_s3 + $0x20] sm:$0xff]   ;;  %v1319_v17 = vadd.f32 %v10893_v46, %v10786_v25 }
 0x18d   : > { %8871 = vmatprep.mubr.msk.bf16.mxu1 %vm9886_vm0, %v9885_v1  ;;  %8895 = vmatprep.mubr.msk.bf16.mxu0 %vm9886_vm0, %v9885_v1 }
 0x18e   : > { %v8597_v19 = vpop.f32.mrf.mxu1  ;;  %v8621_v9 = vpop.f32.mrf.mxu0 }
 0x190   : > { %v10977_v29 = vpop.f32.mrf.mxu1  ;;  %v10979_v14 = vpop.f32.mrf.mxu0 }
 0x192   : > { %v8598_v16 = vpop.f32.mrf.mxu1  ;;  %v8622_v45 = vpop.f32.mrf.mxu0 }
 0x194   : > { %v10987_v56 = vpop.f32.mrf.mxu0  ;;  %v1639_v35 = vpop.f32.mrf.mxu1  ;;  %8872 = vmatmul.mubr.msk.bf16.gmra.mxu1 %vm374_vm1, %v2503_v24  ;;  %8896 = vmatmul.mubr.msk.bf16.vlgmr.msra.gmra.mxu0 %vm374_vm1, %v10719_v42  ;;  %v1518_v42 = vadd.f32 %v10911_v2, %v1303_v47  ;;  %v1519_v2 = vadd.f32 %v10918_v5, %v1308_v20  ;;  %v7527_v5 = vld [vmem:[%s9960_s12 + $0x1d0] sm:$0xff]  ;;  %v1520_v47 = vadd.f32 %v10935_v51, %v1311_v30  ;;  %v7530_v20 = vld [vmem:[%s9960_s12 + $0x1e8] sm:$0x3f] }
 0x195   : > { %v1694_v0 = vadd.f32 %v1639_v35, %v1517_v59  ;;  %8875 = vmatprep.mubr.msk.bf16.mxu1 %vm9886_vm0, %v9885_v1  ;;  %8899 = vmatprep.mubr.msk.bf16.mxu0 %vm9886_vm0, %v9885_v1 }
 0x196   : > { %v8625_v55 = vpop.f32.mrf.mxu0  ;;  %v8645_v4 = vpop.f32.mrf.mxu1  ;;  %8960 = vmatpush3.bf16.msra.mxu0 %v9806_v15  ;;  %v7528_v15 = vld [vmem:[%s9960_s12 + $0x1d8] sm:$0xff] }
 0x197   : > { %v1715_v8 = vadd.f32 %v10615_v10, %v1694_v0  ;;  %8961 = vmatprep.subr.bf16.mxu0 %v9885_v1  ;;  %v2505_v43 = vpack.c.bf16 %v7528_v15, %v7527_v5 }
 0x198   : > { %v11006_v11 = vpop.f32.mrf.mxu0  ;;  %v1642_v37 = vpop.f32.mrf.mxu1 }
 0x199   : > { %v1729_v44 = vmax.f32 %v1715_v8, 0.0  ;;  %v1695_v41 = vadd.f32 %v1642_v37, %v1518_v42  ;;  %v1521_v42 = vadd.f32 %v10943_v13, %v1316_v22  ;;  %v7529_v13 = vld [vmem:[%s9960_s12 + $0x1e0] sm:$0xff]  ;;  %v1332_v22 = vadd.f32 %v10916_v26, %v10821_v57 }
 0x19a   : > { %v8626_v19 = vpop.f32.mrf.mxu0  ;;  %v8646_v9 = vpop.f32.mrf.mxu1  ;;  %8962 = vmatpush3.bf16.msra.mxu0 %v9808_v48  ;;  %v2506_v46 = vpack.c.bf16 %v7530_v20, %v7529_v13  ;;  %v1335_v57 = vadd.f32 %v10933_v23, %v10840_v31  ;;  %v9809_v13 = vld [vmem:[%s12794_s3] sm:$0xff]  }
 0x19b   : > { %1743 = vst.msk [vmem:[#allocation2 + $0x70] sm:$0xff] %vm1012_vm3, %v1729_v44  ;;  %v1716_v24 = vadd.f32 %v10615_v10, %v1695_v41  ;;  %9023 = vmatprep.subr.bf16.mxu0 %v9885_v1  ;;  %v1522_v19 = vadd.f32 %v10961_v32, %v1319_v17 }
 0x19c   : > { %v11014_v62 = vpop.f32.mrf.mxu0  ;;  %v1647_v16 = vpop.f32.mrf.mxu1  ;;  %8876 = vmatmul.mubr.msk.bf16.gmra.mxu1 %vm374_vm1, %v2504_v38  ;;  %8900 = vmatmul.mubr.msk.bf16.gmra.mxu0 %vm374_vm1, %v10753_v50  ;;  %v1526_v31 = vadd.f32 %v11006_v11, %v1335_v57 }
 0x19d   : > { %v1730_v52 = vmax.f32 %v1716_v24, 0.0  ;;  %v1696_v45 = vadd.f32 %v1647_v16, %v1519_v2  ;;  %8879 = vmatprep.mubr.msk.bf16.mxu1 %vm9886_vm0, %v9885_v1  ;;  %8903 = vmatprep.mubr.msk.bf16.mxu0 %vm9886_vm0, %v9885_v1  ;;  %v1324_v2 = vadd.f32 %v10896_v49, %v10796_v28  ;;  %v1327_v28 = vadd.f32 %v10909_v61, %v10812_v6 }
 0x19e   : > { %v8629_v59 = vpop.f32.mrf.mxu0  ;;  %v8649_v35 = vpop.f32.mrf.mxu1 }
 0x19f   : > { %1744 = vst.msk [vmem:[#allocation2 + $0x78] sm:$0xff] %vm1012_vm3, %v1730_v52  ;;  %v1717_v50 = vadd.f32 %v10615_v10, %v1696_v45  ;;  %v1523_v45 = vadd.f32 %v10967_v3, %v1324_v2  ;;  %v2989_v3 = vld [vmem:[%s9960_s12 + $0xc] sm:$0xff]  ;;  %v2990_v35 = vld [vmem:[%s9960_s12 + $0x14] sm:$0xff] }
 0x1a0   : > { %v11030_v0 = vpop.f32.mrf.mxu0  ;;  %v1650_v60 = vpop.f32.mrf.mxu1  ;;  %v3003_v61 = vpack.c.bf16 %v2990_v35, %v2989_v3 }
 0x1a1   : > { %v1731_v53 = vmax.f32 %v1717_v50, 0.0  ;;  %v1697_v55 = vadd.f32 %v1650_v60, %v1520_v47  ;;  %v1524_v60 = vadd.f32 %v10979_v14, %v1327_v28 }
 0x1a2   : > { %v8630_v4 = vpop.f32.mrf.mxu0  ;;  %v8650_v48 = vpop.f32.mrf.mxu1 }
 0x1a3   : > { %1745 = vst.msk [vmem:[#allocation2 + $0x80] sm:$0xff] %vm1012_vm3, %v1731_v53  ;;  %v1718_v51 = vadd.f32 %v10615_v10, %v1697_v55  ;;  %v9807_v4 = vld [vmem:[%s12794_s3 + $0x8] sm:$0xff]  }
 0x1a4   : > { %v11037_v8 = vpop.f32.mrf.mxu0  ;;  %v1655_v37 = vpop.f32.mrf.mxu1  ;;  %8880 = vmatmul.mubr.msk.bf16.gmra.mxu1 %vm374_vm1, %v2505_v43  ;;  %8904 = vmatmul.mubr.msk.bf16.gmra.mxu0 %vm374_vm1, %v10788_v40 }
 0x1a5   : > { %v1732_v63 = vmax.f32 %v1718_v51, 0.0  ;;  %v1698_v38 = vadd.f32 %v1655_v37, %v1521_v42  ;;  %8883 = vmatprep.mubr.msk.bf16.mxu1 %vm9886_vm0, %v9885_v1  ;;  %8907 = vmatprep.mubr.msk.bf16.mxu0 %vm9886_vm0, %v9885_v1  ;;  %v1525_v42 = vadd.f32 %v10987_v56, %v1332_v22  ;;  %v2991_v56 = vld [vmem:[%s9960_s12 + $0x1c] sm:$0xff] }
 0x1a6   : > { %v8633_v44 = vpop.f32.mrf.mxu0  ;;  %v8653_v41 = vpop.f32.mrf.mxu1 }
 0x1a7   : > { %1746 = vst.msk [vmem:[#allocation2 + $0x88] sm:$0xff] %vm1012_vm3, %v1732_v63  ;;  %v1719_v40 = vadd.f32 %v10615_v10, %v1698_v38  ;;  %v2992_v38 = vld [vmem:[%s9960_s12 + $0x24] sm:$0xff] }
 0x1a8   : > { %v11053_v9 = vpop.f32.mrf.mxu0  ;;  %v1658_v25 = vpop.f32.mrf.mxu1 }
 0x1a9   : > { %v1733_v24 = vmax.f32 %v1719_v40, 0.0  ;;  %v1699_v16 = vadd.f32 %v1658_v25, %v1522_v19  ;;  %v3004_v19 = vpack.c.bf16 %v2992_v38, %v2991_v56  ;;  %v1340_v40 = vadd.f32 %v10941_v18, %v10850_v27 }
 0x1aa   : > { %v8634_v30 = vpop.f32.mrf.mxu0  ;;  %v8654_v52 = vpop.f32.mrf.mxu1  ;;  %v1343_v27 = vadd.f32 %v10959_v33, %v10868_v36  ;;  %v9875_v36 = vld [vmem:[%s12793_s2] ss:$0 sm:$0xff] }
 0x1ab   : > { %1747 = vst.msk [vmem:[#allocation2 + $0x90] sm:$0xff] %vm1012_vm3, %v1733_v24  ;;  %v1720_v32 = vadd.f32 %v10615_v10, %v1699_v16  ;;  %v1527_v11 = vadd.f32 %v11014_v62, %v1340_v40  ;;  %v2993_v62 = vld [vmem:[%s9960_s12 + $0x2c] sm:$0xff] }
 0x1ac   : > { %v1663_v5 = vpop.f32.mrf.mxu1  ;;  %v11060_v15 = vpop.f32.mrf.mxu0  ;;  %8884 = vmatmul.mubr.msk.bf16.gmra.mxu1 %vm374_vm1, %v2506_v46  ;;  %8908 = vmatmul.mubr.msk.bf16.gmra.mxu0 %vm374_vm1, %v10814_v12 }
 0x1ad   : > { %v1734_v49 = vmax.f32 %v1720_v32, 0.0  ;;  %v1700_v59 = vadd.f32 %v1663_v5, %v1523_v45  ;;  %8911 = vmatprep.mubr.msk.bf16.mxu0 %vm9886_vm0, %v9885_v1  ;;  %8931 = vmatprep.mubr.msk.bf16.mxu1 %vm9886_vm0, %v9885_v1  ;;  %v2994_v32 = vld [vmem:[%s9960_s12 + $0x34] sm:$0xff] }
 0x1ae   : > { %v8657_v47 = vpop.f32.mrf.mxu1  ;;  %v8681_v50 = vpop.f32.mrf.mxu0  ;;  %v3005_v35 = vpack.c.bf16 %v2994_v32, %v2993_v62  ;;  %v2999_v32 = vld [vmem:[%s9960_s12 + $0x5c] sm:$0xff] }
 0x1af   : > { %1748 = vst.msk [vmem:[#allocation2 + $0x98] sm:$0xff] %vm1012_vm3, %v1734_v49  ;;  %v1721_v12 = vadd.f32 %v10615_v10, %v1700_v59  ;;  %v1348_v47 = vadd.f32 %v10965_v7, %v10875_v54  ;;  %v1351_v54 = vadd.f32 %v10977_v29, %v10891_v21 }
 0x1b0   : > { %v1666_v43 = vpop.f32.mrf.mxu1  ;;  %v11076_v6 = vpop.f32.mrf.mxu0 }
 0x1b1   : > { %v1735_v53 = vmax.f32 %v1721_v12, 0.0  ;;  %v1701_v55 = vadd.f32 %v1666_v43, %v1524_v60  ;;  %v1529_v43 = vadd.f32 %v11037_v8, %v1348_v47  ;;  %v2995_v8 = vld [vmem:[%s9960_s12 + $0x3c] sm:$0xff] }
 0x1b2   : > { %v8658_v14 = vpop.f32.mrf.mxu1  ;;  %v8682_v48 = vpop.f32.mrf.mxu0 }
 0x1b3   : > { %1749 = vst.msk [vmem:[#allocation2 + $0xa0] sm:$0xff] %vm1012_vm3, %v1735_v53  ;;  %v1722_v51 = vadd.f32 %v10615_v10, %v1701_v55  ;;  %v2996_v55 = vld [vmem:[%s9960_s12 + $0x44] sm:$0xff]  ;;  %v1530_v48 = vadd.f32 %v11053_v9, %v1351_v54 }
 0x1b4   : > { %v1671_v37 = vpop.f32.mrf.mxu1  ;;  %v11086_v17 = vpop.f32.mrf.mxu0  ;;  %8912 = vmatmul.mubr.msk.bf16.gmra.mxu0 %vm374_vm1, %v10844_v58  ;;  %8932 = vmatmul.mubr.msk.bf16.vlgmr.msra.gmra.mxu1 %vm374_vm1, %v3003_v61  ;;  %v3006_v29 = vpack.c.bf16 %v2996_v55, %v2995_v8  ;;  %v9810_v9 = vld [vmem:[%s12794_s3 + $0x88] sm:$0xff]  }
 0x1b5   : > { %v1736_v26 = vmax.f32 %v1722_v51, 0.0  ;;  %v1702_v63 = vadd.f32 %v1671_v37, %v1525_v42  ;;  %8992 = vmatpush3.bf16.msra.mxu1 %v9807_v4  ;;  %8915 = vmatprep.mubr.msk.bf16.mxu0 %vm9886_vm0, %v9885_v1  ;;  %v3240_v51 = vld [vmem:[#allocation2 + $0x9] sm:$0xff] }
 0x1b6   : > { %v8661_v20 = vpop.f32.mrf.mxu1  ;;  %v8685_v44 = vpop.f32.mrf.mxu0  ;;  %8935 = vmatprep.mubr.msk.bf16.mxu1 %vm9886_vm0, %v9885_v1  ;;  %8993 = vmatprep.subr.bf16.mxu1 %v9885_v1 }
 0x1b7   : > { %1750 = vst.msk [vmem:[#allocation2 + $0xa8] sm:$0xff] %vm1012_vm3, %v1736_v26  ;;  %v1723_v58 = vadd.f32 %v10615_v10, %v1702_v63  ;;  %v3239_v63 = vld [vmem:[#allocation2 + $0x1] sm:$0xff] }
 0x1b8   : > { %v1674_v23 = vpop.f32.mrf.mxu1  ;;  %v11106_v41 = vpop.f32.mrf.mxu0 }
 0x1b9   : > { %v1737_v25 = vmax.f32 %v1723_v58, 0.0  ;;  %v1703_v46 = vadd.f32 %v1674_v23, %v1526_v31  ;;  %8994 = vmatpush3.bf16.msra.mxu1 %v9809_v13  ;;  %v3252_v13 = vpack.c.bf16 %v3240_v51, %v3239_v63  ;;  %v2997_v23 = vld [vmem:[%s9960_s12 + $0x4c] sm:$0xff] }
 0x1ba   : > { %v8662_v2 = vpop.f32.mrf.mxu1  ;;  %v8686_v24 = vpop.f32.mrf.mxu0  ;;  %9055 = vmatprep.subr.bf16.mxu1 %v9885_v1  ;;  %v3216_v63 = vld [vmem:[#allocation2 + $0x8] sm:$0xff] }
 0x1bb   : > { %1751 = vst.msk [vmem:[#allocation2 + $0xb0] sm:$0xff] %vm1012_vm3, %v1737_v25  ;;  %v1724_v16 = vadd.f32 %v10615_v10, %v1703_v46  ;;  %v7588_v10 = vld [vmem:[%s9960_s12 + $0xf3] sm:$0x3f]  ;;  %v9812_v46 = vld [vmem:[%s12794_s3 + $0x80] sm:$0xff]  }
 0x1bc   : > { %v1679_v30 = vpop.f32.mrf.mxu1  ;;  %v11114_v52 = vpop.f32.mrf.mxu0  ;;  %8916 = vmatmul.mubr.msk.bf16.gmra.mxu0 %vm374_vm1, %v10872_v39  ;;  %8936 = vmatmul.mubr.msk.bf16.gmra.mxu1 %vm374_vm1, %v3004_v19  ;;  %v1528_v39 = vadd.f32 %v11030_v0, %v1343_v27  ;;  %v2832_v3 = vpack.c.bf16 %v7588_v10, %v10888_v34  ;;  %v2998_v19 = vld [vmem:[%s9960_s12 + $0x54] sm:$0xff] }
 0x1bd   : > { %v1738_v18 = vmax.f32 %v1724_v16, 0.0  ;;  %v1704_v45 = vadd.f32 %v1679_v30, %v1527_v11  ;;  %8919 = vmatprep.mubr.msk.bf16.mxu0 %vm9886_vm0, %v9885_v1  ;;  %8939 = vmatprep.mubr.msk.bf16.mxu1 %vm9886_vm0, %v9885_v1  ;;  %v3242_v2 = vld [vmem:[#allocation2 + $0x19] sm:$0xff]  ;;  %v3007_v16 = vpack.c.bf16 %v2998_v19, %v2997_v23  ;;  %v3241_v30 = vld [vmem:[#allocation2 + $0x11] sm:$0xff] }
 0x1be   : > { %v8665_v5 = vpop.f32.mrf.mxu1  ;;  %v8689_v28 = vpop.f32.mrf.mxu0 }
 0x1bf   : > { %1752 = vst.msk [vmem:[#allocation2 + $0xb8] sm:$0xff] %vm1012_vm3, %v1738_v18  ;;  %v1725_v33 = vadd.f32 %v9875_v36, %v1704_v45  ;;  %v3253_v45 = vpack.c.bf16 %v3242_v2, %v3241_v30  ;;  %v3000_v5 = vld [vmem:[%s9960_s12 + $0x64] sm:$0xff] }
 0x1c0   : > { %v1682_v49 = vpop.f32.mrf.mxu1  ;;  %v11133_v59 = vpop.f32.mrf.mxu0  ;;  %v9813_v2 = vld [vmem:[%s12794_s3 + $0xa0] sm:$0xff]  }
 0x1c1   : > { %v1739_v50 = vmax.f32 %v1725_v33, 0.0  ;;  %v1705_v60 = vadd.f32 %v1682_v49, %v1528_v39 }
 0x1c2   : > { %v8666_v0 = vpop.f32.mrf.mxu1  ;;  %v8690_v12 = vpop.f32.mrf.mxu0 }
 0x1c3   : > { %1753 = vst.msk [vmem:[#allocation2 + $0xc0] sm:$0xff] %vm1012_vm3, %v1739_v50  ;;  %v1726_v61 = vadd.f32 %v9875_v36, %v1705_v60 }
 0x1c4   : > { %v1687_v22 = vpop.f32.mrf.mxu1  ;;  %v11140_v53 = vpop.f32.mrf.mxu0  ;;  %8920 = vmatmul.mubr.msk.bf16.gmra.mxu0 %vm374_vm1, %v2832_v3  ;;  %8940 = vmatmul.mubr.msk.bf16.gmra.mxu1 %vm374_vm1, %v3005_v35  ;;  %v3008_v3 = vpack.c.bf16 %v3000_v5, %v2999_v32  ;;  %v3243_v35 = vld [vmem:[#allocation2 + $0x21] sm:$0xff]  ;;  %v3249_v5 = vld [vmem:[#allocation2 + $0x51] sm:$0xff] }
 0x1c5   : > { %v1740_v34 = vmax.f32 %v1726_v61, 0.0  ;;  %v1706_v7 = vadd.f32 %v1687_v22, %v1529_v43  ;;  %8943 = vmatprep.mubr.msk.bf16.mxu1 %vm9886_vm0, %v9885_v1  ;;  %8963 = vmatprep.mubr.msk.bf16.mxu0 %vm9886_vm0, %v9885_v1  ;;  %v3001_v43 = vld [vmem:[%s9960_s12 + $0x6c] sm:$0xff]  ;;  %v3002_v61 = vld [vmem:[%s9960_s12 + $0x74] sm:$0x3f] }
 0x1c6   : > { %v8669_v4 = vpop.f32.mrf.mxu1  ;;  %v8693_v14 = vpop.f32.mrf.mxu0  ;;  %v3009_v55 = vpack.c.bf16 %v3002_v61, %v3001_v43  ;;  %v3251_v61 = vld [vmem:[#allocation2 + $0x61] sm:$0x7] }
 0x1c7   : > { %1754 = vst.msk [vmem:[#allocation2 + $0xc8] sm:$0xff] %vm1012_vm3, %v1740_v34  ;;  %v1727_v42 = vadd.f32 %v9875_v36, %v1706_v7  ;;  %v3246_v34 = vld [vmem:[#allocation2 + $0x39] sm:$0xff]  ;;  %v3245_v4 = vld [vmem:[#allocation2 + $0x31] sm:$0xff] }
 0x1c8   : > { %v1690_v37 = vpop.f32.mrf.mxu1  ;;  %v11154_v21 = vpop.f32.mrf.mxu0 }
 0x1c9   : > { %v1741_v57 = vmax.f32 %v1727_v42, 0.0  ;;  %v1707_v26 = vadd.f32 %v1690_v37, %v1530_v48  ;;  %v3255_v42 = vpack.c.bf16 %v3246_v34, %v3245_v4 }
 0x1ca   : > { %v8670_v56 = vpop.f32.mrf.mxu1  ;;  %v8694_v38 = vpop.f32.mrf.mxu0 }
 0x1cb   : > { %1755 = vst.msk [vmem:[#allocation2 + $0xd0] sm:$0xff] %vm1012_vm3, %v1741_v57  ;;  %v1728_v20 = vadd.f32 %v9875_v36, %v1707_v26  ;;  %v3244_v36 = vld [vmem:[#allocation2 + $0x29] sm:$0xff] }
 0x1cc   : > { %v11160_v44 = vpop.f32.mrf.mxu0  ;;  %v11162_v31 = vpop.f32.mrf.mxu1  ;;  %8944 = vmatmul.mubr.msk.bf16.gmra.mxu1 %vm374_vm1, %v3006_v29  ;;  %8964 = vmatmul.mubr.msk.bf16.vlgmr.msra.gmra.mxu0 %vm1012_vm3, %v3252_v13  ;;  %v3254_v60 = vpack.c.bf16 %v3244_v36, %v3243_v35  ;;  %v3248_v26 = vld [vmem:[#allocation2 + $0x49] sm:$0xff]  ;;  %v3247_v13 = vld [vmem:[#allocation2 + $0x41] sm:$0xff] }
 0x1cd   : > { %v1742_v58 = vmax.f32 %v1728_v20, 0.0  ;;  %8947 = vmatprep.mubr.msk.bf16.mxu1 %vm9886_vm0, %v9885_v1  ;;  %8967 = vmatprep.mubr.msk.bf16.mxu0 %vm9886_vm0, %v9885_v1  ;;  %v9811_v20 = vld [vmem:[%s12794_s3 + $0xa8] sm:$0xff]   ;;  %v3256_v19 = vpack.c.bf16 %v3248_v26, %v3247_v13  ;;  %v3222_v13 = vld [vmem:[#allocation2 + $0x38] sm:$0xff] }
 0x1ce   : > { %v8697_v40 = vpop.f32.mrf.mxu0  ;;  %v8717_v25 = vpop.f32.mrf.mxu1  ;;  %9024 = vmatpush3.bf16.msra.mxu0 %v9810_v9  ;;  %v3215_v9 = vld [vmem:[#allocation2] sm:$0xff] }
 0x1cf   : > { %1756 = vst.msk [vmem:[#allocation2 + $0xd8] sm:$0x3f] %vm1026_vm4, %v1742_v58  ;;  %9025 = vmatprep.subr.bf16.mxu0 %v9885_v1  ;;  %v3228_v40 = vpack.c.bf16 %v3216_v63, %v3215_v9  ;;  %v3507_v9 = vld [vmem:[#allocation2 + $0x13] sm:$0xff] }
 0x1d0   : > { %v11177_v24 = vpop.f32.mrf.mxu0  ;;  %v11179_v11 = vpop.f32.mrf.mxu1 }
 0x1d2   : > { %v8698_v27 = vpop.f32.mrf.mxu0  ;;  %v8718_v18 = vpop.f32.mrf.mxu1  ;;  %9026 = vmatpush3.bf16.msra.mxu0 %v9812_v46 }
 0x1d3   : > { %9087 = vmatprep.subr.bf16.mxu0 %v9885_v1  ;;  %v3250_v27 = vld [vmem:[#allocation2 + $0x59] sm:$0xff] }
 0x1d4   : > { %v11182_v10 = vpop.f32.mrf.mxu0  ;;  %v11184_v62 = vpop.f32.mrf.mxu1  ;;  %8948 = vmatmul.mubr.msk.bf16.gmra.mxu1 %vm374_vm1, %v3007_v16  ;;  %8968 = vmatmul.mubr.msk.bf16.gmra.mxu0 %vm1012_vm3, %v3253_v45  ;;  %v3218_v18 = vld [vmem:[#allocation2 + $0x18] sm:$0xff] }
 0x1d5   : > { %8951 = vmatprep.mubr.msk.bf16.mxu1 %vm9886_vm0, %v9885_v1  ;;  %8971 = vmatprep.mubr.msk.bf16.mxu0 %vm9886_vm0, %v9885_v1 }
 0x1d6   : > { %v8701_v28 = vpop.f32.mrf.mxu0  ;;  %v8721_v39 = vpop.f32.mrf.mxu1 }
 0x1d7   : > { %v3217_v28 = vld [vmem:[#allocation2 + $0x10] sm:$0xff] }
 0x1d8   : > { %v11194_v33 = vpop.f32.mrf.mxu0  ;;  %v11196_v49 = vpop.f32.mrf.mxu1  ;;  %v3229_v35 = vpack.c.bf16 %v3218_v18, %v3217_v28  ;;  %v9814_v18 = vld [vmem:[%s12794_s3 + $0x18] sm:$0xff]  }
 0x1da   : > { %v8702_v47 = vpop.f32.mrf.mxu0  ;;  %v8722_v50 = vpop.f32.mrf.mxu1 }
 0x1dc   : > { %v11198_v0 = vpop.f32.mrf.mxu0  ;;  %v11200_v12 = vpop.f32.mrf.mxu1  ;;  %8952 = vmatmul.mubr.msk.bf16.gmra.mxu1 %vm374_vm1, %v3008_v3  ;;  %8972 = vmatmul.mubr.msk.bf16.gmra.mxu0 %vm1012_vm3, %v3254_v60  ;;  %v3257_v3 = vpack.c.bf16 %v3250_v27, %v3249_v5 }
 0x1dd   : > { %8955 = vmatprep.mubr.msk.bf16.mxu1 %vm9886_vm0, %v9885_v1  ;;  %8975 = vmatprep.mubr.msk.bf16.mxu0 %vm9886_vm0, %v9885_v1 }
 0x1de   : > { %v8705_v22 = vpop.f32.mrf.mxu0  ;;  %v8725_v54 = vpop.f32.mrf.mxu1 }
 0x1df   : > { %v3220_v22 = vld [vmem:[#allocation2 + $0x28] sm:$0xff] }
 0x1e0   : > { %v11210_v7 = vpop.f32.mrf.mxu0  ;;  %v11212_v8 = vpop.f32.mrf.mxu1 }
 0x1e2   : > { %v8706_v14 = vpop.f32.mrf.mxu0  ;;  %v8726_v48 = vpop.f32.mrf.mxu1 }
 0x1e3   : > { %v3258_v48 = vpack.c.bf16 %v3251_v61, %v3251_v61  ;;  %v3224_v61 = vld [vmem:[#allocation2 + $0x48] sm:$0xff] }
 0x1e4   : > { %v11214_v51 = vpop.f32.mrf.mxu1  ;;  %v11216_v37 = vpop.f32.mrf.mxu0  ;;  %8956 = vmatmul.mubr.msk.bf16.gmra.mxu1 %vm374_vm1, %v3009_v55  ;;  %8976 = vmatmul.mubr.msk.bf16.gmra.mxu0 %vm1012_vm3, %v3255_v42  ;;  %v3219_v55 = vld [vmem:[#allocation2 + $0x20] sm:$0xff] }
 0x1e5   : > { %8979 = vmatprep.mubr.msk.bf16.mxu0 %vm9886_vm0, %v9885_v1  ;;  %8995 = vmatprep.mubr.msk.bf16.mxu1 %vm9886_vm0, %v9885_v1  ;;  %v3230_v42 = vpack.c.bf16 %v3220_v22, %v3219_v55  ;;  %v2037_v55 = vadd.f32 %v11184_v62, %v11086_v17  ;;  %v2040_v62 = vadd.f32 %v11196_v49, %v11106_v41 }
 0x1e6   : > { %v8729_v29 = vpop.f32.mrf.mxu1  ;;  %v8753_v57 = vpop.f32.mrf.mxu0  ;;  %v2045_v49 = vadd.f32 %v11200_v12, %v11114_v52  ;;  %v2048_v52 = vadd.f32 %v11212_v8, %v11133_v59  ;;  %v2053_v8 = vadd.f32 %v11214_v51, %v11140_v53 }
 0x1e8   : > { %v11224_v56 = vpop.f32.mrf.mxu1  ;;  %v11226_v38 = vpop.f32.mrf.mxu0 }
 0x1e9   : > { %v2056_v53 = vadd.f32 %v11224_v56, %v11154_v21 }
 0x1ea   : > { %v8730_v58 = vpop.f32.mrf.mxu1  ;;  %v8754_v23 = vpop.f32.mrf.mxu0 }
 0x1eb   : > { %v2029_v23 = vadd.f32 %v11162_v31, %v11060_v15  ;;  %v2032_v15 = vadd.f32 %v11179_v11, %v11076_v6  ;;  %v3509_v6 = vld [vmem:[#allocation2 + $0x23] sm:$0xff] }
 0x1ec   : > { %v11231_v25 = vpop.f32.mrf.mxu1  ;;  %v11233_v46 = vpop.f32.mrf.mxu0  ;;  %8980 = vmatmul.mubr.msk.bf16.gmra.mxu0 %vm1012_vm3, %v3256_v19  ;;  %8996 = vmatmul.mubr.msk.bf16.vlgmr.msra.gmra.mxu1 %vm1012_vm3, %v3228_v40  ;;  %v3221_v19 = vld [vmem:[#allocation2 + $0x30] sm:$0xff] }
 0x1ed   : > { %9056 = vmatpush3.bf16.msra.mxu1 %v9811_v20  ;;  %8983 = vmatprep.mubr.msk.bf16.mxu0 %vm9886_vm0, %v9885_v1  ;;  %v3506_v40 = vld [vmem:[#allocation2 + $0xb] sm:$0xff]  ;;  %v2246_v5 = vadd.f32 %v11216_v37, %v2029_v23  ;;  %v2061_v56 = vadd.f32 %v11231_v25, %v11160_v44 }
 0x1ee   : > { %v8733_v16 = vpop.f32.mrf.mxu1  ;;  %v8757_v30 = vpop.f32.mrf.mxu0  ;;  %8999 = vmatprep.mubr.msk.bf16.mxu1 %vm9886_vm0, %v9885_v1  ;;  %9057 = vmatprep.subr.bf16.mxu1 %v9885_v1  ;;  %v3519_v27 = vpack.c.bf16 %v3507_v9, %v3506_v40  ;;  %v2248_v9 = vadd.f32 %v11233_v46, %v2037_v55 }
 0x1ef   : > { %v3231_v30 = vpack.c.bf16 %v3222_v13, %v3221_v19 }
 0x1f0   : > { %v11245_v45 = vpop.f32.mrf.mxu1  ;;  %v11247_v32 = vpop.f32.mrf.mxu0 }
 0x1f1   : > { %9058 = vmatpush3.bf16.msra.mxu1 %v9813_v2  ;;  %v2064_v25 = vadd.f32 %v11245_v45, %v11177_v24  ;;  %v3517_v45 = vld [vmem:[#allocation2 + $0x63] sm:$0xff] }
 0x1f2   : > { %v8734_v39 = vpop.f32.mrf.mxu1  ;;  %v8758_v36 = vpop.f32.mrf.mxu0  ;;  %9119 = vmatprep.subr.bf16.mxu1 %v9885_v1 }
 0x1f3   : > { %v11289_v36 = vld [vmem:[%s12793_s2] ss:$0 sm:$0xff] }
 0x1f4   : > { %v11250_v47 = vpop.f32.mrf.mxu1  ;;  %v11252_v50 = vpop.f32.mrf.mxu0  ;;  %8984 = vmatmul.mubr.msk.bf16.gmra.mxu0 %vm1012_vm3, %v3257_v3  ;;  %9000 = vmatmul.mubr.msk.bf16.gmra.mxu1 %vm1012_vm3, %v3229_v35  ;;  %v9816_v35 = vld [vmem:[%s12794_s3 + $0x10] sm:$0xff]  }
 0x1f5   : > { %8987 = vmatprep.mubr.msk.bf16.mxu0 %vm9886_vm0, %v9885_v1  ;;  %9003 = vmatprep.mubr.msk.bf16.mxu1 %vm9886_vm0, %v9885_v1 }
 0x1f6   : > { %v8737_v60 = vpop.f32.mrf.mxu1  ;;  %v8761_v43 = vpop.f32.mrf.mxu0 }
 0x1f7   : > { %v2247_v60 = vadd.f32 %v11226_v38, %v2032_v15 }
 0x1f8   : > { %v11260_v54 = vpop.f32.mrf.mxu1  ;;  %v11262_v34 = vpop.f32.mrf.mxu0 }
 0x1fa   : > { %v8738_v4 = vpop.f32.mrf.mxu1  ;;  %v8762_v14 = vpop.f32.mrf.mxu0 }
 0x1fc   : > { %v11264_v29 = vpop.f32.mrf.mxu1  ;;  %v11266_v57 = vpop.f32.mrf.mxu0  ;;  %8988 = vmatmul.mubr.msk.bf16.gmra.mxu0 %vm1012_vm3, %v3258_v48  ;;  %9004 = vmatmul.mubr.msk.bf16.gmra.mxu1 %vm1012_vm3, %v3230_v42  ;;  %v3223_v48 = vld [vmem:[#allocation2 + $0x40] sm:$0xff] }
 0x1fd   : > { %9007 = vmatprep.mubr.msk.bf16.mxu1 %vm9886_vm0, %v9885_v1  ;;  %9027 = vmatprep.mubr.msk.bf16.mxu0 %vm9886_vm0, %v9885_v1  ;;  %v3508_v42 = vld [vmem:[#allocation2 + $0x1b] sm:$0xff]  ;;  %v3232_v13 = vpack.c.bf16 %v3224_v61, %v3223_v48  ;;  %v2250_v61 = vadd.f32 %v11252_v50, %v2045_v49  ;;  %v2251_v48 = vadd.f32 %v11262_v34, %v2048_v52  ;;  %v3515_v49 = vld [vmem:[#allocation2 + $0x53] sm:$0xff] }
 0x1fe   : > { %v8741_v26 = vpop.f32.mrf.mxu1  ;;  %v8765_v63 = vpop.f32.mrf.mxu0  ;;  %v3520_v38 = vpack.c.bf16 %v3509_v6, %v3508_v42  ;;  %v2252_v34 = vadd.f32 %v11266_v57, %v2053_v8  ;;  %v2069_v8 = vadd.f32 %v11250_v47, %v11182_v10  ;;  %v2072_v10 = vadd.f32 %v11260_v54, %v11194_v33 }
 0x1ff   : > { %v2077_v54 = vadd.f32 %v11264_v29, %v11198_v0 }
 0x200   : > { %v11274_v20 = vpop.f32.mrf.mxu1  ;;  %v11276_v58 = vpop.f32.mrf.mxu0 }
 0x201   : > { %v2080_v0 = vadd.f32 %v11274_v20, %v11210_v7 }
 0x202   : > { %v8742_v2 = vpop.f32.mrf.mxu1  ;;  %v8766_v16 = vpop.f32.mrf.mxu0 }
 0x204   : > { %v11284_v28 = vpop.f32.mrf.mxu0  ;;  %v2368_v39 = vpop.f32.mrf.mxu1  ;;  %9008 = vmatmul.mubr.msk.bf16.gmra.mxu1 %vm1012_vm3, %v3231_v30  ;;  %9028 = vmatmul.mubr.msk.bf16.vlgmr.msra.gmra.mxu0 %vm1012_vm3, %v3519_v27  ;;  %v2249_v30 = vadd.f32 %v11247_v32, %v2040_v62 }
 0x205   : > { %v2423_v31 = vadd.f32 %v2368_v39, %v2246_v5  ;;  %9011 = vmatprep.mubr.msk.bf16.mxu1 %vm9886_vm0, %v9885_v1  ;;  %9031 = vmatprep.mubr.msk.bf16.mxu0 %vm9886_vm0, %v9885_v1  ;;  %v3511_v5 = vld [vmem:[#allocation2 + $0x33] sm:$0xff] }
 0x206   : > { %v8769_v37 = vpop.f32.mrf.mxu0  ;;  %v8789_v3 = vpop.f32.mrf.mxu1  ;;  %9088 = vmatpush3.bf16.msra.mxu0 %v9814_v18  ;;  %v3226_v18 = vld [vmem:[#allocation2 + $0x58] sm:$0xff] }
 0x207   : > { %v2444_v43 = vadd.f32 %v11289_v36, %v2423_v31  ;;  %9089 = vmatprep.subr.bf16.mxu0 %v9885_v1  ;;  %v3225_v37 = vld [vmem:[#allocation2 + $0x50] sm:$0xff] }
 0x208   : > { %v11305_v11 = vpop.f32.mrf.mxu0  ;;  %v2371_v22 = vpop.f32.mrf.mxu1  ;;  %v3510_v3 = vld [vmem:[#allocation2 + $0x2b] sm:$0xff] }
 0x209   : > { %v2458_v4 = vmax.f32 %v2444_v43, 0.0  ;;  %v2424_v14 = vadd.f32 %v2371_v22, %v2247_v60  ;;  %v3233_v43 = vpack.c.bf16 %v3226_v18, %v3225_v37  ;;  %v3521_v32 = vpack.c.bf16 %v3511_v5, %v3510_v3 }
 0x20a   : > { %v8770_v26 = vpop.f32.mrf.mxu0  ;;  %v8790_v63 = vpop.f32.mrf.mxu1  ;;  %9090 = vmatpush3.bf16.msra.mxu0 %v9816_v35  ;;  %v2253_v5 = vadd.f32 %v11276_v58, %v2056_v53  ;;  %v9815_v58 = vld [vmem:[%s12794_s3 + $0x38] sm:$0xff]  }
 0x20b   : > { %2472 = vst.msk [vmem:[#allocation2 + $0xe0] sm:$0xff] %vm1012_vm3, %v2458_v4  ;;  %v2445_v23 = vadd.f32 %v11289_v36, %v2424_v14  ;;  %9151 = vmatprep.subr.bf16.mxu0 %v9885_v1  ;;  %v3227_v26 = vld [vmem:[#allocation2 + $0x60] sm:$0x7]  ;;  %v3513_v63 = vld [vmem:[#allocation2 + $0x43] sm:$0xff] }
 0x20c   : > { %v11313_v19 = vpop.f32.mrf.mxu0  ;;  %v2376_v17 = vpop.f32.mrf.mxu1  ;;  %9012 = vmatmul.mubr.msk.bf16.gmra.mxu1 %vm1012_vm3, %v3232_v13  ;;  %9032 = vmatmul.mubr.msk.bf16.gmra.mxu0 %vm1012_vm3, %v3520_v38 }
 0x20d   : > { %v2459_v40 = vmax.f32 %v2445_v23, 0.0  ;;  %v2425_v2 = vadd.f32 %v2376_v17, %v2248_v9  ;;  %9015 = vmatprep.mubr.msk.bf16.mxu1 %vm9886_vm0, %v9885_v1  ;;  %9035 = vmatprep.mubr.msk.bf16.mxu0 %vm9886_vm0, %v9885_v1  ;;  %v3512_v23 = vld [vmem:[#allocation2 + $0x3b] sm:$0xff] }
 0x20e   : > { %v8773_v46 = vpop.f32.mrf.mxu0  ;;  %v8793_v16 = vpop.f32.mrf.mxu1 }
 0x20f   : > { %2473 = vst.msk [vmem:[#allocation2 + $0xe8] sm:$0xff] %vm1012_vm3, %v2459_v40  ;;  %v2446_v27 = vadd.f32 %v11289_v36, %v2425_v2  ;;  %v3234_v40 = vpack.c.bf16 %v3227_v26, %v3227_v26  ;;  %v3522_v2 = vpack.c.bf16 %v3513_v63, %v3512_v23  ;;  %v3668_v26 = vld [vmem:[#allocation2 + $0x24] sm:$0xff]  ;;  %v3516_v23 = vld [vmem:[#allocation2 + $0x5b] sm:$0xff] }
 0x210   : > { %v11326_v39 = vpop.f32.mrf.mxu0  ;;  %v2379_v41 = vpop.f32.mrf.mxu1 }
 0x211   : > { %v2460_v15 = vmax.f32 %v2446_v27, 0.0  ;;  %v2426_v31 = vadd.f32 %v2379_v41, %v2249_v30 }
 0x212   : > { %v8774_v35 = vpop.f32.mrf.mxu0  ;;  %v8794_v60 = vpop.f32.mrf.mxu1 }
 0x213   : > { %2474 = vst.msk [vmem:[#allocation2 + $0xf0] sm:$0xff] %vm1012_vm3, %v2460_v15  ;;  %v2447_v6 = vadd.f32 %v11289_v36, %v2426_v31  ;;  %v3666_v15 = vld [vmem:[#allocation2 + $0x14] sm:$0xff]  ;;  %v3514_v35 = vld [vmem:[#allocation2 + $0x4b] sm:$0xff] }
 0x214   : > { %v11333_v22 = vpop.f32.mrf.mxu0  ;;  %v2384_v55 = vpop.f32.mrf.mxu1  ;;  %9016 = vmatmul.mubr.msk.bf16.gmra.mxu1 %vm1012_vm3, %v3233_v43  ;;  %9036 = vmatmul.mubr.msk.bf16.gmra.mxu0 %vm1012_vm3, %v3521_v32  ;;  %v3665_v60 = vld [vmem:[#allocation2 + $0xc] sm:$0xff] }
 0x215   : > { %v2461_v12 = vmax.f32 %v2447_v6, 0.0  ;;  %v2427_v4 = vadd.f32 %v2384_v55, %v2250_v61  ;;  %9019 = vmatprep.mubr.msk.bf16.mxu1 %vm9886_vm0, %v9885_v1  ;;  %9039 = vmatprep.mubr.msk.bf16.mxu0 %vm9886_vm0, %v9885_v1  ;;  %v3523_v61 = vpack.c.bf16 %v3515_v49, %v3514_v35  ;;  %v3678_v6 = vpack.c.bf16 %v3666_v15, %v3665_v60 }
 0x216   : > { %v8777_v50 = vpop.f32.mrf.mxu0  ;;  %v8797_v14 = vpop.f32.mrf.mxu1  ;;  %v2254_v55 = vadd.f32 %v11284_v28, %v2061_v56  ;;  %v9817_v28 = vld [vmem:[%s12794_s3 + $0x30] sm:$0xff]  }
 0x217   : > { %2475 = vst.msk [vmem:[#allocation2 + $0xf8] sm:$0xff] %vm1012_vm3, %v2461_v12  ;;  %v2448_v42 = vadd.f32 %v11289_v36, %v2427_v4  ;;  %v3669_v56 = vld [vmem:[#allocation2 + $0x2c] sm:$0xff] }
 0x218   : > { %v11346_v13 = vpop.f32.mrf.mxu0  ;;  %v2387_v59 = vpop.f32.mrf.mxu1 }
 0x219   : > { %v2462_v38 = vmax.f32 %v2448_v42, 0.0  ;;  %v2428_v9 = vadd.f32 %v2387_v59, %v2251_v48  ;;  %v2255_v42 = vadd.f32 %v11305_v11, %v2064_v25  ;;  %v3524_v11 = vpack.c.bf16 %v3517_v45, %v3516_v23  ;;  %v3825_v25 = vld [vmem:[#allocation2 + $0x78] sm:$0xff] }
 0x21a   : > { %v8778_v17 = vpop.f32.mrf.mxu0  ;;  %v8798_v62 = vpop.f32.mrf.mxu1 }
 0x21b   : > { %2476 = vst.msk [vmem:[#allocation2 + $0x100] sm:$0xff] %vm1012_vm3, %v2462_v38  ;;  %v2449_v46 = vadd.f32 %v11289_v36, %v2428_v9  ;;  %v3667_v17 = vld [vmem:[#allocation2 + $0x1c] sm:$0xff] }
 0x21c   : > { %v2392_v16 = vpop.f32.mrf.mxu1  ;;  %v11353_v30 = vpop.f32.mrf.mxu0  ;;  %9020 = vmatmul.mubr.msk.bf16.gmra.mxu1 %vm1012_vm3, %v3234_v40  ;;  %9040 = vmatmul.mubr.msk.bf16.gmra.mxu0 %vm1012_vm3, %v3522_v2  ;;  %v3679_v2 = vpack.c.bf16 %v3668_v26, %v3667_v17  ;;  %v9820_v17 = vld [vmem:[%s12794_s3 + $0x90] sm:$0xff]  }
 0x21d   : > { %v2463_v51 = vmax.f32 %v2449_v46, 0.0  ;;  %v2429_v27 = vadd.f32 %v2392_v16, %v2252_v34  ;;  %9043 = vmatprep.mubr.msk.bf16.mxu0 %vm9886_vm0, %v9885_v1  ;;  %9059 = vmatprep.mubr.msk.bf16.mxu1 %vm9886_vm0, %v9885_v1  ;;  %v2256_v34 = vadd.f32 %v11313_v19, %v2069_v8 }
 0x21e   : > { %v8801_v57 = vpop.f32.mrf.mxu1  ;;  %v8825_v18 = vpop.f32.mrf.mxu0 }
 0x21f   : > { %2477 = vst.msk [vmem:[#allocation2 + $0x108] sm:$0xff] %vm1012_vm3, %v2463_v51  ;;  %v2450_v41 = vadd.f32 %v11289_v36, %v2429_v27  ;;  %v2257_v57 = vadd.f32 %v11326_v39, %v2072_v10  ;;  %v2258_v39 = vadd.f32 %v11333_v22, %v2077_v54 }
 0x220   : > { %v2395_v31 = vpop.f32.mrf.mxu1  ;;  %v11366_v21 = vpop.f32.mrf.mxu0 }
 0x221   : > { %v2464_v37 = vmax.f32 %v2450_v41, 0.0  ;;  %v2430_v3 = vadd.f32 %v2395_v31, %v2253_v5  ;;  %v3518_v5 = vld [vmem:[#allocation2 + $0x6b] sm:$0x7]  ;;  %v3670_v41 = vld [vmem:[#allocation2 + $0x34] sm:$0xff] }
 0x222   : > { %v8802_v43 = vpop.f32.mrf.mxu1  ;;  %v8826_v32 = vpop.f32.mrf.mxu0  ;;  %v3525_v35 = vpack.c.bf16 %v3518_v5, %v3518_v5  ;;  %v3680_v60 = vpack.c.bf16 %v3670_v41, %v3669_v56  ;;  %v3676_v5 = vld [vmem:[#allocation2 + $0x64] sm:$0xff]  ;;  %v3829_v41 = vld [vmem:[#allocation2 + $0x98] sm:$0xff] }
 0x223   : > { %2478 = vst.msk [vmem:[#allocation2 + $0x110] sm:$0xff] %vm1012_vm3, %v2464_v37  ;;  %v2451_v52 = vadd.f32 %v11289_v36, %v2430_v3 }
 0x224   : > { %v2400_v12 = vpop.f32.mrf.mxu1  ;;  %v11376_v44 = vpop.f32.mrf.mxu0  ;;  %9044 = vmatmul.mubr.msk.bf16.gmra.mxu0 %vm1012_vm3, %v3523_v61  ;;  %9060 = vmatmul.mubr.msk.bf16.vlgmr.msra.gmra.mxu1 %vm1012_vm3, %v3678_v6 }
 0x225   : > { %v2465_v4 = vmax.f32 %v2451_v52, 0.0  ;;  %v2431_v50 = vadd.f32 %v2400_v12, %v2254_v55  ;;  %9120 = vmatpush3.bf16.msra.mxu1 %v9815_v58  ;;  %9047 = vmatprep.mubr.msk.bf16.mxu0 %vm9886_vm0, %v9885_v1  ;;  %v2259_v55 = vadd.f32 %v11346_v13, %v2080_v0  ;;  %v3672_v12 = vld [vmem:[#allocation2 + $0x44] sm:$0xff]  ;;  %v9818_v13 = vld [vmem:[%s12794_s3 + $0x98] sm:$0xff]   ;;  %v3677_v0 = vld [vmem:[#allocation2 + $0x6c] sm:$0x7] }
 0x226   : > { %v8805_v14 = vpop.f32.mrf.mxu1  ;;  %v8829_v48 = vpop.f32.mrf.mxu0  ;;  %9063 = vmatprep.mubr.msk.bf16.mxu1 %vm9886_vm0, %v9885_v1  ;;  %9121 = vmatprep.subr.bf16.mxu1 %v9885_v1 }
 0x227   : > { %2479 = vst.msk [vmem:[#allocation2 + $0x118] sm:$0xff] %vm1012_vm3, %v2465_v4  ;;  %v2452_v24 = vadd.f32 %v11289_v36, %v2431_v50  ;;  %v3824_v14 = vld [vmem:[#allocation2 + $0x70] sm:$0xff] }
 0x228   : > { %v2403_v63 = vpop.f32.mrf.mxu1  ;;  %v11393_v59 = vpop.f32.mrf.mxu0  ;;  %v3837_v45 = vpack.c.bf16 %v3825_v25, %v3824_v14  ;;  %v3833_v14 = vld [vmem:[#allocation2 + $0xb8] sm:$0xff] }
 0x229   : > { %v2466_v38 = vmax.f32 %v2452_v24, 0.0  ;;  %v2432_v9 = vadd.f32 %v2403_v63, %v2255_v42  ;;  %9122 = vmatpush3.bf16.msra.mxu1 %v9817_v28  ;;  %v3671_v28 = vld [vmem:[#allocation2 + $0x3c] sm:$0xff] }
 0x22a   : > { %v8806_v62 = vpop.f32.mrf.mxu1  ;;  %v8830_v40 = vpop.f32.mrf.mxu0  ;;  %9183 = vmatprep.subr.bf16.mxu1 %v9885_v1  ;;  %v3681_v24 = vpack.c.bf16 %v3672_v12, %v3671_v28  ;;  %v3684_v12 = vpack.c.bf16 %v3677_v0, %v3677_v0  ;;  %v3988_v0 = vld [vmem:[#allocation2 + $0x99] sm:$0xff] }
 0x22b   : > { %2480 = vst.msk [vmem:[#allocation2 + $0x120] sm:$0xff] %vm1012_vm3, %v2466_v38  ;;  %v2453_v46 = vadd.f32 %v11289_v36, %v2432_v9  ;;  %v3674_v62 = vld [vmem:[#allocation2 + $0x54] sm:$0xff]  ;;  %v3827_v40 = vld [vmem:[#allocation2 + $0x88] sm:$0xff] }
 0x22c   : > { %v2408_v16 = vpop.f32.mrf.mxu1  ;;  %v11401_v53 = vpop.f32.mrf.mxu0  ;;  %9048 = vmatmul.mubr.msk.bf16.gmra.mxu0 %vm1012_vm3, %v3524_v11  ;;  %9064 = vmatmul.mubr.msk.bf16.gmra.mxu1 %vm1012_vm3, %v3679_v2 }
 0x22d   : > { %v2467_v47 = vmax.f32 %v2453_v46, 0.0  ;;  %v2433_v51 = vadd.f32 %v2408_v16, %v2256_v34  ;;  %9051 = vmatprep.mubr.msk.bf16.mxu0 %vm9886_vm0, %v9885_v1  ;;  %9067 = vmatprep.mubr.msk.bf16.mxu1 %vm9886_vm0, %v9885_v1  ;;  %v3673_v34 = vld [vmem:[#allocation2 + $0x4c] sm:$0xff]  ;;  %v3826_v46 = vld [vmem:[#allocation2 + $0x80] sm:$0xff] }
 0x22e   : > { %v8809_v19 = vpop.f32.mrf.mxu1  ;;  %v8833_v27 = vpop.f32.mrf.mxu0 }
 0x22f   : > { %2481 = vst.msk [vmem:[#allocation2 + $0x128] sm:$0xff] %vm1012_vm3, %v2467_v47  ;;  %v2454_v18 = vadd.f32 %v11289_v36, %v2433_v51  ;;  %v3682_v47 = vpack.c.bf16 %v3674_v62, %v3673_v34  ;;  %v3838_v51 = vpack.c.bf16 %v3827_v40, %v3826_v46  ;;  %v9821_v34 = vld [vmem:[%s12794_s3 + $0xb0] sm:$0xff]  }
 0x230   : > { %v2411_v49 = vpop.f32.mrf.mxu1  ;;  %v11414_v33 = vpop.f32.mrf.mxu0 }
 0x231   : > { %v2468_v15 = vmax.f32 %v2454_v18, 0.0  ;;  %v2434_v31 = vadd.f32 %v2411_v49, %v2257_v57 }
 0x232   : > { %v8810_v37 = vpop.f32.mrf.mxu1  ;;  %v8834_v3 = vpop.f32.mrf.mxu0 }
 0x233   : > { %2482 = vst.msk [vmem:[#allocation2 + $0x130] sm:$0xff] %vm1012_vm3, %v2468_v15  ;;  %v2455_v58 = vadd.f32 %v11289_v36, %v2434_v31  ;;  %v3675_v15 = vld [vmem:[#allocation2 + $0x5c] sm:$0xff]  ;;  %v3828_v31 = vld [vmem:[#allocation2 + $0x90] sm:$0xff] }
 0x234   : > { %v2416_v43 = vpop.f32.mrf.mxu1  ;;  %v11421_v32 = vpop.f32.mrf.mxu0  ;;  %9052 = vmatmul.mubr.msk.bf16.gmra.mxu0 %vm1012_vm3, %v3525_v35  ;;  %9068 = vmatmul.mubr.msk.bf16.gmra.mxu1 %vm1012_vm3, %v3680_v60  ;;  %v3683_v3 = vpack.c.bf16 %v3676_v5, %v3675_v15  ;;  %v3839_v35 = vpack.c.bf16 %v3829_v41, %v3828_v31  ;;  %v3985_v5 = vld [vmem:[#allocation2 + $0x81] sm:$0xff] }
 0x235   : > { %v2469_v29 = vmax.f32 %v2455_v58, 0.0  ;;  %v2435_v61 = vadd.f32 %v2416_v43, %v2258_v39  ;;  %9071 = vmatprep.mubr.msk.bf16.mxu1 %vm9886_vm0, %v9885_v1  ;;  %9091 = vmatprep.mubr.msk.bf16.mxu0 %vm9886_vm0, %v9885_v1 }
 0x236   : > { %v8813_v22 = vpop.f32.mrf.mxu1  ;;  %v8837_v6 = vpop.f32.mrf.mxu0 }
 0x237   : > { %2483 = vst.msk [vmem:[#allocation2 + $0x138] sm:$0xff] %vm1012_vm3, %v2469_v29  ;;  %v2456_v52 = vadd.f32 %v11289_v36, %v2435_v61  ;;  %v3831_v29 = vld [vmem:[#allocation2 + $0xa8] sm:$0xff]  ;;  %v3830_v6 = vld [vmem:[#allocation2 + $0xa0] sm:$0xff] }
 0x238   : > { %v2419_v4 = vpop.f32.mrf.mxu1  ;;  %v11434_v7 = vpop.f32.mrf.mxu0  ;;  %v3840_v25 = vpack.c.bf16 %v3831_v29, %v3830_v6 }
 0x239   : > { %v2470_v20 = vmax.f32 %v2456_v52, 0.0  ;;  %v2436_v50 = vadd.f32 %v2419_v4, %v2259_v55 }
 0x23a   : > { %v8814_v48 = vpop.f32.mrf.mxu1  ;;  %v8838_v42 = vpop.f32.mrf.mxu0 }
 0x23b   : > { %2484 = vst.msk [vmem:[#allocation2 + $0x140] sm:$0xff] %vm1012_vm3, %v2470_v20  ;;  %v2457_v26 = vadd.f32 %v11289_v36, %v2436_v50  ;;  %v3984_v48 = vld [vmem:[#allocation2 + $0x79] sm:$0xff] }
 0x23c   : > { %v11441_v63 = vpop.f32.mrf.mxu0  ;;  %v11443_v8 = vpop.f32.mrf.mxu1  ;;  %9072 = vmatmul.mubr.msk.bf16.gmra.mxu1 %vm1012_vm3, %v3681_v24  ;;  %9092 = vmatmul.mubr.msk.bf16.vlgmr.msra.gmra.mxu0 %vm1012_vm3, %v3837_v45  ;;  %v3832_v45 = vld [vmem:[#allocation2 + $0xb0] sm:$0xff] }
 0x23d   : > { %v2471_v38 = vmax.f32 %v2457_v26, 0.0  ;;  %9075 = vmatprep.mubr.msk.bf16.mxu1 %vm9886_vm0, %v9885_v1  ;;  %9095 = vmatprep.mubr.msk.bf16.mxu0 %vm9886_vm0, %v9885_v1  ;;  %v9819_v26 = vld [vmem:[%s12794_s3 + $0xb8] sm:$0xff]  }
 0x23e   : > { %v8841_v9 = vpop.f32.mrf.mxu0  ;;  %v8861_v23 = vpop.f32.mrf.mxu1  ;;  %9152 = vmatpush3.bf16.msra.mxu0 %v9818_v13  ;;  %v3983_v13 = vld [vmem:[#allocation2 + $0x71] sm:$0xff] }
 0x23f   : > { %2485 = vst.msk [vmem:[#allocation2 + $0x148] sm:$0x3f] %vm1026_vm4, %v2471_v38  ;;  %9153 = vmatprep.subr.bf16.mxu0 %v9885_v1  ;;  %v3841_v23 = vpack.c.bf16 %v3833_v14, %v3832_v45 }
 0x240   : > { %v11456_v11 = vpop.f32.mrf.mxu0  ;;  %v11458_v2 = vpop.f32.mrf.mxu1 }
 0x242   : > { %v8842_v16 = vpop.f32.mrf.mxu0  ;;  %v8862_v10 = vpop.f32.mrf.mxu1  ;;  %9154 = vmatpush3.bf16.msra.mxu0 %v9820_v17  ;;  %v3996_v17 = vpack.c.bf16 %v3984_v48, %v3983_v13  ;;  %v3990_v13 = vld [vmem:[#allocation2 + $0xa9] sm:$0xff] }
 0x243   : > { %9215 = vmatprep.subr.bf16.mxu0 %v9885_v1  ;;  %v3835_v10 = vld [vmem:[#allocation2 + $0xc8] sm:$0xff] }
 0x244   : > { %v11461_v19 = vpop.f32.mrf.mxu0  ;;  %v11463_v27 = vpop.f32.mrf.mxu1  ;;  %9076 = vmatmul.mubr.msk.bf16.gmra.mxu1 %vm1012_vm3, %v3682_v47  ;;  %9096 = vmatmul.mubr.msk.bf16.gmra.mxu0 %vm1012_vm3, %v3838_v51  ;;  %v3986_v47 = vld [vmem:[#allocation2 + $0x89] sm:$0xff] }
 0x245   : > { %9079 = vmatprep.mubr.msk.bf16.mxu1 %vm9886_vm0, %v9885_v1  ;;  %9099 = vmatprep.mubr.msk.bf16.mxu0 %vm9886_vm0, %v9885_v1 }
 0x246   : > { %v8845_v57 = vpop.f32.mrf.mxu0  ;;  %v8865_v18 = vpop.f32.mrf.mxu1 }
 0x247   : > { %v3834_v18 = vld [vmem:[#allocation2 + $0xc0] sm:$0xff] }
 0x248   : > { %v11471_v49 = vpop.f32.mrf.mxu0  ;;  %v11473_v54 = vpop.f32.mrf.mxu1  ;;  %v3842_v31 = vpack.c.bf16 %v3835_v10, %v3834_v18  ;;  %v9822_v18 = vld [vmem:[%s12794_s3 + $0x48] sm:$0xff]  }
 0x24a   : > { %v8846_v56 = vpop.f32.mrf.mxu0  ;;  %v8866_v37 = vpop.f32.mrf.mxu1 }
 0x24b   : > { %v3997_v56 = vpack.c.bf16 %v3986_v47, %v3985_v5 }
 0x24c   : > { %v11475_v60 = vpop.f32.mrf.mxu0  ;;  %v11477_v39 = vpop.f32.mrf.mxu1  ;;  %9080 = vmatmul.mubr.msk.bf16.gmra.mxu1 %vm1012_vm3, %v3683_v3  ;;  %9100 = vmatmul.mubr.msk.bf16.gmra.mxu0 %vm1012_vm3, %v3839_v35 }
 0x24d   : > { %9083 = vmatprep.mubr.msk.bf16.mxu1 %vm9886_vm0, %v9885_v1  ;;  %9103 = vmatprep.mubr.msk.bf16.mxu0 %vm9886_vm0, %v9885_v1 }
 0x24e   : > { %v8849_v58 = vpop.f32.mrf.mxu0  ;;  %v8869_v43 = vpop.f32.mrf.mxu1 }
 0x24f   : > { %v3836_v43 = vld [vmem:[#allocation2 + $0xd0] sm:$0x7] }
 0x250   : > { %v11485_v61 = vpop.f32.mrf.mxu0  ;;  %v11487_v22 = vpop.f32.mrf.mxu1 }
 0x252   : > { %v8850_v55 = vpop.f32.mrf.mxu0  ;;  %v8870_v52 = vpop.f32.mrf.mxu1 }
 0x253   : > { %v3987_v55 = vld [vmem:[#allocation2 + $0x91] sm:$0xff] }
 0x254   : > { %v11489_v4 = vpop.f32.mrf.mxu1  ;;  %v11491_v20 = vpop.f32.mrf.mxu0  ;;  %9084 = vmatmul.mubr.msk.bf16.gmra.mxu1 %vm1012_vm3, %v3684_v12  ;;  %9104 = vmatmul.mubr.msk.bf16.gmra.mxu0 %vm1012_vm3, %v3840_v25  ;;  %v3843_v25 = vpack.c.bf16 %v3836_v43, %v3836_v43  ;;  %v3992_v43 = vld [vmem:[#allocation2 + $0xb9] sm:$0xff] }
 0x255   : > { %9107 = vmatprep.mubr.msk.bf16.mxu0 %vm9886_vm0, %v9885_v1  ;;  %9123 = vmatprep.mubr.msk.bf16.mxu1 %vm9886_vm0, %v9885_v1 }
 0x256   : > { %v8873_v50 = vpop.f32.mrf.mxu1  ;;  %v8897_v28 = vpop.f32.mrf.mxu0 }
 0x257   : > { %v3998_v50 = vpack.c.bf16 %v3988_v0, %v3987_v55  ;;  %v2766_v55 = vadd.f32 %v11463_v27, %v11376_v44  ;;  %v2769_v27 = vadd.f32 %v11473_v54, %v11393_v59  ;;  %v2774_v54 = vadd.f32 %v11477_v39, %v11401_v53 }
 0x258   : > { %v11499_v42 = vpop.f32.mrf.mxu1  ;;  %v11501_v24 = vpop.f32.mrf.mxu0  ;;  %v2777_v53 = vadd.f32 %v11487_v22, %v11414_v33  ;;  %v2782_v22 = vadd.f32 %v11489_v4, %v11421_v32 }
 0x259   : > { %v2785_v32 = vadd.f32 %v11499_v42, %v11434_v7 }
 0x25a   : > { %v8874_v38 = vpop.f32.mrf.mxu1  ;;  %v8898_v9 = vpop.f32.mrf.mxu0 }
 0x25c   : > { %v11506_v62 = vpop.f32.mrf.mxu1  ;;  %v11508_v40 = vpop.f32.mrf.mxu0  ;;  %9108 = vmatmul.mubr.msk.bf16.gmra.mxu0 %vm1012_vm3, %v3841_v23  ;;  %9124 = vmatmul.mubr.msk.bf16.vlgmr.msra.gmra.mxu1 %vm1012_vm3, %v3996_v17  ;;  %v2758_v23 = vadd.f32 %v11443_v8, %v11353_v30  ;;  %v3989_v17 = vld [vmem:[#allocation2 + $0xa1] sm:$0xff]  ;;  %v2761_v30 = vadd.f32 %v11458_v2, %v11366_v21  ;;  %v4145_v21 = vld [vmem:[#allocation2 + $0x93] sm:$0xff] }
 0x25d   : > { %9184 = vmatpush3.bf16.msra.mxu1 %v9819_v26  ;;  %9111 = vmatprep.mubr.msk.bf16.mxu0 %vm9886_vm0, %v9885_v1  ;;  %v4143_v26 = vld [vmem:[#allocation2 + $0x83] sm:$0xff]  ;;  %v3999_v10 = vpack.c.bf16 %v3990_v13, %v3989_v17  ;;  %v2790_v42 = vadd.f32 %v11506_v62, %v11441_v63 }
 0x25e   : > { %v8877_v46 = vpop.f32.mrf.mxu1  ;;  %v8901_v16 = vpop.f32.mrf.mxu0  ;;  %9127 = vmatprep.mubr.msk.bf16.mxu1 %vm9886_vm0, %v9885_v1  ;;  %9185 = vmatprep.subr.bf16.mxu1 %v9885_v1  ;;  %v2975_v5 = vadd.f32 %v11491_v20, %v2758_v23  ;;  %v9824_v20 = vld [vmem:[%s12794_s3 + $0x40] sm:$0xff]  }
 0x260   : > { %v11520_v51 = vpop.f32.mrf.mxu1  ;;  %v11522_v57 = vpop.f32.mrf.mxu0 }
 0x261   : > { %9186 = vmatpush3.bf16.msra.mxu1 %v9821_v34  ;;  %v4142_v34 = vld [vmem:[#allocation2 + $0x7b] sm:$0xff]  ;;  %v2793_v62 = vadd.f32 %v11520_v51, %v11456_v11  ;;  %v4153_v51 = vld [vmem:[#allocation2 + $0xd3] sm:$0xff] }
 0x262   : > { %v8878_v41 = vpop.f32.mrf.mxu1  ;;  %v8902_v15 = vpop.f32.mrf.mxu0  ;;  %9247 = vmatprep.subr.bf16.mxu1 %v9885_v1  ;;  %v4155_v47 = vpack.c.bf16 %v4143_v26, %v4142_v34  ;;  %v2977_v26 = vadd.f32 %v11508_v40, %v2766_v55 }
 0x264   : > { %v11525_v37 = vpop.f32.mrf.mxu1  ;;  %v11527_v3 = vpop.f32.mrf.mxu0  ;;  %9112 = vmatmul.mubr.msk.bf16.gmra.mxu0 %vm1012_vm3, %v3842_v31  ;;  %9128 = vmatmul.mubr.msk.bf16.gmra.mxu1 %vm1012_vm3, %v3997_v56 }
 0x265   : > { %9115 = vmatprep.mubr.msk.bf16.mxu0 %vm9886_vm0, %v9885_v1  ;;  %9131 = vmatprep.mubr.msk.bf16.mxu1 %vm9886_vm0, %v9885_v1 }
 0x266   : > { %v8881_v35 = vpop.f32.mrf.mxu1  ;;  %v8905_v58 = vpop.f32.mrf.mxu0 }
 0x267   : > { %v2976_v35 = vadd.f32 %v11501_v24, %v2761_v30 }
 0x268   : > { %v11535_v29 = vpop.f32.mrf.mxu1  ;;  %v11537_v6 = vpop.f32.mrf.mxu0 }
 0x26a   : > { %v8882_v52 = vpop.f32.mrf.mxu1  ;;  %v8906_v12 = vpop.f32.mrf.mxu0 }
 0x26c   : > { %v11539_v28 = vpop.f32.mrf.mxu1  ;;  %v11541_v14 = vpop.f32.mrf.mxu0  ;;  %9116 = vmatmul.mubr.msk.bf16.gmra.mxu0 %vm1012_vm3, %v3843_v25  ;;  %9132 = vmatmul.mubr.msk.bf16.gmra.mxu1 %vm1012_vm3, %v3998_v50  ;;  %v3991_v25 = vld [vmem:[#allocation2 + $0xb1] sm:$0xff] }
 0x26d   : > { %9135 = vmatprep.mubr.msk.bf16.mxu1 %vm9886_vm0, %v9885_v1  ;;  %9155 = vmatprep.mubr.msk.bf16.mxu0 %vm9886_vm0, %v9885_v1  ;;  %v4144_v50 = vld [vmem:[#allocation2 + $0x8b] sm:$0xff]  ;;  %v4000_v13 = vpack.c.bf16 %v3992_v43, %v3991_v25  ;;  %v2979_v43 = vadd.f32 %v11527_v3, %v2774_v54  ;;  %v2980_v25 = vadd.f32 %v11537_v6, %v2777_v53  ;;  %v4151_v54 = vld [vmem:[#allocation2 + $0xc3] sm:$0xff] }
 0x26e   : > { %v8885_v48 = vpop.f32.mrf.mxu1  ;;  %v8909_v45 = vpop.f32.mrf.mxu0  ;;  %v4156_v24 = vpack.c.bf16 %v4145_v21, %v4144_v50  ;;  %v2981_v6 = vadd.f32 %v11541_v14, %v2782_v22  ;;  %v2798_v22 = vadd.f32 %v11525_v37, %v11461_v19 }
 0x270   : > { %v11549_v38 = vpop.f32.mrf.mxu1  ;;  %v11551_v9 = vpop.f32.mrf.mxu0 }
 0x272   : > { %v8886_v46 = vpop.f32.mrf.mxu1  ;;  %v8910_v16 = vpop.f32.mrf.mxu0 }
 0x274   : > { %v11559_v41 = vpop.f32.mrf.mxu0  ;;  %v3097_v15 = vpop.f32.mrf.mxu1  ;;  %9136 = vmatmul.mubr.msk.bf16.gmra.mxu1 %vm1012_vm3, %v3999_v10  ;;  %9156 = vmatmul.mubr.msk.bf16.vlgmr.msra.gmra.mxu0 %vm1012_vm3, %v4155_v47  ;;  %v2978_v10 = vadd.f32 %v11522_v57, %v2769_v27 }
 0x275   : > { %v3152_v8 = vadd.f32 %v3097_v15, %v2975_v5  ;;  %9139 = vmatprep.mubr.msk.bf16.mxu1 %vm9886_vm0, %v9885_v1  ;;  %9159 = vmatprep.mubr.msk.bf16.mxu0 %vm9886_vm0, %v9885_v1  ;;  %v4147_v5 = vld [vmem:[#allocation2 + $0xa3] sm:$0xff] }
 0x276   : > { %v8913_v31 = vpop.f32.mrf.mxu0  ;;  %v8933_v56 = vpop.f32.mrf.mxu1  ;;  %9216 = vmatpush3.bf16.msra.mxu0 %v9822_v18  ;;  %v3994_v18 = vld [vmem:[#allocation2 + $0xc9] sm:$0xff] }
 0x277   : > { %v3173_v58 = vadd.f32 %v11289_v36, %v3152_v8  ;;  %9217 = vmatprep.subr.bf16.mxu0 %v9885_v1  ;;  %v3993_v31 = vld [vmem:[#allocation2 + $0xc1] sm:$0xff] }
 0x278   : > { %v11575_v2 = vpop.f32.mrf.mxu0  ;;  %v3100_v0 = vpop.f32.mrf.mxu1  ;;  %v4146_v56 = vld [vmem:[#allocation2 + $0x9b] sm:$0xff] }
 0x279   : > { %v3187_v52 = vmax.f32 %v3173_v58, 0.0  ;;  %v3153_v12 = vadd.f32 %v3100_v0, %v2976_v35  ;;  %v4001_v58 = vpack.c.bf16 %v3994_v18, %v3993_v31  ;;  %v4157_v57 = vpack.c.bf16 %v4147_v5, %v4146_v56 }
 0x27a   : > { %v8914_v48 = vpop.f32.mrf.mxu0  ;;  %v8934_v45 = vpop.f32.mrf.mxu1  ;;  %9218 = vmatpush3.bf16.msra.mxu0 %v9824_v20  ;;  %v2982_v5 = vadd.f32 %v11551_v9, %v2785_v32  ;;  %v9823_v9 = vld [vmem:[%s12794_s3 + $0x68] sm:$0xff]  }
 0x27b   : > { %3201 = vst.msk [vmem:[#allocation2 + $0x150] sm:$0xff] %vm1012_vm3, %v3187_v52  ;;  %v3174_v23 = vadd.f32 %v11289_v36, %v3153_v12  ;;  %9279 = vmatprep.subr.bf16.mxu0 %v9885_v1  ;;  %v3995_v48 = vld [vmem:[#allocation2 + $0xd1] sm:$0x7] }
 0x27c   : > { %v11583_v17 = vpop.f32.mrf.mxu0  ;;  %v3105_v44 = vpop.f32.mrf.mxu1  ;;  %9140 = vmatmul.mubr.msk.bf16.gmra.mxu1 %vm1012_vm3, %v4000_v13  ;;  %9160 = vmatmul.mubr.msk.bf16.gmra.mxu0 %vm1012_vm3, %v4156_v24  ;;  %v4149_v45 = vld [vmem:[#allocation2 + $0xb3] sm:$0xff] }
 0x27d   : > { %v3188_v34 = vmax.f32 %v3174_v23, 0.0  ;;  %v3154_v46 = vadd.f32 %v3105_v44, %v2977_v26  ;;  %9143 = vmatprep.mubr.msk.bf16.mxu1 %vm9886_vm0, %v9885_v1  ;;  %9163 = vmatprep.mubr.msk.bf16.mxu0 %vm9886_vm0, %v9885_v1  ;;  %v4148_v23 = vld [vmem:[#allocation2 + $0xab] sm:$0xff] }
 0x27e   : > { %v8917_v40 = vpop.f32.mrf.mxu0  ;;  %v8937_v16 = vpop.f32.mrf.mxu1 }
 0x27f   : > { %3202 = vst.msk [vmem:[#allocation2 + $0x158] sm:$0xff] %vm1012_vm3, %v3188_v34  ;;  %v3175_v47 = vadd.f32 %v11289_v36, %v3154_v46  ;;  %v4002_v34 = vpack.c.bf16 %v3995_v48, %v3995_v48  ;;  %v4158_v46 = vpack.c.bf16 %v4149_v45, %v4148_v23  ;;  %v4304_v48 = vld [vmem:[#allocation2 + $0x94] sm:$0xff]  ;;  %v4152_v23 = vld [vmem:[#allocation2 + $0xcb] sm:$0xff] }
 0x280   : > { %v11596_v15 = vpop.f32.mrf.mxu0  ;;  %v3108_v59 = vpop.f32.mrf.mxu1 }
 0x281   : > { %v3189_v30 = vmax.f32 %v3175_v47, 0.0  ;;  %v3155_v8 = vadd.f32 %v3108_v59, %v2978_v10 }
 0x282   : > { %v8918_v20 = vpop.f32.mrf.mxu0  ;;  %v8938_v35 = vpop.f32.mrf.mxu1 }
 0x283   : > { %3203 = vst.msk [vmem:[#allocation2 + $0x160] sm:$0xff] %vm1012_vm3, %v3189_v30  ;;  %v3176_v21 = vadd.f32 %v11289_v36, %v3155_v8  ;;  %v4302_v30 = vld [vmem:[#allocation2 + $0x84] sm:$0xff]  ;;  %v4150_v20 = vld [vmem:[#allocation2 + $0xbb] sm:$0xff] }
 0x284   : > { %v11603_v0 = vpop.f32.mrf.mxu0  ;;  %v3113_v55 = vpop.f32.mrf.mxu1  ;;  %9144 = vmatmul.mubr.msk.bf16.gmra.mxu1 %vm1012_vm3, %v4001_v58  ;;  %9164 = vmatmul.mubr.msk.bf16.gmra.mxu0 %vm1012_vm3, %v4157_v57  ;;  %v4301_v35 = vld [vmem:[#allocation2 + $0x7c] sm:$0xff] }
 0x285   : > { %v3190_v39 = vmax.f32 %v3176_v21, 0.0  ;;  %v3156_v52 = vadd.f32 %v3113_v55, %v2979_v43  ;;  %9147 = vmatprep.mubr.msk.bf16.mxu1 %vm9886_vm0, %v9885_v1  ;;  %9167 = vmatprep.mubr.msk.bf16.mxu0 %vm9886_vm0, %v9885_v1  ;;  %v4159_v43 = vpack.c.bf16 %v4151_v54, %v4150_v20  ;;  %v4314_v21 = vpack.c.bf16 %v4302_v30, %v4301_v35 }
 0x286   : > { %v8921_v3 = vpop.f32.mrf.mxu0  ;;  %v8941_v12 = vpop.f32.mrf.mxu1  ;;  %v2983_v55 = vadd.f32 %v11559_v41, %v2790_v42  ;;  %v9825_v41 = vld [vmem:[%s12794_s3 + $0x60] sm:$0xff]  }
 0x287   : > { %3204 = vst.msk [vmem:[#allocation2 + $0x168] sm:$0xff] %vm1012_vm3, %v3190_v39  ;;  %v3177_v50 = vadd.f32 %v11289_v36, %v3156_v52  ;;  %v4305_v42 = vld [vmem:[#allocation2 + $0x9c] sm:$0xff] }
 0x288   : > { %v11616_v13 = vpop.f32.mrf.mxu0  ;;  %v3116_v33 = vpop.f32.mrf.mxu1 }
 0x289   : > { %v3191_v24 = vmax.f32 %v3177_v50, 0.0  ;;  %v3157_v26 = vadd.f32 %v3116_v33, %v2980_v25  ;;  %v2984_v50 = vadd.f32 %v11575_v2, %v2793_v62  ;;  %v4160_v2 = vpack.c.bf16 %v4153_v51, %v4152_v23  ;;  %v4461_v62 = vld [vmem:[#allocation2 + $0xe8] sm:$0xff] }
 0x28a   : > { %v8922_v44 = vpop.f32.mrf.mxu0  ;;  %v8942_v27 = vpop.f32.mrf.mxu1 }
 0x28b   : > { %3205 = vst.msk [vmem:[#allocation2 + $0x170] sm:$0xff] %vm1012_vm3, %v3191_v24  ;;  %v3178_v40 = vadd.f32 %v11289_v36, %v3157_v26  ;;  %v4303_v44 = vld [vmem:[#allocation2 + $0x8c] sm:$0xff] }
 0x28c   : > { %v3121_v16 = vpop.f32.mrf.mxu1  ;;  %v11623_v10 = vpop.f32.mrf.mxu0  ;;  %9148 = vmatmul.mubr.msk.bf16.gmra.mxu1 %vm1012_vm3, %v4002_v34  ;;  %9168 = vmatmul.mubr.msk.bf16.gmra.mxu0 %vm1012_vm3, %v4158_v46  ;;  %v4315_v46 = vpack.c.bf16 %v4304_v48, %v4303_v44 }
 0x28d   : > { %v3192_v4 = vmax.f32 %v3178_v40, 0.0  ;;  %v3158_v47 = vadd.f32 %v3121_v16, %v2981_v6  ;;  %9171 = vmatprep.mubr.msk.bf16.mxu0 %vm9886_vm0, %v9885_v1  ;;  %9187 = vmatprep.mubr.msk.bf16.mxu1 %vm9886_vm0, %v9885_v1  ;;  %v9876_v6 = vld [vmem:[%s12793_s2] ss:$0 sm:$0xff]  ;;  %v2801_v16 = vadd.f32 %v11535_v29, %v11471_v49  ;;  %v2806_v49 = vadd.f32 %v11539_v28, %v11475_v60 }
 0x28e   : > { %v8945_v14 = vpop.f32.mrf.mxu1  ;;  %v8965_v18 = vpop.f32.mrf.mxu0  ;;  %v2809_v60 = vadd.f32 %v11549_v38, %v11485_v61 }
 0x28f   : > { %3206 = vst.msk [vmem:[#allocation2 + $0x178] sm:$0xff] %vm1012_vm3, %v3192_v4  ;;  %v3179_v59 = vadd.f32 %v11289_v36, %v3158_v47  ;;  %v2986_v14 = vadd.f32 %v11596_v15, %v2801_v16  ;;  %v2987_v15 = vadd.f32 %v11603_v0, %v2806_v49 }
 0x290   : > { %v3124_v8 = vpop.f32.mrf.mxu1  ;;  %v11636_v7 = vpop.f32.mrf.mxu0 }
 0x291   : > { %v3193_v31 = vmax.f32 %v3179_v59, 0.0  ;;  %v3159_v56 = vadd.f32 %v3124_v8, %v2982_v5  ;;  %v4154_v5 = vld [vmem:[#allocation2 + $0xdb] sm:$0x7]  ;;  %v4306_v59 = vld [vmem:[#allocation2 + $0xa4] sm:$0xff] }
 0x292   : > { %v8946_v58 = vpop.f32.mrf.mxu1  ;;  %v8966_v57 = vpop.f32.mrf.mxu0  ;;  %v4161_v20 = vpack.c.bf16 %v4154_v5, %v4154_v5  ;;  %v4316_v35 = vpack.c.bf16 %v4306_v59, %v4305_v42  ;;  %v4312_v5 = vld [vmem:[#allocation2 + $0xd4] sm:$0xff]  ;;  %v4465_v59 = vld [vmem:[#allocation2 + $0x108] sm:$0xff]  ;;  %v4464_v42 = vld [vmem:[#allocation2 + $0x100] sm:$0xff] }
 0x293   : > { %3207 = vst.msk [vmem:[#allocation2 + $0x180] sm:$0xff] %vm1012_vm3, %v3193_v31  ;;  %v3180_v53 = vadd.f32 %v11289_v36, %v3159_v56 }
 0x294   : > { %v3129_v39 = vpop.f32.mrf.mxu1  ;;  %v11646_v63 = vpop.f32.mrf.mxu0  ;;  %9172 = vmatmul.mubr.msk.bf16.gmra.mxu0 %vm1012_vm3, %v4159_v43  ;;  %9188 = vmatmul.mubr.msk.bf16.vlgmr.msra.gmra.mxu1 %vm1012_vm3, %v4314_v21 }
 0x295   : > { %v3194_v52 = vmax.f32 %v3180_v53, 0.0  ;;  %v3160_v3 = vadd.f32 %v3129_v39, %v2983_v55  ;;  %9248 = vmatpush3.bf16.msra.mxu1 %v9823_v9  ;;  %9175 = vmatprep.mubr.msk.bf16.mxu0 %vm9886_vm0, %v9885_v1  ;;  %v2988_v55 = vadd.f32 %v11616_v13, %v2809_v60  ;;  %v4308_v39 = vld [vmem:[#allocation2 + $0xb4] sm:$0xff]  ;;  %v9826_v13 = vld [vmem:[%s12794_s3 + $0xc8] sm:$0xff]   ;;  %v4313_v60 = vld [vmem:[#allocation2 + $0xdc] sm:$0x7] }
 0x296   : > { %v8949_v12 = vpop.f32.mrf.mxu1  ;;  %v8969_v25 = vpop.f32.mrf.mxu0  ;;  %9191 = vmatprep.mubr.msk.bf16.mxu1 %vm9886_vm0, %v9885_v1  ;;  %9249 = vmatprep.subr.bf16.mxu1 %v9885_v1 }
 0x297   : > { %3208 = vst.msk [vmem:[#allocation2 + $0x188] sm:$0xff] %vm1012_vm3, %v3194_v52  ;;  %v3181_v11 = vadd.f32 %v11289_v36, %v3160_v3  ;;  %v2985_v36 = vadd.f32 %v11583_v17, %v2798_v22  ;;  %v4460_v12 = vld [vmem:[#allocation2 + $0xe0] sm:$0xff] }
 0x298   : > { %v3132_v45 = vpop.f32.mrf.mxu1  ;;  %v11663_v33 = vpop.f32.mrf.mxu0  ;;  %v4473_v51 = vpack.c.bf16 %v4461_v62, %v4460_v12 }
 0x299   : > { %v3195_v24 = vmax.f32 %v3181_v11, 0.0  ;;  %v3161_v26 = vadd.f32 %v3132_v45, %v2984_v50  ;;  %9250 = vmatpush3.bf16.msra.mxu1 %v9825_v41  ;;  %v4307_v41 = vld [vmem:[#allocation2 + $0xac] sm:$0xff] }
 0x29a   : > { %v8950_v27 = vpop.f32.mrf.mxu1  ;;  %v8970_v34 = vpop.f32.mrf.mxu0  ;;  %9311 = vmatprep.subr.bf16.mxu1 %v9885_v1  ;;  %v4317_v11 = vpack.c.bf16 %v4308_v39, %v4307_v41 }
 0x29b   : > { %3209 = vst.msk [vmem:[#allocation2 + $0x190] sm:$0xff] %vm1012_vm3, %v3195_v24  ;;  %v3182_v19 = vadd.f32 %v9876_v6, %v3161_v26  ;;  %v9828_v27 = vld [vmem:[%s12794_s3 + $0xc0] sm:$0xff]  }
 0x29c   : > { %v3137_v37 = vpop.f32.mrf.mxu1  ;;  %v11673_v40 = vpop.f32.mrf.mxu0  ;;  %9176 = vmatmul.mubr.msk.bf16.gmra.mxu0 %vm1012_vm3, %v4160_v2  ;;  %9192 = vmatmul.mubr.msk.bf16.gmra.mxu1 %vm1012_vm3, %v4315_v46  ;;  %v4310_v34 = vld [vmem:[#allocation2 + $0xc4] sm:$0xff]  ;;  %v4463_v2 = vld [vmem:[#allocation2 + $0xf8] sm:$0xff] }
 0x29d   : > { %v3196_v32 = vmax.f32 %v3182_v19, 0.0  ;;  %v3162_v4 = vadd.f32 %v3137_v37, %v2985_v36  ;;  %9179 = vmatprep.mubr.msk.bf16.mxu0 %vm9886_vm0, %v9885_v1  ;;  %9195 = vmatprep.mubr.msk.bf16.mxu1 %vm9886_vm0, %v9885_v1  ;;  %v4462_v19 = vld [vmem:[#allocation2 + $0xf0] sm:$0xff] }
 0x29e   : > { %v8953_v17 = vpop.f32.mrf.mxu1  ;;  %v8973_v47 = vpop.f32.mrf.mxu0 }
 0x29f   : > { %3210 = vst.msk [vmem:[#allocation2 + $0x198] sm:$0xff] %vm1012_vm3, %v3196_v32  ;;  %v3183_v18 = vadd.f32 %v9876_v6, %v3162_v4  ;;  %v4474_v4 = vpack.c.bf16 %v4463_v2, %v4462_v19 }
 0x2a0   : > { %v3140_v54 = vpop.f32.mrf.mxu1  ;;  %v11685_v30 = vpop.f32.mrf.mxu0 }
 0x2a1   : > { %v3197_v29 = vmax.f32 %v3183_v18, 0.0  ;;  %v3163_v8 = vadd.f32 %v3140_v54, %v2986_v14 }
 0x2a2   : > { %v8954_v31 = vpop.f32.mrf.mxu1  ;;  %v8974_v56 = vpop.f32.mrf.mxu0 }
 0x2a3   : > { %3211 = vst.msk [vmem:[#allocation2 + $0x1a0] sm:$0xff] %vm1012_vm3, %v3197_v29  ;;  %v3184_v9 = vadd.f32 %v9876_v6, %v3163_v8  ;;  %v4311_v8 = vld [vmem:[#allocation2 + $0xcc] sm:$0xff] }
 0x2a4   : > { %v3145_v58 = vpop.f32.mrf.mxu1  ;;  %v11691_v57 = vpop.f32.mrf.mxu0  ;;  %9180 = vmatmul.mubr.msk.bf16.gmra.mxu0 %vm1012_vm3, %v4161_v20  ;;  %9196 = vmatmul.mubr.msk.bf16.gmra.mxu1 %vm1012_vm3, %v4316_v35  ;;  %v4319_v56 = vpack.c.bf16 %v4312_v5, %v4311_v8  ;;  %v4475_v20 = vpack.c.bf16 %v4465_v59, %v4464_v42 }
 0x2a5   : > { %v3198_v28 = vmax.f32 %v3184_v9, 0.0  ;;  %v3164_v43 = vadd.f32 %v3145_v58, %v2987_v15  ;;  %9199 = vmatprep.mubr.msk.bf16.mxu1 %vm9886_vm0, %v9885_v1  ;;  %9219 = vmatprep.mubr.msk.bf16.mxu0 %vm9886_vm0, %v9885_v1 }
 0x2a6   : > { %v8957_v0 = vpop.f32.mrf.mxu1  ;;  %v8977_v21 = vpop.f32.mrf.mxu0 }
 0x2a7   : > { %3212 = vst.msk [vmem:[#allocation2 + $0x1a8] sm:$0xff] %vm1012_vm3, %v3198_v28  ;;  %v3185_v53 = vadd.f32 %v9876_v6, %v3164_v43  ;;  %v4467_v28 = vld [vmem:[#allocation2 + $0x118] sm:$0xff] }
 0x2a8   : > { %v3148_v52 = vpop.f32.mrf.mxu1  ;;  %v11703_v3 = vpop.f32.mrf.mxu0 }
 0x2a9   : > { %v3199_v61 = vmax.f32 %v3185_v53, 0.0  ;;  %v3165_v38 = vadd.f32 %v3148_v52, %v2988_v55  ;;  %v4466_v55 = vld [vmem:[#allocation2 + $0x110] sm:$0xff] }
 0x2aa   : > { %v8958_v25 = vpop.f32.mrf.mxu1  ;;  %v8978_v50 = vpop.f32.mrf.mxu0  ;;  %v4476_v62 = vpack.c.bf16 %v4467_v28, %v4466_v55 }
 0x2ab   : > { %3213 = vst.msk [vmem:[#allocation2 + $0x1b0] sm:$0xff] %vm1012_vm3, %v3199_v61  ;;  %v3186_v48 = vadd.f32 %v9876_v6, %v3165_v38  ;;  %v4309_v6 = vld [vmem:[#allocation2 + $0xbc] sm:$0xff]  ;;  %v4469_v25 = vld [vmem:[#allocation2 + $0x128] sm:$0xff] }
 0x2ac   : > { %v11709_v45 = vpop.f32.mrf.mxu0  ;;  %v3452_v22 = vpop.f32.mrf.mxu1  ;;  %9200 = vmatmul.mubr.msk.bf16.gmra.mxu1 %vm1012_vm3, %v4317_v11  ;;  %9220 = vmatmul.mubr.msk.bf16.vlgmr.msra.gmra.mxu0 %vm1012_vm3, %v4473_v51  ;;  %v4318_v32 = vpack.c.bf16 %v4310_v34, %v4309_v6  ;;  %v4620_v50 = vld [vmem:[#allocation2 + $0xe9] sm:$0xff] }
 0x2ad   : > { %v3200_v24 = vmax.f32 %v3186_v48, 0.0  ;;  %v11714_v26 = vadd.f32 %v3452_v22, %v11623_v10  ;;  %9203 = vmatprep.mubr.msk.bf16.mxu1 %vm9886_vm0, %v9885_v1  ;;  %9223 = vmatprep.mubr.msk.bf16.mxu0 %vm9886_vm0, %v9885_v1  ;;  %v4468_v48 = vld [vmem:[#allocation2 + $0x120] sm:$0xff] }
 0x2ae   : > { %v8981_v23 = vpop.f32.mrf.mxu0  ;;  %v8997_v44 = vpop.f32.mrf.mxu1  ;;  %9280 = vmatpush3.bf16.msra.mxu0 %v9826_v13  ;;  %v4619_v22 = vld [vmem:[#allocation2 + $0xe1] sm:$0xff] }
 0x2af   : > { %3214 = vst.msk [vmem:[#allocation2 + $0x1b8] sm:$0x3f] %vm1026_vm4, %v3200_v24  ;;  %9281 = vmatprep.subr.bf16.mxu0 %v9885_v1  ;;  %v9827_v24 = vld [vmem:[%s12794_s3 + $0xe8] sm:$0xff]   ;;  %v4477_v44 = vpack.c.bf16 %v4469_v25, %v4468_v48  ;;  %v9830_v48 = vld [vmem:[%s12794_s3 + $0x58] sm:$0xff]  }
 0x2b0   : > { %v11725_v10 = vpop.f32.mrf.mxu0  ;;  %v3455_v46 = vpop.f32.mrf.mxu1  ;;  %v4778_v25 = vld [vmem:[#allocation2 + $0xeb] sm:$0xff] }
 0x2b1   : > { %v11728_v36 = vadd.f32 %v3455_v46, %v11636_v7 }
 0x2b2   : > { %v8982_v37 = vpop.f32.mrf.mxu0  ;;  %v8998_v16 = vpop.f32.mrf.mxu1  ;;  %9282 = vmatpush3.bf16.msra.mxu0 %v9828_v27  ;;  %v4632_v27 = vpack.c.bf16 %v4620_v50, %v4619_v22 }
 0x2b3   : > { %9343 = vmatprep.subr.bf16.mxu0 %v9885_v1  ;;  %v4622_v37 = vld [vmem:[#allocation2 + $0xf9] sm:$0xff] }
 0x2b4   : > { %v11731_v17 = vpop.f32.mrf.mxu0  ;;  %v3460_v47 = vpop.f32.mrf.mxu1  ;;  %9204 = vmatmul.mubr.msk.bf16.gmra.mxu1 %vm1012_vm3, %v4318_v32  ;;  %9224 = vmatmul.mubr.msk.bf16.gmra.mxu0 %vm1012_vm3, %v4474_v4 }
 0x2b5   : > { %v11736_v14 = vadd.f32 %v3460_v47, %v11646_v63  ;;  %9207 = vmatprep.mubr.msk.bf16.mxu1 %vm9886_vm0, %v9885_v1  ;;  %9227 = vmatprep.mubr.msk.bf16.mxu0 %vm9886_vm0, %v9885_v1 }
 0x2b6   : > { %v8985_v7 = vpop.f32.mrf.mxu0  ;;  %v9001_v18 = vpop.f32.mrf.mxu1 }
 0x2b7   : > { %v4621_v7 = vld [vmem:[#allocation2 + $0xf1] sm:$0xff] }
 0x2b8   : > { %v11742_v54 = vpop.f32.mrf.mxu0  ;;  %v3463_v49 = vpop.f32.mrf.mxu1 }
 0x2b9   : > { %v11745_v29 = vadd.f32 %v3463_v49, %v11663_v33  ;;  %v4633_v49 = vpack.c.bf16 %v4622_v37, %v4621_v7 }
 0x2ba   : > { %v8986_v63 = vpop.f32.mrf.mxu0  ;;  %v9002_v31 = vpop.f32.mrf.mxu1 }
 0x2bc   : > { %v11747_v35 = vpop.f32.mrf.mxu0  ;;  %v3468_v15 = vpop.f32.mrf.mxu1  ;;  %9208 = vmatmul.mubr.msk.bf16.gmra.mxu1 %vm1012_vm3, %v4319_v56  ;;  %9228 = vmatmul.mubr.msk.bf16.gmra.mxu0 %vm1012_vm3, %v4475_v20  ;;  %v4472_v56 = vld [vmem:[#allocation2 + $0x140] sm:$0x7]  ;;  %v4624_v20 = vld [vmem:[#allocation2 + $0x109] sm:$0xff] }
 0x2bd   : > { %v11752_v9 = vadd.f32 %v3468_v15, %v11673_v40  ;;  %9211 = vmatprep.mubr.msk.bf16.mxu1 %vm9886_vm0, %v9885_v1  ;;  %9231 = vmatprep.mubr.msk.bf16.mxu0 %vm9886_vm0, %v9885_v1  ;;  %v4320_v40 = vpack.c.bf16 %v4313_v60, %v4313_v60 }
 0x2be   : > { %v8989_v33 = vpop.f32.mrf.mxu0  ;;  %v9005_v58 = vpop.f32.mrf.mxu1 }
 0x2c0   : > { %v3382_v43 = vpop.f32.mrf.mxu0  ;;  %v3471_v0 = vpop.f32.mrf.mxu1 }
 0x2c1   : > { %v11759_v21 = vadd.f32 %v3471_v0, %v11685_v30  ;;  %v4479_v43 = vpack.c.bf16 %v4472_v56, %v4472_v56  ;;  %v4782_v56 = vld [vmem:[#allocation2 + $0x10b] sm:$0xff] }
 0x2c2   : > { %v8990_v53 = vpop.f32.mrf.mxu0  ;;  %v9006_v39 = vpop.f32.mrf.mxu1 }
 0x2c4   : > { %v3476_v52 = vpop.f32.mrf.mxu1  ;;  %v3598_v61 = vpop.f32.mrf.mxu0  ;;  %9212 = vmatmul.mubr.msk.bf16.gmra.mxu1 %vm1012_vm3, %v4320_v40  ;;  %9232 = vmatmul.mubr.msk.bf16.gmra.mxu0 %vm1012_vm3, %v4476_v62  ;;  %v4626_v62 = vld [vmem:[#allocation2 + $0x119] sm:$0xff] }
 0x2c5   : > { %v11764_v38 = vadd.f32 %v3476_v52, %v11691_v57  ;;  %v11767_v41 = vadd.f32 %v3598_v61, %v11714_v26  ;;  %9235 = vmatprep.mubr.msk.bf16.mxu0 %vm9886_vm0, %v9885_v1  ;;  %9251 = vmatprep.mubr.msk.bf16.mxu1 %vm9886_vm0, %v9885_v1  ;;  %v4779_v52 = vld [vmem:[#allocation2 + $0xf3] sm:$0xff] }
 0x2c6   : > { %v9009_v30 = vpop.f32.mrf.mxu1  ;;  %v9029_v12 = vpop.f32.mrf.mxu0 }
 0x2c8   : > { %v3479_v11 = vpop.f32.mrf.mxu1  ;;  %v3601_v51 = vpop.f32.mrf.mxu0 }
 0x2c9   : > { %v11774_v13 = vadd.f32 %v3479_v11, %v11703_v3  ;;  %v11777_v57 = vadd.f32 %v3601_v51, %v11728_v36  ;;  %v9829_v36 = vld [vmem:[%s12794_s3 + $0xe0] sm:$0xff]   ;;  %v4791_v51 = vpack.c.bf16 %v4779_v52, %v4778_v25 }
 0x2ca   : > { %v9010_v26 = vpop.f32.mrf.mxu1  ;;  %v9030_v23 = vpop.f32.mrf.mxu0 }
 0x2cc   : > { %v3484_v34 = vpop.f32.mrf.mxu1  ;;  %v3606_v2 = vpop.f32.mrf.mxu0  ;;  %9236 = vmatmul.mubr.msk.bf16.gmra.mxu0 %vm1012_vm3, %v4477_v44  ;;  %9252 = vmatmul.mubr.msk.bf16.vlgmr.msra.gmra.mxu1 %vm1012_vm3, %v4632_v27  ;;  %v9832_v27 = vld [vmem:[%s12794_s3 + $0x50] sm:$0xff]  }
 0x2cd   : > { %v11785_v3 = vadd.f32 %v3484_v34, %v11709_v45  ;;  %v11788_v46 = vadd.f32 %v3606_v2, %v11736_v14  ;;  %9312 = vmatpush3.bf16.msra.mxu1 %v9827_v24  ;;  %9239 = vmatprep.mubr.msk.bf16.mxu0 %vm9886_vm0, %v9885_v1  ;;  %v4471_v45 = vld [vmem:[#allocation2 + $0x138] sm:$0xff]  ;;  %v4470_v14 = vld [vmem:[#allocation2 + $0x130] sm:$0xff]  ;;  %v4781_v2 = vld [vmem:[#allocation2 + $0x103] sm:$0xff] }
 0x2ce   : > { %v9013_v6 = vpop.f32.mrf.mxu1  ;;  %v9033_v19 = vpop.f32.mrf.mxu0  ;;  %9255 = vmatprep.mubr.msk.bf16.mxu1 %vm9886_vm0, %v9885_v1  ;;  %9313 = vmatprep.subr.bf16.mxu1 %v9885_v1  ;;  %v4478_v59 = vpack.c.bf16 %v4471_v45, %v4470_v14  ;;  %v4628_v34 = vld [vmem:[#allocation2 + $0x129] sm:$0xff]  ;;  %v4780_v45 = vld [vmem:[#allocation2 + $0xfb] sm:$0xff] }
 0x2cf   : > { %v4627_v19 = vld [vmem:[#allocation2 + $0x121] sm:$0xff]  ;;  %v4792_v14 = vpack.c.bf16 %v4781_v2, %v4780_v45 }
 0x2d0   : > { %v3487_v16 = vpop.f32.mrf.mxu1  ;;  %v3609_v32 = vpop.f32.mrf.mxu0 }
 0x2d1   : > { %v11799_v4 = vadd.f32 %v3487_v16, %v11725_v10  ;;  %v11802_v47 = vadd.f32 %v3609_v32, %v11745_v29  ;;  %9314 = vmatpush3.bf16.msra.mxu1 %v9829_v36  ;;  %v4636_v32 = vpack.c.bf16 %v4628_v34, %v4627_v19 }
 0x2d2   : > { %v9014_v18 = vpop.f32.mrf.mxu1  ;;  %v9034_v5 = vpop.f32.mrf.mxu0  ;;  %9375 = vmatprep.subr.bf16.mxu1 %v9885_v1 }
 0x2d4   : > { %v3492_v8 = vpop.f32.mrf.mxu1  ;;  %v3614_v42 = vpop.f32.mrf.mxu0  ;;  %9240 = vmatmul.mubr.msk.bf16.gmra.mxu0 %vm1012_vm3, %v4478_v59  ;;  %9256 = vmatmul.mubr.msk.bf16.gmra.mxu1 %vm1012_vm3, %v4633_v49  ;;  %v4630_v49 = vld [vmem:[#allocation2 + $0x139] sm:$0xff] }
 0x2d5   : > { %v11808_v10 = vadd.f32 %v3492_v8, %v11731_v17  ;;  %v11811_v29 = vadd.f32 %v3614_v42, %v11752_v9  ;;  %9243 = vmatprep.mubr.msk.bf16.mxu0 %vm9886_vm0, %v9885_v1  ;;  %9259 = vmatprep.mubr.msk.bf16.mxu1 %vm9886_vm0, %v9885_v1  ;;  %v4623_v9 = vld [vmem:[#allocation2 + $0x101] sm:$0xff]  ;;  %v4783_v8 = vld [vmem:[#allocation2 + $0x113] sm:$0xff] }
 0x2d6   : > { %v9017_v63 = vpop.f32.mrf.mxu1  ;;  %v9037_v31 = vpop.f32.mrf.mxu0  ;;  %v4634_v0 = vpack.c.bf16 %v4624_v20, %v4623_v9  ;;  %v4793_v9 = vpack.c.bf16 %v4783_v8, %v4782_v56 }
 0x2d8   : > { %v3495_v15 = vpop.f32.mrf.mxu1  ;;  %v3617_v33 = vpop.f32.mrf.mxu0 }
 0x2d9   : > { %v11818_v58 = vadd.f32 %v3495_v15, %v11742_v54  ;;  %v11821_v17 = vadd.f32 %v3617_v33, %v11759_v21 }
 0x2da   : > { %v9018_v60 = vpop.f32.mrf.mxu1  ;;  %v9038_v28 = vpop.f32.mrf.mxu0 }
 0x2dc   : > { %v3500_v55 = vpop.f32.mrf.mxu1  ;;  %v3622_v53 = vpop.f32.mrf.mxu0  ;;  %9244 = vmatmul.mubr.msk.bf16.gmra.mxu0 %vm1012_vm3, %v4479_v43  ;;  %9260 = vmatmul.mubr.msk.bf16.gmra.mxu1 %vm1012_vm3, %v4634_v0 }
 0x2dd   : > { %v11826_v39 = vadd.f32 %v3500_v55, %v11747_v35  ;;  %v11829_v54 = vadd.f32 %v3622_v53, %v11764_v38  ;;  %9263 = vmatprep.mubr.msk.bf16.mxu1 %vm9886_vm0, %v9885_v1  ;;  %9283 = vmatprep.mubr.msk.bf16.mxu0 %vm9886_vm0, %v9885_v1  ;;  %v4625_v35 = vld [vmem:[#allocation2 + $0x111] sm:$0xff]  ;;  %v4631_v55 = vld [vmem:[#allocation2 + $0x141] sm:$0x7] }
 0x2de   : > { %v9021_v21 = vpop.f32.mrf.mxu1  ;;  %v9041_v40 = vpop.f32.mrf.mxu0  ;;  %v4635_v11 = vpack.c.bf16 %v4626_v62, %v4625_v35  ;;  %v4785_v53 = vld [vmem:[#allocation2 + $0x123] sm:$0xff] }
 0x2e0   : > { %v3503_v61 = vpop.f32.mrf.mxu1  ;;  %v3625_v30 = vpop.f32.mrf.mxu0 }
 0x2e1   : > { %v11836_v12 = vadd.f32 %v3625_v30, %v11774_v13 }
 0x2e2   : > { %v9022_v50 = vpop.f32.mrf.mxu1  ;;  %v9042_v38 = vpop.f32.mrf.mxu0 }
 0x2e4   : > { %v3630_v22 = vpop.f32.mrf.mxu0  ;;  %v3757_v24 = vpop.f32.mrf.mxu1  ;;  %9264 = vmatmul.mubr.msk.bf16.gmra.mxu1 %vm1012_vm3, %v4635_v11  ;;  %9284 = vmatmul.mubr.msk.bf16.vlgmr.msra.gmra.mxu0 %vm1012_vm3, %v4791_v51  ;;  %v4787_v51 = vld [vmem:[#allocation2 + $0x133] sm:$0xff] }
 0x2e5   : > { %v11844_v26 = vadd.f32 %v3630_v22, %v11785_v3  ;;  %v11847_v13 = vadd.f32 %v3757_v24, %v11767_v41  ;;  %9267 = vmatprep.mubr.msk.bf16.mxu1 %vm9886_vm0, %v9885_v1  ;;  %9287 = vmatprep.mubr.msk.bf16.mxu0 %vm9886_vm0, %v9885_v1 }
 0x2e6   : > { %v9045_v23 = vpop.f32.mrf.mxu0  ;;  %v9061_v44 = vpop.f32.mrf.mxu1  ;;  %9344 = vmatpush3.bf16.msra.mxu0 %v9830_v48  ;;  %v4938_v48 = vld [vmem:[#allocation2 + $0xf4] sm:$0xff] }
 0x2e7   : > { %9345 = vmatprep.subr.bf16.mxu0 %v9885_v1  ;;  %v4937_v44 = vld [vmem:[#allocation2 + $0xec] sm:$0xff] }
 0x2e8   : > { %v3633_v3 = vpop.f32.mrf.mxu0  ;;  %v3760_v41 = vpop.f32.mrf.mxu1 }
 0x2e9   : > { %v11858_v36 = vadd.f32 %v3633_v3, %v11799_v4  ;;  %v11861_v6 = vadd.f32 %v3760_v41, %v11777_v57  ;;  %v4950_v41 = vpack.c.bf16 %v4938_v48, %v4937_v44 }
 0x2ea   : > { %v9046_v37 = vpop.f32.mrf.mxu0  ;;  %v9062_v16 = vpop.f32.mrf.mxu1  ;;  %9346 = vmatpush3.bf16.msra.mxu0 %v9832_v27  ;;  %v9831_v27 = vld [vmem:[%s12794_s3 + $0x78] sm:$0xff]  }
 0x2eb   : > { %9407 = vmatprep.subr.bf16.mxu0 %v9885_v1  ;;  %v9833_v37 = vld [vmem:[%s12794_s3 + $0x70] sm:$0xff]  }
 0x2ec   : > { %v3638_v7 = vpop.f32.mrf.mxu0  ;;  %v3765_v18 = vpop.f32.mrf.mxu1  ;;  %9268 = vmatmul.mubr.msk.bf16.gmra.mxu1 %vm1012_vm3, %v4636_v32  ;;  %9288 = vmatmul.mubr.msk.bf16.gmra.mxu0 %vm1012_vm3, %v4792_v14  ;;  %v4940_v14 = vld [vmem:[#allocation2 + $0x104] sm:$0xff] }
 0x2ed   : > { %v11867_v4 = vadd.f32 %v3638_v7, %v11808_v10  ;;  %v11870_v57 = vadd.f32 %v3765_v18, %v11788_v46  ;;  %9271 = vmatprep.mubr.msk.bf16.mxu1 %vm9886_vm0, %v9885_v1  ;;  %9291 = vmatprep.mubr.msk.bf16.mxu0 %vm9886_vm0, %v9885_v1  ;;  %v4629_v46 = vld [vmem:[#allocation2 + $0x131] sm:$0xff] }
 0x2ee   : > { %v9049_v5 = vpop.f32.mrf.mxu0  ;;  %v9065_v59 = vpop.f32.mrf.mxu1  ;;  %v4637_v33 = vpack.c.bf16 %v4630_v49, %v4629_v46  ;;  %v4939_v49 = vld [vmem:[#allocation2 + $0xfc] sm:$0xff] }
 0x2ef   : > { %v4788_v59 = vld [vmem:[#allocation2 + $0x13b] sm:$0xff]  ;;  %v4951_v46 = vpack.c.bf16 %v4940_v14, %v4939_v49 }
 0x2f0   : > { %v3641_v42 = vpop.f32.mrf.mxu0  ;;  %v3768_v63 = vpop.f32.mrf.mxu1 }
 0x2f1   : > { %v11877_v31 = vadd.f32 %v3641_v42, %v11818_v58  ;;  %v11880_v10 = vadd.f32 %v3768_v63, %v11802_v47 }
 0x2f2   : > { %v9050_v20 = vpop.f32.mrf.mxu0  ;;  %v9066_v15 = vpop.f32.mrf.mxu1 }
 0x2f4   : > { %v3646_v60 = vpop.f32.mrf.mxu0  ;;  %v3773_v28 = vpop.f32.mrf.mxu1  ;;  %9272 = vmatmul.mubr.msk.bf16.gmra.mxu1 %vm1012_vm3, %v4637_v33  ;;  %9292 = vmatmul.mubr.msk.bf16.gmra.mxu0 %vm1012_vm3, %v4793_v9  ;;  %v4790_v9 = vld [vmem:[#allocation2 + $0x14b] sm:$0x7] }
 0x2f5   : > { %v11885_v43 = vadd.f32 %v3646_v60, %v11826_v39  ;;  %v11888_v58 = vadd.f32 %v3773_v28, %v11811_v29  ;;  %9275 = vmatprep.mubr.msk.bf16.mxu1 %vm9886_vm0, %v9885_v1  ;;  %9295 = vmatprep.mubr.msk.bf16.mxu0 %vm9886_vm0, %v9885_v1  ;;  %v4784_v39 = vld [vmem:[#allocation2 + $0x11b] sm:$0xff]  ;;  %v4638_v29 = vpack.c.bf16 %v4631_v55, %v4631_v55 }
 0x2f6   : > { %v9053_v47 = vpop.f32.mrf.mxu0  ;;  %v9069_v0 = vpop.f32.mrf.mxu1  ;;  %v4794_v30 = vpack.c.bf16 %v4785_v53, %v4784_v39  ;;  %v4942_v60 = vld [vmem:[#allocation2 + $0x114] sm:$0xff] }
 0x2f8   : > { %v3649_v21 = vpop.f32.mrf.mxu0  ;;  %v3776_v40 = vpop.f32.mrf.mxu1 }
 0x2f9   : > { %v11895_v62 = vadd.f32 %v3776_v40, %v11821_v17  ;;  %v4797_v21 = vpack.c.bf16 %v4790_v9, %v4790_v9  ;;  %v5100_v9 = vld [vmem:[#allocation2 + $0x170] sm:$0xff] }
 0x2fa   : > { %v9054_v52 = vpop.f32.mrf.mxu0  ;;  %v9070_v61 = vpop.f32.mrf.mxu1 }
 0x2fc   : > { %v3781_v35 = vpop.f32.mrf.mxu1  ;;  %v3916_v25 = vpop.f32.mrf.mxu0  ;;  %9276 = vmatmul.mubr.msk.bf16.gmra.mxu1 %vm1012_vm3, %v4638_v29  ;;  %9296 = vmatmul.mubr.msk.bf16.gmra.mxu0 %vm1012_vm3, %v4794_v30  ;;  %v4944_v30 = vld [vmem:[#allocation2 + $0x124] sm:$0xff] }
 0x2fd   : > { %v11900_v50 = vadd.f32 %v3781_v35, %v11829_v54  ;;  %v11903_v38 = vadd.f32 %v3916_v25, %v11847_v13  ;;  %9299 = vmatprep.mubr.msk.bf16.mxu0 %vm9886_vm0, %v9885_v1  ;;  %9315 = vmatprep.mubr.msk.bf16.mxu1 %vm9886_vm0, %v9885_v1  ;;  %v4786_v13 = vld [vmem:[#allocation2 + $0x12b] sm:$0xff]  ;;  %v5097_v35 = vld [vmem:[#allocation2 + $0x158] sm:$0xff] }
 0x2fe   : > { %v9073_v17 = vpop.f32.mrf.mxu1  ;;  %v9093_v11 = vpop.f32.mrf.mxu0  ;;  %v4795_v3 = vpack.c.bf16 %v4787_v51, %v4786_v13  ;;  %v5096_v51 = vld [vmem:[#allocation2 + $0x150] sm:$0xff]  ;;  %v9834_v13 = vld [vmem:[%s12794_s3 + $0xd8] sm:$0xff]  }
 0x300   : > { %v3784_v22 = vpop.f32.mrf.mxu1  ;;  %v3919_v24 = vpop.f32.mrf.mxu0 }
 0x301   : > { %v11910_v23 = vadd.f32 %v3784_v22, %v11836_v12  ;;  %v11913_v54 = vadd.f32 %v3919_v24, %v11861_v6  ;;  %v5109_v24 = vpack.c.bf16 %v5097_v35, %v5096_v51 }
 0x302   : > { %v9074_v34 = vpop.f32.mrf.mxu1  ;;  %v9094_v2 = vpop.f32.mrf.mxu0 }
 0x304   : > { %v3789_v19 = vpop.f32.mrf.mxu1  ;;  %v3924_v45 = vpop.f32.mrf.mxu0  ;;  %9300 = vmatmul.mubr.msk.bf16.gmra.mxu0 %vm1012_vm3, %v4795_v3  ;;  %9316 = vmatmul.mubr.msk.bf16.vlgmr.msra.gmra.mxu1 %vm1012_vm3, %v4950_v41  ;;  %v9836_v41 = vld [vmem:[%s12794_s3 + $0xd0] sm:$0xff]  }
 0x305   : > { %v11921_v12 = vadd.f32 %v3789_v19, %v11844_v26  ;;  %v11924_v6 = vadd.f32 %v3924_v45, %v11870_v57  ;;  %9376 = vmatpush3.bf16.msra.mxu1 %v9831_v27  ;;  %9303 = vmatprep.mubr.msk.bf16.mxu0 %vm9886_vm0, %v9885_v1  ;;  %v4789_v26 = vld [vmem:[#allocation2 + $0x143] sm:$0xff]  ;;  %v4946_v19 = vld [vmem:[#allocation2 + $0x134] sm:$0xff] }
 0x306   : > { %v9077_v16 = vpop.f32.mrf.mxu1  ;;  %v9097_v32 = vpop.f32.mrf.mxu0  ;;  %9319 = vmatprep.mubr.msk.bf16.mxu1 %vm9886_vm0, %v9885_v1  ;;  %9377 = vmatprep.subr.bf16.mxu1 %v9885_v1  ;;  %v4796_v63 = vpack.c.bf16 %v4789_v26, %v4788_v59  ;;  %v5099_v45 = vld [vmem:[#allocation2 + $0x168] sm:$0xff]  ;;  %v5098_v26 = vld [vmem:[#allocation2 + $0x160] sm:$0xff] }
 0x307   : > { %v4945_v32 = vld [vmem:[#allocation2 + $0x12c] sm:$0xff]  ;;  %v5110_v59 = vpack.c.bf16 %v5099_v45, %v5098_v26 }
 0x308   : > { %v3792_v7 = vpop.f32.mrf.mxu1  ;;  %v3927_v18 = vpop.f32.mrf.mxu0 }
 0x309   : > { %v11935_v57 = vadd.f32 %v3792_v7, %v11858_v36  ;;  %v11938_v5 = vadd.f32 %v3927_v18, %v11880_v10  ;;  %9378 = vmatpush3.bf16.msra.mxu1 %v9833_v37  ;;  %v4954_v18 = vpack.c.bf16 %v4946_v19, %v4945_v32 }
 0x30a   : > { %v9078_v8 = vpop.f32.mrf.mxu1  ;;  %v9098_v42 = vpop.f32.mrf.mxu0  ;;  %9439 = vmatprep.subr.bf16.mxu1 %v9885_v1 }
 0x30c   : > { %v3797_v56 = vpop.f32.mrf.mxu1  ;;  %v3932_v20 = vpop.f32.mrf.mxu0  ;;  %9304 = vmatmul.mubr.msk.bf16.gmra.mxu0 %vm1012_vm3, %v4796_v63  ;;  %9320 = vmatmul.mubr.msk.bf16.gmra.mxu1 %vm1012_vm3, %v4951_v46  ;;  %v4948_v46 = vld [vmem:[#allocation2 + $0x144] sm:$0xff] }
 0x30d   : > { %v11944_v36 = vadd.f32 %v3797_v56, %v11867_v4  ;;  %v11947_v10 = vadd.f32 %v3932_v20, %v11888_v58  ;;  %9307 = vmatprep.mubr.msk.bf16.mxu0 %vm9886_vm0, %v9885_v1  ;;  %9323 = vmatprep.mubr.msk.bf16.mxu1 %vm9886_vm0, %v9885_v1  ;;  %v4941_v58 = vld [vmem:[#allocation2 + $0x10c] sm:$0xff]  ;;  %v5101_v56 = vld [vmem:[#allocation2 + $0x178] sm:$0xff] }
 0x30e   : > { %v9081_v15 = vpop.f32.mrf.mxu1  ;;  %v9101_v33 = vpop.f32.mrf.mxu0  ;;  %v4952_v40 = vpack.c.bf16 %v4942_v60, %v4941_v58  ;;  %v5111_v58 = vpack.c.bf16 %v5101_v56, %v5100_v9 }
 0x310   : > { %v3800_v28 = vpop.f32.mrf.mxu1  ;;  %v3935_v47 = vpop.f32.mrf.mxu0 }
 0x311   : > { %v11954_v0 = vadd.f32 %v3800_v28, %v11877_v31  ;;  %v11957_v4 = vadd.f32 %v3935_v47, %v11895_v62 }
 0x312   : > { %v9082_v55 = vpop.f32.mrf.mxu1  ;;  %v9102_v53 = vpop.f32.mrf.mxu0 }
 0x314   : > { %v3805_v39 = vpop.f32.mrf.mxu1  ;;  %v3940_v52 = vpop.f32.mrf.mxu0  ;;  %9308 = vmatmul.mubr.msk.bf16.gmra.mxu0 %vm1012_vm3, %v4797_v21  ;;  %9324 = vmatmul.mubr.msk.bf16.gmra.mxu1 %vm1012_vm3, %v4952_v40 }
 0x315   : > { %v11962_v61 = vadd.f32 %v3805_v39, %v11885_v43  ;;  %v11965_v31 = vadd.f32 %v3940_v52, %v11900_v50  ;;  %9327 = vmatprep.mubr.msk.bf16.mxu1 %vm9886_vm0, %v9885_v1  ;;  %9347 = vmatprep.mubr.msk.bf16.mxu0 %vm9886_vm0, %v9885_v1  ;;  %v4943_v43 = vld [vmem:[#allocation2 + $0x11c] sm:$0xff]  ;;  %v4949_v39 = vld [vmem:[#allocation2 + $0x14c] sm:$0x7] }
 0x316   : > { %v9085_v62 = vpop.f32.mrf.mxu1  ;;  %v9105_v29 = vpop.f32.mrf.mxu0  ;;  %v4953_v22 = vpack.c.bf16 %v4944_v30, %v4943_v43  ;;  %v5103_v52 = vld [vmem:[#allocation2 + $0x188] sm:$0xff] }
 0x318   : > { %v3808_v25 = vpop.f32.mrf.mxu1  ;;  %v3943_v17 = vpop.f32.mrf.mxu0 }
 0x319   : > { %v11972_v11 = vadd.f32 %v3943_v17, %v11910_v23 }
 0x31a   : > { %v9086_v48 = vpop.f32.mrf.mxu1  ;;  %v9106_v50 = vpop.f32.mrf.mxu0 }
 0x31c   : > { %v3948_v44 = vpop.f32.mrf.mxu0  ;;  %v4075_v27 = vpop.f32.mrf.mxu1  ;;  %9328 = vmatmul.mubr.msk.bf16.gmra.mxu1 %vm1012_vm3, %v4953_v22  ;;  %9348 = vmatmul.mubr.msk.bf16.vlgmr.msra.gmra.mxu0 %vm1012_vm3, %v5109_v24  ;;  %v5105_v24 = vld [vmem:[#allocation2 + $0x198] sm:$0xff] }
 0x31d   : > { %v11980_v34 = vadd.f32 %v3948_v44, %v11921_v12  ;;  %v11983_v23 = vadd.f32 %v4075_v27, %v11903_v38  ;;  %9331 = vmatprep.mubr.msk.bf16.mxu1 %vm9886_vm0, %v9885_v1  ;;  %9351 = vmatprep.mubr.msk.bf16.mxu0 %vm9886_vm0, %v9885_v1 }
 0x31e   : > { %v9109_v2 = vpop.f32.mrf.mxu0  ;;  %v9125_v3 = vpop.f32.mrf.mxu1  ;;  %9408 = vmatpush3.bf16.msra.mxu0 %v9834_v13  ;;  %v5256_v13 = vld [vmem:[#allocation2 + $0x159] sm:$0xff] }
 0x31f   : > { %9409 = vmatprep.subr.bf16.mxu0 %v9885_v1  ;;  %v5255_v3 = vld [vmem:[#allocation2 + $0x151] sm:$0xff] }
 0x320   : > { %v3951_v12 = vpop.f32.mrf.mxu0  ;;  %v4078_v38 = vpop.f32.mrf.mxu1 }
 0x321   : > { %v11994_v37 = vadd.f32 %v3951_v12, %v11935_v57  ;;  %v11997_v16 = vadd.f32 %v4078_v38, %v11913_v54  ;;  %v5268_v38 = vpack.c.bf16 %v5256_v13, %v5255_v3 }
 0x322   : > { %v9110_v14 = vpop.f32.mrf.mxu0  ;;  %v9126_v7 = vpop.f32.mrf.mxu1  ;;  %9410 = vmatpush3.bf16.msra.mxu0 %v9836_v41  ;;  %v9835_v41 = vld [vmem:[%s12794_s3 + $0xf8] sm:$0xff]  }
 0x323   : > { %9471 = vmatprep.subr.bf16.mxu0 %v9885_v1  ;;  %v9837_v14 = vld [vmem:[%s12794_s3 + $0xf0] sm:$0xff]  }
 0x324   : > { %v3956_v49 = vpop.f32.mrf.mxu0  ;;  %v4083_v8 = vpop.f32.mrf.mxu1  ;;  %9332 = vmatmul.mubr.msk.bf16.gmra.mxu1 %vm1012_vm3, %v4954_v18  ;;  %9352 = vmatmul.mubr.msk.bf16.gmra.mxu0 %vm1012_vm3, %v5110_v59  ;;  %v5258_v59 = vld [vmem:[#allocation2 + $0x169] sm:$0xff] }
 0x325   : > { %v12003_v57 = vadd.f32 %v3956_v49, %v11944_v36  ;;  %v12006_v54 = vadd.f32 %v4083_v8, %v11924_v6  ;;  %9335 = vmatprep.mubr.msk.bf16.mxu1 %vm9886_vm0, %v9885_v1  ;;  %9355 = vmatprep.mubr.msk.bf16.mxu0 %vm9886_vm0, %v9885_v1  ;;  %v4947_v6 = vld [vmem:[#allocation2 + $0x13c] sm:$0xff] }
 0x326   : > { %v9113_v42 = vpop.f32.mrf.mxu0  ;;  %v9129_v63 = vpop.f32.mrf.mxu1  ;;  %v4955_v47 = vpack.c.bf16 %v4948_v46, %v4947_v6  ;;  %v5257_v46 = vld [vmem:[#allocation2 + $0x161] sm:$0xff] }
 0x327   : > { %v5106_v63 = vld [vmem:[#allocation2 + $0x1a0] sm:$0xff]  ;;  %v5269_v6 = vpack.c.bf16 %v5258_v59, %v5257_v46 }
 0x328   : > { %v3959_v20 = vpop.f32.mrf.mxu0  ;;  %v4086_v15 = vpop.f32.mrf.mxu1 }
 0x329   : > { %v12013_v33 = vadd.f32 %v3959_v20, %v11954_v0  ;;  %v12016_v36 = vadd.f32 %v4086_v15, %v11938_v5 }
 0x32a   : > { %v9114_v60 = vpop.f32.mrf.mxu0  ;;  %v9130_v28 = vpop.f32.mrf.mxu1 }
 0x32c   : > { %v3964_v55 = vpop.f32.mrf.mxu0  ;;  %v4091_v53 = vpop.f32.mrf.mxu1  ;;  %9336 = vmatmul.mubr.msk.bf16.gmra.mxu1 %vm1012_vm3, %v4955_v47  ;;  %9356 = vmatmul.mubr.msk.bf16.gmra.mxu0 %vm1012_vm3, %v5111_v58  ;;  %v5108_v58 = vld [vmem:[#allocation2 + $0x1b0] sm:$0x7] }
 0x32d   : > { %v12021_v21 = vadd.f32 %v3964_v55, %v11962_v61  ;;  %v12024_v0 = vadd.f32 %v4091_v53, %v11947_v10  ;;  %9339 = vmatprep.mubr.msk.bf16.mxu1 %vm9886_vm0, %v9885_v1  ;;  %9359 = vmatprep.mubr.msk.bf16.mxu0 %vm9886_vm0, %v9885_v1  ;;  %v5102_v61 = vld [vmem:[#allocation2 + $0x180] sm:$0xff]  ;;  %v4956_v10 = vpack.c.bf16 %v4949_v39, %v4949_v39 }
 0x32e   : > { %v9117_v5 = vpop.f32.mrf.mxu0  ;;  %v9133_v40 = vpop.f32.mrf.mxu1  ;;  %v5112_v17 = vpack.c.bf16 %v5103_v52, %v5102_v61  ;;  %v5260_v55 = vld [vmem:[#allocation2 + $0x179] sm:$0xff] }
 0x330   : > { %v3967_v62 = vpop.f32.mrf.mxu0  ;;  %v4094_v29 = vpop.f32.mrf.mxu1 }
 0x331   : > { %v12031_v30 = vadd.f32 %v4094_v29, %v11957_v4  ;;  %v5115_v62 = vpack.c.bf16 %v5108_v58, %v5108_v58 }
 0x332   : > { %v9118_v35 = vpop.f32.mrf.mxu0  ;;  %v9134_v25 = vpop.f32.mrf.mxu1 }
 0x334   : > { %v4099_v43 = vpop.f32.mrf.mxu1  ;;  %v4234_v51 = vpop.f32.mrf.mxu0  ;;  %9340 = vmatmul.mubr.msk.bf16.gmra.mxu1 %vm1012_vm3, %v4956_v10  ;;  %9360 = vmatmul.mubr.msk.bf16.gmra.mxu0 %vm1012_vm3, %v5112_v17  ;;  %v5262_v17 = vld [vmem:[#allocation2 + $0x189] sm:$0xff] }
 0x335   : > { %v12036_v48 = vadd.f32 %v4099_v43, %v11965_v31  ;;  %v12039_v50 = vadd.f32 %v4234_v51, %v11983_v23  ;;  %9363 = vmatprep.mubr.msk.bf16.mxu0 %vm9886_vm0, %v9885_v1  ;;  %9379 = vmatprep.mubr.msk.bf16.mxu1 %vm9886_vm0, %v9885_v1  ;;  %v5104_v23 = vld [vmem:[#allocation2 + $0x190] sm:$0xff]  ;;  %v5415_v43 = vld [vmem:[#allocation2 + $0x163] sm:$0xff] }
 0x336   : > { %v9137_v4 = vpop.f32.mrf.mxu1  ;;  %v9157_v22 = vpop.f32.mrf.mxu0  ;;  %v5113_v12 = vpack.c.bf16 %v5105_v24, %v5104_v23  ;;  %v5414_v24 = vld [vmem:[#allocation2 + $0x15b] sm:$0xff] }
 0x338   : > { %v4102_v44 = vpop.f32.mrf.mxu1  ;;  %v4237_v27 = vpop.f32.mrf.mxu0 }
 0x339   : > { %v12046_v2 = vadd.f32 %v4102_v44, %v11972_v11  ;;  %v12049_v31 = vadd.f32 %v4237_v27, %v11997_v16  ;;  %v5427_v27 = vpack.c.bf16 %v5415_v43, %v5414_v24 }
 0x33a   : > { %v9138_v19 = vpop.f32.mrf.mxu1  ;;  %v9158_v45 = vpop.f32.mrf.mxu0 }
 0x33c   : > { %v4107_v32 = vpop.f32.mrf.mxu1  ;;  %v4242_v26 = vpop.f32.mrf.mxu0  ;;  %9364 = vmatmul.mubr.msk.bf16.gmra.mxu0 %vm1012_vm3, %v5113_v12  ;;  %9380 = vmatmul.mubr.msk.bf16.vlgmr.msra.gmra.mxu1 %vm1012_vm3, %v5268_v38  ;;  %v5264_v12 = vld [vmem:[#allocation2 + $0x199] sm:$0xff] }
 0x33d   : > { %v12057_v11 = vadd.f32 %v4107_v32, %v11980_v34  ;;  %v12060_v16 = vadd.f32 %v4242_v26, %v12006_v54  ;;  %9440 = vmatpush3.bf16.msra.mxu1 %v9835_v41  ;;  %9367 = vmatprep.mubr.msk.bf16.mxu0 %vm9886_vm0, %v9885_v1  ;;  %v5107_v34 = vld [vmem:[#allocation2 + $0x1a8] sm:$0xff]  ;;  %v5417_v38 = vld [vmem:[#allocation2 + $0x173] sm:$0xff] }
 0x33e   : > { %v9141_v7 = vpop.f32.mrf.mxu1  ;;  %v9161_v18 = vpop.f32.mrf.mxu0  ;;  %9383 = vmatprep.mubr.msk.bf16.mxu1 %vm9886_vm0, %v9885_v1  ;;  %9441 = vmatprep.subr.bf16.mxu1 %v9885_v1  ;;  %v5114_v15 = vpack.c.bf16 %v5107_v34, %v5106_v63 }
 0x33f   : > { %v5416_v7 = vld [vmem:[#allocation2 + $0x16b] sm:$0xff] }
 0x340   : > { %v4110_v49 = vpop.f32.mrf.mxu1  ;;  %v4245_v8 = vpop.f32.mrf.mxu0 }
 0x341   : > { %v12071_v54 = vadd.f32 %v4110_v49, %v11994_v37  ;;  %v12074_v42 = vadd.f32 %v4245_v8, %v12016_v36  ;;  %9442 = vmatpush3.bf16.msra.mxu1 %v9837_v14  ;;  %v5428_v49 = vpack.c.bf16 %v5417_v38, %v5416_v7 }
 0x342   : > { %v9142_v56 = vpop.f32.mrf.mxu1  ;;  %v9162_v20 = vpop.f32.mrf.mxu0  ;;  %9499 = vmatprep.subr.bf16.mxu1 %v9885_v1 }
 0x343   : > { %v5266_v20 = vld [vmem:[#allocation2 + $0x1a9] sm:$0xff] }
 0x344   : > { %v4115_v9 = vpop.f32.mrf.mxu1  ;;  %v4250_v60 = vpop.f32.mrf.mxu0  ;;  %9368 = vmatmul.mubr.msk.bf16.gmra.mxu0 %vm1012_vm3, %v5114_v15  ;;  %9384 = vmatmul.mubr.msk.bf16.gmra.mxu1 %vm1012_vm3, %v5269_v6  ;;  %v5419_v15 = vld [vmem:[#allocation2 + $0x183] sm:$0xff] }
 0x345   : > { %v12080_v37 = vadd.f32 %v4115_v9, %v12003_v57  ;;  %v12083_v36 = vadd.f32 %v4250_v60, %v12024_v0  ;;  %9371 = vmatprep.mubr.msk.bf16.mxu0 %vm9886_vm0, %v9885_v1  ;;  %9387 = vmatprep.mubr.msk.bf16.mxu1 %vm9886_vm0, %v9885_v1  ;;  %v5259_v0 = vld [vmem:[#allocation2 + $0x171] sm:$0xff] }
 0x346   : > { %v9145_v28 = vpop.f32.mrf.mxu1  ;;  %v9165_v47 = vpop.f32.mrf.mxu0  ;;  %v5270_v29 = vpack.c.bf16 %v5260_v55, %v5259_v0 }
 0x347   : > { %v5418_v28 = vld [vmem:[#allocation2 + $0x17b] sm:$0xff] }
 0x348   : > { %v4118_v53 = vpop.f32.mrf.mxu1  ;;  %v4253_v5 = vpop.f32.mrf.mxu0 }
 0x349   : > { %v12090_v40 = vadd.f32 %v4118_v53, %v12013_v33  ;;  %v12093_v57 = vadd.f32 %v4253_v5, %v12031_v30  ;;  %v5429_v53 = vpack.c.bf16 %v5419_v15, %v5418_v28 }
 0x34a   : > { %v9146_v39 = vpop.f32.mrf.mxu1  ;;  %v9166_v52 = vpop.f32.mrf.mxu0 }
 0x34c   : > { %v4123_v61 = vpop.f32.mrf.mxu1  ;;  %v4258_v35 = vpop.f32.mrf.mxu0  ;;  %9372 = vmatmul.mubr.msk.bf16.gmra.mxu0 %vm1012_vm3, %v5115_v62  ;;  %9388 = vmatmul.mubr.msk.bf16.gmra.mxu1 %vm1012_vm3, %v5270_v29  ;;  %v5267_v62 = vld [vmem:[#allocation2 + $0x1b1] sm:$0x7] }
 0x34d   : > { %v12098_v25 = vadd.f32 %v4123_v61, %v12021_v21  ;;  %v12101_v33 = vadd.f32 %v4258_v35, %v12036_v48  ;;  %9391 = vmatprep.mubr.msk.bf16.mxu1 %vm9886_vm0, %v9885_v1  ;;  %9411 = vmatprep.mubr.msk.bf16.mxu0 %vm9886_vm0, %v9885_v1  ;;  %v5261_v21 = vld [vmem:[#allocation2 + $0x181] sm:$0xff]  ;;  %v5421_v29 = vld [vmem:[#allocation2 + $0x193] sm:$0xff] }
 0x34e   : > { %v9149_v30 = vpop.f32.mrf.mxu1  ;;  %v9169_v10 = vpop.f32.mrf.mxu0  ;;  %v5271_v44 = vpack.c.bf16 %v5262_v17, %v5261_v21 }
 0x350   : > { %v4126_v51 = vpop.f32.mrf.mxu1  ;;  %v4261_v4 = vpop.f32.mrf.mxu0 }
 0x351   : > { %v12108_v22 = vadd.f32 %v4261_v4, %v12046_v2 }
 0x352   : > { %v9150_v13 = vpop.f32.mrf.mxu1  ;;  %v9170_v48 = vpop.f32.mrf.mxu0 }
 0x353   : > { %v5423_v48 = vld [vmem:[#allocation2 + $0x1a3] sm:$0xff] }
 0x354   : > { %v4266_v23 = vpop.f32.mrf.mxu0  ;;  %v4393_v3 = vpop.f32.mrf.mxu1  ;;  %9392 = vmatmul.mubr.msk.bf16.gmra.mxu1 %vm1012_vm3, %v5271_v44  ;;  %9412 = vmatmul.mubr.msk.bf16.vlgmr.msra.gmra.mxu0 %vm1012_vm3, %v5427_v27  ;;  %v5574_v44 = vld [vmem:[#allocation2 + $0x164] sm:$0xff] }
 0x355   : > { %v12113_v41 = vadd.f32 %v4266_v23, %v12057_v11  ;;  %v12116_v19 = vadd.f32 %v4393_v3, %v12039_v50  ;;  %9395 = vmatprep.mubr.msk.bf16.mxu1 %vm9886_vm0, %v9885_v1  ;;  %9415 = vmatprep.mubr.msk.bf16.mxu0 %vm9886_vm0, %v9885_v1  ;;  %v5263_v50 = vld [vmem:[#allocation2 + $0x191] sm:$0xff] }
 0x356   : > { %v9173_v2 = vpop.f32.mrf.mxu0  ;;  %v9189_v45 = vpop.f32.mrf.mxu1  ;;  %v5272_v59 = vpack.c.bf16 %v5264_v12, %v5263_v50 }
 0x357   : > { %v5573_v2 = vld [vmem:[#allocation2 + $0x15c] sm:$0xff] }
 0x358   : > { %v4269_v32 = vpop.f32.mrf.mxu0  ;;  %v4396_v26 = vpop.f32.mrf.mxu1 }
 0x359   : > { %v12123_v14 = vadd.f32 %v4269_v32, %v12071_v54  ;;  %v12126_v11 = vadd.f32 %v4396_v26, %v12049_v31  ;;  %v5586_v32 = vpack.c.bf16 %v5574_v44, %v5573_v2  ;;  %v5582_v2 = vld [vmem:[#allocation2 + $0x1a4] sm:$0xff] }
 0x35a   : > { %v9174_v18 = vpop.f32.mrf.mxu0  ;;  %v9190_v34 = vpop.f32.mrf.mxu1 }
 0x35b   : > { %v5425_v34 = vld [vmem:[#allocation2 + $0x1b3] sm:$0xff] }
 0x35c   : > { %v4274_v8 = vpop.f32.mrf.mxu0  ;;  %v4401_v63 = vpop.f32.mrf.mxu1  ;;  %9396 = vmatmul.mubr.msk.bf16.gmra.mxu1 %vm1012_vm3, %v5272_v59  ;;  %9416 = vmatmul.mubr.msk.bf16.gmra.mxu0 %vm1012_vm3, %v5428_v49  ;;  %v5576_v59 = vld [vmem:[#allocation2 + $0x174] sm:$0xff] }
 0x35d   : > { %v12131_v46 = vadd.f32 %v4274_v8, %v12080_v37  ;;  %v12134_v54 = vadd.f32 %v4401_v63, %v12060_v16  ;;  %9399 = vmatprep.mubr.msk.bf16.mxu1 %vm9886_vm0, %v9885_v1  ;;  %9419 = vmatprep.mubr.msk.bf16.mxu0 %vm9886_vm0, %v9885_v1  ;;  %v5265_v16 = vld [vmem:[#allocation2 + $0x1a1] sm:$0xff] }
 0x35e   : > { %v9177_v31 = vpop.f32.mrf.mxu0  ;;  %v9193_v56 = vpop.f32.mrf.mxu1  ;;  %v5273_v55 = vpack.c.bf16 %v5266_v20, %v5265_v16 }
 0x360   : > { %v4277_v6 = vpop.f32.mrf.mxu0  ;;  %v4404_v9 = vpop.f32.mrf.mxu1 }
 0x361   : > { %v12141_v60 = vadd.f32 %v4277_v6, %v12090_v40  ;;  %v12144_v37 = vadd.f32 %v4404_v9, %v12074_v42 }
 0x362   : > { %v9178_v47 = vpop.f32.mrf.mxu0  ;;  %v9194_v58 = vpop.f32.mrf.mxu1 }
 0x363   : > { %v5426_v58 = vld [vmem:[#allocation2 + $0x1bb] sm:$0x7] }
 0x364   : > { %v4282_v5 = vpop.f32.mrf.mxu0  ;;  %v4409_v0 = vpop.f32.mrf.mxu1  ;;  %9400 = vmatmul.mubr.msk.bf16.gmra.mxu1 %vm1012_vm3, %v5273_v55  ;;  %9420 = vmatmul.mubr.msk.bf16.gmra.mxu0 %vm1012_vm3, %v5429_v53  ;;  %v5578_v55 = vld [vmem:[#allocation2 + $0x184] sm:$0xff] }
 0x365   : > { %v12149_v39 = vadd.f32 %v4282_v5, %v12098_v25  ;;  %v12152_v40 = vadd.f32 %v4409_v0, %v12083_v36  ;;  %9403 = vmatprep.mubr.msk.bf16.mxu1 %vm9886_vm0, %v9885_v1  ;;  %9423 = vmatprep.mubr.msk.bf16.mxu0 %vm9886_vm0, %v9885_v1  ;;  %v5420_v25 = vld [vmem:[#allocation2 + $0x18b] sm:$0xff]  ;;  %v5274_v36 = vpack.c.bf16 %v5267_v62, %v5267_v62 }
 0x366   : > { %v9181_v42 = vpop.f32.mrf.mxu0  ;;  %v9197_v52 = vpop.f32.mrf.mxu1  ;;  %v5430_v43 = vpack.c.bf16 %v5421_v29, %v5420_v25  ;;  %v5433_v62 = vpack.c.bf16 %v5426_v58, %v5426_v58 }
 0x368   : > { %v4285_v61 = vpop.f32.mrf.mxu0  ;;  %v4412_v35 = vpop.f32.mrf.mxu1 }
 0x369   : > { %v12159_v30 = vadd.f32 %v4412_v35, %v12093_v57 }
 0x36a   : > { %v9182_v10 = vpop.f32.mrf.mxu0  ;;  %v9198_v17 = vpop.f32.mrf.mxu1 }
 0x36b   : > { %v5580_v17 = vld [vmem:[#allocation2 + $0x194] sm:$0xff] }
 0x36c   : > { %v4417_v51 = vpop.f32.mrf.mxu1  ;;  %v4552_v4 = vpop.f32.mrf.mxu0  ;;  %9404 = vmatmul.mubr.msk.bf16.gmra.mxu1 %vm1012_vm3, %v5274_v36  ;;  %9424 = vmatmul.mubr.msk.bf16.gmra.mxu0 %vm1012_vm3, %v5430_v43 }
 0x36d   : > { %v12164_v21 = vadd.f32 %v4417_v51, %v12101_v33  ;;  %v12167_v24 = vadd.f32 %v4552_v4, %v12116_v19  ;;  %9427 = vmatprep.mubr.msk.bf16.mxu0 %vm9886_vm0, %v9885_v1  ;;  %9443 = vmatprep.mubr.msk.bf16.mxu1 %vm9886_vm0, %v9885_v1  ;;  %v5422_v19 = vld [vmem:[#allocation2 + $0x19b] sm:$0xff]  ;;  %v5579_v4 = vld [vmem:[#allocation2 + $0x18c] sm:$0xff] }
 0x36e   : > { %v9201_v57 = vpop.f32.mrf.mxu1  ;;  %v9221_v13 = vpop.f32.mrf.mxu0  ;;  %v5431_v38 = vpack.c.bf16 %v5423_v48, %v5422_v19 }
 0x36f   : > { %v5589_v13 = vpack.c.bf16 %v5580_v17, %v5579_v4 }
 0x370   : > { %v4420_v27 = vpop.f32.mrf.mxu1  ;;  %v4555_v23 = vpop.f32.mrf.mxu0 }
 0x371   : > { %v12174_v3 = vadd.f32 %v4420_v27, %v12108_v22  ;;  %v12177_v33 = vadd.f32 %v4555_v23, %v12126_v11 }
 0x372   : > { %v9202_v45 = vpop.f32.mrf.mxu1  ;;  %v9222_v12 = vpop.f32.mrf.mxu0 }
 0x374   : > { %v4425_v26 = vpop.f32.mrf.mxu1  ;;  %v4560_v50 = vpop.f32.mrf.mxu0  ;;  %9428 = vmatmul.mubr.msk.bf16.gmra.mxu0 %vm1012_vm3, %v5431_v38  ;;  %9444 = vmatmul.mubr.msk.bf16.vlgmr.msra.gmra.mxu1 %vm1012_vm3, %v5586_v32  ;;  %v5581_v32 = vld [vmem:[#allocation2 + $0x19c] sm:$0xff] }
 0x375   : > { %v4455_v7 = vadd.f32 %v4425_v26, %v12113_v41  ;;  %v12183_v22 = vadd.f32 %v4560_v50, %v12134_v54  ;;  %9431 = vmatprep.mubr.msk.bf16.mxu0 %vm9886_vm0, %v9885_v1  ;;  %9447 = vmatprep.mubr.msk.bf16.mxu1 %vm9886_vm0, %v9885_v1  ;;  %v5424_v41 = vld [vmem:[#allocation2 + $0x1ab] sm:$0xff] }
 0x376   : > { %v9205_v11 = vpop.f32.mrf.mxu1  ;;  %v9225_v18 = vpop.f32.mrf.mxu0  ;;  %v5575_v54 = vld [vmem:[#allocation2 + $0x16c] sm:$0xff]  ;;  %v5432_v15 = vpack.c.bf16 %v5425_v34, %v5424_v41 }
 0x377   : > { %v5587_v6 = vpack.c.bf16 %v5576_v59, %v5575_v54  ;;  %v5590_v11 = vpack.c.bf16 %v5582_v2, %v5581_v32 }
 0x378   : > { %v4428_v49 = vpop.f32.mrf.mxu1  ;;  %v4563_v8 = vpop.f32.mrf.mxu0 }
 0x379   : > { %v4456_v63 = vadd.f32 %v4428_v49, %v12123_v14  ;;  %v12191_v31 = vadd.f32 %v4563_v8, %v12144_v37  ;;  %v5584_v8 = vld [vmem:[#allocation2 + $0x1b4] sm:$0xff] }
 0x37a   : > { %v9206_v56 = vpop.f32.mrf.mxu1  ;;  %v9226_v20 = vpop.f32.mrf.mxu0 }
 0x37b   : > { %v5583_v20 = vld [vmem:[#allocation2 + $0x1ac] sm:$0xff] }
 0x37c   : > { %v4433_v9 = vpop.f32.mrf.mxu1  ;;  %v4568_v16 = vpop.f32.mrf.mxu0  ;;  %9432 = vmatmul.mubr.msk.bf16.gmra.mxu0 %vm1012_vm3, %v5432_v15  ;;  %9448 = vmatmul.mubr.msk.bf16.gmra.mxu1 %vm1012_vm3, %v5587_v6  ;;  %v5591_v6 = vpack.c.bf16 %v5584_v8, %v5583_v20 }
 0x37d   : > { %v4457_v28 = vadd.f32 %v4433_v9, %v12131_v46  ;;  %v12197_v47 = vadd.f32 %v4568_v16, %v12152_v40  ;;  %9435 = vmatprep.mubr.msk.bf16.mxu0 %vm9886_vm0, %v9885_v1  ;;  %9451 = vmatprep.mubr.msk.bf16.mxu1 %vm9886_vm0, %v9885_v1  ;;  %v5577_v46 = vld [vmem:[#allocation2 + $0x17c] sm:$0xff] }
 0x37e   : > { %v9209_v14 = vpop.f32.mrf.mxu1  ;;  %v9229_v37 = vpop.f32.mrf.mxu0  ;;  %v5588_v29 = vpack.c.bf16 %v5578_v55, %v5577_v46  ;;  %v5585_v55 = vld [vmem:[#allocation2 + $0x1bc] sm:$0x7] }
 0x380   : > { %v4436_v53 = vpop.f32.mrf.mxu1  ;;  %v4571_v5 = vpop.f32.mrf.mxu0 }
 0x381   : > { %v4458_v0 = vadd.f32 %v4436_v53, %v12141_v60  ;;  %v12205_v42 = vadd.f32 %v4571_v5, %v12159_v30 }
 0x382   : > { %v9210_v40 = vpop.f32.mrf.mxu1  ;;  %v9230_v52 = vpop.f32.mrf.mxu0 }
 0x383   : > { %v5592_v40 = vpack.c.bf16 %v5585_v55, %v5585_v55  ;;  %v9845_v55 = vld [vmem:[%s12796_s5] sm:$0xff]  }
 0x384   : > { %v4441_v61 = vpop.f32.mrf.mxu1  ;;  %v4576_v35 = vpop.f32.mrf.mxu0  ;;  %9436 = vmatmul.mubr.msk.bf16.gmra.mxu0 %vm1012_vm3, %v5433_v62  ;;  %9452 = vmatmul.mubr.msk.bf16.gmra.mxu1 %vm1012_vm3, %v5588_v29 }
 0x385   : > { %v4459_v25 = vadd.f32 %v4441_v61, %v12149_v39  ;;  %v12211_v10 = vadd.f32 %v4576_v35, %v12164_v21  ;;  %9455 = vmatprep.mubr.msk.bf16.mxu1 %vm9886_vm0, %v9885_v1  ;;  %9479 = vmatprep.mubr.msk.bf16.mxu0 %vm9886_vm0, %v9885_v1  ;;  %v9839_v61 = vld [vmem:[%s12796_s5 + $0x30] sm:$0xff]  }
 0x386   : > { %v9213_v60 = vpop.f32.mrf.mxu1  ;;  %v9233_v30 = vpop.f32.mrf.mxu0 }
 0x388   : > { %v4444_v36 = vpop.f32.mrf.mxu1  ;;  %v4579_v43 = vpop.f32.mrf.mxu0 }
 0x389   : > { %v12218_v51 = vadd.f32 %v4579_v43, %v12174_v3 }
 0x38a   : > { %v9214_v57 = vpop.f32.mrf.mxu1  ;;  %v9234_v39 = vpop.f32.mrf.mxu0 }
 0x38c   : > { %v4584_v21 = vpop.f32.mrf.mxu0  ;;  %v4711_v48 = vpop.f32.mrf.mxu1  ;;  %9456 = vmatmul.mubr.msk.bf16.gmra.mxu1 %vm1012_vm3, %v5589_v13 }
 0x38d   : > { %v12221_v44 = vadd.f32 %v4584_v21, %v4455_v7  ;;  %v4765_v27 = vadd.f32 %v4711_v48, %v12167_v24  ;;  %9459 = vmatprep.mubr.msk.bf16.mxu1 %vm9886_vm0, %v9885_v1 }
 0x38e   : > { %v9237_v23 = vpop.f32.mrf.mxu0  ;;  %v9253_v19 = vpop.f32.mrf.mxu1 }
 0x390   : > { %v4587_v3 = vpop.f32.mrf.mxu0  ;;  %v4714_v45 = vpop.f32.mrf.mxu1 }
 0x391   : > { %v12226_v12 = vadd.f32 %v4587_v3, %v4456_v63  ;;  %v4766_v38 = vadd.f32 %v4714_v45, %v12177_v33  ;;  %v9838_v33 = vld [vmem:[%s12796_s5 + $0x38] sm:$0xff]   ;;  %v9840_v3 = vld [vmem:[%s12796_s5 + $0x28] sm:$0xff]  }
 0x392   : > { %v9238_v26 = vpop.f32.mrf.mxu0  ;;  %v9254_v50 = vpop.f32.mrf.mxu1  ;;  %9472 = vmatpush3.bf16.msra.mxu0 %v9838_v33 }
 0x393   : > { %9473 = vmatprep.subr.bf16.mxu0 %v9885_v1 }
 0x394   : > { %v4592_v7 = vpop.f32.mrf.mxu0  ;;  %v4719_v18 = vpop.f32.mrf.mxu1  ;;  %9460 = vmatmul.mubr.msk.bf16.gmra.mxu1 %vm1012_vm3, %v5590_v11 }
 0x395   : > { %v12230_v24 = vadd.f32 %v4592_v7, %v4457_v28  ;;  %v4767_v34 = vadd.f32 %v4719_v18, %v12183_v22  ;;  %9463 = vmatprep.mubr.msk.bf16.mxu1 %vm9886_vm0, %v9885_v1 }
 0x396   : > { %v9241_v59 = vpop.f32.mrf.mxu0  ;;  %v9257_v49 = vpop.f32.mrf.mxu1  ;;  %9474 = vmatpush3.bf16.msra.mxu0 %v9839_v61 }
 0x397   : > { %9475 = vmatprep.subr.bf16.mxu0 %v9885_v1 }
 0x398   : > { %v4595_v63 = vpop.f32.mrf.mxu0  ;;  %v4722_v41 = vpop.f32.mrf.mxu1 }
 0x399   : > { %v4617_v54 = vadd.f32 %v4595_v63, %v4458_v0  ;;  %v4768_v56 = vadd.f32 %v4722_v41, %v12191_v31  ;;  %v9842_v41 = vld [vmem:[%s12796_s5 + $0x10] sm:$0xff]  }
 0x39a   : > { %v9242_v22 = vpop.f32.mrf.mxu0  ;;  %v9258_v15 = vpop.f32.mrf.mxu1  ;;  %9476 = vmatpush3.bf16.msra.mxu0 %v9840_v3 }
 0x39b   : > { %9477 = vmatprep.subr.bf16.mxu0 %v9885_v1 }
 0x39c   : > { %v4600_v9 = vpop.f32.mrf.mxu0  ;;  %v4727_v16 = vpop.f32.mrf.mxu1  ;;  %9464 = vmatmul.mubr.msk.bf16.gmra.mxu1 %vm1012_vm3, %v5591_v6  ;;  %v9844_v6 = vld [vmem:[%s12796_s5 + $0x8] sm:$0xff]  }
 0x39d   : > { %v4618_v28 = vadd.f32 %v4600_v9, %v4459_v25  ;;  %v4769_v14 = vadd.f32 %v4727_v16, %v12197_v47  ;;  %9467 = vmatprep.mubr.msk.bf16.mxu1 %vm9886_vm0, %v9885_v1 }
 0x39e   : > { %v9245_v37 = vpop.f32.mrf.mxu0  ;;  %v9261_v58 = vpop.f32.mrf.mxu1 }
 0x3a0   : > { %v4603_v31 = vpop.f32.mrf.mxu0  ;;  %v4730_v53 = vpop.f32.mrf.mxu1 }
 0x3a1   : > { %v4770_v5 = vadd.f32 %v4730_v53, %v12205_v42 }
 0x3a2   : > { %v9246_v0 = vpop.f32.mrf.mxu0  ;;  %v9262_v46 = vpop.f32.mrf.mxu1 }
 0x3a4   : > { %v4735_v52 = vpop.f32.mrf.mxu1  ;;  %v4870_v62 = vpop.f32.mrf.mxu0  ;;  %9468 = vmatmul.mubr.msk.bf16.gmra.mxu1 %vm1012_vm3, %v5592_v40 }
 0x3a5   : > { %v4771_v29 = vadd.f32 %v4735_v52, %v12211_v10  ;;  %v12247_v47 = vadd.f32 %v4870_v62, %v4765_v27  ;;  %9507 = vmatprep.mubr.msk.bf16.mxu1 %vm9886_vm0, %v9885_v1 }
 0x3a6   : > { %v9265_v35 = vpop.f32.mrf.mxu1  ;;  %v9285_v42 = vpop.f32.mrf.mxu0 }
 0x3a8   : > { %v4738_v25 = vpop.f32.mrf.mxu1  ;;  %v4873_v60 = vpop.f32.mrf.mxu0 }
 0x3a9   : > { %v4772_v30 = vadd.f32 %v4738_v25, %v12218_v51  ;;  %v12256_v17 = vadd.f32 %v4873_v60, %v4766_v38 }
 0x3aa   : > { %v9266_v10 = vpop.f32.mrf.mxu1  ;;  %v9286_v36 = vpop.f32.mrf.mxu0 }
 0x3ac   : > { %v4743_v43 = vpop.f32.mrf.mxu1  ;;  %v4878_v4 = vpop.f32.mrf.mxu0 }
 0x3ad   : > { %v4773_v57 = vadd.f32 %v4743_v43, %v12221_v44  ;;  %v12259_v39 = vadd.f32 %v4878_v4, %v4767_v34  ;;  %v9841_v34 = vld [vmem:[%s12796_s5 + $0x18] sm:$0xff]  }
 0x3ae   : > { %v9269_v13 = vpop.f32.mrf.mxu1  ;;  %v9289_v21 = vpop.f32.mrf.mxu0  ;;  %9500 = vmatpush3.bf16.msra.mxu1 %v9841_v34 }
 0x3af   : > { %9501 = vmatprep.subr.bf16.mxu1 %v9885_v1 }
 0x3b0   : > { %v4746_v48 = vpop.f32.mrf.mxu1  ;;  %v4881_v27 = vpop.f32.mrf.mxu0 }
 0x3b1   : > { %v4774_v23 = vadd.f32 %v4746_v48, %v12226_v12  ;;  %v12262_v19 = vadd.f32 %v4881_v27, %v4768_v56 }
 0x3b2   : > { %v9270_v2 = vpop.f32.mrf.mxu1  ;;  %v9290_v51 = vpop.f32.mrf.mxu0  ;;  %9502 = vmatpush3.bf16.msra.mxu1 %v9842_v41 }
 0x3b3   : > { %9503 = vmatprep.subr.bf16.mxu1 %v9885_v1 }
 0x3b4   : > { %v4751_v45 = vpop.f32.mrf.mxu1  ;;  %v4886_v38 = vpop.f32.mrf.mxu0 }
 0x3b5   : > { %v4775_v44 = vadd.f32 %v4751_v45, %v12230_v24  ;;  %v12268_v32 = vadd.f32 %v4886_v38, %v4769_v14 }
 0x3b6   : > { %v9273_v26 = vpop.f32.mrf.mxu1  ;;  %v9293_v50 = vpop.f32.mrf.mxu0  ;;  %9504 = vmatpush3.bf16.msra.mxu1 %v9844_v6 }
 0x3b7   : > { %9505 = vmatprep.subr.bf16.mxu1 %v9885_v1 }
 0x3b8   : > { %v4754_v12 = vpop.f32.mrf.mxu1  ;;  %v4889_v11 = vpop.f32.mrf.mxu0 }
 0x3b9   : > { %v4776_v7 = vadd.f32 %v4754_v12, %v4617_v54  ;;  %v4929_v18 = vadd.f32 %v4889_v11, %v4770_v5  ;;  %v9843_v5 = vld [vmem:[%s12796_s5 + $0x20] sm:$0xff]  }
 0x3ba   : > { %v9274_v59 = vpop.f32.mrf.mxu1  ;;  %v9294_v49 = vpop.f32.mrf.mxu0  ;;  %9506 = vmatpush3.bf16.msra.mxu1 %v9845_v55  ;;  %9478 = vmatpush3.bf16.msra.mxu0 %v9843_v5 }
 0x3bb   : > { %9555 = vmatprep.subr.bf16.mxu1 %v9885_v1  ;;  %9527 = vmatprep.subr.bf16.mxu0 %v9885_v1 }
 0x3bc   : > { %v4759_v33 = vpop.f32.mrf.mxu1  ;;  %v4894_v8 = vpop.f32.mrf.mxu0 }
 0x3bd   : > { %v4777_v24 = vadd.f32 %v4759_v33, %v4618_v28  ;;  %v4930_v63 = vadd.f32 %v4894_v8, %v4771_v29 }
 0x3be   : > { %v9277_v56 = vpop.f32.mrf.mxu1  ;;  %v9297_v54 = vpop.f32.mrf.mxu0 }
 0x3c0   : > { %v4762_v20 = vpop.f32.mrf.mxu1  ;;  %v4897_v22 = vpop.f32.mrf.mxu0 }
 0x3c1   : > { %v4931_v15 = vadd.f32 %v4897_v22, %v4772_v30 }
 0x3c2   : > { %v9278_v9 = vpop.f32.mrf.mxu1  ;;  %v9298_v16 = vpop.f32.mrf.mxu0 }
 0x3c4   : > { %v4902_v28 = vpop.f32.mrf.mxu0  ;;  %v5029_v14 = vpop.f32.mrf.mxu1 }
 0x3c5   : > { %v4932_v37 = vadd.f32 %v4902_v28, %v4773_v57  ;;  %v5083_v58 = vadd.f32 %v5029_v14, %v12247_v47 }
 0x3c6   : > { %v9301_v31 = vpop.f32.mrf.mxu0  ;;  %v9317_v53 = vpop.f32.mrf.mxu1 }
 0x3c8   : > { %v4905_v0 = vpop.f32.mrf.mxu0  ;;  %v5032_v46 = vpop.f32.mrf.mxu1 }
 0x3c9   : > { %v4933_v40 = vadd.f32 %v4905_v0, %v4774_v23  ;;  %v5084_v52 = vadd.f32 %v5032_v46, %v12256_v17 }
 0x3ca   : > { %v9302_v62 = vpop.f32.mrf.mxu0  ;;  %v9318_v29 = vpop.f32.mrf.mxu1 }
 0x3cc   : > { %v4910_v47 = vpop.f32.mrf.mxu0  ;;  %v5037_v61 = vpop.f32.mrf.mxu1 }
 0x3cd   : > { %v4934_v35 = vadd.f32 %v4910_v47, %v4775_v44  ;;  %v5085_v42 = vadd.f32 %v5037_v61, %v12259_v39 }
 0x3ce   : > { %v9305_v25 = vpop.f32.mrf.mxu0  ;;  %v9321_v60 = vpop.f32.mrf.mxu1 }
 0x3d0   : > { %v4913_v30 = vpop.f32.mrf.mxu0  ;;  %v5040_v10 = vpop.f32.mrf.mxu1 }
 0x3d1   : > { %v4935_v36 = vadd.f32 %v4913_v30, %v4776_v7  ;;  %v5086_v43 = vadd.f32 %v5040_v10, %v12262_v19 }
 0x3d2   : > { %v9306_v4 = vpop.f32.mrf.mxu0  ;;  %v9322_v57 = vpop.f32.mrf.mxu1 }
 0x3d4   : > { %v4918_v17 = vpop.f32.mrf.mxu0  ;;  %v5045_v13 = vpop.f32.mrf.mxu1 }
 0x3d5   : > { %v4936_v21 = vadd.f32 %v4918_v17, %v4777_v24  ;;  %v5087_v48 = vadd.f32 %v5045_v13, %v12268_v32 }
 0x3d6   : > { %v9309_v27 = vpop.f32.mrf.mxu0  ;;  %v9325_v23 = vpop.f32.mrf.mxu1 }
 0x3d8   : > { %v4921_v2 = vpop.f32.mrf.mxu0  ;;  %v5048_v51 = vpop.f32.mrf.mxu1 }
 0x3d9   : > { %v5088_v3 = vadd.f32 %v5048_v51, %v4929_v18 }
 0x3da   : > { %v9310_v39 = vpop.f32.mrf.mxu0  ;;  %v9326_v45 = vpop.f32.mrf.mxu1 }
 0x3dc   : > { %v5053_v38 = vpop.f32.mrf.mxu1  ;;  %v5188_v44 = vpop.f32.mrf.mxu0 }
 0x3dd   : > { %v5089_v26 = vadd.f32 %v5053_v38, %v4930_v63  ;;  %v12296_v50 = vadd.f32 %v5188_v44, %v5083_v58 }
 0x3de   : > { %v9329_v19 = vpop.f32.mrf.mxu1  ;;  %v9349_v12 = vpop.f32.mrf.mxu0 }
 0x3e0   : > { %v5056_v11 = vpop.f32.mrf.mxu1  ;;  %v5191_v7 = vpop.f32.mrf.mxu0 }
 0x3e1   : > { %v5090_v34 = vadd.f32 %v5056_v11, %v4931_v15  ;;  %v12298_v59 = vadd.f32 %v5191_v7, %v5084_v52 }
 0x3e2   : > { %v9330_v32 = vpop.f32.mrf.mxu1  ;;  %v9350_v49 = vpop.f32.mrf.mxu0 }
 0x3e4   : > { %v5061_v33 = vpop.f32.mrf.mxu1  ;;  %v5196_v8 = vpop.f32.mrf.mxu0 }
 0x3e5   : > { %v5091_v24 = vadd.f32 %v5061_v33, %v4932_v37  ;;  %v12300_v18 = vadd.f32 %v5196_v8, %v5085_v42 }
 0x3e6   : > { %v9333_v41 = vpop.f32.mrf.mxu1  ;;  %v9353_v56 = vpop.f32.mrf.mxu0 }
 0x3e8   : > { %v5064_v54 = vpop.f32.mrf.mxu1  ;;  %v5199_v63 = vpop.f32.mrf.mxu0 }
 0x3e9   : > { %v5092_v20 = vadd.f32 %v5064_v54, %v4933_v40  ;;  %v12302_v22 = vadd.f32 %v5199_v63, %v5086_v43 }
 0x3ea   : > { %v9334_v6 = vpop.f32.mrf.mxu1  ;;  %v9354_v9 = vpop.f32.mrf.mxu0 }
 0x3ec   : > { %v5069_v16 = vpop.f32.mrf.mxu1  ;;  %v5204_v15 = vpop.f32.mrf.mxu0 }
 0x3ed   : > { %v5093_v28 = vadd.f32 %v5069_v16, %v4934_v35  ;;  %v12304_v14 = vadd.f32 %v5204_v15, %v5087_v48 }
 0x3ee   : > { %v9337_v58 = vpop.f32.mrf.mxu1  ;;  %v9357_v55 = vpop.f32.mrf.mxu0 }
 0x3f0   : > { %v5072_v37 = vpop.f32.mrf.mxu1  ;;  %v5207_v31 = vpop.f32.mrf.mxu0 }
 0x3f1   : > { %v5094_v53 = vadd.f32 %v5072_v37, %v4935_v36  ;;  %v12308_v5 = vadd.f32 %v5207_v31, %v5088_v3 }
 0x3f2   : > { %v9338_v0 = vpop.f32.mrf.mxu1  ;;  %v9358_v46 = vpop.f32.mrf.mxu0 }
 0x3f4   : > { %v5077_v40 = vpop.f32.mrf.mxu1  ;;  %v5212_v52 = vpop.f32.mrf.mxu0 }
 0x3f5   : > { %v5095_v62 = vadd.f32 %v5077_v40, %v4936_v21  ;;  %v12310_v29 = vadd.f32 %v5212_v52, %v5089_v26 }
 0x3f6   : > { %v9341_v47 = vpop.f32.mrf.mxu1  ;;  %v9361_v61 = vpop.f32.mrf.mxu0 }
 0x3f8   : > { %v5080_v35 = vpop.f32.mrf.mxu1  ;;  %v5215_v42 = vpop.f32.mrf.mxu0 }
 0x3f9   : > { %v12312_v25 = vadd.f32 %v5215_v42, %v5090_v34 }
 0x3fa   : > { %v9342_v60 = vpop.f32.mrf.mxu1  ;;  %v9362_v30 = vpop.f32.mrf.mxu0 }
 0x3fc   : > { %v5220_v10 = vpop.f32.mrf.mxu0  ;;  %v5347_v43 = vpop.f32.mrf.mxu1 }
 0x3fd   : > { %v12314_v36 = vadd.f32 %v5220_v10, %v5091_v24 }
 0x3fe   : > { %v9365_v4 = vpop.f32.mrf.mxu0  ;;  %v9381_v57 = vpop.f32.mrf.mxu1 }
 0x400   : > { %v5223_v17 = vpop.f32.mrf.mxu0  ;;  %v5350_v13 = vpop.f32.mrf.mxu1 }
 0x401   : > { %v12316_v48 = vadd.f32 %v5223_v17, %v5092_v20 }
 0x402   : > { %v9366_v21 = vpop.f32.mrf.mxu0  ;;  %v9382_v27 = vpop.f32.mrf.mxu1 }
 0x403   : > { %v5401_v21 = vadd.f32 %v5347_v43, %v12296_v50 }
 0x404   : > { %v5228_v23 = vpop.f32.mrf.mxu0  ;;  %v12318_v2 = vpop.f32.mrf.mxu1 }
 0x405   : > { %v12320_v51 = vadd.f32 %v5228_v23, %v5093_v28 }
 0x406   : > { %v9369_v3 = vpop.f32.mrf.mxu0  ;;  %v9385_v39 = vpop.f32.mrf.mxu1 }
 0x408   : > { %v5231_v45 = vpop.f32.mrf.mxu0  ;;  %v12322_v38 = vpop.f32.mrf.mxu1 }
 0x409   : > { %v12324_v44 = vadd.f32 %v5231_v45, %v5094_v53 }
 0x40a   : > { %v9370_v26 = vpop.f32.mrf.mxu0  ;;  %v9386_v19 = vpop.f32.mrf.mxu1 }
 0x40b   : > { %v12356_v26 = vld [vmem:[%s12795_s4] ss:$0 sm:$0xff]  ;;  %v5402_v19 = vadd.f32 %v5350_v13, %v12298_v59 }
 0x40c   : > { %v5236_v12 = vpop.f32.mrf.mxu0  ;;  %v12326_v11 = vpop.f32.mrf.mxu1 }
 0x40d   : > { %v12328_v7 = vadd.f32 %v5236_v12, %v5095_v62 }
 0x40e   : > { %v9373_v34 = vpop.f32.mrf.mxu0  ;;  %v9389_v32 = vpop.f32.mrf.mxu1 }
 0x410   : > { %v5239_v49 = vpop.f32.mrf.mxu0  ;;  %v12330_v33 = vpop.f32.mrf.mxu1 }
 0x412   : > { %v9374_v8 = vpop.f32.mrf.mxu0  ;;  %v9390_v24 = vpop.f32.mrf.mxu1 }
 0x413   : > { %v5403_v24 = vadd.f32 %v12318_v2, %v12300_v18 }
 0x414   : > { %v12332_v41 = vpop.f32.mrf.mxu1  ;;  %v5506_v56 = vpop.f32.mrf.mxu0 }
 0x415   : > { %v5560_v3 = vadd.f32 %v5506_v56, %v5401_v21 }
 0x416   : > { %v9393_v54 = vpop.f32.mrf.mxu1  ;;  %v9413_v63 = vpop.f32.mrf.mxu0 }
 0x418   : > { %v12334_v20 = vpop.f32.mrf.mxu1  ;;  %v5509_v6 = vpop.f32.mrf.mxu0 }
 0x419   : > { %v5561_v49 = vadd.f32 %v5509_v6, %v5402_v19 }
 0x41a   : > { %v9394_v9 = vpop.f32.mrf.mxu1  ;;  %v9414_v16 = vpop.f32.mrf.mxu0 }
 0x41c   : > { %v12336_v15 = vpop.f32.mrf.mxu1  ;;  %v5514_v28 = vpop.f32.mrf.mxu0 }
 0x41d   : > { %v5562_v16 = vadd.f32 %v5514_v28, %v5403_v24 }
 0x41e   : > { %v9397_v58 = vpop.f32.mrf.mxu1  ;;  %v9417_v55 = vpop.f32.mrf.mxu0 }
 0x41f   : > { %v5404_v58 = vadd.f32 %v12322_v38, %v12302_v22 }
 0x420   : > { %v12338_v37 = vpop.f32.mrf.mxu1  ;;  %v5517_v31 = vpop.f32.mrf.mxu0 }
 0x421   : > { %v5563_v18 = vadd.f32 %v5517_v31, %v5404_v58 }
 0x422   : > { %v9398_v53 = vpop.f32.mrf.mxu1  ;;  %v9418_v0 = vpop.f32.mrf.mxu0 }
 0x424   : > { %v12340_v46 = vpop.f32.mrf.mxu1  ;;  %v5522_v40 = vpop.f32.mrf.mxu0 }
 0x426   : > { %v9401_v52 = vpop.f32.mrf.mxu1  ;;  %v9421_v62 = vpop.f32.mrf.mxu0 }
 0x428   : > { %v12342_v47 = vpop.f32.mrf.mxu1  ;;  %v5525_v61 = vpop.f32.mrf.mxu0 }
 0x42a   : > { %v9402_v35 = vpop.f32.mrf.mxu1  ;;  %v9422_v42 = vpop.f32.mrf.mxu0 }
 0x42b   : > { %v5405_v35 = vadd.f32 %v12326_v11, %v12304_v14 }
 0x42c   : > { %v12344_v60 = vpop.f32.mrf.mxu1  ;;  %v12346_v30 = vpop.f32.mrf.mxu0 }
 0x42d   : > { %v5564_v22 = vadd.f32 %v5522_v40, %v5405_v35  ;;  %v9849_v40 = vld [vmem:[%s12796_s5 + $0x78] sm:$0xff]  }
 0x42e   : > { %v9405_v10 = vpop.f32.mrf.mxu1  ;;  %v9425_v4 = vpop.f32.mrf.mxu0 }
 0x430   : > { %v5398_v57 = vpop.f32.mrf.mxu1  ;;  %v12348_v17 = vpop.f32.mrf.mxu0 }
 0x432   : > { %v9406_v27 = vpop.f32.mrf.mxu1  ;;  %v9426_v23 = vpop.f32.mrf.mxu0 }
 0x433   : > { %v5406_v27 = vadd.f32 %v12330_v33, %v12308_v5  ;;  %v5407_v5 = vadd.f32 %v12332_v41, %v12310_v29 }
 0x434   : > { %v12351_v39 = vpop.f32.mrf.mxu0  ;;  %v5665_v45 = vpop.f32.mrf.mxu1 }
 0x435   : > { %v5719_v12 = vadd.f32 %v5665_v45, %v5560_v3 }
 0x436   : > { %v9429_v34 = vpop.f32.mrf.mxu0  ;;  %v9445_v32 = vpop.f32.mrf.mxu1 }
 0x437   : > { %v5739_v8 = vadd.f32 %v12356_v26, %v5719_v12  ;;  %v5565_v12 = vadd.f32 %v5525_v61, %v5406_v27  ;;  %v9846_v61 = vld [vmem:[%s12796_s5 + $0x58] sm:$0xff]  }
 0x438   : > { %v12360_v50 = vpop.f32.mrf.mxu0  ;;  %v5668_v43 = vpop.f32.mrf.mxu1 }
 0x439   : > { %v5752_v56 = vmax.f32 %v5739_v8, 0.0  ;;  %v5720_v54 = vadd.f32 %v5668_v43, %v5561_v49 }
 0x43a   : > { %v9430_v63 = vpop.f32.mrf.mxu0  ;;  %v9446_v9 = vpop.f32.mrf.mxu1 }
 0x43b   : > { %5765 = vst.msk [vmem:[#allocation3] sm:$0xff] %vm374_vm1, %v5752_v56  ;;  %v5740_v59 = vadd.f32 %v12356_v26, %v5720_v54  ;;  %v5566_v9 = vadd.f32 %v12346_v30, %v5407_v5 }
 0x43c   : > { %v12366_v13 = vpop.f32.mrf.mxu0  ;;  %v5673_v6 = vpop.f32.mrf.mxu1 }
 0x43d   : > { %v5753_v55 = vmax.f32 %v5740_v59, 0.0  ;;  %v5721_v53 = vadd.f32 %v5673_v6, %v5562_v16  ;;  %v9850_v16 = vld [vmem:[%s12796_s5 + $0x70] sm:$0xff]   ;;  %v5408_v6 = vadd.f32 %v12334_v20, %v12312_v25 }
 0x43e   : > { %v9433_v0 = vpop.f32.mrf.mxu0  ;;  %v9449_v52 = vpop.f32.mrf.mxu1 }
 0x43f   : > { %5766 = vst.msk [vmem:[#allocation3 + $0x8] sm:$0xff] %vm374_vm1, %v5753_v55  ;;  %v5741_v2 = vadd.f32 %v12356_v26, %v5721_v53  ;;  %v9847_v52 = vld [vmem:[%s12796_s5 + $0x50] sm:$0xff]  }
 0x440   : > { %v12372_v28 = vpop.f32.mrf.mxu0  ;;  %v5676_v62 = vpop.f32.mrf.mxu1 }
 0x441   : > { %v5754_v42 = vmax.f32 %v5741_v2, 0.0  ;;  %v5722_v10 = vadd.f32 %v5676_v62, %v5563_v18  ;;  %v5567_v18 = vadd.f32 %v12348_v17, %v5408_v6  ;;  %v9851_v2 = vld [vmem:[%s12796_s5 + $0x68] sm:$0xff]   ;;  %v5409_v62 = vadd.f32 %v12336_v15, %v12314_v36 }
 0x442   : > { %v9434_v4 = vpop.f32.mrf.mxu0  ;;  %v9450_v57 = vpop.f32.mrf.mxu1  ;;  %v5779_v14 = vld [vmem:[#allocation3] sm:$0xff] }
 0x443   : > { %5767 = vst.msk [vmem:[#allocation3 + $0x10] sm:$0xff] %vm374_vm1, %v5754_v42  ;;  %v5742_v38 = vadd.f32 %v12356_v26, %v5722_v10  ;;  %v9848_v10 = vld [vmem:[%s12796_s5 + $0x48] sm:$0xff]   ;;  %v5568_v4 = vadd.f32 %v12351_v39, %v5409_v62  ;;  %v9853_v39 = vld [vmem:[%s12796_s5 + $0x60] sm:$0xff]  }
 0x444   : > { %v12378_v31 = vpop.f32.mrf.mxu0  ;;  %v5681_v21 = vpop.f32.mrf.mxu1 }
 0x445   : > { %v5755_v23 = vmax.f32 %v5742_v38, 0.0  ;;  %v5723_v3 = vadd.f32 %v5681_v21, %v5564_v22 }
 0x446   : > { %v9437_v45 = vpop.f32.mrf.mxu0  ;;  %v9453_v19 = vpop.f32.mrf.mxu1  ;;  %v5780_v11 = vld [vmem:[#allocation3 + $0x8] sm:$0xff] }
 0x447   : > { %5768 = vst.msk [vmem:[#allocation3 + $0x18] sm:$0xff] %vm374_vm1, %v5755_v23  ;;  %v5743_v34 = vadd.f32 %v12356_v26, %v5723_v3  ;;  %v5789_v32 = vpack.c.bf16 %v5780_v11, %v5779_v14  ;;  %v5802_v54 = vld [vmem:[#allocation3 + $0x1] sm:$0xff]  ;;  %v5410_v3 = vadd.f32 %v12338_v37, %v12316_v48 }
 0x448   : > { %v5557_v49 = vpop.f32.mrf.mxu0  ;;  %v5684_v8 = vpop.f32.mrf.mxu1 }
 0x449   : > { %v5756_v33 = vmax.f32 %v5743_v34, 0.0  ;;  %v5724_v43 = vadd.f32 %v5684_v8, %v5565_v12  ;;  %9508 = vmatmul.mubr.msk.bf16.vlgmr.msra.gmra.mxu1 %vm374_vm1, %v5789_v32  ;;  %v5569_v12 = vadd.f32 %v12360_v50, %v5410_v3  ;;  %v5411_v32 = vadd.f32 %v12340_v46, %v12320_v51  ;;  %v6050_v3 = vld [vmem:[#allocation3 + $0x2] sm:$0xff] }
 0x44a   : > { %v9438_v24 = vpop.f32.mrf.mxu0  ;;  %v9454_v56 = vpop.f32.mrf.mxu1  ;;  %v5803_v63 = vld [vmem:[#allocation3 + $0x9] sm:$0xff]  ;;  %9511 = vmatprep.mubr.msk.bf16.mxu1 %vm9886_vm0, %v9885_v1  ;;  %9556 = vmatpush3.bf16.msra.mxu1 %v9849_v40  ;;  %v9852_v40 = vld [vmem:[%s12796_s5 + $0x40] sm:$0xff]  }
 0x44b   : > { %5769 = vst.msk [vmem:[#allocation3 + $0x20] sm:$0xff] %vm374_vm1, %v5756_v33  ;;  %v5744_v29 = vadd.f32 %v12356_v26, %v5724_v43  ;;  %v5812_v41 = vpack.c.bf16 %v5803_v63, %v5802_v54  ;;  %9557 = vmatprep.subr.bf16.mxu1 %v9885_v1  ;;  %v5781_v53 = vld [vmem:[#allocation3 + $0x10] sm:$0xff]  ;;  %v5570_v24 = vadd.f32 %v12366_v13, %v5411_v32 }
 0x44c   : > { %v5689_v59 = vpop.f32.mrf.mxu1  ;;  %v5412_v63 = vadd.f32 %v12342_v47, %v12324_v44  ;;  %v5413_v47 = vadd.f32 %v12344_v60, %v12328_v7 }
 0x44d   : > { %v5757_v58 = vmax.f32 %v5744_v29, 0.0  ;;  %v5725_v55 = vadd.f32 %v5689_v59, %v5566_v9  ;;  %9480 = vmatmul.mubr.msk.bf16.vlgmr.msra.gmra.mxu0 %vm374_vm1, %v5812_v41 }
 0x44e   : > { %v9457_v30 = vpop.f32.mrf.mxu1  ;;  %9528 = vmatpush3.bf16.msra.mxu0 %v9846_v61  ;;  %v12405_v0 = vld [vmem:[#allocation3 + $0x18] sm:$0xff]  ;;  %9483 = vmatprep.mubr.msk.bf16.mxu0 %vm9886_vm0, %v9885_v1  ;;  %v5571_v41 = vadd.f32 %v12372_v28, %v5412_v63 }
 0x44f   : > { %5770 = vst.msk [vmem:[#allocation3 + $0x28] sm:$0xff] %vm374_vm1, %v5757_v58  ;;  %v5745_v25 = vadd.f32 %v12356_v26, %v5725_v55  ;;  %v5790_v20 = vpack.c.bf16 %v12405_v0, %v5781_v53  ;;  %9529 = vmatprep.subr.bf16.mxu0 %v9885_v1  ;;  %9558 = vmatpush3.bf16.msra.mxu1 %v9850_v16  ;;  %v5804_v22 = vld [vmem:[#allocation3 + $0x11] sm:$0xff] }
 0x450   : > { %v5692_v35 = vpop.f32.mrf.mxu1  ;;  %9559 = vmatprep.subr.bf16.mxu1 %v9885_v1 }
 0x451   : > { %v5758_v17 = vmax.f32 %v5745_v25, 0.0  ;;  %v5726_v42 = vadd.f32 %v5692_v35, %v5567_v18  ;;  %9512 = vmatmul.mubr.msk.bf16.gmra.mxu1 %vm374_vm1, %v5790_v20 }
 0x452   : > { %v9458_v57 = vpop.f32.mrf.mxu1  ;;  %v5805_v38 = vld [vmem:[#allocation3 + $0x19] sm:$0xff]  ;;  %9515 = vmatprep.mubr.msk.bf16.mxu1 %vm9886_vm0, %v9885_v1  ;;  %9530 = vmatpush3.bf16.msra.mxu0 %v9847_v52  ;;  %v5572_v52 = vadd.f32 %v12378_v31, %v5413_v47 }
 0x453   : > { %v12430_v36 = vld [vmem:[#allocation3 + $0x20] sm:$0xff]  ;;  %5771 = vst.msk [vmem:[#allocation3 + $0x30] sm:$0xff] %vm374_vm1, %v5758_v17  ;;  %v5746_v15 = vadd.f32 %v12356_v26, %v5726_v42  ;;  %v5813_v21 = vpack.c.bf16 %v5805_v38, %v5804_v22  ;;  %9531 = vmatprep.subr.bf16.mxu0 %v9885_v1  ;;  %9560 = vmatpush3.bf16.msra.mxu1 %v9851_v2 }
 0x454   : > { %v6936_v27 = vpack.c.bf16 %v12430_v36, %v12405_v0  ;;  %v5697_v23 = vpop.f32.mrf.mxu1  ;;  %9561 = vmatprep.subr.bf16.mxu1 %v9885_v1  ;;  %v6053_v32 = vld [vmem:[#allocation3 + $0x1a] sm:$0xff] }
 0x455   : > { %v5759_v45 = vmax.f32 %v5746_v15, 0.0  ;;  %v5727_v19 = vadd.f32 %v5697_v23, %v5568_v4  ;;  %9484 = vmatmul.mubr.msk.bf16.gmra.mxu0 %vm374_vm1, %v5813_v21  ;;  %v6197_v15 = vld [vmem:[#allocation3 + $0x13] sm:$0xff]  ;;  %v6051_v23 = vld [vmem:[#allocation3 + $0xa] sm:$0xff] }
 0x456   : > { %v9461_v14 = vpop.f32.mrf.mxu1  ;;  %v12444_v11 = vld [vmem:[#allocation3 + $0x28] sm:$0xff]  ;;  %9487 = vmatprep.mubr.msk.bf16.mxu0 %vm9886_vm0, %v9885_v1  ;;  %9532 = vmatpush3.bf16.msra.mxu0 %v9848_v10  ;;  %v9857_v21 = vld [vmem:[%s12796_s5 + $0xb8] sm:$0xff]  }
 0x457   : > { %5772 = vst.msk [vmem:[#allocation3 + $0x38] sm:$0xff] %vm374_vm1, %v5759_v45  ;;  %v5747_v48 = vadd.f32 %v12356_v26, %v5727_v19  ;;  %v5791_v37 = vpack.c.bf16 %v12444_v11, %v12430_v36  ;;  %9533 = vmatprep.subr.bf16.mxu0 %v9885_v1  ;;  %9562 = vmatpush3.bf16.msra.mxu1 %v9853_v39  ;;  %v5806_v5 = vld [vmem:[#allocation3 + $0x21] sm:$0xff]  ;;  %v9854_v45 = vld [vmem:[%s12796_s5 + $0x98] sm:$0xff]   ;;  %v9858_v14 = vld [vmem:[%s12796_s5 + $0xb0] sm:$0xff]  }
 0x458   : > { %v5700_v34 = vpop.f32.mrf.mxu1  ;;  %9611 = vmatprep.subr.bf16.mxu1 %v9885_v1  ;;  %v6060_v19 = vpack.c.bf16 %v6051_v23, %v6050_v3  ;;  %v6054_v63 = vld [vmem:[#allocation3 + $0x22] sm:$0xff] }
 0x459   : > { %v5760_v49 = vmax.f32 %v5747_v48, 0.0  ;;  %v5728_v8 = vadd.f32 %v5700_v34, %v5569_v12  ;;  %9516 = vmatmul.mubr.msk.bf16.gmra.mxu1 %vm374_vm1, %v5791_v37  ;;  %v6198_v12 = vld [vmem:[#allocation3 + $0x1b] sm:$0xff]  ;;  %v9855_v48 = vld [vmem:[%s12796_s5 + $0x90] sm:$0xff]   ;;  %v9859_v34 = vld [vmem:[%s12796_s5 + $0xa8] sm:$0xff]  }
 0x45a   : > { %v9462_v50 = vpop.f32.mrf.mxu1  ;;  %v5807_v33 = vld [vmem:[#allocation3 + $0x29] sm:$0xff]  ;;  %9519 = vmatprep.mubr.msk.bf16.mxu1 %vm9886_vm0, %v9885_v1  ;;  %9534 = vmatpush3.bf16.msra.mxu0 %v9852_v40  ;;  %v9868_v3 = vld [vmem:[%s12796_s5 + $0xc0] sm:$0xff]  }
 0x45b   : > { %v12463_v43 = vld [vmem:[#allocation3 + $0x30] sm:$0xff]  ;;  %5773 = vst.msk [vmem:[#allocation3 + $0x40] sm:$0xff] %vm374_vm1, %v5760_v49  ;;  %v5748_v56 = vadd.f32 %v12356_v26, %v5728_v8  ;;  %v5814_v51 = vpack.c.bf16 %v5807_v33, %v5806_v5  ;;  %9583 = vmatprep.subr.bf16.mxu0 %v9885_v1  ;;  %v6199_v40 = vld [vmem:[#allocation3 + $0x23] sm:$0xff] }
 0x45c   : > { %v6937_v46 = vpack.c.bf16 %v12463_v43, %v12444_v11  ;;  %v5705_v54 = vpop.f32.mrf.mxu1  ;;  %v6207_v37 = vpack.c.bf16 %v6199_v40, %v6198_v12  ;;  %v6052_v49 = vld [vmem:[#allocation3 + $0x12] sm:$0xff]  ;;  %v9856_v8 = vld [vmem:[%s12796_s5 + $0x88] sm:$0xff]   ;;  %v9861_v5 = vld [vmem:[%s12796_s5 + $0xa0] sm:$0xff]  }
 0x45d   : > { %v5761_v61 = vmax.f32 %v5748_v56, 0.0  ;;  %v5729_v9 = vadd.f32 %v5705_v54, %v5570_v24  ;;  %9488 = vmatmul.mubr.msk.bf16.gmra.mxu0 %vm374_vm1, %v5814_v51  ;;  %v6061_v50 = vpack.c.bf16 %v6053_v32, %v6052_v49  ;;  %v6200_v24 = vld [vmem:[#allocation3 + $0x2b] sm:$0xff]  ;;  %v9860_v56 = vld [vmem:[%s12796_s5 + $0x80] sm:$0xff]  }
 0x45e   : > { %v9465_v29 = vpop.f32.mrf.mxu1  ;;  %v12474_v13 = vld [vmem:[#allocation3 + $0x38] sm:$0xff]  ;;  %9491 = vmatprep.mubr.msk.bf16.mxu0 %vm9886_vm0, %v9885_v1  ;;  %v6055_v54 = vld [vmem:[#allocation3 + $0x2a] sm:$0xff] }
 0x45f   : > { %5774 = vst.msk [vmem:[#allocation3 + $0x48] sm:$0xff] %vm374_vm1, %v5761_v61  ;;  %v5749_v16 = vadd.f32 %v12356_v26, %v5729_v9  ;;  %v5792_v59 = vpack.c.bf16 %v12474_v13, %v12463_v43  ;;  %v5808_v30 = vld [vmem:[#allocation3 + $0x31] sm:$0xff]  ;;  %v6062_v61 = vpack.c.bf16 %v6055_v54, %v6054_v63 }
 0x460   : > { %v5708_v44 = vpop.f32.mrf.mxu1  ;;  %v6201_v33 = vld [vmem:[#allocation3 + $0x33] sm:$0xff] }
 0x461   : > { %v5762_v6 = vmax.f32 %v5749_v16, 0.0  ;;  %v5730_v58 = vadd.f32 %v5708_v44, %v5571_v41  ;;  %9520 = vmatmul.mubr.msk.bf16.gmra.mxu1 %vm374_vm1, %v5792_v59  ;;  %v6208_v51 = vpack.c.bf16 %v6201_v33, %v6200_v24  ;;  %v6056_v59 = vld [vmem:[#allocation3 + $0x32] sm:$0xff] }
 0x462   : > { %v9466_v55 = vpop.f32.mrf.mxu1  ;;  %v5809_v53 = vld [vmem:[#allocation3 + $0x39] sm:$0xff]  ;;  %9523 = vmatprep.mubr.msk.bf16.mxu1 %vm9886_vm0, %v9885_v1  ;;  %v6492_v23 = vld [vmem:[#allocation3 + $0x2d] sm:$0xff] }
 0x463   : > { %v12488_v28 = vld [vmem:[#allocation3 + $0x40] sm:$0xff]  ;;  %5775 = vst.msk [vmem:[#allocation3 + $0x50] sm:$0xff] %vm374_vm1, %v5762_v6  ;;  %v5750_v18 = vadd.f32 %v12356_v26, %v5730_v58  ;;  %v5815_v25 = vpack.c.bf16 %v5809_v53, %v5808_v30  ;;  %v6780_v54 = vld [vmem:[#allocation3 + $0x17] sm:$0xff] }
 0x464   : > { %v6938_v7 = vpack.c.bf16 %v12488_v28, %v12474_v13  ;;  %v5713_v60 = vpop.f32.mrf.mxu1  ;;  %v6202_v29 = vld [vmem:[#allocation3 + $0x3b] sm:$0xff] }
 0x465   : > { %v5763_v20 = vmax.f32 %v5750_v18, 0.0  ;;  %v5731_v2 = vadd.f32 %v5713_v60, %v5572_v52  ;;  %9492 = vmatmul.mubr.msk.bf16.gmra.mxu0 %vm374_vm1, %v5815_v25  ;;  %v6057_v16 = vld [vmem:[#allocation3 + $0x3a] sm:$0xff]  ;;  %v6488_v18 = vld [vmem:[#allocation3 + $0xd] sm:$0xff] }
 0x466   : > { %v9469_v62 = vpop.f32.mrf.mxu1  ;;  %v5788_v35 = vld [vmem:[#allocation3 + $0x48] sm:$0x1f]  ;;  %9495 = vmatprep.mubr.msk.bf16.mxu0 %vm9886_vm0, %v9885_v1  ;;  %v6063_v44 = vpack.c.bf16 %v6057_v16, %v6056_v59  ;;  %v6489_v52 = vld [vmem:[#allocation3 + $0x15] sm:$0xff] }
 0x467   : > { %5776 = vst.msk [vmem:[#allocation3 + $0x58] sm:$0xff] %vm374_vm1, %v5763_v20  ;;  %v5751_v31 = vadd.f32 %v12356_v26, %v5731_v2  ;;  %v5793_v17 = vpack.c.bf16 %v5788_v35, %v12488_v28  ;;  %v5810_v10 = vld [vmem:[#allocation3 + $0x41] sm:$0xff]  ;;  %v5811_v4 = vld [vmem:[#allocation3 + $0x49] sm:$0x1f]  ;;  %v9865_v25 = vld [vmem:[%s12796_s5 + $0xf8] sm:$0xff]   ;;  %v6498_v60 = vpack.c.bf16 %v6489_v52, %v6488_v18 }
 0x468   : > { %v5716_v42 = vpop.f32.mrf.mxu1  ;;  %v5816_v38 = vpack.c.bf16 %v5811_v4, %v5810_v10  ;;  %v6196_v26 = vld [vmem:[#allocation3 + $0xb] sm:$0xff]  ;;  %v6203_v9 = vld [vmem:[#allocation3 + $0x43] sm:$0xff]  ;;  %v6343_v20 = vld [vmem:[#allocation3 + $0x14] sm:$0xff] }
 0x469   : > { %v5764_v57 = vmax.f32 %v5751_v31, 0.0  ;;  %9524 = vmatmul.mubr.msk.bf16.gmra.mxu1 %vm374_vm1, %v5793_v17  ;;  %v6206_v39 = vpack.c.bf16 %v6197_v15, %v6196_v26  ;;  %v6209_v41 = vpack.c.bf16 %v6203_v9, %v6202_v29  ;;  %v6058_v55 = vld [vmem:[#allocation3 + $0x42] sm:$0xff]  ;;  %v6059_v30 = vld [vmem:[#allocation3 + $0x4a] sm:$0x1f]  ;;  %v9862_v62 = vld [vmem:[%s12796_s5 + $0xd8] sm:$0xff]  }
 0x46a   : > { %v9470_v22 = vpop.f32.mrf.mxu1  ;;  %9563 = vmatprep.mubr.msk.bf16.mxu1 %vm9886_vm0, %v9885_v1  ;;  %v6204_v47 = vld [vmem:[#allocation3 + $0x4b] sm:$0xff]  ;;  %v6205_v6 = vld [vmem:[#allocation3 + $0x53] sm:$0x1f]  ;;  %v6064_v53 = vpack.c.bf16 %v6059_v30, %v6058_v55  ;;  %v6490_v42 = vld [vmem:[#allocation3 + $0x1d] sm:$0xff] }
 0x46b   : > { %5778 = vst.msk [vmem:[#allocation3 + $0x60] sm:$0x7] %vm5777_vm6, %v5764_v57  ;;  %v6210_v58 = vpack.c.bf16 %v6205_v6, %v6204_v47  ;;  %v6342_v2 = vld [vmem:[#allocation3 + $0xc] sm:$0xff]  ;;  %v6345_v22 = vld [vmem:[#allocation3 + $0x24] sm:$0xff]  ;;  %v6348_v32 = vld [vmem:[#allocation3 + $0x3c] sm:$0xff] }
 0x46c   : > { %v6352_v35 = vpack.c.bf16 %v6343_v20, %v6342_v2  ;;  %v9866_v31 = vld [vmem:[%s12796_s5 + $0xf0] sm:$0xff]   ;;  %v6491_v17 = vld [vmem:[#allocation3 + $0x25] sm:$0xff]  ;;  %v9870_v29 = vld [vmem:[%s12796_s5 + $0x118] sm:$0xff]  }
 0x46d   : > { %9496 = vmatmul.mubr.msk.bf16.gmra.mxu0 %vm374_vm1, %v5816_v38  ;;  %v9863_v10 = vld [vmem:[%s12796_s5 + $0xd0] sm:$0xff]   ;;  %v6499_v4 = vpack.c.bf16 %v6491_v17, %v6490_v42  ;;  %v9867_v57 = vld [vmem:[%s12796_s5 + $0xe8] sm:$0xff]   ;;  %v6344_v38 = vld [vmem:[#allocation3 + $0x1c] sm:$0xff] }
 0x46e   : > { %9535 = vmatprep.mubr.msk.bf16.mxu0 %vm9886_vm0, %v9885_v1  ;;  %v9864_v15 = vld [vmem:[%s12796_s5 + $0xc8] sm:$0xff]   ;;  %v6353_v26 = vpack.c.bf16 %v6345_v22, %v6344_v38  ;;  %v6351_v33 = vld [vmem:[#allocation3 + $0x54] sm:$0x1f]  ;;  %v9873_v18 = vld [vmem:[%s12796_s5 + $0x100] sm:$0xff]  }
 0x46f   : > { %v6495_v12 = vld [vmem:[#allocation3 + $0x45] sm:$0xff]  ;;  %v6634_v9 = vld [vmem:[#allocation3 + $0x16] sm:$0xff]  ;;  %v6637_v6 = vld [vmem:[#allocation3 + $0x2e] sm:$0xff] }
 0x470   : > { %v6350_v24 = vld [vmem:[#allocation3 + $0x4c] sm:$0xff]  ;;  %v6784_v52 = vld [vmem:[#allocation3 + $0x37] sm:$0xff] }
 0x471   : > { %9564 = vmatmul.mubr.msk.bf16.vlgmr.msra.gmra.mxu1 %vm374_vm1, %v6206_v39  ;;  %v6493_v39 = vld [vmem:[#allocation3 + $0x35] sm:$0xff]  ;;  %v6782_v59 = vld [vmem:[#allocation3 + $0x27] sm:$0xff] }
 0x472   : > { %9567 = vmatprep.mubr.msk.bf16.mxu1 %vm9886_vm0, %v9885_v1  ;;  %9612 = vmatpush3.bf16.msra.mxu1 %v9857_v21  ;;  %v9869_v21 = vld [vmem:[%s12796_s5 + $0xe0] sm:$0xff]   ;;  %v6783_v16 = vld [vmem:[#allocation3 + $0x2f] sm:$0xff] }
 0x473   : > { %9613 = vmatprep.subr.bf16.mxu1 %v9885_v1  ;;  %v6791_v47 = vpack.c.bf16 %v6783_v16, %v6782_v59  ;;  %v9872_v55 = vld [vmem:[%s12796_s5 + $0x108] sm:$0xff]   ;;  %v6638_v20 = vld [vmem:[#allocation3 + $0x36] sm:$0xff]  ;;  %v6643_v38 = vld [vmem:[#allocation3 + $0x5e] sm:$0x1f] }
 0x474   : > { %v6641_v17 = vld [vmem:[#allocation3 + $0x4e] sm:$0xff]  ;;  %v6640_v42 = vld [vmem:[#allocation3 + $0x46] sm:$0xff]  ;;  %v6935_v11 = vld [vmem:[#allocation3 + $0x60] sm:$0x1f] }
 0x475   : > { %9536 = vmatmul.mubr.msk.bf16.vlgmr.msra.gmra.mxu0 %vm374_vm1, %v6060_v19  ;;  %v6347_v19 = vld [vmem:[#allocation3 + $0x34] sm:$0xff]  ;;  %v6932_v36 = vld [vmem:[#allocation3 + $0x48] sm:$0xff] }
 0x476   : > { %9584 = vmatpush3.bf16.msra.mxu0 %v9854_v45  ;;  %9539 = vmatprep.mubr.msk.bf16.mxu0 %vm9886_vm0, %v9885_v1  ;;  %v6500_v45 = vpack.c.bf16 %v6493_v39, %v6492_v23  ;;  %v6933_v0 = vld [vmem:[#allocation3 + $0x50] sm:$0xff] }
 0x477   : > { %9585 = vmatprep.subr.bf16.mxu0 %v9885_v1  ;;  %9614 = vmatpush3.bf16.msra.mxu1 %v9858_v14  ;;  %v6346_v14 = vld [vmem:[#allocation3 + $0x2c] sm:$0xff] }
 0x478   : > { %9615 = vmatprep.subr.bf16.mxu1 %v9885_v1  ;;  %v6354_v40 = vpack.c.bf16 %v6347_v19, %v6346_v14 }
 0x479   : > { %9568 = vmatmul.mubr.msk.bf16.gmra.mxu1 %vm374_vm1, %v6207_v37 }
 0x47a   : > { %9571 = vmatprep.mubr.msk.bf16.mxu1 %vm9886_vm0, %v9885_v1  ;;  %9586 = vmatpush3.bf16.msra.mxu0 %v9855_v48  ;;  %v6494_v48 = vld [vmem:[#allocation3 + $0x3d] sm:$0xff] }
 0x47b   : > { %9587 = vmatprep.subr.bf16.mxu0 %v9885_v1  ;;  %9616 = vmatpush3.bf16.msra.mxu1 %v9859_v34  ;;  %v6501_v37 = vpack.c.bf16 %v6495_v12, %v6494_v48  ;;  %v6349_v34 = vld [vmem:[#allocation3 + $0x44] sm:$0xff] }
 0x47c   : > { %9617 = vmatprep.subr.bf16.mxu1 %v9885_v1  ;;  %v6355_v49 = vpack.c.bf16 %v6349_v34, %v6348_v32 }
 0x47d   : > { %9540 = vmatmul.mubr.msk.bf16.gmra.mxu0 %vm374_vm1, %v6061_v50  ;;  %v6496_v50 = vld [vmem:[#allocation3 + $0x4d] sm:$0xff] }
 0x47e   : > { %9543 = vmatprep.mubr.msk.bf16.mxu0 %vm9886_vm0, %v9885_v1  ;;  %9588 = vmatpush3.bf16.msra.mxu0 %v9856_v8  ;;  %v6497_v8 = vld [vmem:[#allocation3 + $0x55] sm:$0x1f] }
 0x47f   : > { %9589 = vmatprep.subr.bf16.mxu0 %v9885_v1  ;;  %9618 = vmatpush3.bf16.msra.mxu1 %v9861_v5  ;;  %v6502_v5 = vpack.c.bf16 %v6497_v8, %v6496_v50 }
 0x480   : > { %9667 = vmatprep.subr.bf16.mxu1 %v9885_v1 }
 0x481   : > { %9572 = vmatmul.mubr.msk.bf16.gmra.mxu1 %vm374_vm1, %v6208_v51  ;;  %v6781_v51 = vld [vmem:[#allocation3 + $0x1f] sm:$0xff] }
 0x482   : > { %9575 = vmatprep.mubr.msk.bf16.mxu1 %vm9886_vm0, %v9885_v1  ;;  %9590 = vmatpush3.bf16.msra.mxu0 %v9860_v56  ;;  %v6356_v56 = vpack.c.bf16 %v6351_v33, %v6350_v24  ;;  %v6790_v63 = vpack.c.bf16 %v6781_v51, %v6780_v54 }
 0x483   : > { %9639 = vmatprep.subr.bf16.mxu0 %v9885_v1 }
 0x485   : > { %9544 = vmatmul.mubr.msk.bf16.gmra.mxu0 %vm374_vm1, %v6062_v61  ;;  %v6635_v61 = vld [vmem:[#allocation3 + $0x1e] sm:$0xff] }
 0x486   : > { %9547 = vmatprep.mubr.msk.bf16.mxu0 %vm9886_vm0, %v9885_v1 }
 0x489   : > { %9576 = vmatmul.mubr.msk.bf16.gmra.mxu1 %vm374_vm1, %v6209_v41  ;;  %v6644_v41 = vpack.c.bf16 %v6635_v61, %v6634_v9 }
 0x48a   : > { %9579 = vmatprep.mubr.msk.bf16.mxu1 %vm9886_vm0, %v9885_v1 }
 0x48d   : > { %9548 = vmatmul.mubr.msk.bf16.gmra.mxu0 %vm374_vm1, %v6063_v44  ;;  %v9871_v44 = vld [vmem:[%s12796_s5 + $0x110] sm:$0xff]  }
 0x48e   : > { %9551 = vmatprep.mubr.msk.bf16.mxu0 %vm9886_vm0, %v9885_v1 }
 0x491   : > { %9580 = vmatmul.mubr.msk.bf16.gmra.mxu1 %vm374_vm1, %v6210_v58  ;;  %v6636_v58 = vld [vmem:[#allocation3 + $0x26] sm:$0xff] }
 0x492   : > { %9619 = vmatprep.mubr.msk.bf16.mxu1 %vm9886_vm0, %v9885_v1  ;;  %v6645_v30 = vpack.c.bf16 %v6637_v6, %v6636_v58 }
 0x495   : > { %9552 = vmatmul.mubr.msk.bf16.gmra.mxu0 %vm374_vm1, %v6064_v53  ;;  %v6785_v53 = vld [vmem:[#allocation3 + $0x3f] sm:$0xff] }
 0x496   : > { %9591 = vmatprep.mubr.msk.bf16.mxu0 %vm9886_vm0, %v9885_v1 }
 0x499   : > { %9620 = vmatmul.mubr.msk.bf16.vlgmr.msra.gmra.mxu1 %vm374_vm1, %v6498_v60  ;;  %v6639_v60 = vld [vmem:[#allocation3 + $0x3e] sm:$0xff] }
 0x49a   : > { %9623 = vmatprep.mubr.msk.bf16.mxu1 %vm9886_vm0, %v9885_v1  ;;  %9668 = vmatpush3.bf16.msra.mxu1 %v9865_v25  ;;  %v6792_v25 = vpack.c.bf16 %v6785_v53, %v6784_v52  ;;  %v6646_v2 = vpack.c.bf16 %v6639_v60, %v6638_v20 }
 0x49b   : > { %9669 = vmatprep.subr.bf16.mxu1 %v9885_v1 }
 0x49d   : > { %9592 = vmatmul.mubr.msk.bf16.vlgmr.msra.gmra.mxu0 %vm374_vm1, %v6352_v35  ;;  %v6786_v35 = vld [vmem:[#allocation3 + $0x47] sm:$0xff] }
 0x49e   : > { %9640 = vmatpush3.bf16.msra.mxu0 %v9862_v62  ;;  %9595 = vmatprep.mubr.msk.bf16.mxu0 %vm9886_vm0, %v9885_v1  ;;  %v6787_v62 = vld [vmem:[#allocation3 + $0x4f] sm:$0xff] }
 0x49f   : > { %9641 = vmatprep.subr.bf16.mxu0 %v9885_v1  ;;  %9670 = vmatpush3.bf16.msra.mxu1 %v9866_v31  ;;  %v6793_v31 = vpack.c.bf16 %v6787_v62, %v6786_v35 }
 0x4a0   : > { %9671 = vmatprep.subr.bf16.mxu1 %v9885_v1 }
 0x4a1   : > { %9624 = vmatmul.mubr.msk.bf16.gmra.mxu1 %vm374_vm1, %v6499_v4  ;;  %v6789_v4 = vld [vmem:[#allocation3 + $0x5f] sm:$0x1f] }
 0x4a2   : > { %9627 = vmatprep.mubr.msk.bf16.mxu1 %vm9886_vm0, %v9885_v1  ;;  %9642 = vmatpush3.bf16.msra.mxu0 %v9863_v10  ;;  %v6647_v10 = vpack.c.bf16 %v6641_v17, %v6640_v42 }
 0x4a3   : > { %9643 = vmatprep.subr.bf16.mxu0 %v9885_v1  ;;  %9672 = vmatpush3.bf16.msra.mxu1 %v9867_v57  ;;  %v6788_v57 = vld [vmem:[#allocation3 + $0x57] sm:$0xff] }
 0x4a4   : > { %9673 = vmatprep.subr.bf16.mxu1 %v9885_v1  ;;  %v6794_v22 = vpack.c.bf16 %v6789_v4, %v6788_v57 }
 0x4a5   : > { %9596 = vmatmul.mubr.msk.bf16.gmra.mxu0 %vm374_vm1, %v6353_v26 }
 0x4a6   : > { %9599 = vmatprep.mubr.msk.bf16.mxu0 %vm9886_vm0, %v9885_v1  ;;  %9644 = vmatpush3.bf16.msra.mxu0 %v9864_v15  ;;  %v6642_v15 = vld [vmem:[#allocation3 + $0x56] sm:$0xff] }
 0x4a7   : > { %9645 = vmatprep.subr.bf16.mxu0 %v9885_v1  ;;  %9674 = vmatpush3.bf16.msra.mxu1 %v9869_v21  ;;  %v6648_v26 = vpack.c.bf16 %v6643_v38, %v6642_v15 }
 0x4a9   : > { %9628 = vmatmul.mubr.msk.bf16.gmra.mxu1 %vm374_vm1, %v6500_v45 }
 0x4aa   : > { %9631 = vmatprep.mubr.msk.bf16.mxu1 %vm9886_vm0, %v9885_v1  ;;  %9646 = vmatpush3.bf16.msra.mxu0 %v9868_v3 }
 0x4ab   : > { %9695 = vmatprep.subr.bf16.mxu0 %v9885_v1 }
 0x4ad   : > { %9600 = vmatmul.mubr.msk.bf16.gmra.mxu0 %vm374_vm1, %v6354_v40 }
 0x4ae   : > { %9603 = vmatprep.mubr.msk.bf16.mxu0 %vm9886_vm0, %v9885_v1 }
 0x4b1   : > { %9632 = vmatmul.mubr.msk.bf16.gmra.mxu1 %vm374_vm1, %v6501_v37 }
 0x4b2   : > { %9635 = vmatprep.mubr.msk.bf16.mxu1 %vm9886_vm0, %v9885_v1 }
 0x4b5   : > { %9604 = vmatmul.mubr.msk.bf16.gmra.mxu0 %vm374_vm1, %v6355_v49 }
 0x4b6   : > { %9607 = vmatprep.mubr.msk.bf16.mxu0 %vm9886_vm0, %v9885_v1 }
 0x4b9   : > { %9636 = vmatmul.mubr.msk.bf16.gmra.mxu1 %vm374_vm1, %v6502_v5 }
 0x4ba   : > { %9675 = vmatprep.mubr.msk.bf16.mxu1 %vm9886_vm0, %v9885_v1 }
 0x4bd   : > { %9608 = vmatmul.mubr.msk.bf16.gmra.mxu0 %vm374_vm1, %v6356_v56 }
 0x4be   : > { %9647 = vmatprep.mubr.msk.bf16.mxu0 %vm9886_vm0, %v9885_v1 }
 0x4c1   : > { %9676 = vmatmul.mubr.msk.bf16.vlgmr.msra.gmra.mxu1 %vm374_vm1, %v6790_v63 }
 0x4c2   : > { %9679 = vmatprep.mubr.msk.bf16.mxu1 %vm9886_vm0, %v9885_v1 }
 0x4c5   : > { %9648 = vmatmul.mubr.msk.bf16.vlgmr.msra.gmra.mxu0 %vm374_vm1, %v6644_v41 }
 0x4c6   : > { %9696 = vmatpush3.bf16.msra.mxu0 %v9870_v29  ;;  %9651 = vmatprep.mubr.msk.bf16.mxu0 %vm9886_vm0, %v9885_v1 }
 0x4c7   : > { %9697 = vmatprep.subr.bf16.mxu0 %v9885_v1 }
 0x4c9   : > { %9680 = vmatmul.mubr.msk.bf16.gmra.mxu1 %vm374_vm1, %v6791_v47 }
 0x4ca   : > { %9683 = vmatprep.mubr.msk.bf16.mxu1 %vm9886_vm0, %v9885_v1  ;;  %9698 = vmatpush3.bf16.msra.mxu0 %v9871_v44 }
 0x4cb   : > { %9699 = vmatprep.subr.bf16.mxu0 %v9885_v1 }
 0x4cd   : > { %9652 = vmatmul.mubr.msk.bf16.gmra.mxu0 %vm374_vm1, %v6645_v30 }
 0x4ce   : > { %9655 = vmatprep.mubr.msk.bf16.mxu0 %vm9886_vm0, %v9885_v1  ;;  %9700 = vmatpush3.bf16.msra.mxu0 %v9872_v55 }
 0x4cf   : > { %9701 = vmatprep.subr.bf16.mxu0 %v9885_v1 }
 0x4d1   : > { %9684 = vmatmul.mubr.msk.bf16.gmra.mxu1 %vm374_vm1, %v6792_v25 }
 0x4d2   : > { %9687 = vmatprep.mubr.msk.bf16.mxu1 %vm9886_vm0, %v9885_v1  ;;  %9702 = vmatpush3.bf16.msra.mxu0 %v9873_v18 }
 0x4d5   : > { %9656 = vmatmul.mubr.msk.bf16.gmra.mxu0 %vm374_vm1, %v6646_v2 }
 0x4d6   : > { %9659 = vmatprep.mubr.msk.bf16.mxu0 %vm9886_vm0, %v9885_v1 }
 0x4d9   : > { %9688 = vmatmul.mubr.msk.bf16.gmra.mxu1 %vm374_vm1, %v6793_v31 }
 0x4da   : > { %9691 = vmatprep.mubr.msk.bf16.mxu1 %vm9886_vm0, %v9885_v1 }
 0x4dd   : > { %9660 = vmatmul.mubr.msk.bf16.gmra.mxu0 %vm374_vm1, %v6647_v10 }
 0x4de   : > { %9663 = vmatprep.mubr.msk.bf16.mxu0 %vm9886_vm0, %v9885_v1 }
 0x4e1   : > { %9692 = vmatmul.mubr.msk.bf16.gmra.mxu1 %vm374_vm1, %v6794_v22 }
 0x4e5   : > { %9664 = vmatmul.mubr.msk.bf16.gmra.mxu0 %vm374_vm1, %v6648_v26 }
 0x4e6   : > { %9703 = vmatprep.mubr.msk.bf16.mxu0 %vm9886_vm0, %v9885_v1 }
 0x4ed   : > { %9704 = vmatmul.mubr.msk.bf16.vlgmr.msra.gmra.mxu0 %vm374_vm1, %v6936_v27  ;;  %v6939_v27 = vpack.c.bf16 %v6933_v0, %v6932_v36 }
 0x4ee   : > { %9707 = vmatprep.mubr.msk.bf16.mxu0 %vm9886_vm0, %v9885_v1 }
 0x4f5   : > { %9708 = vmatmul.mubr.msk.bf16.gmra.mxu0 %vm374_vm1, %v6937_v46  ;;  %v6934_v46 = vld [vmem:[#allocation3 + $0x58] sm:$0xff] }
 0x4f6   : > { %9711 = vmatprep.mubr.msk.bf16.mxu0 %vm9886_vm0, %v9885_v1  ;;  %v6940_v39 = vpack.c.bf16 %v6935_v11, %v6934_v46 }
 0x4fd   : > { %9712 = vmatmul.mubr.msk.bf16.gmra.mxu0 %vm374_vm1, %v6938_v7 }
 0x4fe   : > { %9715 = vmatprep.mubr.msk.bf16.mxu0 %vm9886_vm0, %v9885_v1 }
 0x505   : > { %9716 = vmatmul.mubr.msk.bf16.gmra.mxu0 %vm374_vm1, %v6939_v27 }
 0x506   : > { %9719 = vmatprep.mubr.msk.bf16.mxu0 %vm9886_vm0, %v9885_v1  ;;  %vm7119_vm0 = vcmask 516096  }
 0x509   : > { %v6011_v43 = vpop.f32.mrf.mxu1 }
 0x50b   : > { %v9509_v21 = vpop.f32.mrf.mxu1 }
 0x50d   : > { %v5899_v23 = vpop.f32.mrf.mxu0  ;;  %v6014_v13 = vpop.f32.mrf.mxu1  ;;  %9720 = vmatmul.mubr.msk.bf16.gmra.mxu0 %vm374_vm1, %v6940_v39 }
 0x50e   : > { %v6012_v28 = vadd.f32 %v6011_v43, %v5899_v23 }
 0x50f   : > { %v9481_v7 = vpop.f32.mrf.mxu0  ;;  %v9510_v3 = vpop.f32.mrf.mxu1 }
 0x511   : > { %v5902_v45 = vpop.f32.mrf.mxu0  ;;  %v6019_v19 = vpop.f32.mrf.mxu1 }
 0x512   : > { %v6015_v14 = vadd.f32 %v6014_v13, %v5902_v45 }
 0x513   : > { %v9482_v40 = vpop.f32.mrf.mxu0  ;;  %v9513_v12 = vpop.f32.mrf.mxu1 }
 0x515   : > { %v5907_v48 = vpop.f32.mrf.mxu0  ;;  %v6022_v37 = vpop.f32.mrf.mxu1 }
 0x516   : > { %v6020_v1 = vadd.f32 %v6019_v19, %v5907_v48 }
 0x517   : > { %v9485_v34 = vpop.f32.mrf.mxu0  ;;  %v9514_v32 = vpop.f32.mrf.mxu1 }
 0x519   : > { %v5910_v49 = vpop.f32.mrf.mxu0  ;;  %v6027_v8 = vpop.f32.mrf.mxu1 }
 0x51a   : > { %v6023_v50 = vadd.f32 %v6022_v37, %v5910_v49 }
 0x51b   : > { %v9486_v5 = vpop.f32.mrf.mxu0  ;;  %v9517_v33 = vpop.f32.mrf.mxu1 }
 0x51d   : > { %v5915_v24 = vpop.f32.mrf.mxu0  ;;  %v6030_v56 = vpop.f32.mrf.mxu1 }
 0x51e   : > { %v6028_v51 = vadd.f32 %v6027_v8, %v5915_v24 }
 0x51f   : > { %v9489_v54 = vpop.f32.mrf.mxu0  ;;  %v9518_v63 = vpop.f32.mrf.mxu1 }
 0x521   : > { %v5918_v61 = vpop.f32.mrf.mxu0  ;;  %v6035_v9 = vpop.f32.mrf.mxu1 }
 0x522   : > { %v6031_v29 = vadd.f32 %v6030_v56, %v5918_v61 }
 0x523   : > { %v9490_v41 = vpop.f32.mrf.mxu0  ;;  %v9521_v16 = vpop.f32.mrf.mxu1 }
 0x525   : > { %v5923_v59 = vpop.f32.mrf.mxu0  ;;  %v6038_v44 = vpop.f32.mrf.mxu1 }
 0x526   : > { %v6036_v47 = vadd.f32 %v6035_v9, %v5923_v59 }
 0x527   : > { %v9493_v6 = vpop.f32.mrf.mxu0  ;;  %v9522_v58 = vpop.f32.mrf.mxu1 }
 0x529   : > { %v5926_v55 = vpop.f32.mrf.mxu0  ;;  %v6043_v30 = vpop.f32.mrf.mxu1 }
 0x52a   : > { %v6039_v53 = vadd.f32 %v6038_v44, %v5926_v55 }
 0x52b   : > { %v9494_v52 = vpop.f32.mrf.mxu0  ;;  %v9525_v18 = vpop.f32.mrf.mxu1 }
 0x52d   : > { %v5931_v25 = vpop.f32.mrf.mxu0  ;;  %v6046_v60 = vpop.f32.mrf.mxu1 }
 0x52e   : > { %v6044_v20 = vadd.f32 %v6043_v30, %v5931_v25 }
 0x52f   : > { %v9497_v2 = vpop.f32.mrf.mxu0  ;;  %v9526_v62 = vpop.f32.mrf.mxu1 }
 0x531   : > { %v5934_v35 = vpop.f32.mrf.mxu0  ;;  %v6293_v31 = vpop.f32.mrf.mxu1 }
 0x532   : > { %v6047_v17 = vadd.f32 %v6046_v60, %v5934_v35 }
 0x533   : > { %v9498_v42 = vpop.f32.mrf.mxu0  ;;  %v9565_v10 = vpop.f32.mrf.mxu1 }
 0x535   : > { %v6147_v4 = vpop.f32.mrf.mxu0  ;;  %v6296_v57 = vpop.f32.mrf.mxu1 }
 0x536   : > { %v6186_v22 = vadd.f32 %v6147_v4, %v6012_v28 }
 0x537   : > { %v9537_v38 = vpop.f32.mrf.mxu0  ;;  %v9566_v15 = vpop.f32.mrf.mxu1 }
 0x538   : > { %v6332_v26 = vadd.f32 %v6293_v31, %v6186_v22 }
 0x539   : > { %v6150_v0 = vpop.f32.mrf.mxu0  ;;  %v6301_v36 = vpop.f32.mrf.mxu1 }
 0x53a   : > { %v6187_v27 = vadd.f32 %v6150_v0, %v6015_v14 }
 0x53b   : > { %v9538_v11 = vpop.f32.mrf.mxu0  ;;  %v9569_v43 = vpop.f32.mrf.mxu1 }
 0x53c   : > { %v6333_v46 = vadd.f32 %v6296_v57, %v6187_v27 }
 0x53d   : > { %v6155_v21 = vpop.f32.mrf.mxu0  ;;  %v6304_v39 = vpop.f32.mrf.mxu1 }
 0x53e   : > { %v6188_v23 = vadd.f32 %v6155_v21, %v6020_v1 }
 0x53f   : > { %v9541_v13 = vpop.f32.mrf.mxu0  ;;  %v9570_v7 = vpop.f32.mrf.mxu1 }
 0x540   : > { %v6334_v3 = vadd.f32 %v6301_v36, %v6188_v23 }
 0x541   : > { %v6158_v45 = vpop.f32.mrf.mxu0  ;;  %v6309_v19 = vpop.f32.mrf.mxu1 }
 0x542   : > { %v6189_v40 = vadd.f32 %v6158_v45, %v6023_v50 }
 0x543   : > { %v9542_v12 = vpop.f32.mrf.mxu0  ;;  %v9573_v28 = vpop.f32.mrf.mxu1 }
 0x544   : > { %v6335_v48 = vadd.f32 %v6304_v39, %v6189_v40 }
 0x545   : > { %v6163_v37 = vpop.f32.mrf.mxu0  ;;  %v6312_v34 = vpop.f32.mrf.mxu1 }
 0x546   : > { %v6190_v32 = vadd.f32 %v6163_v37, %v6028_v51 }
 0x547   : > { %v9545_v49 = vpop.f32.mrf.mxu0  ;;  %v9574_v14 = vpop.f32.mrf.mxu1 }
 0x548   : > { %v6336_v8 = vadd.f32 %v6309_v19, %v6190_v32 }
 0x549   : > { %v6166_v5 = vpop.f32.mrf.mxu0  ;;  %v6317_v33 = vpop.f32.mrf.mxu1 }
 0x54a   : > { %v6191_v24 = vadd.f32 %v6166_v5, %v6031_v29 }
 0x54b   : > { %v9546_v56 = vpop.f32.mrf.mxu0  ;;  %v9577_v1 = vpop.f32.mrf.mxu1 }
 0x54c   : > { %v6337_v54 = vadd.f32 %v6312_v34, %v6191_v24 }
 0x54d   : > { %v6171_v63 = vpop.f32.mrf.mxu0  ;;  %v6320_v61 = vpop.f32.mrf.mxu1 }
 0x54e   : > { %v6192_v9 = vadd.f32 %v6171_v63, %v6036_v47 }
 0x54f   : > { %v9549_v41 = vpop.f32.mrf.mxu0  ;;  %v9578_v50 = vpop.f32.mrf.mxu1 }
 0x550   : > { %v6338_v16 = vadd.f32 %v6317_v33, %v6192_v9 }
 0x551   : > { %v6174_v59 = vpop.f32.mrf.mxu0  ;;  %v6325_v44 = vpop.f32.mrf.mxu1 }
 0x552   : > { %v6193_v6 = vadd.f32 %v6174_v59, %v6039_v53 }
 0x553   : > { %v9550_v58 = vpop.f32.mrf.mxu0  ;;  %v9581_v51 = vpop.f32.mrf.mxu1 }
 0x554   : > { %v6339_v55 = vadd.f32 %v6320_v61, %v6193_v6 }
 0x555   : > { %v6179_v30 = vpop.f32.mrf.mxu0  ;;  %v6328_v52 = vpop.f32.mrf.mxu1 }
 0x556   : > { %v6194_v18 = vadd.f32 %v6179_v30, %v6044_v20 }
 0x557   : > { %v9553_v25 = vpop.f32.mrf.mxu0  ;;  %v9582_v29 = vpop.f32.mrf.mxu1 }
 0x558   : > { %v6340_v60 = vadd.f32 %v6325_v44, %v6194_v18 }
 0x559   : > { %v6182_v2 = vpop.f32.mrf.mxu0  ;;  %v6585_v62 = vpop.f32.mrf.mxu1 }
 0x55a   : > { %v6195_v35 = vadd.f32 %v6182_v2, %v6047_v17 }
 0x55b   : > { %v9554_v31 = vpop.f32.mrf.mxu0  ;;  %v9621_v47 = vpop.f32.mrf.mxu1 }
 0x55c   : > { %v6341_v42 = vadd.f32 %v6328_v52, %v6195_v35 }
 0x55d   : > { %v6439_v10 = vpop.f32.mrf.mxu0  ;;  %v6588_v4 = vpop.f32.mrf.mxu1 }
 0x55e   : > { %v6478_v57 = vadd.f32 %v6439_v10, %v6332_v26 }
 0x55f   : > { %v9593_v22 = vpop.f32.mrf.mxu0  ;;  %v9622_v53 = vpop.f32.mrf.mxu1 }
 0x560   : > { %v12696_v38 = vadd.f32 %v6585_v62, %v6478_v57 }
 0x561   : > { %v6442_v15 = vpop.f32.mrf.mxu0  ;;  %v6593_v0 = vpop.f32.mrf.mxu1 }
 0x562   : > { %v6479_v36 = vadd.f32 %v6442_v15, %v6333_v46 }
 0x563   : > { %v9594_v20 = vpop.f32.mrf.mxu0  ;;  %v9625_v27 = vpop.f32.mrf.mxu1 }
 0x564   : > { %v12698_v11 = vadd.f32 %v6588_v4, %v6479_v36 }
 0x565   : > { %v6447_v43 = vpop.f32.mrf.mxu0  ;;  %v6596_v21 = vpop.f32.mrf.mxu1 }
 0x566   : > { %v6480_v17 = vadd.f32 %v6447_v43, %v6334_v3 }
 0x567   : > { %v9597_v39 = vpop.f32.mrf.mxu0  ;;  %v9626_v23 = vpop.f32.mrf.mxu1 }
 0x568   : > { %v12700_v13 = vadd.f32 %v6593_v0, %v6480_v17 }
 0x569   : > { %v6450_v7 = vpop.f32.mrf.mxu0  ;;  %v6601_v26 = vpop.f32.mrf.mxu1 }
 0x56a   : > { %v6481_v45 = vadd.f32 %v6450_v7, %v6335_v48 }
 0x56b   : > { %v9598_v19 = vpop.f32.mrf.mxu0  ;;  %v9629_v40 = vpop.f32.mrf.mxu1 }
 0x56c   : > { %v12702_v12 = vadd.f32 %v6596_v21, %v6481_v45 }
 0x56d   : > { %v6455_v28 = vpop.f32.mrf.mxu0  ;;  %v6604_v46 = vpop.f32.mrf.mxu1 }
 0x56e   : > { %v6482_v37 = vadd.f32 %v6455_v28, %v6336_v8 }
 0x56f   : > { %v9601_v34 = vpop.f32.mrf.mxu0  ;;  %v9630_v32 = vpop.f32.mrf.mxu1 }
 0x570   : > { %v12704_v49 = vadd.f32 %v6601_v26, %v6482_v37 }
 0x571   : > { %v6458_v14 = vpop.f32.mrf.mxu0  ;;  %v6609_v3 = vpop.f32.mrf.mxu1 }
 0x572   : > { %v6483_v5 = vadd.f32 %v6458_v14, %v6337_v54 }
 0x573   : > { %v9602_v33 = vpop.f32.mrf.mxu0  ;;  %v9633_v24 = vpop.f32.mrf.mxu1 }
 0x574   : > { %v12706_v56 = vadd.f32 %v6604_v46, %v6483_v5 }
 0x575   : > { %v6463_v1 = vpop.f32.mrf.mxu0  ;;  %v6612_v48 = vpop.f32.mrf.mxu1 }
 0x576   : > { %v6484_v63 = vadd.f32 %v6463_v1, %v6338_v16 }
 0x577   : > { %v9605_v61 = vpop.f32.mrf.mxu0  ;;  %v9634_v9 = vpop.f32.mrf.mxu1 }
 0x578   : > { %v12708_v41 = vadd.f32 %v6609_v3, %v6484_v63 }
 0x579   : > { %v6466_v50 = vpop.f32.mrf.mxu0  ;;  %v6617_v8 = vpop.f32.mrf.mxu1 }
 0x57a   : > { %v6485_v59 = vadd.f32 %v6466_v50, %v6339_v55 }
 0x57b   : > { %v9606_v44 = vpop.f32.mrf.mxu0  ;;  %v9637_v6 = vpop.f32.mrf.mxu1 }
 0x57c   : > { %v12710_v58 = vadd.f32 %v6612_v48, %v6485_v59  ;;  %v12740_v44 = vld [vmem:[%s12797_s6] ss:$0 sm:$0xff] }
 0x57d   : > { %v6471_v51 = vpop.f32.mrf.mxu0  ;;  %v6620_v54 = vpop.f32.mrf.mxu1 }
 0x57e   : > { %v6486_v30 = vadd.f32 %v6471_v51, %v6340_v60 }
 0x57f   : > { %v9609_v52 = vpop.f32.mrf.mxu0  ;;  %v9638_v18 = vpop.f32.mrf.mxu1 }
 0x580   : > { %v12712_v25 = vadd.f32 %v6617_v8, %v6486_v30 }
 0x581   : > { %v6474_v29 = vpop.f32.mrf.mxu0  ;;  %v6877_v16 = vpop.f32.mrf.mxu1 }
 0x582   : > { %v6487_v2 = vadd.f32 %v6474_v29, %v6341_v42 }
 0x583   : > { %v9610_v62 = vpop.f32.mrf.mxu0  ;;  %v9677_v35 = vpop.f32.mrf.mxu1 }
 0x584   : > { %v12714_v31 = vadd.f32 %v6620_v54, %v6487_v2 }
 0x585   : > { %v6731_v47 = vpop.f32.mrf.mxu0  ;;  %v6880_v55 = vpop.f32.mrf.mxu1 }
 0x586   : > { %v6770_v63 = vadd.f32 %v6731_v47, %v12696_v38 }
 0x587   : > { %v9649_v10 = vpop.f32.mrf.mxu0  ;;  %v9678_v4 = vpop.f32.mrf.mxu1 }
 0x588   : > { %v6916_v8 = vadd.f32 %v6877_v16, %v6770_v63 }
 0x589   : > { %v6734_v57 = vpop.f32.mrf.mxu0  ;;  %v6885_v22 = vpop.f32.mrf.mxu1 }
 0x58a   : > { %v6771_v50 = vadd.f32 %v6734_v57, %v12698_v11 }
 0x58b   : > { %v9650_v53 = vpop.f32.mrf.mxu0  ;;  %v9681_v15 = vpop.f32.mrf.mxu1 }
 0x58c   : > { %v6917_v38 = vadd.f32 %v6880_v55, %v6771_v50 }
 0x58d   : > { %v6739_v60 = vpop.f32.mrf.mxu0  ;;  %v6888_v0 = vpop.f32.mrf.mxu1 }
 0x58e   : > { %v6772_v54 = vadd.f32 %v6739_v60, %v12700_v13 }
 0x58f   : > { %v9653_v36 = vpop.f32.mrf.mxu0  ;;  %v9682_v20 = vpop.f32.mrf.mxu1 }
 0x590   : > { %v6918_v2 = vadd.f32 %v6885_v22, %v6772_v54 }
 0x591   : > { %v6742_v27 = vpop.f32.mrf.mxu0  ;;  %v12716_v43 = vpop.f32.mrf.mxu1 }
 0x592   : > { %v6773_v16 = vadd.f32 %v6742_v27, %v12702_v12 }
 0x593   : > { %v9654_v42 = vpop.f32.mrf.mxu0  ;;  %v9685_v21 = vpop.f32.mrf.mxu1 }
 0x594   : > { %v6919_v57 = vadd.f32 %v6888_v0, %v6773_v16 }
 0x595   : > { %v6747_v17 = vpop.f32.mrf.mxu0  ;;  %v12718_v39 = vpop.f32.mrf.mxu1 }
 0x596   : > { %v6774_v10 = vadd.f32 %v6747_v17, %v12704_v49 }
 0x597   : > { %v9657_v23 = vpop.f32.mrf.mxu0  ;;  %v9686_v7 = vpop.f32.mrf.mxu1 }
 0x598   : > { %v6920_v49 = vadd.f32 %v12716_v43, %v6774_v10 }
 0x599   : > { %v6750_v26 = vpop.f32.mrf.mxu0  ;;  %v12720_v45 = vpop.f32.mrf.mxu1 }
 0x59a   : > { %v6775_v60 = vadd.f32 %v6750_v26, %v12706_v56 }
 0x59b   : > { %v9658_v19 = vpop.f32.mrf.mxu0  ;;  %v9689_v40 = vpop.f32.mrf.mxu1 }
 0x59c   : > { %v6921_v23 = vadd.f32 %v12718_v39, %v6775_v60 }
 0x59d   : > { %v6755_v28 = vpop.f32.mrf.mxu0  ;;  %v12722_v46 = vpop.f32.mrf.mxu1 }
 0x59e   : > { %v6776_v21 = vadd.f32 %v6755_v28, %v12708_v41 }
 0x59f   : > { %v9661_v37 = vpop.f32.mrf.mxu0  ;;  %v9690_v34 = vpop.f32.mrf.mxu1 }
 0x5a0   : > { %v6922_v41 = vadd.f32 %v12720_v45, %v6776_v21 }
 0x5a1   : > { %v12724_v32 = vpop.f32.mrf.mxu0  ;;  %v12726_v14 = vpop.f32.mrf.mxu1 }
 0x5a2   : > { %v6777_v43 = vadd.f32 %v12724_v32, %v12710_v58 }
 0x5a3   : > { %v9662_v3 = vpop.f32.mrf.mxu0  ;;  %v9693_v5 = vpop.f32.mrf.mxu1 }
 0x5a4   : > { %v6923_v58 = vadd.f32 %v12722_v46, %v6777_v43 }
 0x5a5   : > { %v12728_v33 = vpop.f32.mrf.mxu0  ;;  %v12730_v24 = vpop.f32.mrf.mxu1 }
 0x5a6   : > { %v6778_v3 = vadd.f32 %v12728_v33, %v12712_v25 }
 0x5a7   : > { %v9665_v1 = vpop.f32.mrf.mxu0  ;;  %v9694_v48 = vpop.f32.mrf.mxu1 }
 0x5a8   : > { %v6924_v33 = vadd.f32 %v12726_v14, %v6778_v3 }
 0x5a9   : > { %v12733_v61 = vpop.f32.mrf.mxu0 }
 0x5aa   : > { %v6779_v63 = vadd.f32 %v12733_v61, %v12714_v31 }
 0x5ab   : > { %v9666_v9 = vpop.f32.mrf.mxu0 }
 0x5ad   : > { %v7023_v59 = vpop.f32.mrf.mxu0 }
 0x5ae   : > { %v7062_v6 = vadd.f32 %v7023_v59, %v6916_v8 }
 0x5af   : > { %v9705_v51 = vpop.f32.mrf.mxu0 }
 0x5b0   : > { %v7079_v30 = vadd.f32 %v12740_v44, %v7062_v6  ;;  %v6925_v6 = vadd.f32 %v12730_v24, %v6779_v63 }
 0x5b1   : > { %v7026_v11 = vpop.f32.mrf.mxu0 }
 0x5b2   : > { %v7089_v52 = vmax.f32 %v7079_v30, 0.0  ;;  %v7063_v18 = vadd.f32 %v7026_v11, %v6917_v38 }
 0x5b3   : > { %v9706_v29 = vpop.f32.mrf.mxu0 }
 0x5b4   : > { %7100 = vst.msk [vmem:[%s12747_s19] sm:$0x7f] %vm7099_vm7, %v7089_v52  ;;  %v7080_v13 = vadd.f32 %v12740_v44, %v7063_v18 }
 0x5b5   : > { %v7031_v62 = vpop.f32.mrf.mxu0 }
 0x5b6   : > { %v7090_v35 = vmax.f32 %v7080_v13, 0.0  ;;  %v7064_v47 = vadd.f32 %v7031_v62, %v6918_v2 }
 0x5b7   : > { %v9709_v55 = vpop.f32.mrf.mxu0 }
 0x5b8   : > { %7102 = vst.msk [vmem:[%s12747_s19 + $0x4] sm:$0xf8] %vm7101_vm8, %v7090_v35  ;;  %v7081_v4 = vadd.f32 %v12740_v44, %v7064_v47 }
 0x5b9   : > { %v7034_v12 = vpop.f32.mrf.mxu0 }
 0x5ba   : > { %v7091_v53 = vmax.f32 %v7081_v4, 0.0  ;;  %v7065_v15 = vadd.f32 %v7034_v12, %v6919_v57 }
 0x5bb   : > { %v9710_v22 = vpop.f32.mrf.mxu0 }
 0x5bc   : > { %7104 = vst.msk [vmem:[%s12747_s19 + $0xc] sm:$0x3] %vm7103_vm9, %v7091_v53  ;;  %v7082_v36 = vadd.f32 %v12740_v44, %v7065_v15 }
 0x5bd   : > { %7106 = vst.msk [vmem:[%s12747_s19 + $0x8] sm:$0xc0] %vm7105_vm10, %v7091_v53  ;;  %v7039_v20 = vpop.f32.mrf.mxu0 }
 0x5be   : > { %v7092_v27 = vmax.f32 %v7082_v36, 0.0  ;;  %v7066_v42 = vadd.f32 %v7039_v20, %v6920_v49 }
 0x5bf   : > { %v9713_v0 = vpop.f32.mrf.mxu0 }
 0x5c0   : > { %7107 = vst.msk [vmem:[%s12747_s19 + $0x10] sm:$0x1f] %vm288_vm5, %v7092_v27  ;;  %v7083_v17 = vadd.f32 %v12740_v44, %v7066_v42 }
 0x5c1   : > { %v7042_v56 = vpop.f32.mrf.mxu0 }
 0x5c2   : > { %v7093_v7 = vmax.f32 %v7083_v17, 0.0  ;;  %v7067_v26 = vadd.f32 %v7042_v56, %v6921_v23 }
 0x5c3   : > { %v9714_v19 = vpop.f32.mrf.mxu0 }
 0x5c4   : > { %7109 = vst.msk [vmem:[%s12747_s19 + $0x14] sm:$0xfe] %vm7108_vm11, %v7093_v7  ;;  %v7084_v40 = vadd.f32 %v12740_v44, %v7067_v26 }
 0x5c5   : > { %v7047_v28 = vpop.f32.mrf.mxu0 }
 0x5c6   : > { %v7094_v37 = vmax.f32 %v7084_v40, 0.0  ;;  %v7068_v39 = vadd.f32 %v7047_v28, %v6922_v41 }
 0x5c7   : > { %v9717_v34 = vpop.f32.mrf.mxu0 }
 0x5c8   : > { %7111 = vst.msk [vmem:[%s12747_s19 + $0x18] sm:$0xf0] %vm7110_vm12, %v7094_v37  ;;  %v7085_v5 = vadd.f32 %v12740_v44, %v7068_v39 }
 0x5c9   : > { %v7050_v32 = vpop.f32.mrf.mxu0 }
 0x5ca   : > { %v7095_v1 = vmax.f32 %v7085_v5, 0.0  ;;  %v7069_v45 = vadd.f32 %v7050_v32, %v6923_v58 }
 0x5cb   : > { %v9718_v48 = vpop.f32.mrf.mxu0 }
 0x5cc   : > { %7112 = vst.msk [vmem:[%s12747_s19 + $0x20] sm:$0x7] %vm5777_vm6, %v7095_v1  ;;  %v7086_v25 = vadd.f32 %v12740_v44, %v7069_v45 }
 0x5cd   : > { %7114 = vst.msk [vmem:[%s12747_s19 + $0x1c] sm:$0x80] %vm7113_vm13, %v7095_v1  ;;  %v7055_v9 = vpop.f32.mrf.mxu0 }
 0x5ce   : > { %v7096_v46 = vmax.f32 %v7086_v25, 0.0  ;;  %v7070_v50 = vadd.f32 %v7055_v9, %v6924_v33 }
 0x5cf   : > { %v9721_v8 = vpop.f32.mrf.mxu0 }
 0x5d0   : > { %7116 = vst.msk [vmem:[%s12747_s19 + $0x24] sm:$0x3f] %vm7115_vm14, %v7096_v46  ;;  %v7087_v59 = vadd.f32 %v12740_v44, %v7070_v50 }
 0x5d1   : > { %v7058_v31 = vpop.f32.mrf.mxu0 }
 0x5d2   : > { %v7097_v61 = vmax.f32 %v7087_v59, 0.0  ;;  %v7071_v51 = vadd.f32 %v7058_v31, %v6925_v6 }
 0x5d3   : > { %v9722_v54 = vpop.f32.mrf.mxu0 }
 0x5d4   : > { %7118 = vst.msk [vmem:[%s12747_s19 + $0x28] sm:$0xfc] %vm7117_vm15, %v7097_v61  ;;  %v7088_v30 = vadd.f32 %v12740_v44, %v7071_v51 }
 0x5d6   : > { %v7098_v14 = vmax.f32 %v7088_v30, 0.0 }
 0x5d8   : > { %7120 = vst.msk [vmem:[%s12747_s19 + $0x30] sm:$0x1] %vm7119_vm0, %v7098_v14 }
 0x5d9 PF: > { %s17_s24 = sadd.s32 1, %s9883_s24  }
 0x5da   : > { %p14_p4 = scmp.ge.s32.totalorder %s17_s24, 4  }
 0x5dc   :  { %16 = sbr.rel (!%p14_p4) target bundleno = 1 (0x1), region = 110 }

// kernel: arsenet_apply.3
= control target key start
LH: loop header
LB: loop body
LE: loop exit
PB: predicated region body
PF: predicated region fallthrough
CT: control target
= control target key end

     0   :  { %vm4797_vm0 = vcmask 523264   ;;  %s11020_s1 = inlined_call_operand.vmem [shape: bf16[3136,512], index: 1, kind: input, shape index: {}]   ;;  %s11021_s0 = inlined_call_operand.vmem [shape: f32[8,3136], index: 0, kind: input, shape index: {}]   ;;  %s11022_s2 = inlined_call_operand.vmem [shape: f32[1,512], index: 2, kind: input, shape index: {}]   ;;  %s11023_s3 = inlined_call_operand.vmem [shape: bf16[512,128], index: 3, kind: input, shape index: {}]   ;;  %s11024_s4 = inlined_call_operand.vmem [shape: f32[1,128], index: 4, kind: input, shape index: {}]   ;;  %s11025_s5 = inlined_call_operand.vmem [shape: f32[8,128], index: 5, kind: output, shape index: {}]  }
   0x1   :  { %v7087_v0 = vld [vmem:[%s11020_s1 + $0xe4] ss:$16 sps:$4 sm:$0xff]   ;;  %v7091_v2 = vld [vmem:[%s11020_s1 + $0xe0] ss:$16 sps:$4 sm:$0xff]   ;;  %v22_v46 = vld [vmem:[%s11021_s0 + $0x8] sm:$0xff] }
   0x2   :  { %v7089_v1 = vld [vmem:[%s11020_s1 + $0x2e4] ss:$16 sps:$4 sm:$0xff]   ;;  %4801 = vmatprep.subr.bf16.mxu0 %v7087_v0  ;;  %v7092_v3 = vld [vmem:[%s11020_s1 + $0x2e0] ss:$16 sps:$4 sm:$0xff]   ;;  %v8474_v49 = vpack.c.bf16 %v22_v46, %v22_v46  ;;  %v24_v50 = vld [vmem:[%s11021_s0 + $0x18] sm:$0xff] }
   0x3   :  { %4842 = vmatprep.subr.bf16.mxu1 %v7089_v1  ;;  %v7093_v4 = vld [vmem:[%s11020_s1 + $0xc4] ss:$16 sps:$4 sm:$0xff]   ;;  %4802 = vmatpush1.bf16.msra.mxu0 %v7091_v2  ;;  %v7097_v6 = vld [vmem:[%s11020_s1 + $0xc0] ss:$16 sps:$4 sm:$0xff]   ;;  %v8482_v52 = vpack.c.bf16 %v24_v50, %v24_v50 }
   0x4   :  { %4843 = vmatpush1.bf16.msra.mxu1 %v7092_v3  ;;  %v7095_v5 = vld [vmem:[%s11020_s1 + $0x2c4] ss:$16 sps:$4 sm:$0xff]   ;;  %4803 = vmatprep.subr.bf16.mxu0 %v7093_v4  ;;  %v7098_v7 = vld [vmem:[%s11020_s1 + $0x2c0] ss:$16 sps:$4 sm:$0xff]  }
   0x5   :  { %4844 = vmatprep.subr.bf16.mxu1 %v7095_v5  ;;  %v7099_v8 = vld [vmem:[%s11020_s1 + $0xa4] ss:$16 sps:$4 sm:$0xff]   ;;  %v7103_v10 = vld [vmem:[%s11020_s1 + $0xa0] ss:$16 sps:$4 sm:$0xff]   ;;  %4833 = vmatprep.mubr.bf16.mxu0 %v8474_v49 }
   0x6   :  { %v7101_v9 = vld [vmem:[%s11020_s1 + $0x2a4] ss:$16 sps:$4 sm:$0xff]   ;;  %v7104_v11 = vld [vmem:[%s11020_s1 + $0x2a0] ss:$16 sps:$4 sm:$0xff]   ;;  %4874 = vmatprep.mubr.bf16.mxu1 %v8482_v52 }
   0x7   :  { %4804 = vmatpush1.bf16.msra.mxu0 %v7097_v6  ;;  %v7105_v12 = vld [vmem:[%s11020_s1 + $0x84] ss:$16 sps:$4 sm:$0xff]   ;;  %v7109_v14 = vld [vmem:[%s11020_s1 + $0x80] ss:$16 sps:$4 sm:$0xff]  }
   0x8   :  { %4845 = vmatpush1.bf16.msra.mxu1 %v7098_v7  ;;  %4805 = vmatprep.subr.bf16.mxu0 %v7099_v8  ;;  %v7107_v13 = vld [vmem:[%s11020_s1 + $0x284] ss:$16 sps:$4 sm:$0xff]   ;;  %v7110_v15 = vld [vmem:[%s11020_s1 + $0x280] ss:$16 sps:$4 sm:$0xff]  }
   0x9   :  { %4846 = vmatprep.subr.bf16.mxu1 %v7101_v9  ;;  %v7111_v16 = vld [vmem:[%s11020_s1 + $0x64] ss:$16 sps:$4 sm:$0xff]   ;;  %v7115_v18 = vld [vmem:[%s11020_s1 + $0x60] ss:$16 sps:$4 sm:$0xff]  }
   0xa   :  { %v7113_v17 = vld [vmem:[%s11020_s1 + $0x264] ss:$16 sps:$4 sm:$0xff]   ;;  %v7116_v19 = vld [vmem:[%s11020_s1 + $0x260] ss:$16 sps:$4 sm:$0xff]  }
   0xb   :  { %4806 = vmatpush1.bf16.msra.mxu0 %v7103_v10  ;;  %v7117_v20 = vld [vmem:[%s11020_s1 + $0x44] ss:$16 sps:$4 sm:$0xff]   ;;  %v7121_v22 = vld [vmem:[%s11020_s1 + $0x40] ss:$16 sps:$4 sm:$0xff]  }
   0xc   :  { %4847 = vmatpush1.bf16.msra.mxu1 %v7104_v11  ;;  %4807 = vmatprep.subr.bf16.mxu0 %v7105_v12  ;;  %v7119_v21 = vld [vmem:[%s11020_s1 + $0x244] ss:$16 sps:$4 sm:$0xff]   ;;  %v7122_v23 = vld [vmem:[%s11020_s1 + $0x240] ss:$16 sps:$4 sm:$0xff]  }
   0xd   :  { %4848 = vmatprep.subr.bf16.mxu1 %v7107_v13  ;;  %v7123_v24 = vld [vmem:[%s11020_s1 + $0x24] ss:$16 sps:$4 sm:$0xff]   ;;  %v7127_v26 = vld [vmem:[%s11020_s1 + $0x20] ss:$16 sps:$4 sm:$0xff]  }
   0xe   :  { %v7125_v25 = vld [vmem:[%s11020_s1 + $0x224] ss:$16 sps:$4 sm:$0xff]   ;;  %v7128_v27 = vld [vmem:[%s11020_s1 + $0x220] ss:$16 sps:$4 sm:$0xff]  }
   0xf   :  { %4808 = vmatpush1.bf16.msra.mxu0 %v7109_v14  ;;  %v7129_v28 = vld [vmem:[%s11020_s1 + $0x4] ss:$16 sps:$4 sm:$0xff]   ;;  %v7133_v30 = vld [vmem:[%s11020_s1] ss:$16 sps:$4 sm:$0xff]  }
  0x10   :  { %4849 = vmatpush1.bf16.msra.mxu1 %v7110_v15  ;;  %4809 = vmatprep.subr.bf16.mxu0 %v7111_v16  ;;  %v7131_v29 = vld [vmem:[%s11020_s1 + $0x204] ss:$16 sps:$4 sm:$0xff]   ;;  %v7134_v31 = vld [vmem:[%s11020_s1 + $0x200] ss:$16 sps:$4 sm:$0xff]  }
  0x11   :  { %4850 = vmatprep.subr.bf16.mxu1 %v7113_v17  ;;  %v7135_v32 = vld [vmem:[%s11020_s1 + $0x1e4] ss:$16 sps:$4 sm:$0xff]   ;;  %v7139_v34 = vld [vmem:[%s11020_s1 + $0x1e0] ss:$16 sps:$4 sm:$0xff]  }
  0x12   :  { %v7137_v33 = vld [vmem:[%s11020_s1 + $0x3e4] ss:$16 sps:$4 sm:$0xff]   ;;  %v7140_v35 = vld [vmem:[%s11020_s1 + $0x3e0] ss:$16 sps:$4 sm:$0xff]  }
  0x13   :  { %4810 = vmatpush1.bf16.msra.mxu0 %v7115_v18  ;;  %v7141_v36 = vld [vmem:[%s11020_s1 + $0x1c4] ss:$16 sps:$4 sm:$0xff]   ;;  %v7145_v38 = vld [vmem:[%s11020_s1 + $0x1c0] ss:$16 sps:$4 sm:$0xff]  }
  0x14   :  { %4851 = vmatpush1.bf16.msra.mxu1 %v7116_v19  ;;  %4811 = vmatprep.subr.bf16.mxu0 %v7117_v20  ;;  %v7143_v37 = vld [vmem:[%s11020_s1 + $0x3c4] ss:$16 sps:$4 sm:$0xff]   ;;  %v7146_v39 = vld [vmem:[%s11020_s1 + $0x3c0] ss:$16 sps:$4 sm:$0xff]  }
  0x15   :  { %4852 = vmatprep.subr.bf16.mxu1 %v7119_v21  ;;  %v7147_v40 = vld [vmem:[%s11020_s1 + $0x1a4] ss:$16 sps:$4 sm:$0xff]   ;;  %v7151_v42 = vld [vmem:[%s11020_s1 + $0x1a0] ss:$16 sps:$4 sm:$0xff]  }
  0x16   :  { %v7149_v41 = vld [vmem:[%s11020_s1 + $0x3a4] ss:$16 sps:$4 sm:$0xff]   ;;  %v7152_v43 = vld [vmem:[%s11020_s1 + $0x3a0] ss:$16 sps:$4 sm:$0xff]  }
  0x17   :  { %4812 = vmatpush1.bf16.msra.mxu0 %v7121_v22  ;;  %v7153_v44 = vld [vmem:[%s11020_s1 + $0x184] ss:$16 sps:$4 sm:$0xff]   ;;  %v7157_v47 = vld [vmem:[%s11020_s1 + $0x180] ss:$16 sps:$4 sm:$0xff]  }
  0x18   :  { %4853 = vmatpush1.bf16.msra.mxu1 %v7122_v23  ;;  %4813 = vmatprep.subr.bf16.mxu0 %v7123_v24  ;;  %v7155_v45 = vld [vmem:[%s11020_s1 + $0x384] ss:$16 sps:$4 sm:$0xff]   ;;  %v7158_v48 = vld [vmem:[%s11020_s1 + $0x380] ss:$16 sps:$4 sm:$0xff]  }
  0x19   :  { %4854 = vmatprep.subr.bf16.mxu1 %v7125_v25  ;;  %v7159_v51 = vld [vmem:[%s11020_s1 + $0x164] ss:$16 sps:$4 sm:$0xff]   ;;  %v7163_v54 = vld [vmem:[%s11020_s1 + $0x160] ss:$16 sps:$4 sm:$0xff]  }
  0x1a   :  { %v7161_v53 = vld [vmem:[%s11020_s1 + $0x364] ss:$16 sps:$4 sm:$0xff]   ;;  %v7164_v55 = vld [vmem:[%s11020_s1 + $0x360] ss:$16 sps:$4 sm:$0xff]  }
  0x1b   :  { %4814 = vmatpush1.bf16.msra.mxu0 %v7127_v26  ;;  %v7165_v56 = vld [vmem:[%s11020_s1 + $0x144] ss:$16 sps:$4 sm:$0xff]   ;;  %v7169_v58 = vld [vmem:[%s11020_s1 + $0x140] ss:$16 sps:$4 sm:$0xff]  }
  0x1c   :  { %4855 = vmatpush1.bf16.msra.mxu1 %v7128_v27  ;;  %4815 = vmatprep.subr.bf16.mxu0 %v7129_v28  ;;  %v7167_v57 = vld [vmem:[%s11020_s1 + $0x344] ss:$16 sps:$4 sm:$0xff]   ;;  %v7170_v59 = vld [vmem:[%s11020_s1 + $0x340] ss:$16 sps:$4 sm:$0xff]  }
  0x1d   :  { %4856 = vmatprep.subr.bf16.mxu1 %v7131_v29  ;;  %v7171_v60 = vld [vmem:[%s11020_s1 + $0x124] ss:$16 sps:$4 sm:$0xff]   ;;  %v7175_v62 = vld [vmem:[%s11020_s1 + $0x120] ss:$16 sps:$4 sm:$0xff]  }
  0x1e   :  { %v7173_v61 = vld [vmem:[%s11020_s1 + $0x324] ss:$16 sps:$4 sm:$0xff]   ;;  %v7176_v63 = vld [vmem:[%s11020_s1 + $0x320] ss:$16 sps:$4 sm:$0xff]  }
  0x1f   :  { %4816 = vmatpush1.bf16.msra.mxu0 %v7133_v30  ;;  %v7177_v0 = vld [vmem:[%s11020_s1 + $0x104] ss:$16 sps:$4 sm:$0xff]   ;;  %v7181_v2 = vld [vmem:[%s11020_s1 + $0x100] ss:$16 sps:$4 sm:$0xff]  }
  0x20   :  { %4857 = vmatpush1.bf16.msra.mxu1 %v7134_v31  ;;  %4817 = vmatprep.subr.bf16.mxu0 %v7135_v32  ;;  %v7179_v1 = vld [vmem:[%s11020_s1 + $0x304] ss:$16 sps:$4 sm:$0xff]   ;;  %v7182_v3 = vld [vmem:[%s11020_s1 + $0x300] ss:$16 sps:$4 sm:$0xff]  }
  0x21   :  { %4858 = vmatprep.subr.bf16.mxu1 %v7137_v33  ;;  %v21_v4 = vld [vmem:[%s11021_s0] sm:$0xff]  ;;  %v23_v5 = vld [vmem:[%s11021_s0 + $0x10] sm:$0xff] }
  0x22   :  { %v7185_v6 = vld [vmem:[%s11020_s1 + $0x4e4] ss:$16 sps:$4 sm:$0xff]   ;;  %v8543_v8 = vpack.c.bf16 %v21_v4, %v21_v4  ;;  %v8545_v9 = vpack.c.bf16 %v23_v5, %v23_v5  ;;  %v7183_v10 = vld [vmem:[%s11020_s1 + $0x4e0] ss:$16 sps:$4 sm:$0xff]  }
  0x23   :  { %4818 = vmatpush2.bf16.msra.mxu0 %v7139_v34  ;;  %v7188_v7 = vld [vmem:[%s11020_s1 + $0x6e4] ss:$16 sps:$4 sm:$0xff]   ;;  %v7186_v11 = vld [vmem:[%s11020_s1 + $0x6e0] ss:$16 sps:$4 sm:$0xff]   ;;  %v26_v34 = vld [vmem:[%s11021_s0 + $0x28] sm:$0xff] }
  0x24   :  { %4859 = vmatpush2.bf16.msra.mxu1 %v7140_v35  ;;  %4819 = vmatprep.subr.bf16.mxu0 %v7141_v36  ;;  %v7191_v12 = vld [vmem:[%s11020_s1 + $0x4c4] ss:$16 sps:$4 sm:$0xff]   ;;  %v7189_v14 = vld [vmem:[%s11020_s1 + $0x4c0] ss:$16 sps:$4 sm:$0xff]  }
  0x25   :  { %4860 = vmatprep.subr.bf16.mxu1 %v7143_v37  ;;  %v7194_v13 = vld [vmem:[%s11020_s1 + $0x6c4] ss:$16 sps:$4 sm:$0xff]   ;;  %v7192_v15 = vld [vmem:[%s11020_s1 + $0x6c0] ss:$16 sps:$4 sm:$0xff]   ;;  %v8630_v37 = vpack.c.bf16 %v26_v34, %v26_v34 }
  0x26   :  { %v7197_v16 = vld [vmem:[%s11020_s1 + $0x4a4] ss:$16 sps:$4 sm:$0xff]   ;;  %v7195_v18 = vld [vmem:[%s11020_s1 + $0x4a0] ss:$16 sps:$4 sm:$0xff]  }
  0x27   :  { %4820 = vmatpush2.bf16.msra.mxu0 %v7145_v38  ;;  %v7200_v17 = vld [vmem:[%s11020_s1 + $0x6a4] ss:$16 sps:$4 sm:$0xff]   ;;  %v7198_v19 = vld [vmem:[%s11020_s1 + $0x6a0] ss:$16 sps:$4 sm:$0xff]   ;;  %v28_v38 = vld [vmem:[%s11021_s0 + $0x38] sm:$0xff] }
  0x28   :  { %4861 = vmatpush2.bf16.msra.mxu1 %v7146_v39  ;;  %4821 = vmatprep.subr.bf16.mxu0 %v7147_v40  ;;  %v7203_v20 = vld [vmem:[%s11020_s1 + $0x484] ss:$16 sps:$4 sm:$0xff]   ;;  %v7201_v22 = vld [vmem:[%s11020_s1 + $0x480] ss:$16 sps:$4 sm:$0xff]   ;;  %v8638_v40 = vpack.c.bf16 %v28_v38, %v28_v38 }
  0x29   :  { %4862 = vmatprep.subr.bf16.mxu1 %v7149_v41  ;;  %v7206_v21 = vld [vmem:[%s11020_s1 + $0x684] ss:$16 sps:$4 sm:$0xff]   ;;  %v7204_v23 = vld [vmem:[%s11020_s1 + $0x680] ss:$16 sps:$4 sm:$0xff]  }
  0x2a   :  { %v7209_v24 = vld [vmem:[%s11020_s1 + $0x464] ss:$16 sps:$4 sm:$0xff]   ;;  %v7207_v26 = vld [vmem:[%s11020_s1 + $0x460] ss:$16 sps:$4 sm:$0xff]  }
  0x2b   :  { %4822 = vmatpush2.bf16.msra.mxu0 %v7151_v42  ;;  %v7212_v25 = vld [vmem:[%s11020_s1 + $0x664] ss:$16 sps:$4 sm:$0xff]   ;;  %v7210_v27 = vld [vmem:[%s11020_s1 + $0x660] ss:$16 sps:$4 sm:$0xff]  }
  0x2c   :  { %4863 = vmatpush2.bf16.msra.mxu1 %v7152_v43  ;;  %4823 = vmatprep.subr.bf16.mxu0 %v7153_v44  ;;  %v7215_v28 = vld [vmem:[%s11020_s1 + $0x444] ss:$16 sps:$4 sm:$0xff]   ;;  %v7213_v30 = vld [vmem:[%s11020_s1 + $0x440] ss:$16 sps:$4 sm:$0xff]  }
  0x2d   :  { %4864 = vmatprep.subr.bf16.mxu1 %v7155_v45  ;;  %v7218_v29 = vld [vmem:[%s11020_s1 + $0x644] ss:$16 sps:$4 sm:$0xff]   ;;  %v7216_v31 = vld [vmem:[%s11020_s1 + $0x640] ss:$16 sps:$4 sm:$0xff]  }
  0x2e   :  { %v7221_v32 = vld [vmem:[%s11020_s1 + $0x424] ss:$16 sps:$4 sm:$0xff]   ;;  %v7219_v35 = vld [vmem:[%s11020_s1 + $0x420] ss:$16 sps:$4 sm:$0xff]  }
  0x2f   :  { %4824 = vmatpush2.bf16.msra.mxu0 %v7157_v47  ;;  %v7224_v33 = vld [vmem:[%s11020_s1 + $0x624] ss:$16 sps:$4 sm:$0xff]   ;;  %v7222_v36 = vld [vmem:[%s11020_s1 + $0x620] ss:$16 sps:$4 sm:$0xff]  }
  0x30   :  { %4865 = vmatpush2.bf16.msra.mxu1 %v7158_v48  ;;  %4825 = vmatprep.subr.bf16.mxu0 %v7159_v51  ;;  %v7227_v39 = vld [vmem:[%s11020_s1 + $0x404] ss:$16 sps:$4 sm:$0xff]   ;;  %v7225_v42 = vld [vmem:[%s11020_s1 + $0x400] ss:$16 sps:$4 sm:$0xff]  }
  0x31   :  { %4866 = vmatprep.subr.bf16.mxu1 %v7161_v53  ;;  %v7230_v41 = vld [vmem:[%s11020_s1 + $0x604] ss:$16 sps:$4 sm:$0xff]   ;;  %v7228_v43 = vld [vmem:[%s11020_s1 + $0x600] ss:$16 sps:$4 sm:$0xff]  }
  0x32   :  { %v7233_v44 = vld [vmem:[%s11020_s1 + $0x5e4] ss:$16 sps:$4 sm:$0xff]   ;;  %v7231_v46 = vld [vmem:[%s11020_s1 + $0x5e0] ss:$16 sps:$4 sm:$0xff]  }
  0x33   :  { %4826 = vmatpush2.bf16.msra.mxu0 %v7163_v54  ;;  %v7236_v45 = vld [vmem:[%s11020_s1 + $0x7e4] ss:$16 sps:$4 sm:$0xff]   ;;  %v7234_v47 = vld [vmem:[%s11020_s1 + $0x7e0] ss:$16 sps:$4 sm:$0xff]  }
  0x34   :  { %4867 = vmatpush2.bf16.msra.mxu1 %v7164_v55  ;;  %4827 = vmatprep.subr.bf16.mxu0 %v7165_v56  ;;  %v7239_v48 = vld [vmem:[%s11020_s1 + $0x5c4] ss:$16 sps:$4 sm:$0xff]   ;;  %v7237_v51 = vld [vmem:[%s11020_s1 + $0x5c0] ss:$16 sps:$4 sm:$0xff]  }
  0x35   :  { %4868 = vmatprep.subr.bf16.mxu1 %v7167_v57  ;;  %v7242_v50 = vld [vmem:[%s11020_s1 + $0x7c4] ss:$16 sps:$4 sm:$0xff]   ;;  %v7240_v53 = vld [vmem:[%s11020_s1 + $0x7c0] ss:$16 sps:$4 sm:$0xff]  }
  0x36   :  { %v7245_v54 = vld [vmem:[%s11020_s1 + $0x5a4] ss:$16 sps:$4 sm:$0xff]   ;;  %v7243_v56 = vld [vmem:[%s11020_s1 + $0x5a0] ss:$16 sps:$4 sm:$0xff]  }
  0x37   :  { %4828 = vmatpush2.bf16.msra.mxu0 %v7169_v58  ;;  %v7248_v55 = vld [vmem:[%s11020_s1 + $0x7a4] ss:$16 sps:$4 sm:$0xff]   ;;  %v7246_v57 = vld [vmem:[%s11020_s1 + $0x7a0] ss:$16 sps:$4 sm:$0xff]  }
  0x38   :  { %4869 = vmatpush2.bf16.msra.mxu1 %v7170_v59  ;;  %4829 = vmatprep.subr.bf16.mxu0 %v7171_v60  ;;  %v7251_v58 = vld [vmem:[%s11020_s1 + $0x584] ss:$16 sps:$4 sm:$0xff]   ;;  %v7249_v60 = vld [vmem:[%s11020_s1 + $0x580] ss:$16 sps:$4 sm:$0xff]  }
  0x39   :  { %4870 = vmatprep.subr.bf16.mxu1 %v7173_v61  ;;  %v7254_v59 = vld [vmem:[%s11020_s1 + $0x784] ss:$16 sps:$4 sm:$0xff]   ;;  %v7252_v61 = vld [vmem:[%s11020_s1 + $0x780] ss:$16 sps:$4 sm:$0xff]  }
  0x3a   :  { %v7261_v4 = vld [vmem:[%s11020_s1 + $0x540] ss:$16 sps:$4 sm:$0xff]   ;;  %v7302_v38 = vld [vmem:[%s11020_s1 + $0xa84] ss:$16 sps:$4 sm:$0xff]  }
  0x3b   :  { %4830 = vmatpush2.bf16.msra.mxu0 %v7175_v62  ;;  %v7257_v62 = vld [vmem:[%s11020_s1 + $0x564] ss:$16 sps:$4 sm:$0xff]   ;;  %v7264_v5 = vld [vmem:[%s11020_s1 + $0x740] ss:$16 sps:$4 sm:$0xff]  }
  0x3c   :  { %4871 = vmatpush2.bf16.msra.mxu1 %v7176_v63  ;;  %4831 = vmatprep.subr.bf16.mxu0 %v7177_v0  ;;  %v7260_v63 = vld [vmem:[%s11020_s1 + $0x764] ss:$16 sps:$4 sm:$0xff]   ;;  %v7255_v0 = vld [vmem:[%s11020_s1 + $0x560] ss:$16 sps:$4 sm:$0xff]  }
  0x3d   :  { %4872 = vmatprep.subr.bf16.mxu1 %v7179_v1  ;;  %v7258_v1 = vld [vmem:[%s11020_s1 + $0x760] ss:$16 sps:$4 sm:$0xff]  }
  0x3e   :  { %v7291_v34 = vld [vmem:[%s11020_s1 + $0x8a0] ss:$16 sps:$4 sm:$0xff]  }
  0x3f   :  { %4832 = vmatpush2.bf16.msra.mxu0 %v7181_v2  ;;  %v7263_v2 = vld [vmem:[%s11020_s1 + $0x544] ss:$16 sps:$4 sm:$0xff]  }
  0x40   :  { %4873 = vmatpush2.bf16.msra.mxu1 %v7182_v3  ;;  %4883 = vmatprep.subr.bf16.mxu0 %v7185_v6  ;;  %v7266_v3 = vld [vmem:[%s11020_s1 + $0x744] ss:$16 sps:$4 sm:$0xff]  }
  0x41   :  { %4924 = vmatprep.subr.bf16.mxu1 %v7188_v7  ;;  %v7269_v6 = vld [vmem:[%s11020_s1 + $0x524] ss:$16 sps:$4 sm:$0xff]  }
  0x42   :  { %4834 = vmatmul.mubr.bf16.vlgmr.msra.gmra.mxu0 %v8543_v8  ;;  %v7272_v7 = vld [vmem:[%s11020_s1 + $0x724] ss:$16 sps:$4 sm:$0xff]  }
  0x43   :  { %4875 = vmatmul.mubr.bf16.vlgmr.msra.gmra.mxu1 %v8545_v9  ;;  %4884 = vmatpush1.bf16.msra.mxu0 %v7183_v10  ;;  %v7267_v10 = vld [vmem:[%s11020_s1 + $0x520] ss:$16 sps:$4 sm:$0xff]  }
  0x44   :  { %4925 = vmatpush1.bf16.msra.mxu1 %v7186_v11  ;;  %4885 = vmatprep.subr.bf16.mxu0 %v7191_v12  ;;  %v7270_v11 = vld [vmem:[%s11020_s1 + $0x720] ss:$16 sps:$4 sm:$0xff]   ;;  %v7275_v12 = vld [vmem:[%s11020_s1 + $0x504] ss:$16 sps:$4 sm:$0xff]  }
  0x45   :  { %4926 = vmatprep.subr.bf16.mxu1 %v7194_v13  ;;  %4915 = vmatprep.mubr.bf16.mxu0 %v8630_v37  ;;  %v7278_v13 = vld [vmem:[%s11020_s1 + $0x704] ss:$16 sps:$4 sm:$0xff]  }
  0x46   :  { %4956 = vmatprep.mubr.bf16.mxu1 %v8638_v40 }
  0x47   :  { %4886 = vmatpush1.bf16.msra.mxu0 %v7189_v14  ;;  %v7273_v14 = vld [vmem:[%s11020_s1 + $0x500] ss:$16 sps:$4 sm:$0xff]  }
  0x48   :  { %4927 = vmatpush1.bf16.msra.mxu1 %v7192_v15  ;;  %4887 = vmatprep.subr.bf16.mxu0 %v7197_v16  ;;  %v7276_v15 = vld [vmem:[%s11020_s1 + $0x700] ss:$16 sps:$4 sm:$0xff]  }
  0x49   :  { %4928 = vmatprep.subr.bf16.mxu1 %v7200_v17  ;;  %v25_v16 = vld [vmem:[%s11021_s0 + $0x20] sm:$0xff]  ;;  %v27_v17 = vld [vmem:[%s11021_s0 + $0x30] sm:$0xff] }
  0x4b   :  { %4888 = vmatpush1.bf16.msra.mxu0 %v7195_v18  ;;  %v7281_v18 = vld [vmem:[%s11020_s1 + $0x8e4] ss:$16 sps:$4 sm:$0xff]  }
  0x4c   :  { %4929 = vmatpush1.bf16.msra.mxu1 %v7198_v19  ;;  %4889 = vmatprep.subr.bf16.mxu0 %v7203_v20  ;;  %v7284_v19 = vld [vmem:[%s11020_s1 + $0xae4] ss:$16 sps:$4 sm:$0xff]   ;;  %v8759_v20 = vpack.c.bf16 %v25_v16, %v25_v16  ;;  %v7351_v16 = vld [vmem:[%s11020_s1 + $0x960] ss:$16 sps:$4 sm:$0xff]  }
  0x4d   :  { %4930 = vmatprep.subr.bf16.mxu1 %v7206_v21  ;;  %v8761_v21 = vpack.c.bf16 %v27_v17, %v27_v17  ;;  %v7354_v17 = vld [vmem:[%s11020_s1 + $0xb60] ss:$16 sps:$4 sm:$0xff]  }
  0x4f   :  { %4890 = vmatpush1.bf16.msra.mxu0 %v7201_v22  ;;  %v7279_v22 = vld [vmem:[%s11020_s1 + $0x8e0] ss:$16 sps:$4 sm:$0xff]  }
  0x50   :  { %4931 = vmatpush1.bf16.msra.mxu1 %v7204_v23  ;;  %4891 = vmatprep.subr.bf16.mxu0 %v7209_v24  ;;  %v7282_v23 = vld [vmem:[%s11020_s1 + $0xae0] ss:$16 sps:$4 sm:$0xff]   ;;  %v7287_v24 = vld [vmem:[%s11020_s1 + $0x8c4] ss:$16 sps:$4 sm:$0xff]  }
  0x51   :  { %4932 = vmatprep.subr.bf16.mxu1 %v7212_v25  ;;  %v7290_v25 = vld [vmem:[%s11020_s1 + $0xac4] ss:$16 sps:$4 sm:$0xff]  }
  0x53   :  { %4892 = vmatpush1.bf16.msra.mxu0 %v7207_v26  ;;  %v30_v26 = vld [vmem:[%s11021_s0 + $0x48] sm:$0xff] }
  0x54   :  { %4933 = vmatpush1.bf16.msra.mxu1 %v7210_v27  ;;  %4893 = vmatprep.subr.bf16.mxu0 %v7215_v28  ;;  %v7285_v27 = vld [vmem:[%s11020_s1 + $0x8c0] ss:$16 sps:$4 sm:$0xff]  }
  0x55   :  { %4934 = vmatprep.subr.bf16.mxu1 %v7218_v29  ;;  %v7288_v28 = vld [vmem:[%s11020_s1 + $0xac0] ss:$16 sps:$4 sm:$0xff]   ;;  %v8786_v29 = vpack.c.bf16 %v30_v26, %v30_v26 }
  0x56   :  { %v7363_v26 = vld [vmem:[%s11020_s1 + $0x920] ss:$16 sps:$4 sm:$0xff]  }
  0x57   :  { %4894 = vmatpush1.bf16.msra.mxu0 %v7213_v30  ;;  %v32_v30 = vld [vmem:[%s11021_s0 + $0x58] sm:$0xff] }
  0x58   :  { %4935 = vmatpush1.bf16.msra.mxu1 %v7216_v31  ;;  %4895 = vmatprep.subr.bf16.mxu0 %v7221_v32  ;;  %v7293_v31 = vld [vmem:[%s11020_s1 + $0x8a4] ss:$16 sps:$4 sm:$0xff]   ;;  %v8794_v32 = vpack.c.bf16 %v32_v30, %v32_v30 }
  0x59   :  { %4936 = vmatprep.subr.bf16.mxu1 %v7224_v33  ;;  %v7296_v33 = vld [vmem:[%s11020_s1 + $0xaa4] ss:$16 sps:$4 sm:$0xff]  }
  0x5a   :  { %v7374_v30 = vld [vmem:[%s11020_s1 + $0xb04] ss:$16 sps:$4 sm:$0xff]  }
  0x5b   :  { %4896 = vmatpush1.bf16.msra.mxu0 %v7219_v35  ;;  %v7294_v35 = vld [vmem:[%s11020_s1 + $0xaa0] ss:$16 sps:$4 sm:$0xff]  }
  0x5c   :  { %4937 = vmatpush1.bf16.msra.mxu1 %v7222_v36  ;;  %4897 = vmatprep.subr.bf16.mxu0 %v7227_v39  ;;  %v7299_v36 = vld [vmem:[%s11020_s1 + $0x884] ss:$16 sps:$4 sm:$0xff]   ;;  %v7297_v39 = vld [vmem:[%s11020_s1 + $0x880] ss:$16 sps:$4 sm:$0xff]  }
  0x5d   :  { %4938 = vmatprep.subr.bf16.mxu1 %v7230_v41  ;;  %v7300_v41 = vld [vmem:[%s11020_s1 + $0xa80] ss:$16 sps:$4 sm:$0xff]  }
  0x5f   :  { %4898 = vmatpush1.bf16.msra.mxu0 %v7225_v42  ;;  %v7305_v42 = vld [vmem:[%s11020_s1 + $0x864] ss:$16 sps:$4 sm:$0xff]  }
  0x60   :  { %4939 = vmatpush1.bf16.msra.mxu1 %v7228_v43  ;;  %4899 = vmatprep.subr.bf16.mxu0 %v7233_v44  ;;  %v7308_v43 = vld [vmem:[%s11020_s1 + $0xa64] ss:$16 sps:$4 sm:$0xff]   ;;  %v7303_v44 = vld [vmem:[%s11020_s1 + $0x860] ss:$16 sps:$4 sm:$0xff]  }
  0x61   :  { %4940 = vmatprep.subr.bf16.mxu1 %v7236_v45  ;;  %v7306_v45 = vld [vmem:[%s11020_s1 + $0xa60] ss:$16 sps:$4 sm:$0xff]  }
  0x63   :  { %4900 = vmatpush2.bf16.msra.mxu0 %v7231_v46  ;;  %v7311_v46 = vld [vmem:[%s11020_s1 + $0x844] ss:$16 sps:$4 sm:$0xff]  }
  0x64   :  { %4941 = vmatpush2.bf16.msra.mxu1 %v7234_v47  ;;  %4901 = vmatprep.subr.bf16.mxu0 %v7239_v48  ;;  %v7314_v47 = vld [vmem:[%s11020_s1 + $0xa44] ss:$16 sps:$4 sm:$0xff]   ;;  %v7309_v48 = vld [vmem:[%s11020_s1 + $0x840] ss:$16 sps:$4 sm:$0xff]  }
  0x65   :  { %4942 = vmatprep.subr.bf16.mxu1 %v7242_v50  ;;  %v7312_v50 = vld [vmem:[%s11020_s1 + $0xa40] ss:$16 sps:$4 sm:$0xff]  }
  0x67   :  { %4902 = vmatpush2.bf16.msra.mxu0 %v7237_v51  ;;  %v7317_v51 = vld [vmem:[%s11020_s1 + $0x824] ss:$16 sps:$4 sm:$0xff]  }
  0x68   :  { %4943 = vmatpush2.bf16.msra.mxu1 %v7240_v53  ;;  %4903 = vmatprep.subr.bf16.mxu0 %v7245_v54  ;;  %v7320_v53 = vld [vmem:[%s11020_s1 + $0xa24] ss:$16 sps:$4 sm:$0xff]   ;;  %v7315_v54 = vld [vmem:[%s11020_s1 + $0x820] ss:$16 sps:$4 sm:$0xff]  }
  0x69   :  { %4944 = vmatprep.subr.bf16.mxu1 %v7248_v55  ;;  %v7318_v55 = vld [vmem:[%s11020_s1 + $0xa20] ss:$16 sps:$4 sm:$0xff]  }
  0x6b   :  { %4904 = vmatpush2.bf16.msra.mxu0 %v7243_v56  ;;  %v7323_v56 = vld [vmem:[%s11020_s1 + $0x804] ss:$16 sps:$4 sm:$0xff]  }
  0x6c   :  { %4945 = vmatpush2.bf16.msra.mxu1 %v7246_v57  ;;  %4905 = vmatprep.subr.bf16.mxu0 %v7251_v58  ;;  %v7326_v57 = vld [vmem:[%s11020_s1 + $0xa04] ss:$16 sps:$4 sm:$0xff]   ;;  %v7321_v58 = vld [vmem:[%s11020_s1 + $0x800] ss:$16 sps:$4 sm:$0xff]  }
  0x6d   :  { %4946 = vmatprep.subr.bf16.mxu1 %v7254_v59  ;;  %v7324_v59 = vld [vmem:[%s11020_s1 + $0xa00] ss:$16 sps:$4 sm:$0xff]  }
  0x6f   :  { %4906 = vmatpush2.bf16.msra.mxu0 %v7249_v60  ;;  %v7329_v60 = vld [vmem:[%s11020_s1 + $0x9e4] ss:$16 sps:$4 sm:$0xff]  }
  0x70   :  { %4947 = vmatpush2.bf16.msra.mxu1 %v7252_v61  ;;  %4907 = vmatprep.subr.bf16.mxu0 %v7257_v62  ;;  %v7332_v61 = vld [vmem:[%s11020_s1 + $0xbe4] ss:$16 sps:$4 sm:$0xff]   ;;  %v7327_v62 = vld [vmem:[%s11020_s1 + $0x9e0] ss:$16 sps:$4 sm:$0xff]  }
  0x71   :  { %4948 = vmatprep.subr.bf16.mxu1 %v7260_v63  ;;  %v7330_v63 = vld [vmem:[%s11020_s1 + $0xbe0] ss:$16 sps:$4 sm:$0xff]  }
  0x73   :  { %4908 = vmatpush2.bf16.msra.mxu0 %v7255_v0  ;;  %v7335_v0 = vld [vmem:[%s11020_s1 + $0x9c4] ss:$16 sps:$4 sm:$0xff]  }
  0x74   :  { %4949 = vmatpush2.bf16.msra.mxu1 %v7258_v1  ;;  %4909 = vmatprep.subr.bf16.mxu0 %v7263_v2  ;;  %v7338_v1 = vld [vmem:[%s11020_s1 + $0xbc4] ss:$16 sps:$4 sm:$0xff]   ;;  %v7333_v2 = vld [vmem:[%s11020_s1 + $0x9c0] ss:$16 sps:$4 sm:$0xff]  }
  0x75   :  { %4950 = vmatprep.subr.bf16.mxu1 %v7266_v3  ;;  %v7336_v3 = vld [vmem:[%s11020_s1 + $0xbc0] ss:$16 sps:$4 sm:$0xff]  }
  0x77   :  { %4910 = vmatpush2.bf16.msra.mxu0 %v7261_v4  ;;  %v7341_v4 = vld [vmem:[%s11020_s1 + $0x9a4] ss:$16 sps:$4 sm:$0xff]  }
  0x78   :  { %4951 = vmatpush2.bf16.msra.mxu1 %v7264_v5  ;;  %4911 = vmatprep.subr.bf16.mxu0 %v7269_v6  ;;  %v7344_v5 = vld [vmem:[%s11020_s1 + $0xba4] ss:$16 sps:$4 sm:$0xff]   ;;  %v7339_v6 = vld [vmem:[%s11020_s1 + $0x9a0] ss:$16 sps:$4 sm:$0xff]  }
  0x79   :  { %4952 = vmatprep.subr.bf16.mxu1 %v7272_v7  ;;  %v7342_v7 = vld [vmem:[%s11020_s1 + $0xba0] ss:$16 sps:$4 sm:$0xff]  }
  0x7b   :  { %4912 = vmatpush2.bf16.msra.mxu0 %v7267_v10  ;;  %v7347_v10 = vld [vmem:[%s11020_s1 + $0x984] ss:$16 sps:$4 sm:$0xff]  }
  0x7c   :  { %4953 = vmatpush2.bf16.msra.mxu1 %v7270_v11  ;;  %4913 = vmatprep.subr.bf16.mxu0 %v7275_v12  ;;  %v7350_v11 = vld [vmem:[%s11020_s1 + $0xb84] ss:$16 sps:$4 sm:$0xff]   ;;  %v7345_v12 = vld [vmem:[%s11020_s1 + $0x980] ss:$16 sps:$4 sm:$0xff]  }
  0x7d   :  { %4954 = vmatprep.subr.bf16.mxu1 %v7278_v13  ;;  %v7348_v13 = vld [vmem:[%s11020_s1 + $0xb80] ss:$16 sps:$4 sm:$0xff]  }
  0x7f   :  { %4914 = vmatpush2.bf16.msra.mxu0 %v7273_v14  ;;  %v7353_v14 = vld [vmem:[%s11020_s1 + $0x964] ss:$16 sps:$4 sm:$0xff]  }
  0x80   :  { %4955 = vmatpush2.bf16.msra.mxu1 %v7276_v15  ;;  %4965 = vmatprep.subr.bf16.mxu0 %v7281_v18  ;;  %v7356_v15 = vld [vmem:[%s11020_s1 + $0xb64] ss:$16 sps:$4 sm:$0xff]  }
  0x81   :  { %5006 = vmatprep.subr.bf16.mxu1 %v7284_v19  ;;  %v7359_v18 = vld [vmem:[%s11020_s1 + $0x944] ss:$16 sps:$4 sm:$0xff]  }
  0x82   :  { %4916 = vmatmul.mubr.bf16.vlgmr.msra.gmra.mxu0 %v8759_v20  ;;  %v7362_v19 = vld [vmem:[%s11020_s1 + $0xb44] ss:$16 sps:$4 sm:$0xff]  }
  0x83   :  { %4957 = vmatmul.mubr.bf16.vlgmr.msra.gmra.mxu1 %v8761_v21  ;;  %4966 = vmatpush1.bf16.msra.mxu0 %v7279_v22  ;;  %v7357_v22 = vld [vmem:[%s11020_s1 + $0x940] ss:$16 sps:$4 sm:$0xff]  }
  0x84   :  { %5007 = vmatpush1.bf16.msra.mxu1 %v7282_v23  ;;  %4967 = vmatprep.subr.bf16.mxu0 %v7287_v24  ;;  %v7360_v23 = vld [vmem:[%s11020_s1 + $0xb40] ss:$16 sps:$4 sm:$0xff]   ;;  %v7365_v24 = vld [vmem:[%s11020_s1 + $0x924] ss:$16 sps:$4 sm:$0xff]  }
  0x85   :  { %5008 = vmatprep.subr.bf16.mxu1 %v7290_v25  ;;  %4997 = vmatprep.mubr.bf16.mxu0 %v8786_v29  ;;  %v7368_v25 = vld [vmem:[%s11020_s1 + $0xb24] ss:$16 sps:$4 sm:$0xff]  }
  0x86   :  { %5038 = vmatprep.mubr.bf16.mxu1 %v8794_v32 }
  0x87   :  { %4968 = vmatpush1.bf16.msra.mxu0 %v7285_v27  ;;  %v7366_v27 = vld [vmem:[%s11020_s1 + $0xb20] ss:$16 sps:$4 sm:$0xff]  }
  0x88   :  { %5009 = vmatpush1.bf16.msra.mxu1 %v7288_v28  ;;  %4969 = vmatprep.subr.bf16.mxu0 %v7293_v31  ;;  %v7371_v28 = vld [vmem:[%s11020_s1 + $0x904] ss:$16 sps:$4 sm:$0xff]   ;;  %v7369_v31 = vld [vmem:[%s11020_s1 + $0x900] ss:$16 sps:$4 sm:$0xff]  }
  0x89   :  { %5010 = vmatprep.subr.bf16.mxu1 %v7296_v33  ;;  %v7372_v33 = vld [vmem:[%s11020_s1 + $0xb00] ss:$16 sps:$4 sm:$0xff]  }
  0x8b   :  { %4970 = vmatpush1.bf16.msra.mxu0 %v7291_v34  ;;  %v29_v34 = vld [vmem:[%s11021_s0 + $0x40] sm:$0xff] }
  0x8c   :  { %5011 = vmatpush1.bf16.msra.mxu1 %v7294_v35  ;;  %4971 = vmatprep.subr.bf16.mxu0 %v7299_v36  ;;  %v31_v35 = vld [vmem:[%s11021_s0 + $0x50] sm:$0xff] }
  0x8d   :  { %5012 = vmatprep.subr.bf16.mxu1 %v7302_v38  ;;  %v7377_v36 = vld [vmem:[%s11020_s1 + $0xce4] ss:$16 sps:$4 sm:$0xff]  }
  0x8e   :  { %v7380_v38 = vld [vmem:[%s11020_s1 + $0xee4] ss:$16 sps:$4 sm:$0xff]  }
  0x8f   :  { %4972 = vmatpush1.bf16.msra.mxu0 %v7297_v39  ;;  %v7375_v39 = vld [vmem:[%s11020_s1 + $0xce0] ss:$16 sps:$4 sm:$0xff]  }
  0x90   :  { %5013 = vmatpush1.bf16.msra.mxu1 %v7300_v41  ;;  %4973 = vmatprep.subr.bf16.mxu0 %v7305_v42  ;;  %v34_v41 = vld [vmem:[%s11021_s0 + $0x68] sm:$0xff]  ;;  %v8981_v42 = vpack.c.bf16 %v29_v34, %v29_v34  ;;  %v7441_v34 = vld [vmem:[%s11020_s1 + $0xd80] ss:$16 sps:$4 sm:$0xff]  }
  0x91   :  { %5014 = vmatprep.subr.bf16.mxu1 %v7308_v43  ;;  %v8983_v43 = vpack.c.bf16 %v31_v35, %v31_v35  ;;  %v7444_v35 = vld [vmem:[%s11020_s1 + $0xf80] ss:$16 sps:$4 sm:$0xff]  }
  0x93   :  { %4974 = vmatpush1.bf16.msra.mxu0 %v7303_v44  ;;  %v36_v44 = vld [vmem:[%s11021_s0 + $0x78] sm:$0xff] }
  0x94   :  { %5015 = vmatpush1.bf16.msra.mxu1 %v7306_v45  ;;  %4975 = vmatprep.subr.bf16.mxu0 %v7311_v46  ;;  %v7378_v45 = vld [vmem:[%s11020_s1 + $0xee0] ss:$16 sps:$4 sm:$0xff]   ;;  %v7383_v46 = vld [vmem:[%s11020_s1 + $0xcc4] ss:$16 sps:$4 sm:$0xff]  }
  0x95   :  { %5016 = vmatprep.subr.bf16.mxu1 %v7314_v47  ;;  %v7386_v47 = vld [vmem:[%s11020_s1 + $0xec4] ss:$16 sps:$4 sm:$0xff]  }
  0x97   :  { %4976 = vmatpush1.bf16.msra.mxu0 %v7309_v48  ;;  %v8997_v48 = vpack.c.bf16 %v34_v41, %v34_v41  ;;  %v7450_v41 = vld [vmem:[%s11020_s1 + $0xf60] ss:$16 sps:$4 sm:$0xff]  }
  0x98   :  { %5017 = vmatpush1.bf16.msra.mxu1 %v7312_v50  ;;  %4977 = vmatprep.subr.bf16.mxu0 %v7317_v51  ;;  %v8999_v50 = vpack.c.bf16 %v36_v44, %v36_v44  ;;  %v7381_v51 = vld [vmem:[%s11020_s1 + $0xcc0] ss:$16 sps:$4 sm:$0xff]   ;;  %v7455_v44 = vld [vmem:[%s11020_s1 + $0xd44] ss:$16 sps:$4 sm:$0xff]  }
  0x99   :  { %5018 = vmatprep.subr.bf16.mxu1 %v7320_v53  ;;  %v7384_v53 = vld [vmem:[%s11020_s1 + $0xec0] ss:$16 sps:$4 sm:$0xff]  }
  0x9b   :  { %4978 = vmatpush1.bf16.msra.mxu0 %v7315_v54  ;;  %v7389_v54 = vld [vmem:[%s11020_s1 + $0xca4] ss:$16 sps:$4 sm:$0xff]  }
  0x9c   :  { %5019 = vmatpush1.bf16.msra.mxu1 %v7318_v55  ;;  %4979 = vmatprep.subr.bf16.mxu0 %v7323_v56  ;;  %v7392_v55 = vld [vmem:[%s11020_s1 + $0xea4] ss:$16 sps:$4 sm:$0xff]   ;;  %v7387_v56 = vld [vmem:[%s11020_s1 + $0xca0] ss:$16 sps:$4 sm:$0xff]  }
  0x9d   :  { %5020 = vmatprep.subr.bf16.mxu1 %v7326_v57  ;;  %v7390_v57 = vld [vmem:[%s11020_s1 + $0xea0] ss:$16 sps:$4 sm:$0xff]  }
  0x9f   :  { %4980 = vmatpush1.bf16.msra.mxu0 %v7321_v58  ;;  %v7395_v58 = vld [vmem:[%s11020_s1 + $0xc84] ss:$16 sps:$4 sm:$0xff]  }
  0xa0   :  { %5021 = vmatpush1.bf16.msra.mxu1 %v7324_v59  ;;  %4981 = vmatprep.subr.bf16.mxu0 %v7329_v60  ;;  %v7398_v59 = vld [vmem:[%s11020_s1 + $0xe84] ss:$16 sps:$4 sm:$0xff]   ;;  %v7393_v60 = vld [vmem:[%s11020_s1 + $0xc80] ss:$16 sps:$4 sm:$0xff]  }
  0xa1   :  { %5022 = vmatprep.subr.bf16.mxu1 %v7332_v61  ;;  %v7396_v61 = vld [vmem:[%s11020_s1 + $0xe80] ss:$16 sps:$4 sm:$0xff]  }
  0xa3   :  { %4982 = vmatpush2.bf16.msra.mxu0 %v7327_v62  ;;  %v7401_v62 = vld [vmem:[%s11020_s1 + $0xc64] ss:$16 sps:$4 sm:$0xff]  }
  0xa4   :  { %5023 = vmatpush2.bf16.msra.mxu1 %v7330_v63  ;;  %4983 = vmatprep.subr.bf16.mxu0 %v7335_v0  ;;  %v7404_v63 = vld [vmem:[%s11020_s1 + $0xe64] ss:$16 sps:$4 sm:$0xff]   ;;  %v7399_v0 = vld [vmem:[%s11020_s1 + $0xc60] ss:$16 sps:$4 sm:$0xff]  }
  0xa5   :  { %5024 = vmatprep.subr.bf16.mxu1 %v7338_v1  ;;  %v7402_v1 = vld [vmem:[%s11020_s1 + $0xe60] ss:$16 sps:$4 sm:$0xff]  }
  0xa7   :  { %4984 = vmatpush2.bf16.msra.mxu0 %v7333_v2  ;;  %v7407_v2 = vld [vmem:[%s11020_s1 + $0xc44] ss:$16 sps:$4 sm:$0xff]  }
  0xa8   :  { %5025 = vmatpush2.bf16.msra.mxu1 %v7336_v3  ;;  %4985 = vmatprep.subr.bf16.mxu0 %v7341_v4  ;;  %v7410_v3 = vld [vmem:[%s11020_s1 + $0xe44] ss:$16 sps:$4 sm:$0xff]   ;;  %v7405_v4 = vld [vmem:[%s11020_s1 + $0xc40] ss:$16 sps:$4 sm:$0xff]  }
  0xa9   :  { %5026 = vmatprep.subr.bf16.mxu1 %v7344_v5  ;;  %v7408_v5 = vld [vmem:[%s11020_s1 + $0xe40] ss:$16 sps:$4 sm:$0xff]  }
  0xab   :  { %4986 = vmatpush2.bf16.msra.mxu0 %v7339_v6  ;;  %v7413_v6 = vld [vmem:[%s11020_s1 + $0xc24] ss:$16 sps:$4 sm:$0xff]  }
  0xac   :  { %5027 = vmatpush2.bf16.msra.mxu1 %v7342_v7  ;;  %4987 = vmatprep.subr.bf16.mxu0 %v7347_v10  ;;  %v7416_v7 = vld [vmem:[%s11020_s1 + $0xe24] ss:$16 sps:$4 sm:$0xff]   ;;  %v7411_v10 = vld [vmem:[%s11020_s1 + $0xc20] ss:$16 sps:$4 sm:$0xff]  }
  0xad   :  { %5028 = vmatprep.subr.bf16.mxu1 %v7350_v11  ;;  %v7414_v11 = vld [vmem:[%s11020_s1 + $0xe20] ss:$16 sps:$4 sm:$0xff]  }
  0xaf   :  { %4988 = vmatpush2.bf16.msra.mxu0 %v7345_v12  ;;  %v7419_v12 = vld [vmem:[%s11020_s1 + $0xc04] ss:$16 sps:$4 sm:$0xff]  }
  0xb0   :  { %5029 = vmatpush2.bf16.msra.mxu1 %v7348_v13  ;;  %4989 = vmatprep.subr.bf16.mxu0 %v7353_v14  ;;  %v7422_v13 = vld [vmem:[%s11020_s1 + $0xe04] ss:$16 sps:$4 sm:$0xff]   ;;  %v7417_v14 = vld [vmem:[%s11020_s1 + $0xc00] ss:$16 sps:$4 sm:$0xff]  }
  0xb1   :  { %5030 = vmatprep.subr.bf16.mxu1 %v7356_v15  ;;  %v7420_v15 = vld [vmem:[%s11020_s1 + $0xe00] ss:$16 sps:$4 sm:$0xff]  }
  0xb3   :  { %4990 = vmatpush2.bf16.msra.mxu0 %v7351_v16  ;;  %v7425_v16 = vld [vmem:[%s11020_s1 + $0xde4] ss:$16 sps:$4 sm:$0xff]  }
  0xb4   :  { %5031 = vmatpush2.bf16.msra.mxu1 %v7354_v17  ;;  %4991 = vmatprep.subr.bf16.mxu0 %v7359_v18  ;;  %v7428_v17 = vld [vmem:[%s11020_s1 + $0xfe4] ss:$16 sps:$4 sm:$0xff]   ;;  %v7423_v18 = vld [vmem:[%s11020_s1 + $0xde0] ss:$16 sps:$4 sm:$0xff]  }
  0xb5   :  { %5032 = vmatprep.subr.bf16.mxu1 %v7362_v19  ;;  %v7426_v19 = vld [vmem:[%s11020_s1 + $0xfe0] ss:$16 sps:$4 sm:$0xff]  }
  0xb7   :  { %4992 = vmatpush2.bf16.msra.mxu0 %v7357_v22  ;;  %v7431_v22 = vld [vmem:[%s11020_s1 + $0xdc4] ss:$16 sps:$4 sm:$0xff]  }
  0xb8   :  { %5033 = vmatpush2.bf16.msra.mxu1 %v7360_v23  ;;  %4993 = vmatprep.subr.bf16.mxu0 %v7365_v24  ;;  %v7434_v23 = vld [vmem:[%s11020_s1 + $0xfc4] ss:$16 sps:$4 sm:$0xff]   ;;  %v7429_v24 = vld [vmem:[%s11020_s1 + $0xdc0] ss:$16 sps:$4 sm:$0xff]  }
  0xb9   :  { %5034 = vmatprep.subr.bf16.mxu1 %v7368_v25  ;;  %v7432_v25 = vld [vmem:[%s11020_s1 + $0xfc0] ss:$16 sps:$4 sm:$0xff]  }
  0xbb   :  { %4994 = vmatpush2.bf16.msra.mxu0 %v7363_v26  ;;  %v7437_v26 = vld [vmem:[%s11020_s1 + $0xda4] ss:$16 sps:$4 sm:$0xff]  }
  0xbc   :  { %5035 = vmatpush2.bf16.msra.mxu1 %v7366_v27  ;;  %4995 = vmatprep.subr.bf16.mxu0 %v7371_v28  ;;  %v7440_v27 = vld [vmem:[%s11020_s1 + $0xfa4] ss:$16 sps:$4 sm:$0xff]   ;;  %v7435_v28 = vld [vmem:[%s11020_s1 + $0xda0] ss:$16 sps:$4 sm:$0xff]  }
  0xbd   :  { %5036 = vmatprep.subr.bf16.mxu1 %v7374_v30  ;;  %v7438_v30 = vld [vmem:[%s11020_s1 + $0xfa0] ss:$16 sps:$4 sm:$0xff]  }
  0xbf   :  { %4996 = vmatpush2.bf16.msra.mxu0 %v7369_v31  ;;  %v7443_v31 = vld [vmem:[%s11020_s1 + $0xd84] ss:$16 sps:$4 sm:$0xff]  }
  0xc0   :  { %5037 = vmatpush2.bf16.msra.mxu1 %v7372_v33  ;;  %5047 = vmatprep.subr.bf16.mxu0 %v7377_v36  ;;  %v7446_v33 = vld [vmem:[%s11020_s1 + $0xf84] ss:$16 sps:$4 sm:$0xff]  }
  0xc1   :  { %5088 = vmatprep.subr.bf16.mxu1 %v7380_v38  ;;  %v7449_v36 = vld [vmem:[%s11020_s1 + $0xd64] ss:$16 sps:$4 sm:$0xff]  }
  0xc2   :  { %4998 = vmatmul.mubr.bf16.vlgmr.msra.gmra.mxu0 %v8981_v42  ;;  %v7452_v38 = vld [vmem:[%s11020_s1 + $0xf64] ss:$16 sps:$4 sm:$0xff]  }
  0xc3   :  { %5039 = vmatmul.mubr.bf16.vlgmr.msra.gmra.mxu1 %v8983_v43  ;;  %5048 = vmatpush1.bf16.msra.mxu0 %v7375_v39  ;;  %v7447_v39 = vld [vmem:[%s11020_s1 + $0xd60] ss:$16 sps:$4 sm:$0xff]  }
  0xc4   :  { %5089 = vmatpush1.bf16.msra.mxu1 %v7378_v45  ;;  %5049 = vmatprep.subr.bf16.mxu0 %v7383_v46  ;;  %v7458_v45 = vld [vmem:[%s11020_s1 + $0xf44] ss:$16 sps:$4 sm:$0xff]   ;;  %v7453_v46 = vld [vmem:[%s11020_s1 + $0xd40] ss:$16 sps:$4 sm:$0xff]  }
  0xc5   :  { %5090 = vmatprep.subr.bf16.mxu1 %v7386_v47  ;;  %5079 = vmatprep.mubr.bf16.mxu0 %v8997_v48  ;;  %v7456_v47 = vld [vmem:[%s11020_s1 + $0xf40] ss:$16 sps:$4 sm:$0xff]  }
  0xc6   :  { %5120 = vmatprep.mubr.bf16.mxu1 %v8999_v50 }
  0xc7   :  { %5050 = vmatpush1.bf16.msra.mxu0 %v7381_v51  ;;  %v857_v51 = vlaneseq }
  0xc8   :  { %5091 = vmatpush1.bf16.msra.mxu1 %v7384_v53  ;;  %5051 = vmatprep.subr.bf16.mxu0 %v7389_v54  ;;  %v7461_v53 = vld [vmem:[%s11020_s1 + $0xd24] ss:$16 sps:$4 sm:$0xff]  }
  0xc9   :  { %5092 = vmatprep.subr.bf16.mxu1 %v7392_v55  ;;  %v7464_v54 = vld [vmem:[%s11020_s1 + $0xf24] ss:$16 sps:$4 sm:$0xff]   ;;  %v7459_v55 = vld [vmem:[%s11020_s1 + $0xd20] ss:$16 sps:$4 sm:$0xff]  }
  0xcb   :  { %5052 = vmatpush1.bf16.msra.mxu0 %v7387_v56  ;;  %v7462_v56 = vld [vmem:[%s11020_s1 + $0xf20] ss:$16 sps:$4 sm:$0xff]  }
  0xcc   :  { %5093 = vmatpush1.bf16.msra.mxu1 %v7390_v57  ;;  %5053 = vmatprep.subr.bf16.mxu0 %v7395_v58  ;;  %v9167_v57 = vshrl.u32 %v857_v51, 7  ;;  %v7467_v58 = vld [vmem:[%s11020_s1 + $0xd04] ss:$16 sps:$4 sm:$0xff]   ;;  %v7492_v51 = vld [vmem:[%s11020_s1 + $0x1280] ss:$16 sps:$4 sm:$0xff]  }
  0xcd   :  { %5094 = vmatprep.subr.bf16.mxu1 %v7398_v59  ;;  %v7470_v59 = vld [vmem:[%s11020_s1 + $0xf04] ss:$16 sps:$4 sm:$0xff]  }
  0xcf   :  { %5054 = vmatpush1.bf16.msra.mxu0 %v7393_v60  ;;  %v7465_v60 = vld [vmem:[%s11020_s1 + $0xd00] ss:$16 sps:$4 sm:$0xff]  }
  0xd0   :  { %5095 = vmatpush1.bf16.msra.mxu1 %v7396_v61  ;;  %5055 = vmatprep.subr.bf16.mxu0 %v7401_v62  ;;  %v7468_v61 = vld [vmem:[%s11020_s1 + $0xf00] ss:$16 sps:$4 sm:$0xff]  }
  0xd1   :  { %5096 = vmatprep.subr.bf16.mxu1 %v7404_v63  ;;  %v855_v62 = vld [vmem:[%s11022_s2] sm:$0xf] }
  0xd2   :  { %v33_v63 = vld [vmem:[%s11021_s0 + $0x60] sm:$0xff] }
  0xd3   :  { %5056 = vmatpush1.bf16.msra.mxu0 %v7399_v0  ;;  %v859_v0 = vsub.s32 0, %v9167_v57 }
  0xd4   :  { %5097 = vmatpush1.bf16.msra.mxu1 %v7402_v1  ;;  %5057 = vmatprep.subr.bf16.mxu0 %v7407_v2  ;;  %v35_v1 = vld [vmem:[%s11021_s0 + $0x70] sm:$0xff] }
  0xd5   :  { %5098 = vmatprep.subr.bf16.mxu1 %v7410_v3  ;;  %v7473_v2 = vld [vmem:[%s11020_s1 + $0x10e4] ss:$16 sps:$4 sm:$0xff]  }
  0xd6   :  { %v7476_v3 = vld [vmem:[%s11020_s1 + $0x12e4] ss:$16 sps:$4 sm:$0xff]  }
  0xd7   :  { %5058 = vmatpush1.bf16.msra.mxu0 %v7405_v4  ;;  %v7471_v4 = vld [vmem:[%s11020_s1 + $0x10e0] ss:$16 sps:$4 sm:$0xff]  }
  0xd8   :  { %5099 = vmatpush1.bf16.msra.mxu1 %v7408_v5  ;;  %5059 = vmatprep.subr.bf16.mxu0 %v7413_v6  ;;  %v863_v5 = vsub.s32 1, %v9167_v57  ;;  %v38_v6 = vld [vmem:[%s11021_s0 + $0x88] sm:$0xff] }
  0xd9   :  { %5100 = vmatprep.subr.bf16.mxu1 %v7416_v7  ;;  %v9204_v7 = vpack.c.bf16 %v33_v63, %v33_v63  ;;  %v7512_v63 = vld [vmem:[%s11020_s1 + $0x1224] ss:$16 sps:$4 sm:$0xff]  }
  0xdb   :  { %5060 = vmatpush1.bf16.msra.mxu0 %v7411_v10  ;;  %v9206_v10 = vpack.c.bf16 %v35_v1, %v35_v1  ;;  %v7510_v1 = vld [vmem:[%s11020_s1 + $0x1220] ss:$16 sps:$4 sm:$0xff]  }
  0xdc   :  { %5101 = vmatpush1.bf16.msra.mxu1 %v7414_v11  ;;  %5061 = vmatprep.subr.bf16.mxu0 %v7419_v12  ;;  %v40_v11 = vld [vmem:[%s11021_s0 + $0x98] sm:$0xff]  ;;  %v860_v12 = vrot.slane %v855_v62, %v859_v0  ;;  %v7507_v0 = vld [vmem:[%s11020_s1 + $0x1020] ss:$16 sps:$4 sm:$0xff]  }
  0xdd   :  { %5102 = vmatprep.subr.bf16.mxu1 %v7422_v13  ;;  %v7474_v13 = vld [vmem:[%s11020_s1 + $0x12e0] ss:$16 sps:$4 sm:$0xff]  }
  0xdf   :  { %5062 = vmatpush1.bf16.msra.mxu0 %v7417_v14  ;;  %v7479_v14 = vld [vmem:[%s11020_s1 + $0x10c4] ss:$16 sps:$4 sm:$0xff]  }
  0xe0   :  { %5103 = vmatpush1.bf16.msra.mxu1 %v7420_v15  ;;  %5063 = vmatprep.subr.bf16.mxu0 %v7425_v16  ;;  %v7482_v15 = vld [vmem:[%s11020_s1 + $0x12c4] ss:$16 sps:$4 sm:$0xff]   ;;  %v864_v16 = vrot.slane %v855_v62, %v863_v5  ;;  %v7516_v5 = vld [vmem:[%s11020_s1 + $0x1200] ss:$16 sps:$4 sm:$0xff]  }
  0xe1   :  { %5104 = vmatprep.subr.bf16.mxu1 %v7428_v17  ;;  %v9220_v17 = vpack.c.bf16 %v38_v6, %v38_v6  ;;  %v7509_v62 = vld [vmem:[%s11020_s1 + $0x1024] ss:$16 sps:$4 sm:$0xff]  }
  0xe2   :  { %v7521_v6 = vld [vmem:[%s11020_s1 + $0x11e4] ss:$16 sps:$4 sm:$0xff]  }
  0xe3   :  { %5064 = vmatpush2.bf16.msra.mxu0 %v7423_v18  ;;  %v9222_v18 = vpack.c.bf16 %v40_v11, %v40_v11  ;;  %v7524_v11 = vld [vmem:[%s11020_s1 + $0x13e4] ss:$16 sps:$4 sm:$0xff]  }
  0xe4   :  { %5105 = vmatpush2.bf16.msra.mxu1 %v7426_v19  ;;  %5065 = vmatprep.subr.bf16.mxu0 %v7431_v22 }
  0xe5   :  { %5106 = vmatprep.subr.bf16.mxu1 %v7434_v23  ;;  %v7477_v23 = vld [vmem:[%s11020_s1 + $0x10c0] ss:$16 sps:$4 sm:$0xff]  }
  0xe7   :  { %5066 = vmatpush2.bf16.msra.mxu0 %v7429_v24 }
  0xe8   :  { %5107 = vmatpush2.bf16.msra.mxu1 %v7432_v25  ;;  %5067 = vmatprep.subr.bf16.mxu0 %v7437_v26  ;;  %v7480_v25 = vld [vmem:[%s11020_s1 + $0x12c0] ss:$16 sps:$4 sm:$0xff]  }
  0xe9   :  { %5108 = vmatprep.subr.bf16.mxu1 %v7440_v27 }
  0xeb   :  { %5068 = vmatpush2.bf16.msra.mxu0 %v7435_v28  ;;  %v7485_v28 = vld [vmem:[%s11020_s1 + $0x10a4] ss:$16 sps:$4 sm:$0xff]  }
  0xec   :  { %5109 = vmatpush2.bf16.msra.mxu1 %v7438_v30  ;;  %5069 = vmatprep.subr.bf16.mxu0 %v7443_v31  ;;  %v7488_v30 = vld [vmem:[%s11020_s1 + $0x12a4] ss:$16 sps:$4 sm:$0xff]  }
  0xed   :  { %5110 = vmatprep.subr.bf16.mxu1 %v7446_v33 }
  0xef   :  { %5070 = vmatpush2.bf16.msra.mxu0 %v7441_v34 }
  0xf0   :  { %5111 = vmatpush2.bf16.msra.mxu1 %v7444_v35  ;;  %5071 = vmatprep.subr.bf16.mxu0 %v7449_v36  ;;  %v7483_v36 = vld [vmem:[%s11020_s1 + $0x10a0] ss:$16 sps:$4 sm:$0xff]  }
  0xf1   :  { %5112 = vmatprep.subr.bf16.mxu1 %v7452_v38 }
  0xf3   :  { %5072 = vmatpush2.bf16.msra.mxu0 %v7447_v39  ;;  %v7486_v39 = vld [vmem:[%s11020_s1 + $0x12a0] ss:$16 sps:$4 sm:$0xff]  }
  0xf4   :  { %5113 = vmatpush2.bf16.msra.mxu1 %v7450_v41  ;;  %5073 = vmatprep.subr.bf16.mxu0 %v7455_v44 }
  0xf5   :  { %5114 = vmatprep.subr.bf16.mxu1 %v7458_v45  ;;  %v7491_v45 = vld [vmem:[%s11020_s1 + $0x1084] ss:$16 sps:$4 sm:$0xff]  }
  0xf7   :  { %5074 = vmatpush2.bf16.msra.mxu0 %v7453_v46  ;;  %v7494_v46 = vld [vmem:[%s11020_s1 + $0x1284] ss:$16 sps:$4 sm:$0xff]  }
  0xf8   :  { %5115 = vmatpush2.bf16.msra.mxu1 %v7456_v47  ;;  %5075 = vmatprep.subr.bf16.mxu0 %v7461_v53  ;;  %v7489_v47 = vld [vmem:[%s11020_s1 + $0x1080] ss:$16 sps:$4 sm:$0xff]   ;;  %v7497_v53 = vld [vmem:[%s11020_s1 + $0x1064] ss:$16 sps:$4 sm:$0xff]  }
  0xf9   :  { %5116 = vmatprep.subr.bf16.mxu1 %v7464_v54  ;;  %v7500_v54 = vld [vmem:[%s11020_s1 + $0x1264] ss:$16 sps:$4 sm:$0xff]  }
  0xfb   :  { %5076 = vmatpush2.bf16.msra.mxu0 %v7459_v55  ;;  %v7495_v55 = vld [vmem:[%s11020_s1 + $0x1060] ss:$16 sps:$4 sm:$0xff]  }
  0xfc   :  { %5117 = vmatpush2.bf16.msra.mxu1 %v7462_v56  ;;  %5077 = vmatprep.subr.bf16.mxu0 %v7467_v58  ;;  %v7498_v56 = vld [vmem:[%s11020_s1 + $0x1260] ss:$16 sps:$4 sm:$0xff]   ;;  %v7503_v58 = vld [vmem:[%s11020_s1 + $0x1044] ss:$16 sps:$4 sm:$0xff]  }
  0xfd   :  { %5118 = vmatprep.subr.bf16.mxu1 %v7470_v59  ;;  %v7506_v59 = vld [vmem:[%s11020_s1 + $0x1244] ss:$16 sps:$4 sm:$0xff]  }
  0xff   :  { %5078 = vmatpush2.bf16.msra.mxu0 %v7465_v60  ;;  %v7501_v60 = vld [vmem:[%s11020_s1 + $0x1040] ss:$16 sps:$4 sm:$0xff]  }
 0x100   :  { %5119 = vmatpush2.bf16.msra.mxu1 %v7468_v61  ;;  %5129 = vmatprep.subr.bf16.mxu0 %v7473_v2  ;;  %v7504_v61 = vld [vmem:[%s11020_s1 + $0x1240] ss:$16 sps:$4 sm:$0xff]   ;;  %v7515_v2 = vld [vmem:[%s11020_s1 + $0x1004] ss:$16 sps:$4 sm:$0xff]  }
 0x101   :  { %5170 = vmatprep.subr.bf16.mxu1 %v7476_v3  ;;  %v7518_v3 = vld [vmem:[%s11020_s1 + $0x1204] ss:$16 sps:$4 sm:$0xff]  }
 0x102   :  { %v4835_v19 = vpop.f32.mrf.mxu0  ;;  %5080 = vmatmul.mubr.bf16.vlgmr.msra.gmra.mxu0 %v9204_v7 }
 0x103   :  { %v4876_v22 = vpop.f32.mrf.mxu1  ;;  %5121 = vmatmul.mubr.bf16.vlgmr.msra.gmra.mxu1 %v9206_v10  ;;  %v4836_v24 = vadd.f32 %v4835_v19, %v860_v12  ;;  %5130 = vmatpush1.bf16.msra.mxu0 %v7471_v4  ;;  %v7513_v4 = vld [vmem:[%s11020_s1 + $0x1000] ss:$16 sps:$4 sm:$0xff]  }
 0x104   :  { %5171 = vmatpush1.bf16.msra.mxu1 %v7474_v13  ;;  %v4837_v26 = vpop.f32.mrf.mxu0  ;;  %5131 = vmatprep.subr.bf16.mxu0 %v7479_v14  ;;  %v7519_v12 = vld [vmem:[%s11020_s1 + $0x11e0] ss:$16 sps:$4 sm:$0xff]   ;;  %v7527_v14 = vld [vmem:[%s11020_s1 + $0x11c4] ss:$16 sps:$4 sm:$0xff]  }
 0x105   :  { %v4878_v27 = vpop.f32.mrf.mxu1  ;;  %5172 = vmatprep.subr.bf16.mxu1 %v7482_v15  ;;  %v9238_v31 = vadd.f32 %v4876_v22, %v4836_v24  ;;  %v4838_v33 = vadd.f32 %v4837_v26, %v864_v16  ;;  %5161 = vmatprep.mubr.bf16.mxu0 %v9220_v17  ;;  %v7522_v13 = vld [vmem:[%s11020_s1 + $0x13e0] ss:$16 sps:$4 sm:$0xff]   ;;  %v7530_v15 = vld [vmem:[%s11020_s1 + $0x13c4] ss:$16 sps:$4 sm:$0xff]  }
 0x106   :  { %5202 = vmatprep.mubr.bf16.mxu1 %v9222_v18  ;;  %v4839_v34 = vpop.f32.mrf.mxu0  ;;  %v7525_v16 = vld [vmem:[%s11020_s1 + $0x11c0] ss:$16 sps:$4 sm:$0xff]   ;;  %v7533_v22 = vld [vmem:[%s11020_s1 + $0x11a4] ss:$16 sps:$4 sm:$0xff]  }
 0x107   :  { %v4880_v35 = vpop.f32.mrf.mxu1  ;;  %v9245_v38 = vadd.f32 %v4878_v27, %v4838_v33  ;;  %5132 = vmatpush1.bf16.msra.mxu0 %v7477_v23  ;;  %v7528_v19 = vld [vmem:[%s11020_s1 + $0x13c0] ss:$16 sps:$4 sm:$0xff]   ;;  %v7536_v23 = vld [vmem:[%s11020_s1 + $0x13a4] ss:$16 sps:$4 sm:$0xff]  }
 0x108   :  { %5173 = vmatpush1.bf16.msra.mxu1 %v7480_v25  ;;  %v4840_v41 = vpop.f32.mrf.mxu0  ;;  %5133 = vmatprep.subr.bf16.mxu0 %v7485_v28  ;;  %v7531_v24 = vld [vmem:[%s11020_s1 + $0x11a0] ss:$16 sps:$4 sm:$0xff]   ;;  %v7539_v26 = vld [vmem:[%s11020_s1 + $0x1184] ss:$16 sps:$4 sm:$0xff]  }
 0x109   :  { %v4881_v44 = vpop.f32.mrf.mxu1  ;;  %5174 = vmatprep.subr.bf16.mxu1 %v7488_v30  ;;  %v7534_v25 = vld [vmem:[%s11020_s1 + $0x13a0] ss:$16 sps:$4 sm:$0xff]   ;;  %v7542_v27 = vld [vmem:[%s11020_s1 + $0x1384] ss:$16 sps:$4 sm:$0xff]  }
 0x10a   :  { %v7537_v28 = vld [vmem:[%s11020_s1 + $0x1180] ss:$16 sps:$4 sm:$0xff]   ;;  %v7545_v33 = vld [vmem:[%s11020_s1 + $0x1164] ss:$16 sps:$4 sm:$0xff]  }
 0x10b   :  { %5134 = vmatpush1.bf16.msra.mxu0 %v7483_v36  ;;  %v7540_v30 = vld [vmem:[%s11020_s1 + $0x1380] ss:$16 sps:$4 sm:$0xff]   ;;  %v7548_v34 = vld [vmem:[%s11020_s1 + $0x1364] ss:$16 sps:$4 sm:$0xff]  }
 0x10c   :  { %5175 = vmatpush1.bf16.msra.mxu1 %v7486_v39  ;;  %5135 = vmatprep.subr.bf16.mxu0 %v7491_v45  ;;  %v7543_v35 = vld [vmem:[%s11020_s1 + $0x1160] ss:$16 sps:$4 sm:$0xff]   ;;  %v7551_v39 = vld [vmem:[%s11020_s1 + $0x1144] ss:$16 sps:$4 sm:$0xff]  }
 0x10d   :  { %5176 = vmatprep.subr.bf16.mxu1 %v7494_v46  ;;  %v7546_v36 = vld [vmem:[%s11020_s1 + $0x1360] ss:$16 sps:$4 sm:$0xff]   ;;  %v7554_v41 = vld [vmem:[%s11020_s1 + $0x1344] ss:$16 sps:$4 sm:$0xff]  }
 0x10e   :  { %v7549_v44 = vld [vmem:[%s11020_s1 + $0x1140] ss:$16 sps:$4 sm:$0xff]   ;;  %v7557_v46 = vld [vmem:[%s11020_s1 + $0x1124] ss:$16 sps:$4 sm:$0xff]  }
 0x10f   :  { %5136 = vmatpush1.bf16.msra.mxu0 %v7489_v47  ;;  %v7552_v45 = vld [vmem:[%s11020_s1 + $0x1340] ss:$16 sps:$4 sm:$0xff]   ;;  %v7560_v47 = vld [vmem:[%s11020_s1 + $0x1324] ss:$16 sps:$4 sm:$0xff]  }
 0x110   :  { %5177 = vmatpush1.bf16.msra.mxu1 %v7492_v51  ;;  %5137 = vmatprep.subr.bf16.mxu0 %v7497_v53  ;;  %v7555_v51 = vld [vmem:[%s11020_s1 + $0x1120] ss:$16 sps:$4 sm:$0xff]  }
 0x111   :  { %5178 = vmatprep.subr.bf16.mxu1 %v7500_v54  ;;  %v7558_v53 = vld [vmem:[%s11020_s1 + $0x1320] ss:$16 sps:$4 sm:$0xff]   ;;  %v7563_v54 = vld [vmem:[%s11020_s1 + $0x1104] ss:$16 sps:$4 sm:$0xff]  }
 0x113   :  { %5138 = vmatpush1.bf16.msra.mxu0 %v7495_v55  ;;  %v7566_v55 = vld [vmem:[%s11020_s1 + $0x1304] ss:$16 sps:$4 sm:$0xff]  }
 0x114   :  { %5179 = vmatpush1.bf16.msra.mxu1 %v7498_v56  ;;  %5139 = vmatprep.subr.bf16.mxu0 %v7503_v58  ;;  %v7561_v56 = vld [vmem:[%s11020_s1 + $0x1100] ss:$16 sps:$4 sm:$0xff]  }
 0x115   :  { %5180 = vmatprep.subr.bf16.mxu1 %v7506_v59  ;;  %v7564_v58 = vld [vmem:[%s11020_s1 + $0x1300] ss:$16 sps:$4 sm:$0xff]  }
 0x116   :  { %v37_v59 = vld [vmem:[%s11021_s0 + $0x80] sm:$0xff] }
 0x117   :  { %5140 = vmatpush1.bf16.msra.mxu0 %v7501_v60  ;;  %v39_v60 = vld [vmem:[%s11021_s0 + $0x90] sm:$0xff] }
 0x118   :  { %5181 = vmatpush1.bf16.msra.mxu1 %v7504_v61  ;;  %5141 = vmatprep.subr.bf16.mxu0 %v7509_v62  ;;  %v7569_v61 = vld [vmem:[%s11020_s1 + $0x14e4] ss:$16 sps:$4 sm:$0xff]  }
 0x119   :  { %5182 = vmatprep.subr.bf16.mxu1 %v7512_v63  ;;  %v7572_v62 = vld [vmem:[%s11020_s1 + $0x16e4] ss:$16 sps:$4 sm:$0xff]   ;;  %v42_v63 = vld [vmem:[%s11021_s0 + $0xa8] sm:$0xff] }
 0x11b   :  { %5142 = vmatpush1.bf16.msra.mxu0 %v7507_v0  ;;  %v44_v0 = vld [vmem:[%s11021_s0 + $0xb8] sm:$0xff] }
 0x11c   :  { %5183 = vmatpush1.bf16.msra.mxu1 %v7510_v1  ;;  %5143 = vmatprep.subr.bf16.mxu0 %v7515_v2  ;;  %v7567_v1 = vld [vmem:[%s11020_s1 + $0x14e0] ss:$16 sps:$4 sm:$0xff]  }
 0x11d   :  { %5184 = vmatprep.subr.bf16.mxu1 %v7518_v3  ;;  %v7570_v2 = vld [vmem:[%s11020_s1 + $0x16e0] ss:$16 sps:$4 sm:$0xff]   ;;  %v9430_v3 = vpack.c.bf16 %v37_v59, %v37_v59  ;;  %v7608_v59 = vld [vmem:[%s11020_s1 + $0x1624] ss:$16 sps:$4 sm:$0xff]  }
 0x11f   :  { %5144 = vmatpush1.bf16.msra.mxu0 %v7513_v4  ;;  %v9432_v4 = vpack.c.bf16 %v39_v60, %v39_v60  ;;  %v7603_v60 = vld [vmem:[%s11020_s1 + $0x1420] ss:$16 sps:$4 sm:$0xff]  }
 0x120   :  { %5185 = vmatpush1.bf16.msra.mxu1 %v7516_v5  ;;  %5145 = vmatprep.subr.bf16.mxu0 %v7521_v6  ;;  %v7575_v5 = vld [vmem:[%s11020_s1 + $0x14c4] ss:$16 sps:$4 sm:$0xff]  }
 0x121   :  { %5186 = vmatprep.subr.bf16.mxu1 %v7524_v11  ;;  %v7578_v6 = vld [vmem:[%s11020_s1 + $0x16c4] ss:$16 sps:$4 sm:$0xff]   ;;  %v7573_v11 = vld [vmem:[%s11020_s1 + $0x14c0] ss:$16 sps:$4 sm:$0xff]  }
 0x123   :  { %5146 = vmatpush2.bf16.msra.mxu0 %v7519_v12  ;;  %v7576_v12 = vld [vmem:[%s11020_s1 + $0x16c0] ss:$16 sps:$4 sm:$0xff]  }
 0x124   :  { %5187 = vmatpush2.bf16.msra.mxu1 %v7522_v13  ;;  %5147 = vmatprep.subr.bf16.mxu0 %v7527_v14  ;;  %v9446_v13 = vpack.c.bf16 %v42_v63, %v42_v63  ;;  %v9448_v14 = vpack.c.bf16 %v44_v0, %v44_v0  ;;  %v7614_v63 = vld [vmem:[%s11020_s1 + $0x1604] ss:$16 sps:$4 sm:$0xff]   ;;  %v7609_v0 = vld [vmem:[%s11020_s1 + $0x1400] ss:$16 sps:$4 sm:$0xff]  }
 0x125   :  { %5188 = vmatprep.subr.bf16.mxu1 %v7530_v15 }
 0x127   :  { %5148 = vmatpush2.bf16.msra.mxu0 %v7525_v16 }
 0x128   :  { %5189 = vmatpush2.bf16.msra.mxu1 %v7528_v19  ;;  %5149 = vmatprep.subr.bf16.mxu0 %v7533_v22 }
 0x129   :  { %5190 = vmatprep.subr.bf16.mxu1 %v7536_v23 }
 0x12b   :  { %5150 = vmatpush2.bf16.msra.mxu0 %v7531_v24  ;;  %v7581_v24 = vld [vmem:[%s11020_s1 + $0x14a4] ss:$16 sps:$4 sm:$0xff]  }
 0x12c   :  { %5191 = vmatpush2.bf16.msra.mxu1 %v7534_v25  ;;  %5151 = vmatprep.subr.bf16.mxu0 %v7539_v26  ;;  %v7584_v25 = vld [vmem:[%s11020_s1 + $0x16a4] ss:$16 sps:$4 sm:$0xff]  }
 0x12d   :  { %5192 = vmatprep.subr.bf16.mxu1 %v7542_v27 }
 0x12f   :  { %5152 = vmatpush2.bf16.msra.mxu0 %v7537_v28  ;;  %v7582_v28 = vld [vmem:[%s11020_s1 + $0x16a0] ss:$16 sps:$4 sm:$0xff]  }
 0x130   :  { %5193 = vmatpush2.bf16.msra.mxu1 %v7540_v30  ;;  %5153 = vmatprep.subr.bf16.mxu0 %v7545_v33 }
 0x131   :  { %5194 = vmatprep.subr.bf16.mxu1 %v7548_v34 }
 0x133   :  { %5154 = vmatpush2.bf16.msra.mxu0 %v7543_v35 }
 0x134   :  { %5195 = vmatpush2.bf16.msra.mxu1 %v7546_v36  ;;  %5155 = vmatprep.subr.bf16.mxu0 %v7551_v39  ;;  %v7587_v36 = vld [vmem:[%s11020_s1 + $0x1484] ss:$16 sps:$4 sm:$0xff]  }
 0x135   :  { %5196 = vmatprep.subr.bf16.mxu1 %v7554_v41  ;;  %v7590_v39 = vld [vmem:[%s11020_s1 + $0x1684] ss:$16 sps:$4 sm:$0xff]   ;;  %v7585_v41 = vld [vmem:[%s11020_s1 + $0x1480] ss:$16 sps:$4 sm:$0xff]  }
 0x137   :  { %5156 = vmatpush2.bf16.msra.mxu0 %v7549_v44  ;;  %v7588_v44 = vld [vmem:[%s11020_s1 + $0x1680] ss:$16 sps:$4 sm:$0xff]  }
 0x138   :  { %5197 = vmatpush2.bf16.msra.mxu1 %v7552_v45  ;;  %5157 = vmatprep.subr.bf16.mxu0 %v7557_v46  ;;  %v7593_v45 = vld [vmem:[%s11020_s1 + $0x1464] ss:$16 sps:$4 sm:$0xff]  }
 0x139   :  { %5198 = vmatprep.subr.bf16.mxu1 %v7560_v47  ;;  %v7596_v46 = vld [vmem:[%s11020_s1 + $0x1664] ss:$16 sps:$4 sm:$0xff]   ;;  %v7591_v47 = vld [vmem:[%s11020_s1 + $0x1460] ss:$16 sps:$4 sm:$0xff]  }
 0x13b   :  { %5158 = vmatpush2.bf16.msra.mxu0 %v7555_v51  ;;  %v7594_v51 = vld [vmem:[%s11020_s1 + $0x1660] ss:$16 sps:$4 sm:$0xff]  }
 0x13c   :  { %5199 = vmatpush2.bf16.msra.mxu1 %v7558_v53  ;;  %5159 = vmatprep.subr.bf16.mxu0 %v7563_v54  ;;  %v7599_v53 = vld [vmem:[%s11020_s1 + $0x1444] ss:$16 sps:$4 sm:$0xff]  }
 0x13d   :  { %5200 = vmatprep.subr.bf16.mxu1 %v7566_v55  ;;  %v7602_v54 = vld [vmem:[%s11020_s1 + $0x1644] ss:$16 sps:$4 sm:$0xff]   ;;  %v7597_v55 = vld [vmem:[%s11020_s1 + $0x1440] ss:$16 sps:$4 sm:$0xff]  }
 0x13f   :  { %5160 = vmatpush2.bf16.msra.mxu0 %v7561_v56  ;;  %v7600_v56 = vld [vmem:[%s11020_s1 + $0x1640] ss:$16 sps:$4 sm:$0xff]  }
 0x140   :  { %5201 = vmatpush2.bf16.msra.mxu1 %v7564_v58  ;;  %5211 = vmatprep.subr.bf16.mxu0 %v7569_v61  ;;  %v7605_v58 = vld [vmem:[%s11020_s1 + $0x1424] ss:$16 sps:$4 sm:$0xff]   ;;  %v7606_v61 = vld [vmem:[%s11020_s1 + $0x1620] ss:$16 sps:$4 sm:$0xff]  }
 0x141   :  { %5252 = vmatprep.subr.bf16.mxu1 %v7572_v62  ;;  %v7611_v62 = vld [vmem:[%s11020_s1 + $0x1404] ss:$16 sps:$4 sm:$0xff]  }
 0x142   :  { %v4917_v15 = vpop.f32.mrf.mxu0  ;;  %5162 = vmatmul.mubr.bf16.vlgmr.msra.gmra.mxu0 %v9430_v3 }
 0x143   :  { %v4958_v16 = vpop.f32.mrf.mxu1  ;;  %5203 = vmatmul.mubr.bf16.vlgmr.msra.gmra.mxu1 %v9432_v4  ;;  %v4918_v19 = vadd.f32 %v4917_v15, %v9238_v31  ;;  %5212 = vmatpush1.bf16.msra.mxu0 %v7567_v1  ;;  %v7579_v31 = vld [vmem:[%s11020_s1 + $0x14a0] ss:$16 sps:$4 sm:$0xff]   ;;  %v7626_v15 = vld [vmem:[%s11020_s1 + $0x17c4] ss:$16 sps:$4 sm:$0xff]  }
 0x144   :  { %5253 = vmatpush1.bf16.msra.mxu1 %v7570_v2  ;;  %v4919_v22 = vpop.f32.mrf.mxu0  ;;  %5213 = vmatprep.subr.bf16.mxu0 %v7575_v5  ;;  %v7612_v1 = vld [vmem:[%s11020_s1 + $0x1600] ss:$16 sps:$4 sm:$0xff]   ;;  %v7617_v2 = vld [vmem:[%s11020_s1 + $0x15e4] ss:$16 sps:$4 sm:$0xff]  }
 0x145   :  { %v4960_v23 = vpop.f32.mrf.mxu1  ;;  %5254 = vmatprep.subr.bf16.mxu1 %v7578_v6  ;;  %v9459_v26 = vadd.f32 %v4958_v16, %v4918_v19  ;;  %v4920_v27 = vadd.f32 %v4919_v22, %v9245_v38  ;;  %5243 = vmatprep.mubr.bf16.mxu0 %v9446_v13  ;;  %v7620_v5 = vld [vmem:[%s11020_s1 + $0x17e4] ss:$16 sps:$4 sm:$0xff]   ;;  %v7615_v6 = vld [vmem:[%s11020_s1 + $0x15e0] ss:$16 sps:$4 sm:$0xff]  }
 0x146   :  { %5284 = vmatprep.mubr.bf16.mxu1 %v9448_v14  ;;  %v4921_v30 = vpop.f32.mrf.mxu0  ;;  %v7621_v16 = vld [vmem:[%s11020_s1 + $0x15c0] ss:$16 sps:$4 sm:$0xff]   ;;  %v7629_v22 = vld [vmem:[%s11020_s1 + $0x15a4] ss:$16 sps:$4 sm:$0xff]  }
 0x147   :  { %v4962_v33 = vpop.f32.mrf.mxu1  ;;  %v9470_v34 = vadd.f32 %v4960_v23, %v4920_v27  ;;  %5214 = vmatpush1.bf16.msra.mxu0 %v7573_v11  ;;  %v7618_v11 = vld [vmem:[%s11020_s1 + $0x17e0] ss:$16 sps:$4 sm:$0xff]   ;;  %v7632_v23 = vld [vmem:[%s11020_s1 + $0x17a4] ss:$16 sps:$4 sm:$0xff]  }
 0x148   :  { %5255 = vmatpush1.bf16.msra.mxu1 %v7576_v12  ;;  %v4922_v35 = vpop.f32.mrf.mxu0  ;;  %5215 = vmatprep.subr.bf16.mxu0 %v7581_v24  ;;  %v7623_v12 = vld [vmem:[%s11020_s1 + $0x15c4] ss:$16 sps:$4 sm:$0xff]   ;;  %v7624_v19 = vld [vmem:[%s11020_s1 + $0x17c0] ss:$16 sps:$4 sm:$0xff]  }
 0x149   :  { %v4963_v38 = vpop.f32.mrf.mxu1  ;;  %5256 = vmatprep.subr.bf16.mxu1 %v7584_v25  ;;  %v7627_v24 = vld [vmem:[%s11020_s1 + $0x15a0] ss:$16 sps:$4 sm:$0xff]   ;;  %v7635_v27 = vld [vmem:[%s11020_s1 + $0x1584] ss:$16 sps:$4 sm:$0xff]  }
 0x14a   :  { %v7630_v25 = vld [vmem:[%s11020_s1 + $0x17a0] ss:$16 sps:$4 sm:$0xff]   ;;  %v7641_v33 = vld [vmem:[%s11020_s1 + $0x1564] ss:$16 sps:$4 sm:$0xff]  }
 0x14b   :  { %5216 = vmatpush1.bf16.msra.mxu0 %v7579_v31  ;;  %v7638_v31 = vld [vmem:[%s11020_s1 + $0x1784] ss:$16 sps:$4 sm:$0xff]   ;;  %v7636_v30 = vld [vmem:[%s11020_s1 + $0x1780] ss:$16 sps:$4 sm:$0xff]  }
 0x14c   :  { %5257 = vmatpush1.bf16.msra.mxu1 %v7582_v28  ;;  %5217 = vmatprep.subr.bf16.mxu0 %v7587_v36  ;;  %v7633_v28 = vld [vmem:[%s11020_s1 + $0x1580] ss:$16 sps:$4 sm:$0xff]   ;;  %v7644_v35 = vld [vmem:[%s11020_s1 + $0x1764] ss:$16 sps:$4 sm:$0xff]  }
 0x14d   :  { %5258 = vmatprep.subr.bf16.mxu1 %v7590_v39  ;;  %v7639_v38 = vld [vmem:[%s11020_s1 + $0x1560] ss:$16 sps:$4 sm:$0xff]   ;;  %v7647_v39 = vld [vmem:[%s11020_s1 + $0x1544] ss:$16 sps:$4 sm:$0xff]  }
 0x14e   :  { %v7642_v36 = vld [vmem:[%s11020_s1 + $0x1760] ss:$16 sps:$4 sm:$0xff]  }
 0x14f   :  { %5218 = vmatpush1.bf16.msra.mxu0 %v7585_v41  ;;  %v7650_v41 = vld [vmem:[%s11020_s1 + $0x1744] ss:$16 sps:$4 sm:$0xff]  }
 0x150   :  { %5259 = vmatpush1.bf16.msra.mxu1 %v7588_v44  ;;  %5219 = vmatprep.subr.bf16.mxu0 %v7593_v45  ;;  %v7645_v44 = vld [vmem:[%s11020_s1 + $0x1540] ss:$16 sps:$4 sm:$0xff]  }
 0x151   :  { %5260 = vmatprep.subr.bf16.mxu1 %v7596_v46  ;;  %v7648_v45 = vld [vmem:[%s11020_s1 + $0x1740] ss:$16 sps:$4 sm:$0xff]   ;;  %v7653_v46 = vld [vmem:[%s11020_s1 + $0x1524] ss:$16 sps:$4 sm:$0xff]  }
 0x153   :  { %5220 = vmatpush1.bf16.msra.mxu0 %v7591_v47  ;;  %v7656_v47 = vld [vmem:[%s11020_s1 + $0x1724] ss:$16 sps:$4 sm:$0xff]  }
 0x154   :  { %5261 = vmatpush1.bf16.msra.mxu1 %v7594_v51  ;;  %5221 = vmatprep.subr.bf16.mxu0 %v7599_v53  ;;  %v7651_v51 = vld [vmem:[%s11020_s1 + $0x1520] ss:$16 sps:$4 sm:$0xff]  }
 0x155   :  { %5262 = vmatprep.subr.bf16.mxu1 %v7602_v54  ;;  %v7654_v53 = vld [vmem:[%s11020_s1 + $0x1720] ss:$16 sps:$4 sm:$0xff]   ;;  %v7659_v54 = vld [vmem:[%s11020_s1 + $0x1504] ss:$16 sps:$4 sm:$0xff]  }
 0x157   :  { %5222 = vmatpush1.bf16.msra.mxu0 %v7597_v55  ;;  %v7662_v55 = vld [vmem:[%s11020_s1 + $0x1704] ss:$16 sps:$4 sm:$0xff]  }
 0x158   :  { %5263 = vmatpush1.bf16.msra.mxu1 %v7600_v56  ;;  %5223 = vmatprep.subr.bf16.mxu0 %v7605_v58  ;;  %v7657_v56 = vld [vmem:[%s11020_s1 + $0x1500] ss:$16 sps:$4 sm:$0xff]  }
 0x159   :  { %5264 = vmatprep.subr.bf16.mxu1 %v7608_v59  ;;  %v7660_v58 = vld [vmem:[%s11020_s1 + $0x1700] ss:$16 sps:$4 sm:$0xff]  }
 0x15a   :  { %v41_v59 = vld [vmem:[%s11021_s0 + $0xa0] sm:$0xff] }
 0x15b   :  { %5224 = vmatpush1.bf16.msra.mxu0 %v7603_v60  ;;  %v43_v60 = vld [vmem:[%s11021_s0 + $0xb0] sm:$0xff] }
 0x15c   :  { %5265 = vmatpush1.bf16.msra.mxu1 %v7606_v61  ;;  %5225 = vmatprep.subr.bf16.mxu0 %v7611_v62  ;;  %v7665_v61 = vld [vmem:[%s11020_s1 + $0x1864] ss:$16 sps:$4 sm:$0xff]   ;;  %v7668_v62 = vld [vmem:[%s11020_s1 + $0xec] ss:$16 sps:$4 sm:$0xff]  }
 0x15d   :  { %5266 = vmatprep.subr.bf16.mxu1 %v7614_v63  ;;  %v7663_v63 = vld [vmem:[%s11020_s1 + $0x1860] ss:$16 sps:$4 sm:$0xff]  }
 0x15f   :  { %5226 = vmatpush1.bf16.msra.mxu0 %v7609_v0  ;;  %v7666_v0 = vld [vmem:[%s11020_s1 + $0xe8] ss:$16 sps:$4 sm:$0xff]  }
 0x160   :  { %5267 = vmatpush1.bf16.msra.mxu1 %v7612_v1  ;;  %5227 = vmatprep.subr.bf16.mxu0 %v7617_v2  ;;  %v9646_v1 = vpack.c.bf16 %v41_v59, %v41_v59  ;;  %v9648_v2 = vpack.c.bf16 %v43_v60, %v43_v60  ;;  %v7696_v59 = vld [vmem:[%s11020_s1 + $0x2c8] ss:$16 sps:$4 sm:$0xff]   ;;  %v7701_v60 = vld [vmem:[%s11020_s1 + $0x2c] ss:$16 sps:$4 sm:$0xff]  }
 0x161   :  { %5268 = vmatprep.subr.bf16.mxu1 %v7620_v5  ;;  %v7671_v5 = vld [vmem:[%s11020_s1 + $0x1844] ss:$16 sps:$4 sm:$0xff]  }
 0x163   :  { %5228 = vmatpush2.bf16.msra.mxu0 %v7615_v6  ;;  %v7674_v6 = vld [vmem:[%s11020_s1 + $0xcc] ss:$16 sps:$4 sm:$0xff]  }
 0x164   :  { %5269 = vmatpush2.bf16.msra.mxu1 %v7618_v11  ;;  %5229 = vmatprep.subr.bf16.mxu0 %v7623_v12  ;;  %v7669_v11 = vld [vmem:[%s11020_s1 + $0x1840] ss:$16 sps:$4 sm:$0xff]   ;;  %v7672_v12 = vld [vmem:[%s11020_s1 + $0xc8] ss:$16 sps:$4 sm:$0xff]  }
 0x165   :  { %5270 = vmatprep.subr.bf16.mxu1 %v7626_v15 }
 0x167   :  { %5230 = vmatpush2.bf16.msra.mxu0 %v7621_v16 }
 0x168   :  { %5271 = vmatpush2.bf16.msra.mxu1 %v7624_v19  ;;  %5231 = vmatprep.subr.bf16.mxu0 %v7629_v22 }
 0x169   :  { %5272 = vmatprep.subr.bf16.mxu1 %v7632_v23 }
 0x16b   :  { %5232 = vmatpush2.bf16.msra.mxu0 %v7627_v24  ;;  %v7677_v24 = vld [vmem:[%s11020_s1 + $0x1824] ss:$16 sps:$4 sm:$0xff]  }
 0x16c   :  { %5273 = vmatpush2.bf16.msra.mxu1 %v7630_v25  ;;  %5233 = vmatprep.subr.bf16.mxu0 %v7635_v27  ;;  %v7680_v25 = vld [vmem:[%s11020_s1 + $0xac] ss:$16 sps:$4 sm:$0xff]  }
 0x16d   :  { %5274 = vmatprep.subr.bf16.mxu1 %v7638_v31 }
 0x16f   :  { %5234 = vmatpush2.bf16.msra.mxu0 %v7633_v28  ;;  %v7678_v28 = vld [vmem:[%s11020_s1 + $0xa8] ss:$16 sps:$4 sm:$0xff]  }
 0x170   :  { %5275 = vmatpush2.bf16.msra.mxu1 %v7636_v30  ;;  %5235 = vmatprep.subr.bf16.mxu0 %v7641_v33  ;;  %v8296_v30 = vmov 0  }
 0x171   :  { %5276 = vmatprep.subr.bf16.mxu1 %v7644_v35 }
 0x173   :  { %5236 = vmatpush2.bf16.msra.mxu0 %v7639_v38 }
 0x174   :  { %5277 = vmatpush2.bf16.msra.mxu1 %v7642_v36  ;;  %5237 = vmatprep.subr.bf16.mxu0 %v7647_v39  ;;  %v7683_v39 = vld [vmem:[%s11020_s1 + $0x1804] ss:$16 sps:$4 sm:$0xff]  }
 0x175   :  { %5278 = vmatprep.subr.bf16.mxu1 %v7650_v41  ;;  %v7686_v41 = vld [vmem:[%s11020_s1 + $0x8c] ss:$16 sps:$4 sm:$0xff]  }
 0x177   :  { %5238 = vmatpush2.bf16.msra.mxu0 %v7645_v44  ;;  %v7684_v44 = vld [vmem:[%s11020_s1 + $0x88] ss:$16 sps:$4 sm:$0xff]  }
 0x178   :  { %5279 = vmatpush2.bf16.msra.mxu1 %v7648_v45  ;;  %5239 = vmatprep.subr.bf16.mxu0 %v7653_v46  ;;  %v45_v45 = vld [vmem:[%s11021_s0 + $0xc0] sm:$0xff]  ;;  %v7689_v46 = vld [vmem:[%s11020_s1 + $0x6c] ss:$16 sps:$4 sm:$0xff]  }
 0x179   :  { %5280 = vmatprep.subr.bf16.mxu1 %v7656_v47  ;;  %v7692_v47 = vld [vmem:[%s11020_s1 + $0x2ec] ss:$16 sps:$4 sm:$0xff]  }
 0x17b   :  { %5240 = vmatpush2.bf16.msra.mxu0 %v7651_v51  ;;  %v7687_v51 = vld [vmem:[%s11020_s1 + $0x68] ss:$16 sps:$4 sm:$0xff]  }
 0x17c   :  { %5281 = vmatpush2.bf16.msra.mxu1 %v7654_v53  ;;  %5241 = vmatprep.subr.bf16.mxu0 %v7659_v54  ;;  %v7690_v53 = vld [vmem:[%s11020_s1 + $0x2e8] ss:$16 sps:$4 sm:$0xff]   ;;  %v9711_v54 = vpack.c.bf16 %v45_v45, %v45_v45  ;;  %v7743_v45 = vld [vmem:[%s11020_s1 + $0x14c] ss:$16 sps:$4 sm:$0xff]  }
 0x17d   :  { %5282 = vmatprep.subr.bf16.mxu1 %v7662_v55  ;;  %v7695_v55 = vld [vmem:[%s11020_s1 + $0x4c] ss:$16 sps:$4 sm:$0xff]  }
 0x17f   :  { %5242 = vmatpush2.bf16.msra.mxu0 %v7657_v56  ;;  %v7698_v56 = vld [vmem:[%s11020_s1 + $0x2cc] ss:$16 sps:$4 sm:$0xff]  }
 0x180   :  { %5283 = vmatpush2.bf16.msra.mxu1 %v7660_v58  ;;  %5301 = vmatprep.subr.bf16.mxu0 %v7665_v61  ;;  %v7693_v58 = vld [vmem:[%s11020_s1 + $0x48] ss:$16 sps:$4 sm:$0xff]   ;;  %v7704_v61 = vld [vmem:[%s11020_s1 + $0x2ac] ss:$16 sps:$4 sm:$0xff]  }
 0x181   :  { %5334 = vmatprep.subr.bf16.mxu1 %v7668_v62  ;;  %v7699_v62 = vld [vmem:[%s11020_s1 + $0x28] ss:$16 sps:$4 sm:$0xff]  }
 0x182   :  { %v4999_v15 = vpop.f32.mrf.mxu0  ;;  %5244 = vmatmul.mubr.bf16.vlgmr.msra.gmra.mxu0 %v9646_v1 }
 0x183   :  { %v5040_v16 = vpop.f32.mrf.mxu1  ;;  %5285 = vmatmul.mubr.bf16.vlgmr.msra.gmra.mxu1 %v9648_v2  ;;  %v5000_v19 = vadd.f32 %v4999_v15, %v9459_v26  ;;  %5302 = vmatpush1.bf16.msra.mxu0 %v7663_v63  ;;  %v7675_v26 = vld [vmem:[%s11020_s1 + $0x1820] ss:$16 sps:$4 sm:$0xff]   ;;  %v7702_v63 = vld [vmem:[%s11020_s1 + $0x2a8] ss:$16 sps:$4 sm:$0xff]  }
 0x184   :  { %5335 = vmatpush1.bf16.msra.mxu1 %v7666_v0  ;;  %v5001_v22 = vpop.f32.mrf.mxu0  ;;  %5303 = vmatprep.subr.bf16.mxu0 %v7671_v5  ;;  %v7707_v0 = vld [vmem:[%s11020_s1 + $0xc] ss:$16 sps:$4 sm:$0xff]   ;;  %v7705_v5 = vld [vmem:[%s11020_s1 + $0x8] ss:$16 sps:$4 sm:$0xff]  }
 0x185   :  { %v5042_v23 = vpop.f32.mrf.mxu1  ;;  %5336 = vmatprep.subr.bf16.mxu1 %v7674_v6  ;;  %v9671_v27 = vadd.f32 %v5040_v16, %v5000_v19  ;;  %v5002_v31 = vadd.f32 %v5001_v22, %v9470_v34  ;;  %5325 = vmatprep.mubr.bf16.mxu0 %v8296_v30  ;;  %v7708_v6 = vld [vmem:[%s11020_s1 + $0x288] ss:$16 sps:$4 sm:$0xff]   ;;  %v7719_v19 = vld [vmem:[%s11020_s1 + $0x1cc] ss:$16 sps:$4 sm:$0xff]  }
 0x186   :  { %5366 = vmatprep.mubr.bf16.mxu1 %v8474_v49  ;;  %v5003_v33 = vpop.f32.mrf.mxu0  ;;  %v7681_v49 = vld [vmem:[%s11020_s1 + $0x1800] ss:$16 sps:$4 sm:$0xff]   ;;  %v7711_v15 = vld [vmem:[%s11020_s1 + $0x1e8] ss:$16 sps:$4 sm:$0xff]   ;;  %v7722_v22 = vld [vmem:[%s11020_s1 + $0x24c] ss:$16 sps:$4 sm:$0xff]  }
 0x187   :  { %v5044_v35 = vpop.f32.mrf.mxu1  ;;  %v9682_v38 = vadd.f32 %v5042_v23, %v5002_v31  ;;  %5304 = vmatpush1.bf16.msra.mxu0 %v7669_v11  ;;  %v7713_v11 = vld [vmem:[%s11020_s1 + $0x1ec] ss:$16 sps:$4 sm:$0xff]   ;;  %v7714_v16 = vld [vmem:[%s11020_s1 + $0x268] ss:$16 sps:$4 sm:$0xff]  }
 0x188   :  { %5337 = vmatpush1.bf16.msra.mxu1 %v7672_v12  ;;  %v5004_v34 = vpop.f32.mrf.mxu0  ;;  %5305 = vmatprep.subr.bf16.mxu0 %v7677_v24  ;;  %v7716_v12 = vld [vmem:[%s11020_s1 + $0x26c] ss:$16 sps:$4 sm:$0xff]   ;;  %v7717_v23 = vld [vmem:[%s11020_s1 + $0x1c8] ss:$16 sps:$4 sm:$0xff]  }
 0x189   :  { %v5045_v36 = vpop.f32.mrf.mxu1  ;;  %5338 = vmatprep.subr.bf16.mxu1 %v7680_v25  ;;  %v7720_v24 = vld [vmem:[%s11020_s1 + $0x248] ss:$16 sps:$4 sm:$0xff]   ;;  %v7725_v25 = vld [vmem:[%s11020_s1 + $0x1ac] ss:$16 sps:$4 sm:$0xff]  }
 0x18a   :  { %v7728_v31 = vld [vmem:[%s11020_s1 + $0x22c] ss:$16 sps:$4 sm:$0xff]   ;;  %v7729_v34 = vld [vmem:[%s11020_s1 + $0x188] ss:$16 sps:$4 sm:$0xff]  }
 0x18b   :  { %5306 = vmatpush1.bf16.msra.mxu0 %v7675_v26  ;;  %v7723_v26 = vld [vmem:[%s11020_s1 + $0x1a8] ss:$16 sps:$4 sm:$0xff]   ;;  %v7731_v33 = vld [vmem:[%s11020_s1 + $0x18c] ss:$16 sps:$4 sm:$0xff]  }
 0x18c   :  { %5339 = vmatpush1.bf16.msra.mxu1 %v7678_v28  ;;  %5307 = vmatprep.subr.bf16.mxu0 %v7683_v39  ;;  %v7726_v28 = vld [vmem:[%s11020_s1 + $0x228] ss:$16 sps:$4 sm:$0xff]   ;;  %v7734_v35 = vld [vmem:[%s11020_s1 + $0x20c] ss:$16 sps:$4 sm:$0xff]  }
 0x18d   :  { %5340 = vmatprep.subr.bf16.mxu1 %v7686_v41  ;;  %v7732_v36 = vld [vmem:[%s11020_s1 + $0x208] ss:$16 sps:$4 sm:$0xff]   ;;  %v7737_v39 = vld [vmem:[%s11020_s1 + $0x16c] ss:$16 sps:$4 sm:$0xff]  }
 0x18e   :  { %v7740_v41 = vld [vmem:[%s11020_s1 + $0x3ec] ss:$16 sps:$4 sm:$0xff]  }
 0x18f   :  { %5308 = vmatpush1.bf16.msra.mxu0 %v7681_v49  ;;  %v7735_v49 = vld [vmem:[%s11020_s1 + $0x168] ss:$16 sps:$4 sm:$0xff]  }
 0x190   :  { %5341 = vmatpush1.bf16.msra.mxu1 %v7684_v44  ;;  %5375 = vmatprep.subr.bf16.mxu0 %v7692_v47  ;;  %v7738_v44 = vld [vmem:[%s11020_s1 + $0x3e8] ss:$16 sps:$4 sm:$0xff]  }
 0x191   :  { %5342 = vmatprep.subr.bf16.mxu1 %v7689_v46  ;;  %v7746_v46 = vld [vmem:[%s11020_s1 + $0x3cc] ss:$16 sps:$4 sm:$0xff]   ;;  %v7741_v47 = vld [vmem:[%s11020_s1 + $0x148] ss:$16 sps:$4 sm:$0xff]  }
 0x192   :  { %7007 = vmatmul.mubr.msk.bf16.vlgmr.msra.gmra.mxu0 %vm4797_vm0, %v9711_v54 }
 0x193   :  { %5376 = vmatpush1.bf16.msra.mxu0 %v7690_v53  ;;  %5407 = vmatprep.mubr.bf16.mxu0 %v8482_v52  ;;  %v7710_v52 = vld [vmem:[%s11020_s1 + $0x28c] ss:$16 sps:$4 sm:$0xff]  }
 0x194   :  { %5343 = vmatpush1.bf16.msra.mxu1 %v7687_v51  ;;  %5377 = vmatprep.subr.bf16.mxu0 %v7698_v56  ;;  %v7744_v51 = vld [vmem:[%s11020_s1 + $0x3c8] ss:$16 sps:$4 sm:$0xff]   ;;  %v7749_v53 = vld [vmem:[%s11020_s1 + $0x12c] ss:$16 sps:$4 sm:$0xff]  }
 0x195   :  { %5344 = vmatprep.subr.bf16.mxu1 %v7695_v55  ;;  %v7752_v55 = vld [vmem:[%s11020_s1 + $0x3ac] ss:$16 sps:$4 sm:$0xff]   ;;  %v7747_v56 = vld [vmem:[%s11020_s1 + $0x128] ss:$16 sps:$4 sm:$0xff]  }
 0x197   :  { %5378 = vmatpush1.bf16.msra.mxu0 %v7696_v59  ;;  %v7755_v59 = vld [vmem:[%s11020_s1 + $0x10c] ss:$16 sps:$4 sm:$0xff]  }
 0x198   :  { %5345 = vmatpush1.bf16.msra.mxu1 %v7693_v58  ;;  %5379 = vmatprep.subr.bf16.mxu0 %v7704_v61  ;;  %v7750_v58 = vld [vmem:[%s11020_s1 + $0x3a8] ss:$16 sps:$4 sm:$0xff]  }
 0x199   :  { %5346 = vmatprep.subr.bf16.mxu1 %v7701_v60  ;;  %v7758_v60 = vld [vmem:[%s11020_s1 + $0x38c] ss:$16 sps:$4 sm:$0xff]   ;;  %v7753_v61 = vld [vmem:[%s11020_s1 + $0x108] ss:$16 sps:$4 sm:$0xff]  }
 0x19b   :  { %5380 = vmatpush1.bf16.msra.mxu0 %v7702_v63  ;;  %v7761_v63 = vld [vmem:[%s11020_s1 + $0x36c] ss:$16 sps:$4 sm:$0xff]  }
 0x19c   :  { %5347 = vmatpush1.bf16.msra.mxu1 %v7699_v62  ;;  %5381 = vmatprep.subr.bf16.mxu0 %v7710_v52  ;;  %v7756_v62 = vld [vmem:[%s11020_s1 + $0x388] ss:$16 sps:$4 sm:$0xff]  }
 0x19d   :  { %5348 = vmatprep.subr.bf16.mxu1 %v7707_v0  ;;  %v7764_v0 = vld [vmem:[%s11020_s1 + $0x4ec] ss:$16 sps:$4 sm:$0xff]   ;;  %v7759_v52 = vld [vmem:[%s11020_s1 + $0x368] ss:$16 sps:$4 sm:$0xff]  }
 0x19f   :  { %5382 = vmatpush1.bf16.msra.mxu0 %v7708_v6  ;;  %v7767_v6 = vld [vmem:[%s11020_s1 + $0x34c] ss:$16 sps:$4 sm:$0xff]  }
 0x1a0   :  { %5349 = vmatpush1.bf16.msra.mxu1 %v7705_v5  ;;  %5383 = vmatprep.subr.bf16.mxu0 %v7716_v12  ;;  %v7762_v5 = vld [vmem:[%s11020_s1 + $0x4e8] ss:$16 sps:$4 sm:$0xff]  }
 0x1a1   :  { %5350 = vmatprep.subr.bf16.mxu1 %v7713_v11  ;;  %v7770_v11 = vld [vmem:[%s11020_s1 + $0x4cc] ss:$16 sps:$4 sm:$0xff]   ;;  %v7765_v12 = vld [vmem:[%s11020_s1 + $0x348] ss:$16 sps:$4 sm:$0xff]  }
 0x1a3   :  { %5384 = vmatpush1.bf16.msra.mxu0 %v7714_v16 }
 0x1a4   :  { %5351 = vmatpush2.bf16.msra.mxu1 %v7711_v15  ;;  %5385 = vmatprep.subr.bf16.mxu0 %v7722_v22  ;;  %v7768_v15 = vld [vmem:[%s11020_s1 + $0x4c8] ss:$16 sps:$4 sm:$0xff]  }
 0x1a5   :  { %5352 = vmatprep.subr.bf16.mxu1 %v7719_v19 }
 0x1a7   :  { %5386 = vmatpush1.bf16.msra.mxu0 %v7720_v24 }
 0x1a8   :  { %5353 = vmatpush2.bf16.msra.mxu1 %v7717_v23  ;;  %5387 = vmatprep.subr.bf16.mxu0 %v7728_v31  ;;  %v7776_v31 = vld [vmem:[%s11020_s1 + $0x4ac] ss:$16 sps:$4 sm:$0xff]  }
 0x1a9   :  { %5354 = vmatprep.subr.bf16.mxu1 %v7725_v25  ;;  %v7773_v25 = vld [vmem:[%s11020_s1 + $0x32c] ss:$16 sps:$4 sm:$0xff]  }
 0x1ab   :  { %5388 = vmatpush1.bf16.msra.mxu0 %v7726_v28  ;;  %v7774_v28 = vld [vmem:[%s11020_s1 + $0x4a8] ss:$16 sps:$4 sm:$0xff]  }
 0x1ac   :  { %5355 = vmatpush2.bf16.msra.mxu1 %v7723_v26  ;;  %5389 = vmatprep.subr.bf16.mxu0 %v7734_v35 }
 0x1ad   :  { %5356 = vmatprep.subr.bf16.mxu1 %v7731_v33 }
 0x1af   :  { %5390 = vmatpush1.bf16.msra.mxu0 %v7732_v36 }
 0x1b0   :  { %5357 = vmatpush2.bf16.msra.mxu1 %v7729_v34  ;;  %5391 = vmatprep.subr.bf16.mxu0 %v7740_v41  ;;  %v7782_v41 = vld [vmem:[%s11020_s1 + $0x48c] ss:$16 sps:$4 sm:$0xff]  }
 0x1b1   :  { %5358 = vmatprep.subr.bf16.mxu1 %v7737_v39 }
 0x1b3   :  { %5392 = vmatpush2.bf16.msra.mxu0 %v7738_v44  ;;  %v7785_v44 = vld [vmem:[%s11020_s1 + $0x46c] ss:$16 sps:$4 sm:$0xff]  }
 0x1b4   :  { %5359 = vmatpush2.bf16.msra.mxu1 %v7735_v49  ;;  %5393 = vmatprep.subr.bf16.mxu0 %v7746_v46  ;;  %v7780_v49 = vld [vmem:[%s11020_s1 + $0x488] ss:$16 sps:$4 sm:$0xff]  }
 0x1b5   :  { %5360 = vmatprep.subr.bf16.mxu1 %v7743_v45  ;;  %v7788_v45 = vld [vmem:[%s11020_s1 + $0x6ec] ss:$16 sps:$4 sm:$0xff]   ;;  %v7783_v46 = vld [vmem:[%s11020_s1 + $0x468] ss:$16 sps:$4 sm:$0xff]  }
 0x1b7   :  { %5394 = vmatpush2.bf16.msra.mxu0 %v7744_v51  ;;  %v7791_v51 = vld [vmem:[%s11020_s1 + $0x44c] ss:$16 sps:$4 sm:$0xff]  }
 0x1b8   :  { %5361 = vmatpush2.bf16.msra.mxu1 %v7741_v47  ;;  %5395 = vmatprep.subr.bf16.mxu0 %v7752_v55  ;;  %v7786_v47 = vld [vmem:[%s11020_s1 + $0x6e8] ss:$16 sps:$4 sm:$0xff]  }
 0x1b9   :  { %5362 = vmatprep.subr.bf16.mxu1 %v7749_v53  ;;  %v7794_v53 = vld [vmem:[%s11020_s1 + $0x6cc] ss:$16 sps:$4 sm:$0xff]   ;;  %v7789_v55 = vld [vmem:[%s11020_s1 + $0x448] ss:$16 sps:$4 sm:$0xff]  }
 0x1bb   :  { %5396 = vmatpush2.bf16.msra.mxu0 %v7750_v58  ;;  %v7797_v58 = vld [vmem:[%s11020_s1 + $0x42c] ss:$16 sps:$4 sm:$0xff]  }
 0x1bc   :  { %5363 = vmatpush2.bf16.msra.mxu1 %v7747_v56  ;;  %5397 = vmatprep.subr.bf16.mxu0 %v7758_v60  ;;  %v7792_v56 = vld [vmem:[%s11020_s1 + $0x6c8] ss:$16 sps:$4 sm:$0xff]  }
 0x1bd   :  { %5364 = vmatprep.subr.bf16.mxu1 %v7755_v59  ;;  %v7800_v59 = vld [vmem:[%s11020_s1 + $0x6ac] ss:$16 sps:$4 sm:$0xff]   ;;  %v7798_v60 = vld [vmem:[%s11020_s1 + $0x6a8] ss:$16 sps:$4 sm:$0xff]  }
 0x1bf   :  { %5398 = vmatpush2.bf16.msra.mxu0 %v7756_v62  ;;  %v7801_v62 = vld [vmem:[%s11020_s1 + $0x408] ss:$16 sps:$4 sm:$0xff]  }
 0x1c0   :  { %5365 = vmatpush2.bf16.msra.mxu1 %v7753_v61  ;;  %5399 = vmatprep.subr.bf16.mxu0 %v7761_v63  ;;  %v7803_v61 = vld [vmem:[%s11020_s1 + $0x40c] ss:$16 sps:$4 sm:$0xff]   ;;  %v7804_v63 = vld [vmem:[%s11020_s1 + $0x688] ss:$16 sps:$4 sm:$0xff]  }
 0x1c1   :  { %5416 = vmatprep.subr.bf16.mxu1 %v7764_v0  ;;  %v7809_v0 = vld [vmem:[%s11020_s1 + $0x5ec] ss:$16 sps:$4 sm:$0xff]  }
 0x1c2   :  { %v5081_v16 = vpop.f32.mrf.mxu0 }
 0x1c3   :  { %v5122_v19 = vpop.f32.mrf.mxu1  ;;  %5367 = vmatmul.mubr.bf16.vlgmr.msra.gmra.mxu1 %v8543_v8  ;;  %v5082_v22 = vadd.f32 %v5081_v16, %v9671_v27  ;;  %5400 = vmatpush2.bf16.msra.mxu0 %v7759_v52  ;;  %v7771_v27 = vld [vmem:[%s11020_s1 + $0x328] ss:$16 sps:$4 sm:$0xff]   ;;  %v7812_v52 = vld [vmem:[%s11020_s1 + $0x66c] ss:$16 sps:$4 sm:$0xff]  }
 0x1c4   :  { %5417 = vmatpush1.bf16.msra.mxu1 %v7762_v5  ;;  %v5083_v23 = vpop.f32.mrf.mxu0  ;;  %5401 = vmatprep.subr.bf16.mxu0 %v7767_v6  ;;  %v7807_v5 = vld [vmem:[%s11020_s1 + $0x5e8] ss:$16 sps:$4 sm:$0xff]  }
 0x1c5   :  { %v5124_v24 = vpop.f32.mrf.mxu1  ;;  %5418 = vmatprep.subr.bf16.mxu1 %v7770_v11  ;;  %v9880_v26 = vadd.f32 %v5122_v19, %v5082_v22  ;;  %v5084_v8 = vadd.f32 %v5083_v23, %v9682_v38  ;;  %5448 = vmatprep.mubr.bf16.mxu1 %v8630_v37  ;;  %v7779_v38 = vld [vmem:[%s11020_s1 + $0x30c] ss:$16 sps:$4 sm:$0xff]   ;;  %v7777_v37 = vld [vmem:[%s11020_s1 + $0x308] ss:$16 sps:$4 sm:$0xff]  }
 0x1c6   :  { %v5085_v33 = vpop.f32.mrf.mxu0  ;;  %v7810_v6 = vld [vmem:[%s11020_s1 + $0x668] ss:$16 sps:$4 sm:$0xff]   ;;  %v7815_v11 = vld [vmem:[%s11020_s1 + $0x5cc] ss:$16 sps:$4 sm:$0xff]  }
 0x1c7   :  { %v5126_v35 = vpop.f32.mrf.mxu1  ;;  %v9890_v34 = vadd.f32 %v5124_v24, %v5084_v8  ;;  %5402 = vmatpush2.bf16.msra.mxu0 %v7765_v12  ;;  %v7818_v12 = vld [vmem:[%s11020_s1 + $0x64c] ss:$16 sps:$4 sm:$0xff]   ;;  %v7816_v16 = vld [vmem:[%s11020_s1 + $0x648] ss:$16 sps:$4 sm:$0xff]  }
 0x1c8   :  { %5419 = vmatpush1.bf16.msra.mxu1 %v7768_v15  ;;  %v5086_v36 = vpop.f32.mrf.mxu0  ;;  %5403 = vmatprep.subr.bf16.mxu0 %v7773_v25  ;;  %v7813_v15 = vld [vmem:[%s11020_s1 + $0x5c8] ss:$16 sps:$4 sm:$0xff]   ;;  %v7821_v19 = vld [vmem:[%s11020_s1 + $0x5ac] ss:$16 sps:$4 sm:$0xff]  }
 0x1c9   :  { %v5127_v39 = vpop.f32.mrf.mxu1  ;;  %5420 = vmatprep.subr.bf16.mxu1 %v7776_v31  ;;  %v7824_v22 = vld [vmem:[%s11020_s1 + $0x62c] ss:$16 sps:$4 sm:$0xff]   ;;  %v7819_v23 = vld [vmem:[%s11020_s1 + $0x5a8] ss:$16 sps:$4 sm:$0xff]  }
 0x1ca   :  { %v7822_v24 = vld [vmem:[%s11020_s1 + $0x628] ss:$16 sps:$4 sm:$0xff]   ;;  %v7827_v25 = vld [vmem:[%s11020_s1 + $0x58c] ss:$16 sps:$4 sm:$0xff]  }
 0x1cb   :  { %5404 = vmatpush2.bf16.msra.mxu0 %v7771_v27  ;;  %v7830_v31 = vld [vmem:[%s11020_s1 + $0x60c] ss:$16 sps:$4 sm:$0xff]   ;;  %v7825_v8 = vld [vmem:[%s11020_s1 + $0x588] ss:$16 sps:$4 sm:$0xff]  }
 0x1cc   :  { %5421 = vmatpush1.bf16.msra.mxu1 %v7774_v28  ;;  %5405 = vmatprep.subr.bf16.mxu0 %v7779_v38  ;;  %v7828_v27 = vld [vmem:[%s11020_s1 + $0x608] ss:$16 sps:$4 sm:$0xff]   ;;  %v7833_v28 = vld [vmem:[%s11020_s1 + $0x56c] ss:$16 sps:$4 sm:$0xff]  }
 0x1cd   :  { %5422 = vmatprep.subr.bf16.mxu1 %v7782_v41  ;;  %v7836_v33 = vld [vmem:[%s11020_s1 + $0x7ec] ss:$16 sps:$4 sm:$0xff]   ;;  %v7831_v35 = vld [vmem:[%s11020_s1 + $0x568] ss:$16 sps:$4 sm:$0xff]  }
 0x1ce   :  { %v7834_v36 = vld [vmem:[%s11020_s1 + $0x7e8] ss:$16 sps:$4 sm:$0xff]   ;;  %v7839_v39 = vld [vmem:[%s11020_s1 + $0x54c] ss:$16 sps:$4 sm:$0xff]  }
 0x1cf   :  { %5406 = vmatpush2.bf16.msra.mxu0 %v7777_v37  ;;  %v7842_v38 = vld [vmem:[%s11020_s1 + $0x7cc] ss:$16 sps:$4 sm:$0xff]   ;;  %v7837_v41 = vld [vmem:[%s11020_s1 + $0x548] ss:$16 sps:$4 sm:$0xff]  }
 0x1d0   :  { %5423 = vmatpush1.bf16.msra.mxu1 %v7780_v49  ;;  %5457 = vmatprep.subr.bf16.mxu0 %v7788_v45  ;;  %v7840_v37 = vld [vmem:[%s11020_s1 + $0x7c8] ss:$16 sps:$4 sm:$0xff]   ;;  %v7845_v49 = vld [vmem:[%s11020_s1 + $0x52c] ss:$16 sps:$4 sm:$0xff]  }
 0x1d1   :  { %5424 = vmatprep.subr.bf16.mxu1 %v7785_v44  ;;  %v7848_v44 = vld [vmem:[%s11020_s1 + $0x7ac] ss:$16 sps:$4 sm:$0xff]   ;;  %v7843_v45 = vld [vmem:[%s11020_s1 + $0x528] ss:$16 sps:$4 sm:$0xff]  }
 0x1d2   :  { %5408 = vmatmul.mubr.bf16.vlgmr.msra.gmra.mxu0 %v8545_v9  ;;  %v7795_v9 = vld [vmem:[%s11020_s1 + $0x428] ss:$16 sps:$4 sm:$0xff]  }
 0x1d3   :  { %5458 = vmatpush1.bf16.msra.mxu0 %v7786_v47  ;;  %5489 = vmatprep.mubr.bf16.mxu0 %v8638_v40  ;;  %v7806_v40 = vld [vmem:[%s11020_s1 + $0x68c] ss:$16 sps:$4 sm:$0xff]  }
 0x1d4   :  { %5425 = vmatpush1.bf16.msra.mxu1 %v7783_v46  ;;  %5459 = vmatprep.subr.bf16.mxu0 %v7794_v53  ;;  %v7846_v46 = vld [vmem:[%s11020_s1 + $0x7a8] ss:$16 sps:$4 sm:$0xff]   ;;  %v7851_v47 = vld [vmem:[%s11020_s1 + $0x50c] ss:$16 sps:$4 sm:$0xff]  }
 0x1d5   :  { %5426 = vmatprep.subr.bf16.mxu1 %v7791_v51  ;;  %v7854_v51 = vld [vmem:[%s11020_s1 + $0x78c] ss:$16 sps:$4 sm:$0xff]   ;;  %v7849_v53 = vld [vmem:[%s11020_s1 + $0x508] ss:$16 sps:$4 sm:$0xff]  }
 0x1d7   :  { %5460 = vmatpush1.bf16.msra.mxu0 %v7792_v56  ;;  %v7857_v56 = vld [vmem:[%s11020_s1 + $0x76c] ss:$16 sps:$4 sm:$0xff]  }
 0x1d8   :  { %5427 = vmatpush1.bf16.msra.mxu1 %v7789_v55  ;;  %5461 = vmatprep.subr.bf16.mxu0 %v7800_v59  ;;  %v7852_v55 = vld [vmem:[%s11020_s1 + $0x788] ss:$16 sps:$4 sm:$0xff]  }
 0x1d9   :  { %5428 = vmatprep.subr.bf16.mxu1 %v7797_v58  ;;  %v7860_v58 = vld [vmem:[%s11020_s1 + $0x8ec] ss:$16 sps:$4 sm:$0xff]   ;;  %v7855_v59 = vld [vmem:[%s11020_s1 + $0x768] ss:$16 sps:$4 sm:$0xff]  }
 0x1db   :  { %5462 = vmatpush1.bf16.msra.mxu0 %v7798_v60  ;;  %v7863_v60 = vld [vmem:[%s11020_s1 + $0x74c] ss:$16 sps:$4 sm:$0xff]  }
 0x1dc   :  { %5429 = vmatpush1.bf16.msra.mxu1 %v7795_v9  ;;  %5463 = vmatprep.subr.bf16.mxu0 %v7806_v40  ;;  %v7858_v9 = vld [vmem:[%s11020_s1 + $0x8e8] ss:$16 sps:$4 sm:$0xff]  }
 0x1dd   :  { %5430 = vmatprep.subr.bf16.mxu1 %v7803_v61  ;;  %v7866_v61 = vld [vmem:[%s11020_s1 + $0x8cc] ss:$16 sps:$4 sm:$0xff]  }
 0x1df   :  { %5464 = vmatpush1.bf16.msra.mxu0 %v7804_v63 }
 0x1e0   :  { %5431 = vmatpush1.bf16.msra.mxu1 %v7801_v62  ;;  %5465 = vmatprep.subr.bf16.mxu0 %v7812_v52  ;;  %v7864_v52 = vld [vmem:[%s11020_s1 + $0x8c8] ss:$16 sps:$4 sm:$0xff]  }
 0x1e1   :  { %5432 = vmatprep.subr.bf16.mxu1 %v7809_v0  ;;  %v7861_v0 = vld [vmem:[%s11020_s1 + $0x748] ss:$16 sps:$4 sm:$0xff]  }
 0x1e3   :  { %5466 = vmatpush1.bf16.msra.mxu0 %v7810_v6 }
 0x1e4   :  { %5433 = vmatpush2.bf16.msra.mxu1 %v7807_v5  ;;  %5467 = vmatprep.subr.bf16.mxu0 %v7818_v12 }
 0x1e5   :  { %5434 = vmatprep.subr.bf16.mxu1 %v7815_v11 }
 0x1e7   :  { %5468 = vmatpush1.bf16.msra.mxu0 %v7816_v16 }
 0x1e8   :  { %5435 = vmatpush2.bf16.msra.mxu1 %v7813_v15  ;;  %5469 = vmatprep.subr.bf16.mxu0 %v7824_v22  ;;  %v7867_v22 = vld [vmem:[%s11020_s1 + $0x728] ss:$16 sps:$4 sm:$0xff]  }
 0x1e9   :  { %5436 = vmatprep.subr.bf16.mxu1 %v7821_v19 }
 0x1eb   :  { %5470 = vmatpush1.bf16.msra.mxu0 %v7822_v24 }
 0x1ec   :  { %5437 = vmatpush2.bf16.msra.mxu1 %v7819_v23  ;;  %5471 = vmatprep.subr.bf16.mxu0 %v7830_v31  ;;  %v7870_v23 = vld [vmem:[%s11020_s1 + $0x8a8] ss:$16 sps:$4 sm:$0xff]  }
 0x1ed   :  { %5438 = vmatprep.subr.bf16.mxu1 %v7827_v25  ;;  %v7873_v31 = vld [vmem:[%s11020_s1 + $0x708] ss:$16 sps:$4 sm:$0xff]  }
 0x1ef   :  { %5472 = vmatpush1.bf16.msra.mxu0 %v7828_v27  ;;  %v7881_v27 = vld [vmem:[%s11020_s1 + $0x86c] ss:$16 sps:$4 sm:$0xff]  }
 0x1f0   :  { %5439 = vmatpush2.bf16.msra.mxu1 %v7825_v8  ;;  %5473 = vmatprep.subr.bf16.mxu0 %v7836_v33  ;;  %v7876_v8 = vld [vmem:[%s11020_s1 + $0x888] ss:$16 sps:$4 sm:$0xff]  }
 0x1f1   :  { %5440 = vmatprep.subr.bf16.mxu1 %v7833_v28  ;;  %v7884_v28 = vld [vmem:[%s11020_s1 + $0xaec] ss:$16 sps:$4 sm:$0xff]   ;;  %v7879_v33 = vld [vmem:[%s11020_s1 + $0x868] ss:$16 sps:$4 sm:$0xff]  }
 0x1f3   :  { %5474 = vmatpush2.bf16.msra.mxu0 %v7834_v36  ;;  %v7887_v36 = vld [vmem:[%s11020_s1 + $0x84c] ss:$16 sps:$4 sm:$0xff]  }
 0x1f4   :  { %5441 = vmatpush2.bf16.msra.mxu1 %v7831_v35  ;;  %5475 = vmatprep.subr.bf16.mxu0 %v7842_v38  ;;  %v7882_v35 = vld [vmem:[%s11020_s1 + $0xae8] ss:$16 sps:$4 sm:$0xff]  }
 0x1f5   :  { %5442 = vmatprep.subr.bf16.mxu1 %v7839_v39  ;;  %v7890_v39 = vld [vmem:[%s11020_s1 + $0xacc] ss:$16 sps:$4 sm:$0xff]   ;;  %v7885_v38 = vld [vmem:[%s11020_s1 + $0x848] ss:$16 sps:$4 sm:$0xff]  }
 0x1f7   :  { %5476 = vmatpush2.bf16.msra.mxu0 %v7840_v37  ;;  %v7893_v37 = vld [vmem:[%s11020_s1 + $0x82c] ss:$16 sps:$4 sm:$0xff]  }
 0x1f8   :  { %5443 = vmatpush2.bf16.msra.mxu1 %v7837_v41  ;;  %5477 = vmatprep.subr.bf16.mxu0 %v7848_v44  ;;  %v7888_v41 = vld [vmem:[%s11020_s1 + $0xac8] ss:$16 sps:$4 sm:$0xff]  }
 0x1f9   :  { %5444 = vmatprep.subr.bf16.mxu1 %v7845_v49  ;;  %v7891_v49 = vld [vmem:[%s11020_s1 + $0x828] ss:$16 sps:$4 sm:$0xff]  }
 0x1fa   :  { %v7894_v44 = vld [vmem:[%s11020_s1 + $0xaa8] ss:$16 sps:$4 sm:$0xff]  }
 0x1fb   :  { %5478 = vmatpush2.bf16.msra.mxu0 %v7846_v46  ;;  %v7897_v46 = vld [vmem:[%s11020_s1 + $0x808] ss:$16 sps:$4 sm:$0xff]  }
 0x1fc   :  { %5445 = vmatpush2.bf16.msra.mxu1 %v7843_v45  ;;  %5479 = vmatprep.subr.bf16.mxu0 %v7854_v51  ;;  %v7899_v45 = vld [vmem:[%s11020_s1 + $0x80c] ss:$16 sps:$4 sm:$0xff]  }
 0x1fd   :  { %5446 = vmatprep.subr.bf16.mxu1 %v7851_v47  ;;  %v7900_v47 = vld [vmem:[%s11020_s1 + $0xa88] ss:$16 sps:$4 sm:$0xff]   ;;  %v7905_v51 = vld [vmem:[%s11020_s1 + $0x9ec] ss:$16 sps:$4 sm:$0xff]  }
 0x1ff   :  { %5480 = vmatpush2.bf16.msra.mxu0 %v7852_v55  ;;  %v7903_v55 = vld [vmem:[%s11020_s1 + $0x9e8] ss:$16 sps:$4 sm:$0xff]  }
 0x200   :  { %5447 = vmatpush2.bf16.msra.mxu1 %v7849_v53  ;;  %5481 = vmatprep.subr.bf16.mxu0 %v7857_v56  ;;  %v7908_v53 = vld [vmem:[%s11020_s1 + $0xa6c] ss:$16 sps:$4 sm:$0xff]   ;;  %v7906_v56 = vld [vmem:[%s11020_s1 + $0xa68] ss:$16 sps:$4 sm:$0xff]  }
 0x201   :  { %5498 = vmatprep.subr.bf16.mxu1 %v7860_v58  ;;  %v7911_v58 = vld [vmem:[%s11020_s1 + $0x9cc] ss:$16 sps:$4 sm:$0xff]  }
 0x202   :  { %v5163_v40 = vpop.f32.mrf.mxu0 }
 0x203   :  { %v5204_v62 = vpop.f32.mrf.mxu1  ;;  %5449 = vmatmul.mubr.bf16.vlgmr.msra.gmra.mxu1 %v8759_v20  ;;  %v5164_v63 = vadd.f32 %v5163_v40, %v9880_v26  ;;  %5482 = vmatpush2.bf16.msra.mxu0 %v7855_v59  ;;  %v7869_v20 = vld [vmem:[%s11020_s1 + $0x72c] ss:$16 sps:$4 sm:$0xff]  }
 0x204   :  { %5499 = vmatpush1.bf16.msra.mxu1 %v7858_v9  ;;  %v5165_v5 = vpop.f32.mrf.mxu0  ;;  %5483 = vmatprep.subr.bf16.mxu0 %v7863_v60  ;;  %v7872_v26 = vld [vmem:[%s11020_s1 + $0x8ac] ss:$16 sps:$4 sm:$0xff]   ;;  %v7909_v9 = vld [vmem:[%s11020_s1 + $0x9c8] ss:$16 sps:$4 sm:$0xff]  }
 0x205   :  { %v5206_v6 = vpop.f32.mrf.mxu1  ;;  %5500 = vmatprep.subr.bf16.mxu1 %v7866_v61  ;;  %v10082_v11 = vadd.f32 %v5204_v62, %v5164_v63  ;;  %v5166_v12 = vadd.f32 %v5165_v5, %v9890_v34  ;;  %5530 = vmatprep.mubr.bf16.mxu1 %v8786_v29  ;;  %v7875_v29 = vld [vmem:[%s11020_s1 + $0x70c] ss:$16 sps:$4 sm:$0xff]   ;;  %v7912_v60 = vld [vmem:[%s11020_s1 + $0xa48] ss:$16 sps:$4 sm:$0xff]  }
 0x206   :  { %v5167_v15 = vpop.f32.mrf.mxu0  ;;  %v7878_v34 = vld [vmem:[%s11020_s1 + $0x88c] ss:$16 sps:$4 sm:$0xff]   ;;  %v7915_v62 = vld [vmem:[%s11020_s1 + $0x9a8] ss:$16 sps:$4 sm:$0xff]  }
 0x207   :  { %v5208_v16 = vpop.f32.mrf.mxu1  ;;  %v10086_v19 = vadd.f32 %v5206_v6, %v5166_v12  ;;  %5484 = vmatpush2.bf16.msra.mxu0 %v7861_v0  ;;  %v7914_v59 = vld [vmem:[%s11020_s1 + $0xa4c] ss:$16 sps:$4 sm:$0xff]   ;;  %v7918_v63 = vld [vmem:[%s11020_s1 + $0xa28] ss:$16 sps:$4 sm:$0xff]  }
 0x208   :  { %5501 = vmatpush1.bf16.msra.mxu1 %v7864_v52  ;;  %v5168_v24 = vpop.f32.mrf.mxu0  ;;  %5485 = vmatprep.subr.bf16.mxu0 %v7869_v20  ;;  %v7917_v61 = vld [vmem:[%s11020_s1 + $0x9ac] ss:$16 sps:$4 sm:$0xff]   ;;  %v7921_v5 = vld [vmem:[%s11020_s1 + $0x988] ss:$16 sps:$4 sm:$0xff]  }
 0x209   :  { %v5209_v25 = vpop.f32.mrf.mxu1  ;;  %5502 = vmatprep.subr.bf16.mxu1 %v7872_v26  ;;  %v7920_v40 = vld [vmem:[%s11020_s1 + $0xa2c] ss:$16 sps:$4 sm:$0xff]   ;;  %v7924_v6 = vld [vmem:[%s11020_s1 + $0xa08] ss:$16 sps:$4 sm:$0xff]  }
 0x20a   :  { %v7923_v0 = vld [vmem:[%s11020_s1 + $0x98c] ss:$16 sps:$4 sm:$0xff]   ;;  %v7927_v12 = vld [vmem:[%s11020_s1 + $0x968] ss:$16 sps:$4 sm:$0xff]  }
 0x20b   :  { %5486 = vmatpush2.bf16.msra.mxu0 %v7867_v22  ;;  %v7926_v52 = vld [vmem:[%s11020_s1 + $0xa0c] ss:$16 sps:$4 sm:$0xff]   ;;  %v7930_v15 = vld [vmem:[%s11020_s1 + $0xbe8] ss:$16 sps:$4 sm:$0xff]  }
 0x20c   :  { %5503 = vmatpush1.bf16.msra.mxu1 %v7870_v23  ;;  %5487 = vmatprep.subr.bf16.mxu0 %v7875_v29  ;;  %v7929_v20 = vld [vmem:[%s11020_s1 + $0x96c] ss:$16 sps:$4 sm:$0xff]   ;;  %v7933_v23 = vld [vmem:[%s11020_s1 + $0x948] ss:$16 sps:$4 sm:$0xff]  }
 0x20d   :  { %5504 = vmatprep.subr.bf16.mxu1 %v7878_v34  ;;  %v7932_v26 = vld [vmem:[%s11020_s1 + $0xbec] ss:$16 sps:$4 sm:$0xff]   ;;  %v7936_v24 = vld [vmem:[%s11020_s1 + $0xbc8] ss:$16 sps:$4 sm:$0xff]  }
 0x20e   :  { %v7935_v16 = vld [vmem:[%s11020_s1 + $0x94c] ss:$16 sps:$4 sm:$0xff]   ;;  %v7939_v34 = vld [vmem:[%s11020_s1 + $0x928] ss:$16 sps:$4 sm:$0xff]  }
 0x20f   :  { %5488 = vmatpush2.bf16.msra.mxu0 %v7873_v31  ;;  %v7938_v22 = vld [vmem:[%s11020_s1 + $0xbcc] ss:$16 sps:$4 sm:$0xff]   ;;  %v7942_v31 = vld [vmem:[%s11020_s1 + $0xba8] ss:$16 sps:$4 sm:$0xff]  }
 0x210   :  { %5505 = vmatpush1.bf16.msra.mxu1 %v7876_v8  ;;  %5539 = vmatprep.subr.bf16.mxu0 %v7884_v28  ;;  %v7941_v25 = vld [vmem:[%s11020_s1 + $0x92c] ss:$16 sps:$4 sm:$0xff]   ;;  %v7945_v28 = vld [vmem:[%s11020_s1 + $0x908] ss:$16 sps:$4 sm:$0xff]  }
 0x211   :  { %5506 = vmatprep.subr.bf16.mxu1 %v7881_v27  ;;  %v7944_v29 = vld [vmem:[%s11020_s1 + $0xbac] ss:$16 sps:$4 sm:$0xff]  }
 0x212   :  { %5490 = vmatmul.mubr.bf16.vlgmr.msra.gmra.mxu0 %v8761_v21  ;;  %v7896_v21 = vld [vmem:[%s11020_s1 + $0xaac] ss:$16 sps:$4 sm:$0xff]  }
 0x213   :  { %5540 = vmatpush1.bf16.msra.mxu0 %v7882_v35  ;;  %5571 = vmatprep.mubr.bf16.mxu0 %v8794_v32  ;;  %v7902_v32 = vld [vmem:[%s11020_s1 + $0xa8c] ss:$16 sps:$4 sm:$0xff]  }
 0x214   :  { %5507 = vmatpush1.bf16.msra.mxu1 %v7879_v33  ;;  %5541 = vmatprep.subr.bf16.mxu0 %v7890_v39  ;;  %v7947_v8 = vld [vmem:[%s11020_s1 + $0x90c] ss:$16 sps:$4 sm:$0xff]   ;;  %v7948_v33 = vld [vmem:[%s11020_s1 + $0xb88] ss:$16 sps:$4 sm:$0xff]  }
 0x215   :  { %5508 = vmatprep.subr.bf16.mxu1 %v7887_v36  ;;  %v7950_v27 = vld [vmem:[%s11020_s1 + $0xb8c] ss:$16 sps:$4 sm:$0xff]   ;;  %v7951_v39 = vld [vmem:[%s11020_s1 + $0xb68] ss:$16 sps:$4 sm:$0xff]  }
 0x216   :  { %v7953_v35 = vld [vmem:[%s11020_s1 + $0xb6c] ss:$16 sps:$4 sm:$0xff]  }
 0x217   :  { %5542 = vmatpush1.bf16.msra.mxu0 %v7888_v41  ;;  %v7956_v36 = vld [vmem:[%s11020_s1 + $0xcec] ss:$16 sps:$4 sm:$0xff]  }
 0x218   :  { %5509 = vmatpush1.bf16.msra.mxu1 %v7885_v38  ;;  %5543 = vmatprep.subr.bf16.mxu0 %v7896_v21  ;;  %v7954_v38 = vld [vmem:[%s11020_s1 + $0xce8] ss:$16 sps:$4 sm:$0xff]   ;;  %v7959_v41 = vld [vmem:[%s11020_s1 + $0xb4c] ss:$16 sps:$4 sm:$0xff]  }
 0x219   :  { %5510 = vmatprep.subr.bf16.mxu1 %v7893_v37  ;;  %v7962_v37 = vld [vmem:[%s11020_s1 + $0xccc] ss:$16 sps:$4 sm:$0xff]  }
 0x21b   :  { %5544 = vmatpush1.bf16.msra.mxu0 %v7894_v44 }
 0x21c   :  { %5511 = vmatpush1.bf16.msra.mxu1 %v7891_v49  ;;  %5545 = vmatprep.subr.bf16.mxu0 %v7902_v32  ;;  %v7960_v32 = vld [vmem:[%s11020_s1 + $0xcc8] ss:$16 sps:$4 sm:$0xff]  }
 0x21d   :  { %5512 = vmatprep.subr.bf16.mxu1 %v7899_v45  ;;  %v7957_v45 = vld [vmem:[%s11020_s1 + $0xb48] ss:$16 sps:$4 sm:$0xff]  }
 0x21f   :  { %5546 = vmatpush1.bf16.msra.mxu0 %v7900_v47 }
 0x220   :  { %5513 = vmatpush1.bf16.msra.mxu1 %v7897_v46  ;;  %5547 = vmatprep.subr.bf16.mxu0 %v7908_v53 }
 0x221   :  { %5514 = vmatprep.subr.bf16.mxu1 %v7905_v51 }
 0x223   :  { %5548 = vmatpush1.bf16.msra.mxu0 %v7906_v56 }
 0x224   :  { %5515 = vmatpush2.bf16.msra.mxu1 %v7903_v55  ;;  %5549 = vmatprep.subr.bf16.mxu0 %v7914_v59  ;;  %v7963_v59 = vld [vmem:[%s11020_s1 + $0xb28] ss:$16 sps:$4 sm:$0xff]  }
 0x225   :  { %5516 = vmatprep.subr.bf16.mxu1 %v7911_v58 }
 0x227   :  { %5550 = vmatpush1.bf16.msra.mxu0 %v7912_v60 }
 0x228   :  { %5517 = vmatpush2.bf16.msra.mxu1 %v7909_v9  ;;  %5551 = vmatprep.subr.bf16.mxu0 %v7920_v40  ;;  %v7966_v9 = vld [vmem:[%s11020_s1 + $0xca8] ss:$16 sps:$4 sm:$0xff]  }
 0x229   :  { %5518 = vmatprep.subr.bf16.mxu1 %v7917_v61  ;;  %v7969_v40 = vld [vmem:[%s11020_s1 + $0xb08] ss:$16 sps:$4 sm:$0xff]  }
 0x22b   :  { %5552 = vmatpush1.bf16.msra.mxu0 %v7918_v63  ;;  %v7977_v63 = vld [vmem:[%s11020_s1 + $0xc6c] ss:$16 sps:$4 sm:$0xff]  }
 0x22c   :  { %5519 = vmatpush2.bf16.msra.mxu1 %v7915_v62  ;;  %5553 = vmatprep.subr.bf16.mxu0 %v7926_v52  ;;  %v7972_v62 = vld [vmem:[%s11020_s1 + $0xc88] ss:$16 sps:$4 sm:$0xff]  }
 0x22d   :  { %5520 = vmatprep.subr.bf16.mxu1 %v7923_v0  ;;  %v7980_v0 = vld [vmem:[%s11020_s1 + $0xeec] ss:$16 sps:$4 sm:$0xff]   ;;  %v7975_v52 = vld [vmem:[%s11020_s1 + $0xc68] ss:$16 sps:$4 sm:$0xff]  }
 0x22f   :  { %5554 = vmatpush1.bf16.msra.mxu0 %v7924_v6  ;;  %v7983_v6 = vld [vmem:[%s11020_s1 + $0xc4c] ss:$16 sps:$4 sm:$0xff]  }
 0x230   :  { %5521 = vmatpush2.bf16.msra.mxu1 %v7921_v5  ;;  %5555 = vmatprep.subr.bf16.mxu0 %v7932_v26  ;;  %v7978_v5 = vld [vmem:[%s11020_s1 + $0xee8] ss:$16 sps:$4 sm:$0xff]  }
 0x231   :  { %5522 = vmatprep.subr.bf16.mxu1 %v7929_v20  ;;  %v7986_v20 = vld [vmem:[%s11020_s1 + $0xecc] ss:$16 sps:$4 sm:$0xff]  }
 0x233   :  { %5556 = vmatpush2.bf16.msra.mxu0 %v7930_v15  ;;  %v7981_v15 = vld [vmem:[%s11020_s1 + $0xc48] ss:$16 sps:$4 sm:$0xff]  }
 0x234   :  { %5523 = vmatpush2.bf16.msra.mxu1 %v7927_v12  ;;  %5557 = vmatprep.subr.bf16.mxu0 %v7938_v22 }
 0x235   :  { %5524 = vmatprep.subr.bf16.mxu1 %v7935_v16  ;;  %v7984_v16 = vld [vmem:[%s11020_s1 + $0xec8] ss:$16 sps:$4 sm:$0xff]  }
 0x237   :  { %5558 = vmatpush2.bf16.msra.mxu0 %v7936_v24 }
 0x238   :  { %5525 = vmatpush2.bf16.msra.mxu1 %v7933_v23  ;;  %5559 = vmatprep.subr.bf16.mxu0 %v7944_v29  ;;  %v7989_v23 = vld [vmem:[%s11020_s1 + $0xc2c] ss:$16 sps:$4 sm:$0xff]   ;;  %v7987_v29 = vld [vmem:[%s11020_s1 + $0xc28] ss:$16 sps:$4 sm:$0xff]  }
 0x239   :  { %5526 = vmatprep.subr.bf16.mxu1 %v7941_v25 }
 0x23b   :  { %5560 = vmatpush2.bf16.msra.mxu0 %v7942_v31 }
 0x23c   :  { %5527 = vmatpush2.bf16.msra.mxu1 %v7939_v34  ;;  %5561 = vmatprep.subr.bf16.mxu0 %v7950_v27  ;;  %v7990_v34 = vld [vmem:[%s11020_s1 + $0xea8] ss:$16 sps:$4 sm:$0xff]  }
 0x23d   :  { %5528 = vmatprep.subr.bf16.mxu1 %v7947_v8  ;;  %v7995_v8 = vld [vmem:[%s11020_s1 + $0xc0c] ss:$16 sps:$4 sm:$0xff]   ;;  %v7993_v27 = vld [vmem:[%s11020_s1 + $0xc08] ss:$16 sps:$4 sm:$0xff]  }
 0x23f   :  { %5562 = vmatpush2.bf16.msra.mxu0 %v7948_v33  ;;  %v8001_v33 = vld [vmem:[%s11020_s1 + $0xdec] ss:$16 sps:$4 sm:$0xff]  }
 0x240   :  { %5529 = vmatpush2.bf16.msra.mxu1 %v7945_v28  ;;  %5563 = vmatprep.subr.bf16.mxu0 %v7953_v35  ;;  %v7996_v28 = vld [vmem:[%s11020_s1 + $0xe88] ss:$16 sps:$4 sm:$0xff]   ;;  %v8004_v35 = vld [vmem:[%s11020_s1 + $0xe6c] ss:$16 sps:$4 sm:$0xff]  }
 0x241   :  { %5580 = vmatprep.subr.bf16.mxu1 %v7956_v36  ;;  %v7999_v36 = vld [vmem:[%s11020_s1 + $0xde8] ss:$16 sps:$4 sm:$0xff]  }
 0x242   :  { %v5245_v21 = vpop.f32.mrf.mxu0 }
 0x243   :  { %v5286_v49 = vpop.f32.mrf.mxu1  ;;  %5531 = vmatmul.mubr.bf16.vlgmr.msra.gmra.mxu1 %v8981_v42  ;;  %v5246_v44 = vadd.f32 %v5245_v21, %v10082_v11  ;;  %5564 = vmatpush2.bf16.msra.mxu0 %v7951_v39  ;;  %v7965_v42 = vld [vmem:[%s11020_s1 + $0xb2c] ss:$16 sps:$4 sm:$0xff]   ;;  %v8002_v39 = vld [vmem:[%s11020_s1 + $0xe68] ss:$16 sps:$4 sm:$0xff]  }
 0x244   :  { %5581 = vmatpush1.bf16.msra.mxu1 %v7954_v38  ;;  %v5247_v46 = vpop.f32.mrf.mxu0  ;;  %5565 = vmatprep.subr.bf16.mxu0 %v7959_v41  ;;  %v7968_v11 = vld [vmem:[%s11020_s1 + $0xcac] ss:$16 sps:$4 sm:$0xff]   ;;  %v8008_v21 = vld [vmem:[%s11020_s1 + $0xe48] ss:$16 sps:$4 sm:$0xff]  }
 0x245   :  { %v5288_v47 = vpop.f32.mrf.mxu1  ;;  %5582 = vmatprep.subr.bf16.mxu1 %v7962_v37  ;;  %v5287_v51 = vadd.f32 %v5286_v49, %v5246_v44  ;;  %v5248_v53 = vadd.f32 %v5247_v46, %v10086_v19  ;;  %5612 = vmatprep.mubr.bf16.mxu1 %v8997_v48  ;;  %v7971_v48 = vld [vmem:[%s11020_s1 + $0xb0c] ss:$16 sps:$4 sm:$0xff]   ;;  %v8005_v37 = vld [vmem:[%s11020_s1 + $0xdc8] ss:$16 sps:$4 sm:$0xff]  }
 0x246   :  { %v5249_v55 = vpop.f32.mrf.mxu0  ;;  %v7974_v19 = vld [vmem:[%s11020_s1 + $0xc8c] ss:$16 sps:$4 sm:$0xff]  }
 0x247   :  { %v5290_v56 = vpop.f32.mrf.mxu1  ;;  %v5289_v58 = vadd.f32 %v5288_v47, %v5248_v53  ;;  %5566 = vmatpush2.bf16.msra.mxu0 %v7957_v45  ;;  %v8007_v38 = vld [vmem:[%s11020_s1 + $0xdcc] ss:$16 sps:$4 sm:$0xff]   ;;  %v8011_v45 = vld [vmem:[%s11020_s1 + $0xda8] ss:$16 sps:$4 sm:$0xff]  }
 0x248   :  { %5583 = vmatpush1.bf16.msra.mxu1 %v7960_v32  ;;  %v5250_v60 = vpop.f32.mrf.mxu0  ;;  %5567 = vmatprep.subr.bf16.mxu0 %v7965_v42  ;;  %v8010_v41 = vld [vmem:[%s11020_s1 + $0xe4c] ss:$16 sps:$4 sm:$0xff]   ;;  %v8014_v32 = vld [vmem:[%s11020_s1 + $0xe28] ss:$16 sps:$4 sm:$0xff]  }
 0x249   :  { %v5291_v61 = vpop.f32.mrf.mxu1  ;;  %5584 = vmatprep.subr.bf16.mxu1 %v7968_v11  ;;  %v8013_v49 = vld [vmem:[%s11020_s1 + $0xdac] ss:$16 sps:$4 sm:$0xff]   ;;  %v8017_v42 = vld [vmem:[%s11020_s1 + $0xd88] ss:$16 sps:$4 sm:$0xff]  }
 0x24a   :  { %v8016_v44 = vld [vmem:[%s11020_s1 + $0xe2c] ss:$16 sps:$4 sm:$0xff]   ;;  %v8020_v11 = vld [vmem:[%s11020_s1 + $0xe08] ss:$16 sps:$4 sm:$0xff]  }
 0x24b   :  { %5568 = vmatpush2.bf16.msra.mxu0 %v7963_v59  ;;  %v8019_v46 = vld [vmem:[%s11020_s1 + $0xd8c] ss:$16 sps:$4 sm:$0xff]   ;;  %v8023_v55 = vld [vmem:[%s11020_s1 + $0xd68] ss:$16 sps:$4 sm:$0xff]  }
 0x24c   :  { %5585 = vmatpush1.bf16.msra.mxu1 %v7966_v9  ;;  %5569 = vmatprep.subr.bf16.mxu0 %v7971_v48  ;;  %v8022_v47 = vld [vmem:[%s11020_s1 + $0xe0c] ss:$16 sps:$4 sm:$0xff]   ;;  %v8026_v56 = vld [vmem:[%s11020_s1 + $0xfe8] ss:$16 sps:$4 sm:$0xff]  }
 0x24d   :  { %5586 = vmatprep.subr.bf16.mxu1 %v7974_v19  ;;  %v8028_v53 = vld [vmem:[%s11020_s1 + $0xfec] ss:$16 sps:$4 sm:$0xff]   ;;  %v8029_v9 = vld [vmem:[%s11020_s1 + $0xd48] ss:$16 sps:$4 sm:$0xff]  }
 0x24e   :  { %v8034_v59 = vld [vmem:[%s11020_s1 + $0xfcc] ss:$16 sps:$4 sm:$0xff]   ;;  %v8032_v60 = vld [vmem:[%s11020_s1 + $0xfc8] ss:$16 sps:$4 sm:$0xff]  }
 0x24f   :  { %5570 = vmatpush2.bf16.msra.mxu0 %v7969_v40  ;;  %v8037_v61 = vld [vmem:[%s11020_s1 + $0xd2c] ss:$16 sps:$4 sm:$0xff]   ;;  %v8035_v19 = vld [vmem:[%s11020_s1 + $0xd28] ss:$16 sps:$4 sm:$0xff]  }
 0x250   :  { %5587 = vmatpush1.bf16.msra.mxu1 %v7972_v62  ;;  %5621 = vmatprep.subr.bf16.mxu0 %v7980_v0  ;;  %v8040_v48 = vld [vmem:[%s11020_s1 + $0xfac] ss:$16 sps:$4 sm:$0xff]   ;;  %v8038_v40 = vld [vmem:[%s11020_s1 + $0xfa8] ss:$16 sps:$4 sm:$0xff]  }
 0x251   :  { %5588 = vmatprep.subr.bf16.mxu1 %v7977_v63  ;;  %v8043_v62 = vld [vmem:[%s11020_s1 + $0xd0c] ss:$16 sps:$4 sm:$0xff]   ;;  %v8041_v0 = vld [vmem:[%s11020_s1 + $0xd08] ss:$16 sps:$4 sm:$0xff]  }
 0x252   :  { %v5327_v26 = vpop.f32.mrf.mxu0  ;;  %5572 = vmatmul.mubr.bf16.vlgmr.msra.gmra.mxu0 %v8983_v43  ;;  %v7992_v43 = vld [vmem:[%s11020_s1 + $0xeac] ss:$16 sps:$4 sm:$0xff]  }
 0x253   :  { %v10323_v12 = vadd.f32 %v5327_v26, %v5287_v51  ;;  %5622 = vmatpush1.bf16.msra.mxu0 %v7978_v5  ;;  %5653 = vmatprep.mubr.bf16.mxu0 %v8999_v50  ;;  %v7998_v50 = vld [vmem:[%s11020_s1 + $0xe8c] ss:$16 sps:$4 sm:$0xff]   ;;  %v8050_v26 = vld [vmem:[%s11020_s1 + $0x10e8] ss:$16 sps:$4 sm:$0xff]  }
 0x254   :  { %5589 = vmatpush1.bf16.msra.mxu1 %v7975_v52  ;;  %v5329_v22 = vpop.f32.mrf.mxu0  ;;  %5623 = vmatprep.subr.bf16.mxu0 %v7986_v20  ;;  %v8025_v51 = vld [vmem:[%s11020_s1 + $0xd6c] ss:$16 sps:$4 sm:$0xff]   ;;  %v8044_v52 = vld [vmem:[%s11020_s1 + $0xf88] ss:$16 sps:$4 sm:$0xff]  }
 0x255   :  { %5590 = vmatprep.subr.bf16.mxu1 %v7983_v6  ;;  %v10337_v24 = vadd.f32 %v5329_v22, %v5289_v58  ;;  %v8031_v58 = vld [vmem:[%s11020_s1 + $0xd4c] ss:$16 sps:$4 sm:$0xff]   ;;  %v8047_v20 = vld [vmem:[%s11020_s1 + $0xf68] ss:$16 sps:$4 sm:$0xff]  }
 0x256   :  { %v5331_v25 = vpop.f32.mrf.mxu0  ;;  %v8046_v63 = vld [vmem:[%s11020_s1 + $0xf8c] ss:$16 sps:$4 sm:$0xff]  }
 0x257   :  { %5624 = vmatpush1.bf16.msra.mxu0 %v7984_v16  ;;  %v8049_v5 = vld [vmem:[%s11020_s1 + $0xf6c] ss:$16 sps:$4 sm:$0xff]  }
 0x258   :  { %5591 = vmatpush1.bf16.msra.mxu1 %v7981_v15  ;;  %v5332_v31 = vpop.f32.mrf.mxu0  ;;  %5625 = vmatprep.subr.bf16.mxu0 %v7992_v43  ;;  %v8052_v6 = vld [vmem:[%s11020_s1 + $0x10ec] ss:$16 sps:$4 sm:$0xff]   ;;  %v8056_v43 = vld [vmem:[%s11020_s1 + $0x10c8] ss:$16 sps:$4 sm:$0xff]  }
 0x259   :  { %5592 = vmatprep.subr.bf16.mxu1 %v7989_v23  ;;  %v8055_v15 = vld [vmem:[%s11020_s1 + $0xf4c] ss:$16 sps:$4 sm:$0xff]   ;;  %v8053_v23 = vld [vmem:[%s11020_s1 + $0xf48] ss:$16 sps:$4 sm:$0xff]  }
 0x25a   :  { %v8058_v16 = vld [vmem:[%s11020_s1 + $0x10cc] ss:$16 sps:$4 sm:$0xff]   ;;  %v8059_v31 = vld [vmem:[%s11020_s1 + $0xf28] ss:$16 sps:$4 sm:$0xff]  }
 0x25b   :  { %5626 = vmatpush1.bf16.msra.mxu0 %v7990_v34 }
 0x25c   :  { %5593 = vmatpush1.bf16.msra.mxu1 %v7987_v29  ;;  %5627 = vmatprep.subr.bf16.mxu0 %v7998_v50  ;;  %v8061_v29 = vld [vmem:[%s11020_s1 + $0xf2c] ss:$16 sps:$4 sm:$0xff]  }
 0x25d   :  { %5594 = vmatprep.subr.bf16.mxu1 %v7995_v8  ;;  %v8062_v8 = vld [vmem:[%s11020_s1 + $0x10a8] ss:$16 sps:$4 sm:$0xff]  }
 0x25f   :  { %5628 = vmatpush1.bf16.msra.mxu0 %v7996_v28  ;;  %v867_v28 = vsub.s32 2, %v9167_v57 }
 0x260   :  { %5595 = vmatpush1.bf16.msra.mxu1 %v7993_v27  ;;  %5629 = vmatprep.subr.bf16.mxu0 %v8004_v35  ;;  %v8067_v27 = vld [vmem:[%s11020_s1 + $0xf0c] ss:$16 sps:$4 sm:$0xff]   ;;  %v8065_v35 = vld [vmem:[%s11020_s1 + $0xf08] ss:$16 sps:$4 sm:$0xff]  }
 0x261   :  { %5596 = vmatprep.subr.bf16.mxu1 %v8001_v33  ;;  %v871_v33 = vsub.s32 3, %v9167_v57  ;;  %v8076_v57 = vld [vmem:[%s11020_s1 + $0x12ec] ss:$16 sps:$4 sm:$0xff]  }
 0x263   :  { %5630 = vmatpush1.bf16.msra.mxu0 %v8002_v39  ;;  %v8073_v39 = vld [vmem:[%s11020_s1 + $0x106c] ss:$16 sps:$4 sm:$0xff]  }
 0x264   :  { %5597 = vmatpush2.bf16.msra.mxu1 %v7999_v36  ;;  %5631 = vmatprep.subr.bf16.mxu0 %v8010_v41  ;;  %v8068_v36 = vld [vmem:[%s11020_s1 + $0x1088] ss:$16 sps:$4 sm:$0xff]  }
 0x265   :  { %5598 = vmatprep.subr.bf16.mxu1 %v8007_v38  ;;  %v8295_v38 = vld [vmem:[%s11022_s2] sm:$0xf] }
 0x266   :  { %v868_v41 = vrot.slane %v8295_v38, %v867_v28  ;;  %v8128_v28 = vld [vmem:[%s11020_s1 + $0x13c8] ss:$16 sps:$4 sm:$0xff]  }
 0x267   :  { %5632 = vmatpush1.bf16.msra.mxu0 %v8008_v21  ;;  %v8071_v21 = vld [vmem:[%s11020_s1 + $0x1068] ss:$16 sps:$4 sm:$0xff]  }
 0x268   :  { %5599 = vmatpush2.bf16.msra.mxu1 %v8005_v37  ;;  %5633 = vmatprep.subr.bf16.mxu0 %v8016_v44  ;;  %v872_v37 = vrot.slane %v8295_v38, %v871_v33  ;;  %v8079_v44 = vld [vmem:[%s11020_s1 + $0x104c] ss:$16 sps:$4 sm:$0xff]  }
 0x269   :  { %5600 = vmatprep.subr.bf16.mxu1 %v8013_v49  ;;  %v8074_v49 = vld [vmem:[%s11020_s1 + $0x12e8] ss:$16 sps:$4 sm:$0xff]   ;;  %v8133_v33 = vld [vmem:[%s11020_s1 + $0x112c] ss:$16 sps:$4 sm:$0xff]  }
 0x26a   :  { %v8142_v38 = vld [vmem:[%s11020_s1 + $0x138c] ss:$16 sps:$4 sm:$0xff]  }
 0x26b   :  { %5634 = vmatpush1.bf16.msra.mxu0 %v8014_v32 }
 0x26c   :  { %5601 = vmatpush2.bf16.msra.mxu1 %v8011_v45  ;;  %5635 = vmatprep.subr.bf16.mxu0 %v8022_v47  ;;  %v8082_v45 = vld [vmem:[%s11020_s1 + $0x12cc] ss:$16 sps:$4 sm:$0xff]   ;;  %v8080_v47 = vld [vmem:[%s11020_s1 + $0x12c8] ss:$16 sps:$4 sm:$0xff]  }
 0x26d   :  { %5602 = vmatprep.subr.bf16.mxu1 %v8019_v46  ;;  %v8077_v46 = vld [vmem:[%s11020_s1 + $0x1048] ss:$16 sps:$4 sm:$0xff]  }
 0x26f   :  { %5636 = vmatpush1.bf16.msra.mxu0 %v8020_v11  ;;  %v8085_v11 = vld [vmem:[%s11020_s1 + $0x102c] ss:$16 sps:$4 sm:$0xff]  }
 0x270   :  { %5603 = vmatpush2.bf16.msra.mxu1 %v8017_v42  ;;  %5637 = vmatprep.subr.bf16.mxu0 %v8028_v53 }
 0x271   :  { %5604 = vmatprep.subr.bf16.mxu1 %v8025_v51 }
 0x273   :  { %5638 = vmatpush2.bf16.msra.mxu0 %v8026_v56  ;;  %v8088_v56 = vld [vmem:[%s11020_s1 + $0x12ac] ss:$16 sps:$4 sm:$0xff]  }
 0x274   :  { %5605 = vmatpush2.bf16.msra.mxu1 %v8023_v55  ;;  %5639 = vmatprep.subr.bf16.mxu0 %v8034_v59  ;;  %v8086_v59 = vld [vmem:[%s11020_s1 + $0x12a8] ss:$16 sps:$4 sm:$0xff]  }
 0x275   :  { %5606 = vmatprep.subr.bf16.mxu1 %v8031_v58 }
 0x277   :  { %5640 = vmatpush2.bf16.msra.mxu0 %v8032_v60 }
 0x278   :  { %5607 = vmatpush2.bf16.msra.mxu1 %v8029_v9  ;;  %5641 = vmatprep.subr.bf16.mxu0 %v8040_v48  ;;  %v8094_v48 = vld [vmem:[%s11020_s1 + $0x128c] ss:$16 sps:$4 sm:$0xff]  }
 0x279   :  { %5608 = vmatprep.subr.bf16.mxu1 %v8037_v61  ;;  %v8091_v61 = vld [vmem:[%s11020_s1 + $0x100c] ss:$16 sps:$4 sm:$0xff]  }
 0x27b   :  { %5642 = vmatpush2.bf16.msra.mxu0 %v8038_v40  ;;  %v8097_v40 = vld [vmem:[%s11020_s1 + $0x11ec] ss:$16 sps:$4 sm:$0xff]  }
 0x27c   :  { %5609 = vmatpush2.bf16.msra.mxu1 %v8035_v19  ;;  %5643 = vmatprep.subr.bf16.mxu0 %v8046_v63  ;;  %v8089_v19 = vld [vmem:[%s11020_s1 + $0x1008] ss:$16 sps:$4 sm:$0xff]  }
 0x27d   :  { %5610 = vmatprep.subr.bf16.mxu1 %v8043_v62  ;;  %v8100_v62 = vld [vmem:[%s11020_s1 + $0x126c] ss:$16 sps:$4 sm:$0xff]   ;;  %v8095_v63 = vld [vmem:[%s11020_s1 + $0x11e8] ss:$16 sps:$4 sm:$0xff]  }
 0x27f   :  { %5644 = vmatpush2.bf16.msra.mxu0 %v8044_v52  ;;  %v8103_v52 = vld [vmem:[%s11020_s1 + $0x11cc] ss:$16 sps:$4 sm:$0xff]  }
 0x280   :  { %5611 = vmatpush2.bf16.msra.mxu1 %v8041_v0  ;;  %5645 = vmatprep.subr.bf16.mxu0 %v8049_v5  ;;  %v8098_v0 = vld [vmem:[%s11020_s1 + $0x1268] ss:$16 sps:$4 sm:$0xff]   ;;  %v8106_v5 = vld [vmem:[%s11020_s1 + $0x124c] ss:$16 sps:$4 sm:$0xff]  }
 0x281   :  { %5662 = vmatprep.subr.bf16.mxu1 %v8052_v6  ;;  %v8101_v6 = vld [vmem:[%s11020_s1 + $0x11c8] ss:$16 sps:$4 sm:$0xff]  }
 0x283   :  { %v5368_v22 = vpop.f32.mrf.mxu1  ;;  %5613 = vmatmul.mubr.bf16.vlgmr.msra.gmra.mxu1 %v9204_v7  ;;  %5646 = vmatpush2.bf16.msra.mxu0 %v8047_v20  ;;  %v8064_v7 = vld [vmem:[%s11020_s1 + $0x10ac] ss:$16 sps:$4 sm:$0xff]   ;;  %v8104_v20 = vld [vmem:[%s11020_s1 + $0x1248] ss:$16 sps:$4 sm:$0xff]  }
 0x284   :  { %5663 = vmatpush1.bf16.msra.mxu1 %v8050_v26  ;;  %5647 = vmatprep.subr.bf16.mxu0 %v8055_v15  ;;  %v5369_v32 = vadd.f32 %v5368_v22, %v868_v41  ;;  %v8109_v26 = vld [vmem:[%s11020_s1 + $0x11ac] ss:$16 sps:$4 sm:$0xff]   ;;  %v8110_v22 = vld [vmem:[%s11020_s1 + $0x1228] ss:$16 sps:$4 sm:$0xff]  }
 0x285   :  { %v5370_v25 = vpop.f32.mrf.mxu1  ;;  %5664 = vmatprep.subr.bf16.mxu1 %v8058_v16  ;;  %5694 = vmatprep.mubr.bf16.mxu1 %v9220_v17  ;;  %v8070_v17 = vld [vmem:[%s11020_s1 + $0x108c] ss:$16 sps:$4 sm:$0xff]   ;;  %v8107_v16 = vld [vmem:[%s11020_s1 + $0x11a8] ss:$16 sps:$4 sm:$0xff]  }
 0x286   :  { %v5371_v51 = vadd.f32 %v5370_v25, %v872_v37  ;;  %v8112_v15 = vld [vmem:[%s11020_s1 + $0x122c] ss:$16 sps:$4 sm:$0xff]   ;;  %v8113_v25 = vld [vmem:[%s11020_s1 + $0x1188] ss:$16 sps:$4 sm:$0xff]  }
 0x287   :  { %v5372_v34 = vpop.f32.mrf.mxu1  ;;  %5648 = vmatpush2.bf16.msra.mxu0 %v8053_v23  ;;  %v8115_v23 = vld [vmem:[%s11020_s1 + $0x118c] ss:$16 sps:$4 sm:$0xff]   ;;  %v8137_v41 = vld [vmem:[%s11020_s1 + $0x1108] ss:$16 sps:$4 sm:$0xff]  }
 0x288   :  { %5665 = vmatpush1.bf16.msra.mxu1 %v8056_v43  ;;  %5649 = vmatprep.subr.bf16.mxu0 %v8061_v29  ;;  %v8118_v43 = vld [vmem:[%s11020_s1 + $0x120c] ss:$16 sps:$4 sm:$0xff]   ;;  %v8116_v29 = vld [vmem:[%s11020_s1 + $0x1208] ss:$16 sps:$4 sm:$0xff]  }
 0x289   :  { %v5373_v50 = vpop.f32.mrf.mxu1  ;;  %5666 = vmatprep.subr.bf16.mxu1 %v8064_v7  ;;  %v8121_v7 = vld [vmem:[%s11020_s1 + $0x116c] ss:$16 sps:$4 sm:$0xff]   ;;  %v8140_v37 = vld [vmem:[%s11020_s1 + $0x1388] ss:$16 sps:$4 sm:$0xff]  }
 0x28a   :  { %v8124_v34 = vld [vmem:[%s11020_s1 + $0x13ec] ss:$16 sps:$4 sm:$0xff]  }
 0x28b   :  { %5650 = vmatpush2.bf16.msra.mxu0 %v8059_v31  ;;  %v8119_v31 = vld [vmem:[%s11020_s1 + $0x1168] ss:$16 sps:$4 sm:$0xff]   ;;  %v8127_v50 = vld [vmem:[%s11020_s1 + $0x114c] ss:$16 sps:$4 sm:$0xff]  }
 0x28c   :  { %5667 = vmatpush1.bf16.msra.mxu1 %v8062_v8  ;;  %5651 = vmatprep.subr.bf16.mxu0 %v8067_v27  ;;  %v8122_v8 = vld [vmem:[%s11020_s1 + $0x13e8] ss:$16 sps:$4 sm:$0xff]   ;;  %v8130_v27 = vld [vmem:[%s11020_s1 + $0x13cc] ss:$16 sps:$4 sm:$0xff]  }
 0x28d   :  { %5668 = vmatprep.subr.bf16.mxu1 %v8070_v17  ;;  %v8125_v17 = vld [vmem:[%s11020_s1 + $0x1148] ss:$16 sps:$4 sm:$0xff]  }
 0x28f   :  { %5652 = vmatpush2.bf16.msra.mxu0 %v8065_v35  ;;  %v8136_v35 = vld [vmem:[%s11020_s1 + $0x13ac] ss:$16 sps:$4 sm:$0xff]  }
 0x290   :  { %5669 = vmatpush1.bf16.msra.mxu1 %v8068_v36  ;;  %5703 = vmatprep.subr.bf16.mxu0 %v8076_v57  ;;  %v8131_v36 = vld [vmem:[%s11020_s1 + $0x1128] ss:$16 sps:$4 sm:$0xff]   ;;  %v8139_v57 = vld [vmem:[%s11020_s1 + $0x110c] ss:$16 sps:$4 sm:$0xff]  }
 0x291   :  { %5670 = vmatprep.subr.bf16.mxu1 %v8073_v39  ;;  %v8134_v39 = vld [vmem:[%s11020_s1 + $0x13a8] ss:$16 sps:$4 sm:$0xff]  }
 0x292   :  { %v5409_v42 = vpop.f32.mrf.mxu0  ;;  %5654 = vmatmul.mubr.bf16.vlgmr.msra.gmra.mxu0 %v9206_v10  ;;  %v8083_v10 = vld [vmem:[%s11020_s1 + $0x1028] ss:$16 sps:$4 sm:$0xff]  }
 0x293   :  { %v10537_v53 = vadd.f32 %v5409_v42, %v5369_v32  ;;  %5704 = vmatpush1.bf16.msra.mxu0 %v8074_v49  ;;  %5735 = vmatprep.mubr.bf16.mxu0 %v9222_v18  ;;  %v8092_v18 = vld [vmem:[%s11020_s1 + $0x1288] ss:$16 sps:$4 sm:$0xff]   ;;  %v8148_v49 = vld [vmem:[%s11020_s1 + $0x14ec] ss:$16 sps:$4 sm:$0xff]  }
 0x294   :  { %5671 = vmatpush1.bf16.msra.mxu1 %v8071_v21  ;;  %v5411_v55 = vpop.f32.mrf.mxu0  ;;  %5705 = vmatprep.subr.bf16.mxu0 %v8082_v45  ;;  %v8145_v21 = vld [vmem:[%s11020_s1 + $0x136c] ss:$16 sps:$4 sm:$0xff]   ;;  %v8146_v45 = vld [vmem:[%s11020_s1 + $0x14e8] ss:$16 sps:$4 sm:$0xff]  }
 0x295   :  { %5672 = vmatprep.subr.bf16.mxu1 %v8079_v44  ;;  %v10542_v58 = vadd.f32 %v5411_v55, %v5371_v51  ;;  %v8143_v44 = vld [vmem:[%s11020_s1 + $0x1368] ss:$16 sps:$4 sm:$0xff]   ;;  %v8151_v32 = vld [vmem:[%s11020_s1 + $0x134c] ss:$16 sps:$4 sm:$0xff]  }
 0x296   :  { %v5413_v9 = vpop.f32.mrf.mxu0  ;;  %v8152_v51 = vld [vmem:[%s11020_s1 + $0x14c8] ss:$16 sps:$4 sm:$0xff]  }
 0x297   :  { %5706 = vmatpush1.bf16.msra.mxu0 %v8080_v47  ;;  %v8158_v9 = vld [vmem:[%s11020_s1 + $0x14a8] ss:$16 sps:$4 sm:$0xff]  }
 0x298   :  { %5673 = vmatpush1.bf16.msra.mxu1 %v8077_v46  ;;  %v5414_v60 = vpop.f32.mrf.mxu0  ;;  %5707 = vmatprep.subr.bf16.mxu0 %v8088_v56  ;;  %v8154_v46 = vld [vmem:[%s11020_s1 + $0x14cc] ss:$16 sps:$4 sm:$0xff]  }
 0x299   :  { %5674 = vmatprep.subr.bf16.mxu1 %v8085_v11  ;;  %v8149_v11 = vld [vmem:[%s11020_s1 + $0x1348] ss:$16 sps:$4 sm:$0xff]   ;;  %v8157_v56 = vld [vmem:[%s11020_s1 + $0x132c] ss:$16 sps:$4 sm:$0xff]  }
 0x29b   :  { %5708 = vmatpush1.bf16.msra.mxu0 %v8086_v59  ;;  %v8155_v59 = vld [vmem:[%s11020_s1 + $0x1328] ss:$16 sps:$4 sm:$0xff]  }
 0x29c   :  { %5675 = vmatpush1.bf16.msra.mxu1 %v8083_v10  ;;  %5709 = vmatprep.subr.bf16.mxu0 %v8094_v48  ;;  %v8164_v48 = vld [vmem:[%s11020_s1 + $0x1488] ss:$16 sps:$4 sm:$0xff]  }
 0x29d   :  { %5676 = vmatprep.subr.bf16.mxu1 %v8091_v61  ;;  %v8161_v61 = vld [vmem:[%s11020_s1 + $0x1308] ss:$16 sps:$4 sm:$0xff]  }
 0x29f   :  { %5710 = vmatpush1.bf16.msra.mxu0 %v8092_v18  ;;  %v8172_v18 = vld [vmem:[%s11020_s1 + $0x16ec] ss:$16 sps:$4 sm:$0xff]  }
 0x2a0   :  { %5677 = vmatpush1.bf16.msra.mxu1 %v8089_v19  ;;  %5711 = vmatprep.subr.bf16.mxu0 %v8100_v62  ;;  %v8169_v19 = vld [vmem:[%s11020_s1 + $0x146c] ss:$16 sps:$4 sm:$0xff]   ;;  %v8170_v62 = vld [vmem:[%s11020_s1 + $0x16e8] ss:$16 sps:$4 sm:$0xff]  }
 0x2a1   :  { %5678 = vmatprep.subr.bf16.mxu1 %v8097_v40  ;;  %v8167_v40 = vld [vmem:[%s11020_s1 + $0x1468] ss:$16 sps:$4 sm:$0xff]  }
 0x2a3   :  { %5712 = vmatpush1.bf16.msra.mxu0 %v8098_v0  ;;  %v8178_v0 = vld [vmem:[%s11020_s1 + $0x16cc] ss:$16 sps:$4 sm:$0xff]  }
 0x2a4   :  { %5679 = vmatpush2.bf16.msra.mxu1 %v8095_v63  ;;  %5713 = vmatprep.subr.bf16.mxu0 %v8106_v5  ;;  %v8175_v63 = vld [vmem:[%s11020_s1 + $0x144c] ss:$16 sps:$4 sm:$0xff]  }
 0x2a5   :  { %5680 = vmatprep.subr.bf16.mxu1 %v8103_v52 }
 0x2a7   :  { %5714 = vmatpush1.bf16.msra.mxu0 %v8104_v20  ;;  %v8176_v20 = vld [vmem:[%s11020_s1 + $0x16c8] ss:$16 sps:$4 sm:$0xff]  }
 0x2a8   :  { %5681 = vmatpush2.bf16.msra.mxu1 %v8101_v6  ;;  %5715 = vmatprep.subr.bf16.mxu0 %v8112_v15  ;;  %v8173_v6 = vld [vmem:[%s11020_s1 + $0x1448] ss:$16 sps:$4 sm:$0xff]   ;;  %v8181_v15 = vld [vmem:[%s11020_s1 + $0x142c] ss:$16 sps:$4 sm:$0xff]  }
 0x2a9   :  { %5682 = vmatprep.subr.bf16.mxu1 %v8109_v26 }
 0x2ab   :  { %5716 = vmatpush1.bf16.msra.mxu0 %v8110_v22 }
 0x2ac   :  { %5683 = vmatpush2.bf16.msra.mxu1 %v8107_v16  ;;  %5717 = vmatprep.subr.bf16.mxu0 %v8118_v43  ;;  %v8182_v43 = vld [vmem:[%s11020_s1 + $0x16a8] ss:$16 sps:$4 sm:$0xff]  }
 0x2ad   :  { %5684 = vmatprep.subr.bf16.mxu1 %v8115_v23  ;;  %v8179_v23 = vld [vmem:[%s11020_s1 + $0x1428] ss:$16 sps:$4 sm:$0xff]  }
 0x2af   :  { %5718 = vmatpush1.bf16.msra.mxu0 %v8116_v29  ;;  %v8187_v29 = vld [vmem:[%s11020_s1 + $0x140c] ss:$16 sps:$4 sm:$0xff]  }
 0x2b0   :  { %5685 = vmatpush2.bf16.msra.mxu1 %v8113_v25  ;;  %5719 = vmatprep.subr.bf16.mxu0 %v8124_v34  ;;  %v8188_v34 = vld [vmem:[%s11020_s1 + $0x1688] ss:$16 sps:$4 sm:$0xff]  }
 0x2b1   :  { %5686 = vmatprep.subr.bf16.mxu1 %v8121_v7  ;;  %v8185_v7 = vld [vmem:[%s11020_s1 + $0x1408] ss:$16 sps:$4 sm:$0xff]  }
 0x2b3   :  { %5720 = vmatpush2.bf16.msra.mxu0 %v8122_v8  ;;  %v8196_v8 = vld [vmem:[%s11020_s1 + $0x166c] ss:$16 sps:$4 sm:$0xff]  }
 0x2b4   :  { %5687 = vmatpush2.bf16.msra.mxu1 %v8119_v31  ;;  %5721 = vmatprep.subr.bf16.mxu0 %v8130_v27  ;;  %v8193_v31 = vld [vmem:[%s11020_s1 + $0x15ec] ss:$16 sps:$4 sm:$0xff]   ;;  %v8194_v27 = vld [vmem:[%s11020_s1 + $0x1668] ss:$16 sps:$4 sm:$0xff]  }
 0x2b5   :  { %5688 = vmatprep.subr.bf16.mxu1 %v8127_v50  ;;  %v8191_v50 = vld [vmem:[%s11020_s1 + $0x15e8] ss:$16 sps:$4 sm:$0xff]  }
 0x2b7   :  { %5722 = vmatpush2.bf16.msra.mxu0 %v8128_v28  ;;  %v8202_v28 = vld [vmem:[%s11020_s1 + $0x164c] ss:$16 sps:$4 sm:$0xff]  }
 0x2b8   :  { %5689 = vmatpush2.bf16.msra.mxu1 %v8125_v17  ;;  %5723 = vmatprep.subr.bf16.mxu0 %v8136_v35  ;;  %v8199_v17 = vld [vmem:[%s11020_s1 + $0x15cc] ss:$16 sps:$4 sm:$0xff]   ;;  %v8200_v35 = vld [vmem:[%s11020_s1 + $0x1648] ss:$16 sps:$4 sm:$0xff]  }
 0x2b9   :  { %5690 = vmatprep.subr.bf16.mxu1 %v8133_v33  ;;  %v8197_v33 = vld [vmem:[%s11020_s1 + $0x15c8] ss:$16 sps:$4 sm:$0xff]  }
 0x2bb   :  { %5724 = vmatpush2.bf16.msra.mxu0 %v8134_v39  ;;  %v8208_v39 = vld [vmem:[%s11020_s1 + $0x162c] ss:$16 sps:$4 sm:$0xff]  }
 0x2bc   :  { %5691 = vmatpush2.bf16.msra.mxu1 %v8131_v36  ;;  %5725 = vmatprep.subr.bf16.mxu0 %v8142_v38  ;;  %v8205_v36 = vld [vmem:[%s11020_s1 + $0x15ac] ss:$16 sps:$4 sm:$0xff]   ;;  %v8206_v38 = vld [vmem:[%s11020_s1 + $0x1628] ss:$16 sps:$4 sm:$0xff]  }
 0x2bd   :  { %5692 = vmatprep.subr.bf16.mxu1 %v8139_v57  ;;  %v8203_v57 = vld [vmem:[%s11020_s1 + $0x15a8] ss:$16 sps:$4 sm:$0xff]  }
 0x2bf   :  { %5726 = vmatpush2.bf16.msra.mxu0 %v8140_v37  ;;  %v8214_v37 = vld [vmem:[%s11020_s1 + $0x160c] ss:$16 sps:$4 sm:$0xff]  }
 0x2c0   :  { %5693 = vmatpush2.bf16.msra.mxu1 %v8137_v41  ;;  %5727 = vmatprep.subr.bf16.mxu0 %v8145_v21  ;;  %v8211_v41 = vld [vmem:[%s11020_s1 + $0x158c] ss:$16 sps:$4 sm:$0xff]   ;;  %v8209_v21 = vld [vmem:[%s11020_s1 + $0x1588] ss:$16 sps:$4 sm:$0xff]  }
 0x2c1   :  { %5744 = vmatprep.subr.bf16.mxu1 %v8148_v49  ;;  %v8212_v49 = vld [vmem:[%s11020_s1 + $0x1608] ss:$16 sps:$4 sm:$0xff]  }
 0x2c3   :  { %v5450_v47 = vpop.f32.mrf.mxu1  ;;  %5695 = vmatmul.mubr.bf16.vlgmr.msra.gmra.mxu1 %v9430_v3  ;;  %5728 = vmatpush2.bf16.msra.mxu0 %v8143_v44  ;;  %v8160_v3 = vld [vmem:[%s11020_s1 + $0x14ac] ss:$16 sps:$4 sm:$0xff]  }
 0x2c4   :  { %v5451_v42 = vadd.f32 %v5450_v47, %v10537_v53  ;;  %5745 = vmatpush1.bf16.msra.mxu1 %v8146_v45  ;;  %5729 = vmatprep.subr.bf16.mxu0 %v8151_v32  ;;  %v8217_v44 = vld [vmem:[%s11020_s1 + $0x156c] ss:$16 sps:$4 sm:$0xff]   ;;  %v8215_v32 = vld [vmem:[%s11020_s1 + $0x1568] ss:$16 sps:$4 sm:$0xff]  }
 0x2c5   :  { %v5452_v55 = vpop.f32.mrf.mxu1  ;;  %5746 = vmatprep.subr.bf16.mxu1 %v8154_v46  ;;  %5776 = vmatprep.mubr.bf16.mxu1 %v9446_v13  ;;  %v8166_v13 = vld [vmem:[%s11020_s1 + $0x148c] ss:$16 sps:$4 sm:$0xff]   ;;  %v8218_v46 = vld [vmem:[%s11020_s1 + $0x17e8] ss:$16 sps:$4 sm:$0xff]  }
 0x2c6   :  { %v5453_v53 = vadd.f32 %v5452_v55, %v10542_v58  ;;  %v8163_v58 = vld [vmem:[%s11020_s1 + $0x130c] ss:$16 sps:$4 sm:$0xff]  }
 0x2c7   :  { %v5454_v10 = vpop.f32.mrf.mxu1  ;;  %5730 = vmatpush2.bf16.msra.mxu0 %v8149_v11  ;;  %v8220_v45 = vld [vmem:[%s11020_s1 + $0x17ec] ss:$16 sps:$4 sm:$0xff]   ;;  %v8221_v11 = vld [vmem:[%s11020_s1 + $0x1548] ss:$16 sps:$4 sm:$0xff]  }
 0x2c8   :  { %5747 = vmatpush1.bf16.msra.mxu1 %v8152_v51  ;;  %5731 = vmatprep.subr.bf16.mxu0 %v8157_v56  ;;  %v8223_v47 = vld [vmem:[%s11020_s1 + $0x154c] ss:$16 sps:$4 sm:$0xff]   ;;  %v8224_v51 = vld [vmem:[%s11020_s1 + $0x17c8] ss:$16 sps:$4 sm:$0xff]  }
 0x2c9   :  { %v5455_v60 = vpop.f32.mrf.mxu1  ;;  %5748 = vmatprep.subr.bf16.mxu1 %v8160_v3  ;;  %v8229_v55 = vld [vmem:[%s11020_s1 + $0x152c] ss:$16 sps:$4 sm:$0xff]   ;;  %v8227_v3 = vld [vmem:[%s11020_s1 + $0x1528] ss:$16 sps:$4 sm:$0xff]  }
 0x2ca   :  { %v8232_v56 = vld [vmem:[%s11020_s1 + $0x17ac] ss:$16 sps:$4 sm:$0xff]   ;;  %v8236_v60 = vld [vmem:[%s11020_s1 + $0x1788] ss:$16 sps:$4 sm:$0xff]  }
 0x2cb   :  { %5732 = vmatpush2.bf16.msra.mxu0 %v8155_v59  ;;  %v8235_v10 = vld [vmem:[%s11020_s1 + $0x150c] ss:$16 sps:$4 sm:$0xff]  }
 0x2cc   :  { %5749 = vmatpush1.bf16.msra.mxu1 %v8158_v9  ;;  %5733 = vmatprep.subr.bf16.mxu0 %v8163_v58  ;;  %v8238_v59 = vld [vmem:[%s11020_s1 + $0x178c] ss:$16 sps:$4 sm:$0xff]   ;;  %v8233_v9 = vld [vmem:[%s11020_s1 + $0x1508] ss:$16 sps:$4 sm:$0xff]  }
 0x2cd   :  { %5750 = vmatprep.subr.bf16.mxu1 %v8166_v13  ;;  %v8241_v58 = vld [vmem:[%s11020_s1 + $0x176c] ss:$16 sps:$4 sm:$0xff]  }
 0x2ce   :  { %v8244_v13 = vld [vmem:[%s11020_s1 + $0x186c] ss:$16 sps:$4 sm:$0xff]  }
 0x2cf   :  { %5734 = vmatpush2.bf16.msra.mxu0 %v8161_v61  ;;  %v8239_v61 = vld [vmem:[%s11020_s1 + $0x1768] ss:$16 sps:$4 sm:$0xff]  }
 0x2d0   :  { %5751 = vmatpush1.bf16.msra.mxu1 %v8164_v48  ;;  %5785 = vmatprep.subr.bf16.mxu0 %v8172_v18  ;;  %v8242_v48 = vld [vmem:[%s11020_s1 + $0x1868] ss:$16 sps:$4 sm:$0xff]   ;;  %v8250_v18 = vld [vmem:[%s11020_s1 + $0x184c] ss:$16 sps:$4 sm:$0xff]  }
 0x2d1   :  { %5752 = vmatprep.subr.bf16.mxu1 %v8169_v19  ;;  %v8247_v19 = vld [vmem:[%s11020_s1 + $0x174c] ss:$16 sps:$4 sm:$0xff]  }
 0x2d2   :  { %v5491_v52 = vpop.f32.mrf.mxu0  ;;  %5736 = vmatmul.mubr.bf16.vlgmr.msra.gmra.mxu0 %v9432_v4  ;;  %v8184_v4 = vld [vmem:[%s11020_s1 + $0x16ac] ss:$16 sps:$4 sm:$0xff]  }
 0x2d3   :  { %v10730_v5 = vadd.f32 %v5491_v52, %v5451_v42  ;;  %5786 = vmatpush1.bf16.msra.mxu0 %v8170_v62  ;;  %5817 = vmatprep.mubr.bf16.mxu0 %v9448_v14  ;;  %v8190_v14 = vld [vmem:[%s11020_s1 + $0x168c] ss:$16 sps:$4 sm:$0xff]  }
 0x2d4   :  { %5753 = vmatpush1.bf16.msra.mxu1 %v8167_v40  ;;  %v5493_v26 = vpop.f32.mrf.mxu0  ;;  %5787 = vmatprep.subr.bf16.mxu0 %v8178_v0  ;;  %v8226_v42 = vld [vmem:[%s11020_s1 + $0x17cc] ss:$16 sps:$4 sm:$0xff]   ;;  %v8248_v0 = vld [vmem:[%s11020_s1 + $0x1848] ss:$16 sps:$4 sm:$0xff]  }
 0x2d5   :  { %5754 = vmatprep.subr.bf16.mxu1 %v8175_v63  ;;  %v10744_v16 = vadd.f32 %v5493_v26, %v5453_v53  ;;  %v8230_v53 = vld [vmem:[%s11020_s1 + $0x17a8] ss:$16 sps:$4 sm:$0xff]  }
 0x2d6   :  { %v5495_v22 = vpop.f32.mrf.mxu0  ;;  %v8245_v63 = vld [vmem:[%s11020_s1 + $0x1748] ss:$16 sps:$4 sm:$0xff]  }
 0x2d7   :  { %5788 = vmatpush1.bf16.msra.mxu0 %v8176_v20  ;;  %v8251_v26 = vld [vmem:[%s11020_s1 + $0x1728] ss:$16 sps:$4 sm:$0xff]  }
 0x2d8   :  { %5755 = vmatpush1.bf16.msra.mxu1 %v8173_v6  ;;  %v5496_v25 = vpop.f32.mrf.mxu0  ;;  %5789 = vmatprep.subr.bf16.mxu0 %v8184_v4  ;;  %v8253_v6 = vld [vmem:[%s11020_s1 + $0x172c] ss:$16 sps:$4 sm:$0xff]   ;;  %v8257_v22 = vld [vmem:[%s11020_s1 + $0x1708] ss:$16 sps:$4 sm:$0xff]  }
 0x2d9   :  { %5756 = vmatprep.subr.bf16.mxu1 %v8181_v15  ;;  %v8254_v15 = vld [vmem:[%s11020_s1 + $0x1828] ss:$16 sps:$4 sm:$0xff]   ;;  %v5868_v25 = vmax.f32 %v10337_v24, 0.0  ;;  %v8266_v24 = vld [vmem:[%s11023_s3 + $0x30] sm:$0xff]  }
 0x2db   :  { %5790 = vmatpush1.bf16.msra.mxu0 %v8182_v43  ;;  %v8263_v43 = vld [vmem:[%s11023_s3 + $0x78] sm:$0xff]  }
 0x2dc   :  { %5757 = vmatpush1.bf16.msra.mxu1 %v8179_v23  ;;  %5791 = vmatprep.subr.bf16.mxu0 %v8190_v14  ;;  %v8260_v23 = vld [vmem:[%s11020_s1 + $0x1808] ss:$16 sps:$4 sm:$0xff]   ;;  %v8265_v14 = vld [vmem:[%s11023_s3 + $0x70] sm:$0xff]  }
 0x2dd   :  { %5758 = vmatprep.subr.bf16.mxu1 %v8187_v29  ;;  %v8264_v29 = vld [vmem:[%s11023_s3 + $0x38] sm:$0xff]  }
 0x2df   :  { %5792 = vmatpush1.bf16.msra.mxu0 %v8188_v34 }
 0x2e0   :  { %5759 = vmatpush1.bf16.msra.mxu1 %v8185_v7  ;;  %5793 = vmatprep.subr.bf16.mxu0 %v8196_v8  ;;  %v5872_v7 = vpack.c.bf16 %v5868_v25, %v5868_v25 }
 0x2e1   :  { %5760 = vmatprep.subr.bf16.mxu1 %v8193_v31 }
 0x2e3   :  { %5794 = vmatpush1.bf16.msra.mxu0 %v8194_v27 }
 0x2e4   :  { %5761 = vmatpush2.bf16.msra.mxu1 %v8191_v50  ;;  %5795 = vmatprep.subr.bf16.mxu0 %v8202_v28  ;;  %v8267_v50 = vld [vmem:[%s11023_s3 + $0x68] sm:$0xff]   ;;  %v8269_v28 = vld [vmem:[%s11023_s3 + $0x60] sm:$0xff]  }
 0x2e5   :  { %5762 = vmatprep.subr.bf16.mxu1 %v8199_v17 }
 0x2e7   :  { %5796 = vmatpush1.bf16.msra.mxu0 %v8200_v35  ;;  %v8280_v35 = vld [vmem:[%s11023_s3 + $0xb8] sm:$0xff]  }
 0x2e8   :  { %5763 = vmatpush2.bf16.msra.mxu1 %v8197_v33  ;;  %5797 = vmatprep.subr.bf16.mxu0 %v8208_v39  ;;  %v8279_v33 = vld [vmem:[%s11023_s3 + $0xf8] sm:$0xff]  }
 0x2e9   :  { %5764 = vmatprep.subr.bf16.mxu1 %v8205_v36  ;;  %v8270_v36 = vld [vmem:[%s11023_s3 + $0x20] sm:$0xff]   ;;  %v8271_v39 = vld [vmem:[%s11023_s3 + $0x58] sm:$0xff]  }
 0x2eb   :  { %5798 = vmatpush1.bf16.msra.mxu0 %v8206_v38  ;;  %v8273_v38 = vld [vmem:[%s11023_s3 + $0x50] sm:$0xff]  }
 0x2ec   :  { %5765 = vmatpush2.bf16.msra.mxu1 %v8203_v57  ;;  %5799 = vmatprep.subr.bf16.mxu0 %v8214_v37  ;;  %v8272_v57 = vld [vmem:[%s11023_s3 + $0x18] sm:$0xff]   ;;  %v8275_v37 = vld [vmem:[%s11023_s3 + $0x48] sm:$0xff]  }
 0x2ed   :  { %5766 = vmatprep.subr.bf16.mxu1 %v8211_v41  ;;  %v8274_v41 = vld [vmem:[%s11023_s3 + $0x10] sm:$0xff]  }
 0x2ef   :  { %5800 = vmatpush1.bf16.msra.mxu0 %v8212_v49  ;;  %v8277_v49 = vld [vmem:[%s11023_s3 + $0x40] sm:$0xff]  }
 0x2f0   :  { %5767 = vmatpush2.bf16.msra.mxu1 %v8209_v21  ;;  %5801 = vmatprep.subr.bf16.mxu0 %v8220_v45  ;;  %v8276_v21 = vld [vmem:[%s11023_s3 + $0x8] sm:$0xff]   ;;  %v5867_v45 = vmax.f32 %v10323_v12, 0.0 }
 0x2f1   :  { %5768 = vmatprep.subr.bf16.mxu1 %v8217_v44  ;;  %v8278_v44 = vld [vmem:[%s11023_s3] sm:$0xff]   ;;  %v8283_v12 = vld [vmem:[%s11023_s3 + $0xe8] sm:$0xff]  }
 0x2f3   :  { %5802 = vmatpush2.bf16.msra.mxu0 %v8218_v46  ;;  %v8281_v46 = vld [vmem:[%s11023_s3 + $0xf0] sm:$0xff]  }
 0x2f4   :  { %5769 = vmatpush2.bf16.msra.mxu1 %v8215_v32  ;;  %5803 = vmatprep.subr.bf16.mxu0 %v8226_v42  ;;  %v5871_v32 = vpack.c.bf16 %v5867_v45, %v5867_v45 }
 0x2f5   :  { %5770 = vmatprep.subr.bf16.mxu1 %v8223_v47  ;;  %v8282_v47 = vld [vmem:[%s11023_s3 + $0xb0] sm:$0xff]  }
 0x2f7   :  { %5804 = vmatpush2.bf16.msra.mxu0 %v8224_v51 }
 0x2f8   :  { %5771 = vmatpush2.bf16.msra.mxu1 %v8221_v11  ;;  %5805 = vmatprep.subr.bf16.mxu0 %v8232_v56  ;;  %v8284_v56 = vld [vmem:[%s11023_s3 + $0xa8] sm:$0xff]  }
 0x2f9   :  { %5772 = vmatprep.subr.bf16.mxu1 %v8229_v55 }
 0x2fb   :  { %5806 = vmatpush2.bf16.msra.mxu0 %v8230_v53 }
 0x2fc   :  { %5773 = vmatpush2.bf16.msra.mxu1 %v8227_v3  ;;  %5807 = vmatprep.subr.bf16.mxu0 %v8238_v59  ;;  %v8286_v59 = vld [vmem:[%s11023_s3 + $0xa0] sm:$0xff]  }
 0x2fd   :  { %5774 = vmatprep.subr.bf16.mxu1 %v8235_v10  ;;  %v8285_v10 = vld [vmem:[%s11023_s3 + $0xe0] sm:$0xff]  }
 0x2ff   :  { %5808 = vmatpush2.bf16.msra.mxu0 %v8236_v60  ;;  %v8288_v60 = vld [vmem:[%s11023_s3 + $0x98] sm:$0xff]  }
 0x300   :  { %5775 = vmatpush2.bf16.msra.mxu1 %v8233_v9  ;;  %5809 = vmatprep.subr.bf16.mxu0 %v8241_v58  ;;  %v8287_v9 = vld [vmem:[%s11023_s3 + $0xd8] sm:$0xff]   ;;  %v8289_v58 = vld [vmem:[%s11023_s3 + $0xd0] sm:$0xff]  }
 0x301   :  { %5834 = vmatprep.subr.bf16.mxu1 %v8244_v13  ;;  %v8290_v13 = vld [vmem:[%s11023_s3 + $0x90] sm:$0xff]  }
 0x303   :  { %v5532_v40 = vpop.f32.mrf.mxu1  ;;  %5777 = vmatmul.mubr.bf16.vlgmr.msra.gmra.mxu1 %v9646_v1  ;;  %5810 = vmatpush2.bf16.msra.mxu0 %v8239_v61  ;;  %v8256_v1 = vld [vmem:[%s11020_s1 + $0x182c] ss:$16 sps:$4 sm:$0xff]  }
 0x304   :  { %v5533_v62 = vadd.f32 %v5532_v40, %v10730_v5  ;;  %5835 = vmatpush1.bf16.msra.mxu1 %v8242_v48  ;;  %5811 = vmatprep.subr.bf16.mxu0 %v8247_v19 }
 0x305   :  { %v5534_v52 = vpop.f32.mrf.mxu1  ;;  %5836 = vmatprep.subr.bf16.mxu1 %v8250_v18  ;;  %5858 = vmatprep.mubr.bf16.mxu1 %v8296_v30  ;;  %v8262_v30 = vld [vmem:[%s11020_s1 + $0x180c] ss:$16 sps:$4 sm:$0xff]  }
 0x306   :  { %v5535_v5 = vadd.f32 %v5534_v52, %v10744_v16  ;;  %v8259_v16 = vld [vmem:[%s11020_s1 + $0x170c] ss:$16 sps:$4 sm:$0xff]   ;;  %v8293_v52 = vld [vmem:[%s11023_s3 + $0xc0] sm:$0xff]  }
 0x307   :  { %v5536_v20 = vpop.f32.mrf.mxu1  ;;  %5812 = vmatpush2.bf16.msra.mxu0 %v8245_v63  ;;  %v8291_v18 = vld [vmem:[%s11023_s3 + $0xc8] sm:$0xff]  }
 0x308   :  { %5837 = vmatpush1.bf16.msra.mxu1 %v8248_v0  ;;  %5813 = vmatprep.subr.bf16.mxu0 %v8253_v6  ;;  %v8294_v6 = vld [vmem:[%s11023_s3 + $0x80] sm:$0xff]  }
 0x309   :  { %v5537_v4 = vpop.f32.mrf.mxu1  ;;  %5838 = vmatprep.subr.bf16.mxu1 %v8256_v1 }
 0x30b   :  { %5814 = vmatpush2.bf16.msra.mxu0 %v8251_v26 }
 0x30c   :  { %5839 = vmatpush1.bf16.msra.mxu1 %v8254_v15  ;;  %5815 = vmatprep.subr.bf16.mxu0 %v8259_v16 }
 0x30d   :  { %5840 = vmatprep.subr.bf16.mxu1 %v8262_v30 }
 0x30f   :  { %5816 = vmatpush2.bf16.msra.mxu0 %v8257_v22 }
 0x310   :  { %5841 = vmatpush1.bf16.msra.mxu1 %v8260_v23  ;;  %7042 = vmatprep.subr.bf16.mxu0 %v8263_v43 }
 0x311   :  { %7064 = vmatprep.subr.bf16.mxu1 %v8279_v33 }
 0x312   :  { %v5573_v34 = vpop.f32.mrf.mxu0  ;;  %5818 = vmatmul.mubr.bf16.vlgmr.msra.gmra.mxu0 %v9648_v2  ;;  %v8268_v2 = vld [vmem:[%s11023_s3 + $0x28] sm:$0xff]  }
 0x313   :  { %7008 = vmatmul.mubr.msk.bf16.vlgmr.msra.gmra.mxu1 %vm4797_vm0, %v9711_v54  ;;  %v5574_v31 = vadd.f32 %v5573_v34, %v5533_v62  ;;  %7043 = vmatpush3.bf16.msra.mxu0 %v8264_v29  ;;  %v8292_v62 = vld [vmem:[%s11023_s3 + $0x88] sm:$0xff]  }
 0x314   :  { %6170 = vmatprep.mubr.bf16.mxu0 %v5872_v7  ;;  %v5575_v8 = vpop.f32.mrf.mxu0  ;;  %7044 = vmatprep.subr.bf16.mxu0 %v8265_v14 }
 0x315   :  { %v5576_v27 = vadd.f32 %v5575_v8, %v5535_v5  ;;  %7065 = vmatpush3.bf16.msra.mxu1 %v8280_v35 }
 0x316   :  { %v5577_v17 = vpop.f32.mrf.mxu0  ;;  %7066 = vmatprep.subr.bf16.mxu1 %v8281_v46 }
 0x317   :  { %7045 = vmatpush3.bf16.msra.mxu0 %v8266_v24 }
 0x318   :  { %v5578_v54 = vpop.f32.mrf.mxu0  ;;  %7046 = vmatprep.subr.bf16.mxu0 %v8267_v50 }
 0x319   :  { %7067 = vmatpush3.bf16.msra.mxu1 %v8282_v47  ;;  %v7009_v47 = vld [vmem:[%s11024_s4] ss:$0 sm:$0xff] }
 0x31a   :  { %7068 = vmatprep.subr.bf16.mxu1 %v8283_v12 }
 0x31b   :  { %7047 = vmatpush3.bf16.msra.mxu0 %v8268_v2 }
 0x31c   :  { %7048 = vmatprep.subr.bf16.mxu0 %v8269_v28 }
 0x31d   :  { %7069 = vmatpush3.bf16.msra.mxu1 %v8284_v56 }
 0x31e   :  { %7070 = vmatprep.subr.bf16.mxu1 %v8285_v10 }
 0x31f   :  { %7049 = vmatpush3.bf16.msra.mxu0 %v8270_v36 }
 0x320   :  { %7050 = vmatprep.subr.bf16.mxu0 %v8271_v39 }
 0x321   :  { %7071 = vmatpush3.bf16.msra.mxu1 %v8286_v59 }
 0x322   :  { %7072 = vmatprep.subr.bf16.mxu1 %v8287_v9 }
 0x323   :  { %7051 = vmatpush3.bf16.msra.mxu0 %v8272_v57 }
 0x324   :  { %7052 = vmatprep.subr.bf16.mxu0 %v8273_v38 }
 0x325   :  { %7073 = vmatpush3.bf16.msra.mxu1 %v8288_v60 }
 0x326   :  { %7074 = vmatprep.subr.bf16.mxu1 %v8289_v58 }
 0x327   :  { %7053 = vmatpush3.bf16.msra.mxu0 %v8274_v41 }
 0x328   :  { %7054 = vmatprep.subr.bf16.mxu0 %v8275_v37 }
 0x329   :  { %7075 = vmatpush3.bf16.msra.mxu1 %v8290_v13 }
 0x32a   :  { %7076 = vmatprep.subr.bf16.mxu1 %v8291_v18 }
 0x32b   :  { %7055 = vmatpush3.bf16.msra.mxu0 %v8276_v21 }
 0x32c   :  { %7056 = vmatprep.subr.bf16.mxu0 %v8277_v49 }
 0x32d   :  { %7077 = vmatpush3.bf16.msra.mxu1 %v8292_v62 }
 0x32e   :  { %7078 = vmatprep.subr.bf16.mxu1 %v8293_v52 }
 0x32f   :  { %7057 = vmatpush3.bf16.msra.mxu0 %v8278_v44 }
 0x331   :  { %7079 = vmatpush3.bf16.msra.mxu1 %v8294_v6 }
 0x332   :  { %6171 = vmatmul.mubr.bf16.vlgmr.msra.gmra.mxu0 %v5871_v32 }
 0x343   :  { %v5614_v42 = vpop.f32.mrf.mxu1 }
 0x344   :  { %v5615_v11 = vadd.f32 %v5614_v42, %v5574_v31 }
 0x345   :  { %v5616_v51 = vpop.f32.mrf.mxu1 }
 0x346   :  { %v5617_v55 = vadd.f32 %v5616_v51, %v5576_v27 }
 0x347   :  { %v5618_v3 = vpop.f32.mrf.mxu1 }
 0x349   :  { %v5619_v53 = vpop.f32.mrf.mxu1 }
 0x352   :  { %v5655_v61 = vpop.f32.mrf.mxu0 }
 0x353   :  { %v5656_v48 = vadd.f32 %v5655_v61, %v5615_v11 }
 0x354   :  { %v5657_v19 = vpop.f32.mrf.mxu0 }
 0x355   :  { %v5658_v40 = vadd.f32 %v5657_v19, %v5617_v55 }
 0x356   :  { %v5659_v63 = vpop.f32.mrf.mxu0 }
 0x358   :  { %v5660_v0 = vpop.f32.mrf.mxu0 }
 0x383   :  { %v5696_v1 = vpop.f32.mrf.mxu1 }
 0x384   :  { %v5697_v5 = vadd.f32 %v5696_v1, %v5656_v48 }
 0x385   :  { %v5698_v20 = vpop.f32.mrf.mxu1 }
 0x386   :  { %v5699_v26 = vadd.f32 %v5698_v20, %v5658_v40 }
 0x387   :  { %v5700_v15 = vpop.f32.mrf.mxu1 }
 0x389   :  { %v5701_v4 = vpop.f32.mrf.mxu1 }
 0x392   :  { %v5737_v16 = vpop.f32.mrf.mxu0 }
 0x393   :  { %v5738_v7 = vadd.f32 %v5737_v16, %v5697_v5 }
 0x394   :  { %v5739_v30 = vpop.f32.mrf.mxu0 }
 0x395   :  { %v5740_v34 = vadd.f32 %v5739_v30, %v5699_v26 }
 0x396   :  { %v5741_v22 = vpop.f32.mrf.mxu0 }
 0x398   :  { %v5742_v23 = vpop.f32.mrf.mxu0 }
 0x3c3   :  { %v5778_v43 = vpop.f32.mrf.mxu1 }
 0x3c4   :  { %v5779_v31 = vadd.f32 %v5778_v43, %v5738_v7 }
 0x3c5   :  { %v5780_v25 = vpop.f32.mrf.mxu1 }
 0x3c6   :  { %v5781_v50 = vadd.f32 %v5780_v25, %v5740_v34 }
 0x3c7   :  { %v5782_v29 = vpop.f32.mrf.mxu1 }
 0x3c9   :  { %v5783_v14 = vpop.f32.mrf.mxu1 }
 0x3d2   :  { %v5819_v24 = vpop.f32.mrf.mxu0 }
 0x3d3   :  { %v5860_v8 = vpop.f32.mrf.mxu1  ;;  %v5820_v27 = vadd.f32 %v5819_v24, %v5779_v31 }
 0x3d4   :  { %v5821_v17 = vpop.f32.mrf.mxu0 }
 0x3d5   :  { %v5862_v2 = vpop.f32.mrf.mxu1  ;;  %v5861_v54 = vadd.f32 %v5860_v8, %v5820_v27  ;;  %v5822_v28 = vadd.f32 %v5821_v17, %v5781_v50 }
 0x3d6   :  { %v5823_v33 = vpop.f32.mrf.mxu0 }
 0x3d7   :  { %v5864_v35 = vpop.f32.mrf.mxu1  ;;  %v5863_v36 = vadd.f32 %v5862_v2, %v5822_v28  ;;  %v5869_v39 = vmax.f32 %v5861_v54, 0.0 }
 0x3d8   :  { %v5824_v57 = vpop.f32.mrf.mxu0 }
 0x3d9   :  { %v5865_v38 = vpop.f32.mrf.mxu1  ;;  %v5870_v41 = vmax.f32 %v5863_v36, 0.0  ;;  %v5873_v21 = vpack.c.bf16 %v5869_v39, %v5869_v39 }
 0x3db   :  { %v5874_v37 = vpack.c.bf16 %v5870_v41, %v5870_v41 }
 0x3dd   :  { %6210 = vmatprep.mubr.bf16.mxu1 %v5874_v37 }
 0x3de   :  { %6211 = vmatmul.mubr.bf16.vlgmr.msra.gmra.mxu1 %v5873_v21 }
 0x3f2   :  { %v7058_v49 = vpop.f32.mrf.mxu0 }
 0x3f4   :  { %v7059_v44 = vpop.f32.mrf.mxu0 }
 0x3f5   :  { %v7060_v45 = vadd.f32 %v7059_v44, %v7058_v49 }
 0x3f6   :  { %v7061_v32 = vpop.f32.mrf.mxu0 }
 0x3f7   :  { %v6173_v51 = vadd.f32 %v7060_v45, %v7009_v47 }
 0x3f8   :  { %v7062_v46 = vpop.f32.mrf.mxu0 }
 0x49e   :  { %v7080_v42 = vpop.f32.mrf.mxu1 }
 0x4a0   :  { %v7081_v11 = vpop.f32.mrf.mxu1 }
 0x4a1   :  { %v7082_v12 = vadd.f32 %v7081_v11, %v7080_v42 }
 0x4a2   :  { %v7083_v55 = vpop.f32.mrf.mxu1 }
 0x4a3   :  { %v6213_v56 = vadd.f32 %v7082_v12, %v6173_v51 }
 0x4a4   :  { %v7084_v3 = vpop.f32.mrf.mxu1 }
 0x4a5   :  { %6218 = vst [vmem:[%s11025_s5] sm:$0xff] %v6213_v56 }

</bundles_post_ra>
